<compile_context>
chip_gen: v5e
topology: v5e:2x2
jax: 0.10.0
libtpu: 0.0.40
codegen_flags: <defaults>
</compile_context>

<pallas_src>
import functools
import math

import jax
import jax.numpy as jnp
import numpy as np
from jax.experimental import pallas as pl
from jax.experimental.pallas import tpu as pltpu

# ----------------------------- configuration --------------------------------
HIDDEN = 32          # ResidualGRU hidden_size (= feature dim of the input)
NUM_LAYERS = 2
BATCH = 2
SEQ = 8
LN_EPS = 1e-5        # nn.LayerNorm default


def _sigmoid(x):
    return 1.0 / (1.0 + jnp.exp(-x))


def _tanh(x):
    # tanh expressed with the same exp primitive used for the gates so the
    # kernel relies only on guaranteed EUP/VPU lowerings and matches the
    # pure-JAX reference up to exp rounding.
    return 2.0 / (1.0 + jnp.exp(-2.0 * x)) - 1.0


# ------------------------------ Pallas kernel --------------------------------
def residual_gru_kernel(x_ref,        # [T*B, H]        time-major flattened input
                        w_ih_ref,     # [L*2*3, H,  Hh] gate-split, pre-transposed
                        b_ih_ref,     # [L*2*3, 1,  Hh]
                        w_hh_ref,     # [L*2*3, Hh, Hh]
                        b_hh_ref,     # [L*2*3, 1,  Hh]
                        ln_g_ref,     # [1, H]
                        ln_b_ref,     # [1, H]
                        out_ref,      # [T*B, H]
                        seq_ref,      # VMEM scratch [T*B, H]
                        *, num_layers, seq_len, batch):
    T, B = seq_len, batch
    H = x_ref.shape[-1]
    Hh = H // 2

    x = x_ref[...]                    # [T*B, H]
    layer_in = x                      # layer-0 input

    for l in range(num_layers):
        for d in range(2):            # 0 = forward, 1 = reverse direction
            base = (l * 2 + d) * 3    # offset of this (layer, dir)'s r/z/n slabs

            # ---- input-to-hidden projections for all T timesteps at once ----
            # (h-independent r/z hidden biases folded in here)
            xr = (jnp.dot(layer_in, w_ih_ref[base + 0],
                          preferred_element_type=jnp.float32)
                  + b_ih_ref[base + 0] + b_hh_ref[base + 0])
            xz = (jnp.dot(layer_in, w_ih_ref[base + 1],
                          preferred_element_type=jnp.float32)
                  + b_ih_ref[base + 1] + b_hh_ref[base + 1])
            xn = (jnp.dot(layer_in, w_ih_ref[base + 2],
                          preferred_element_type=jnp.float32)
                  + b_ih_ref[base + 2])

            # ---- hoist recurrent weights / n-gate bias out of the time loop ----
            whr = w_hh_ref[base + 0]                               # [Hh, Hh]
            whz = w_hh_ref[base + 1]
            whn = w_hh_ref[base + 2]
            bhn = jnp.broadcast_to(b_hh_ref[base + 2], (B, Hh))    # [B, Hh]

            h = jnp.zeros((B, Hh), jnp.float32)
            time_order = range(T) if d == 0 else range(T - 1, -1, -1)
            for t in time_order:                                   # fully unrolled
                rows = slice(t * B, (t + 1) * B)
                hr = jnp.dot(h, whr, preferred_element_type=jnp.float32)
                hz = jnp.dot(h, whz, preferred_element_type=jnp.float32)
                hn = jnp.dot(h, whn, preferred_element_type=jnp.float32) + bhn
                r = _sigmoid(xr[rows] + hr)
                z = _sigmoid(xz[rows] + hz)
                n = _tanh(xn[rows] + r * hn)
                h = (1.0 - z) * n + z * h
                # forward direction fills lanes [0, Hh), reverse fills [Hh, H)
                seq_ref[rows, d * Hh:(d + 1) * Hh] = h

        # next layer consumes the concatenated bidirectional output of this layer
        # (inter-layer dropout is identity in eval mode)
        layer_in = seq_ref[...]

    # ---- residual + LayerNorm over the feature axis ----
    y = layer_in + x
    mu = jnp.mean(y, axis=-1, keepdims=True)
    var = jnp.mean((y - mu) * (y - mu), axis=-1, keepdims=True)
    out_ref[...] = ((y - mu) * jax.lax.rsqrt(var + LN_EPS)
                    * ln_g_ref[...] + ln_b_ref[...])


# ------------------------------- wrapper -------------------------------------
def _pack_params(p, hidden, num_layers):
    """Gate-split and pre-transpose the PyTorch-layout GRU weights."""
    Hh = hidden // 2
    w_ih, w_hh, b_ih, b_hh = [], [], [], []
    for l in range(num_layers):
        for d in range(2):
            sfx = f"_l{l}" + ("_reverse" if d == 1 else "")
            Wih, Whh = p["weight_ih" + sfx], p["weight_hh" + sfx]   # [3Hh,H],[3Hh,Hh]
            bih, bhh = p["bias_ih" + sfx], p["bias_hh" + sfx]       # [3Hh],[3Hh]
            for g in range(3):                                      # r, z, n
                sl = slice(g * Hh, (g + 1) * Hh)
                w_ih.append(Wih[sl].T)            # [H,  Hh]
                w_hh.append(Whh[sl].T)            # [Hh, Hh]
                b_ih.append(bih[sl][None, :])     # [1,  Hh]
                b_hh.append(bhh[sl][None, :])     # [1,  Hh]
    return (jnp.stack(w_ih), jnp.stack(b_ih), jnp.stack(w_hh), jnp.stack(b_hh))


def residual_gru(x, params):
    """x: [B, T, H] float32. Returns LayerNorm(BiGRU(x) + x): [B, T, H]."""
    B, T, H = x.shape
    assert H == HIDDEN and H % 2 == 0

    w_ih, b_ih, w_hh, b_hh = _pack_params(params, H, NUM_LAYERS)
    ln_g = params["ln_weight"][None, :]            # [1, H]
    ln_b = params["ln_bias"][None, :]              # [1, H]

    # time-major flatten (row = t*B + b) so the per-timestep recurrence only
    # touches contiguous sublane rows inside the kernel.
    x_tm = jnp.transpose(x, (1, 0, 2)).reshape(T * B, H).astype(jnp.float32)

    kernel = functools.partial(residual_gru_kernel,
                               num_layers=NUM_LAYERS, seq_len=T, batch=B)

    vmem_spec = pl.BlockSpec(memory_space=pltpu.MemorySpace.VMEM)
    out_tm = pl.pallas_call(
        kernel,
        out_shape=jax.ShapeDtypeStruct((T * B, H), jnp.float32),
        in_specs=[vmem_spec] * 7,
        out_specs=vmem_spec,
        scratch_shapes=[pltpu.VMEM((T * B, H), jnp.float32)],
    )(x_tm, w_ih, b_ih, w_hh, b_hh, ln_g, ln_b)

    return jnp.transpose(out_tm.reshape(T, B, H), (1, 0, 2))


# --------------------------- deterministic params ----------------------------
def init_params(key, hidden=HIDDEN, num_layers=NUM_LAYERS):
    """PyTorch-style parameter layout: weight_ih_l{k}[_reverse] etc."""
    Hh = hidden // 2
    bound = 1.0 / math.sqrt(Hh)                    # PyTorch GRU init
    keys = iter(jax.random.split(key, 4 * 2 * num_layers))
    p = {}
    for l in range(num_layers):
        in_dim = hidden                            # bidirectional: 2*Hh == hidden
        for d in range(2):
            sfx = f"_l{l}" + ("_reverse" if d == 1 else "")
            p["weight_ih" + sfx] = jax.random.uniform(
                next(keys), (3 * Hh, in_dim), jnp.float32, -bound, bound)
            p["weight_hh" + sfx] = jax.random.uniform(
                next(keys), (3 * Hh, Hh), jnp.float32, -bound, bound)
            p["bias_ih" + sfx] = jax.random.uniform(
                next(keys), (3 * Hh,), jnp.float32, -bound, bound)
            p["bias_hh" + sfx] = jax.random.uniform(
                next(keys), (3 * Hh,), jnp.float32, -bound, bound)
    p["ln_weight"] = jnp.ones((hidden,), jnp.float32)
    p["ln_bias"] = jnp.zeros((hidden,), jnp.float32)
    return p


# ------------------------------ pure-JAX reference ---------------------------
_HIGHEST = jax.lax.Precision.HIGHEST


def _mm(a, b):
    return jnp.dot(a, b, precision=_HIGHEST)


def reference(x, p, num_layers=NUM_LAYERS):
    B, T, H = x.shape
    Hh = H // 2
    layer_in = x.astype(jnp.float32)
    for l in range(num_layers):
        dir_outs = []
        for d in range(2):
            sfx = f"_l{l}" + ("_reverse" if d == 1 else "")
            Wih, Whh = p["weight_ih" + sfx], p["weight_hh" + sfx]
            bih, bhh = p["bias_ih" + sfx], p["bias_hh" + sfx]
            Wir, Wiz, Win = Wih[:Hh], Wih[Hh:2 * Hh], Wih[2 * Hh:]
            Whr, Whz, Whn = Whh[:Hh], Whh[Hh:2 * Hh], Whh[2 * Hh:]
            bir, biz, bin_ = bih[:Hh], bih[Hh:2 * Hh], bih[2 * Hh:]
            bhr, bhz, bhn = bhh[:Hh], bhh[Hh:2 * Hh], bhh[2 * Hh:]
            h = jnp.zeros((B, Hh), jnp.float32)
            outs = [None] * T
            order = range(T) if d == 0 else range(T - 1, -1, -1)
            for t in order:
                xt = layer_in[:, t, :]
                r = _sigmoid(_mm(xt, Wir.T) + bir + _mm(h, Whr.T) + bhr)
                z = _sigmoid(_mm(xt, Wiz.T) + biz + _mm(h, Whz.T) + bhz)
                n = _tanh(_mm(xt, Win.T) + bin_ + r * (_mm(h, Whn.T) + bhn))
                h = (1.0 - z) * n + z * h
                outs[t] = h
            dir_outs.append(jnp.stack(outs, axis=1))       # [B, T, Hh]
        layer_in = jnp.concatenate(dir_outs, axis=-1)      # [B, T, H]
    y = layer_in + x
    mu = y.mean(-1, keepdims=True)
    var = ((y - mu) ** 2).mean(-1, keepdims=True)
    return (y - mu) * jax.lax.rsqrt(var + LN_EPS) * p["ln_weight"] + p["ln_bias"]


if __name__ == "__main__":
    key = jax.random.PRNGKey(0)
    k_param, k_x = jax.random.split(key)
    params = init_params(k_param)

    x = jax.random.normal(k_x, (BATCH, SEQ, HIDDEN), jnp.float32)

    out = residual_gru(x, params)
    out = jax.block_until_ready(out)

    ref = reference(x, params)
    np.testing.assert_allclose(np.asarray(out), np.asarray(ref),
                               rtol=2e-3, atol=2e-4)

    print("KERNEL_OK")
</pallas_src>

<mosaic_0001>
module attributes {stable_mosaic.version = 11 : i64} {
  func.func @residual_gru_kernel(%arg0: memref<16x32xf32, #tpu.memory_space<vmem>>, %arg1: memref<12x32x16xf32, #tpu.memory_space<vmem>>, %arg2: memref<12x1x16xf32, #tpu.memory_space<vmem>>, %arg3: memref<12x16x16xf32, #tpu.memory_space<vmem>>, %arg4: memref<12x1x16xf32, #tpu.memory_space<vmem>>, %arg5: memref<1x32xf32, #tpu.memory_space<vmem>>, %arg6: memref<1x32xf32, #tpu.memory_space<vmem>>, %arg7: memref<16x32xf32, #tpu.memory_space<vmem>>, %arg8: memref<16x32xf32, #tpu.memory_space<vmem>>) attributes {dimension_semantics = [], scalar_prefetch = 0 : i64, scratch_operands = 1 : i64, tpu.core_type = #tpu.core_type<tc>} {
    %c0 = arith.constant 0 : index
    %c0_0 = arith.constant 0 : index
    %0 = vector.load %arg0[%c0, %c0_0] : memref<16x32xf32, #tpu.memory_space<vmem>>, vector<16x32xf32>
    %c0_1 = arith.constant 0 : index
    %c0_2 = arith.constant 0 : index
    %c0_3 = arith.constant 0 : index
    %1 = vector.load %arg1[%c0_1, %c0_2, %c0_3] : memref<12x32x16xf32, #tpu.memory_space<vmem>>, vector<1x32x16xf32>
    %2 = vector.shape_cast %1 : vector<1x32x16xf32> to vector<32x16xf32>
    %cst = arith.constant dense<0.000000e+00> : vector<16x16xf32>
    %3 = tpu.matmul %0, %2, %cst {dimension_numbers = #tpu.dot_dimension_numbers<[1], [0], [0], [1], [0, 0, 1, 1], [], []>} : vector<16x32xf32>, vector<32x16xf32>, vector<16x16xf32> -> vector<16x16xf32>
    %c0_4 = arith.constant 0 : index
    %c0_5 = arith.constant 0 : index
    %c0_6 = arith.constant 0 : index
    %4 = vector.load %arg2[%c0_4, %c0_5, %c0_6] : memref<12x1x16xf32, #tpu.memory_space<vmem>>, vector<1x1x16xf32>
    %5 = vector.shape_cast %4 : vector<1x1x16xf32> to vector<1x16xf32>
    %6 = vector.broadcast %5 : vector<1x16xf32> to vector<16x16xf32>
    %7 = arith.addf %3, %6 : vector<16x16xf32>
    %c0_7 = arith.constant 0 : index
    %c0_8 = arith.constant 0 : index
    %c0_9 = arith.constant 0 : index
    %8 = vector.load %arg4[%c0_7, %c0_8, %c0_9] : memref<12x1x16xf32, #tpu.memory_space<vmem>>, vector<1x1x16xf32>
    %9 = vector.shape_cast %8 : vector<1x1x16xf32> to vector<1x16xf32>
    %10 = vector.broadcast %9 : vector<1x16xf32> to vector<16x16xf32>
    %11 = arith.addf %7, %10 : vector<16x16xf32>
    %c1 = arith.constant 1 : index
    %c0_10 = arith.constant 0 : index
    %c0_11 = arith.constant 0 : index
    %12 = vector.load %arg1[%c1, %c0_10, %c0_11] : memref<12x32x16xf32, #tpu.memory_space<vmem>>, vector<1x32x16xf32>
    %13 = vector.shape_cast %12 : vector<1x32x16xf32> to vector<32x16xf32>
    %cst_12 = arith.constant dense<0.000000e+00> : vector<16x16xf32>
    %14 = tpu.matmul %0, %13, %cst_12 {dimension_numbers = #tpu.dot_dimension_numbers<[1], [0], [0], [1], [0, 0, 1, 1], [], []>} : vector<16x32xf32>, vector<32x16xf32>, vector<16x16xf32> -> vector<16x16xf32>
    %c1_13 = arith.constant 1 : index
    %c0_14 = arith.constant 0 : index
    %c0_15 = arith.constant 0 : index
    %15 = vector.load %arg2[%c1_13, %c0_14, %c0_15] : memref<12x1x16xf32, #tpu.memory_space<vmem>>, vector<1x1x16xf32>
    %16 = vector.shape_cast %15 : vector<1x1x16xf32> to vector<1x16xf32>
    %17 = vector.broadcast %16 : vector<1x16xf32> to vector<16x16xf32>
    %18 = arith.addf %14, %17 : vector<16x16xf32>
    %c1_16 = arith.constant 1 : index
    %c0_17 = arith.constant 0 : index
    %c0_18 = arith.constant 0 : index
    %19 = vector.load %arg4[%c1_16, %c0_17, %c0_18] : memref<12x1x16xf32, #tpu.memory_space<vmem>>, vector<1x1x16xf32>
    %20 = vector.shape_cast %19 : vector<1x1x16xf32> to vector<1x16xf32>
    %21 = vector.broadcast %20 : vector<1x16xf32> to vector<16x16xf32>
    %22 = arith.addf %18, %21 : vector<16x16xf32>
    %c2 = arith.constant 2 : index
    %c0_19 = arith.constant 0 : index
    %c0_20 = arith.constant 0 : index
    %23 = vector.load %arg1[%c2, %c0_19, %c0_20] : memref<12x32x16xf32, #tpu.memory_space<vmem>>, vector<1x32x16xf32>
    %24 = vector.shape_cast %23 : vector<1x32x16xf32> to vector<32x16xf32>
    %cst_21 = arith.constant dense<0.000000e+00> : vector<16x16xf32>
    %25 = tpu.matmul %0, %24, %cst_21 {dimension_numbers = #tpu.dot_dimension_numbers<[1], [0], [0], [1], [0, 0, 1, 1], [], []>} : vector<16x32xf32>, vector<32x16xf32>, vector<16x16xf32> -> vector<16x16xf32>
    %c2_22 = arith.constant 2 : index
    %c0_23 = arith.constant 0 : index
    %c0_24 = arith.constant 0 : index
    %26 = vector.load %arg2[%c2_22, %c0_23, %c0_24] : memref<12x1x16xf32, #tpu.memory_space<vmem>>, vector<1x1x16xf32>
    %27 = vector.shape_cast %26 : vector<1x1x16xf32> to vector<1x16xf32>
    %28 = vector.broadcast %27 : vector<1x16xf32> to vector<16x16xf32>
    %29 = arith.addf %25, %28 : vector<16x16xf32>
    %c0_25 = arith.constant 0 : index
    %c0_26 = arith.constant 0 : index
    %c0_27 = arith.constant 0 : index
    %30 = vector.load %arg3[%c0_25, %c0_26, %c0_27] : memref<12x16x16xf32, #tpu.memory_space<vmem>>, vector<1x16x16xf32>
    %31 = vector.shape_cast %30 : vector<1x16x16xf32> to vector<16x16xf32>
    %c1_28 = arith.constant 1 : index
    %c0_29 = arith.constant 0 : index
    %c0_30 = arith.constant 0 : index
    %32 = vector.load %arg3[%c1_28, %c0_29, %c0_30] : memref<12x16x16xf32, #tpu.memory_space<vmem>>, vector<1x16x16xf32>
    %33 = vector.shape_cast %32 : vector<1x16x16xf32> to vector<16x16xf32>
    %c2_31 = arith.constant 2 : index
    %c0_32 = arith.constant 0 : index
    %c0_33 = arith.constant 0 : index
    %34 = vector.load %arg3[%c2_31, %c0_32, %c0_33] : memref<12x16x16xf32, #tpu.memory_space<vmem>>, vector<1x16x16xf32>
    %35 = vector.shape_cast %34 : vector<1x16x16xf32> to vector<16x16xf32>
    %c2_34 = arith.constant 2 : index
    %c0_35 = arith.constant 0 : index
    %c0_36 = arith.constant 0 : index
    %36 = vector.load %arg4[%c2_34, %c0_35, %c0_36] : memref<12x1x16xf32, #tpu.memory_space<vmem>>, vector<1x1x16xf32>
    %37 = vector.shape_cast %36 : vector<1x1x16xf32> to vector<1x16xf32>
    %38 = vector.shape_cast %37 : vector<1x16xf32> to vector<1x16xf32>
    %39 = vector.broadcast %38 : vector<1x16xf32> to vector<2x16xf32>
    %cst_37 = arith.constant 0.000000e+00 : f32
    %40 = vector.broadcast %cst_37 : f32 to vector<2x16xf32>
    %cst_38 = arith.constant dense<0.000000e+00> : vector<2x16xf32>
    %41 = tpu.matmul %40, %31, %cst_38 {dimension_numbers = #tpu.dot_dimension_numbers<[1], [0], [0], [1], [0, 0, 1, 1], [], []>} : vector<2x16xf32>, vector<16x16xf32>, vector<2x16xf32> -> vector<2x16xf32>
    %cst_39 = arith.constant dense<0.000000e+00> : vector<2x16xf32>
    %42 = tpu.matmul %40, %33, %cst_39 {dimension_numbers = #tpu.dot_dimension_numbers<[1], [0], [0], [1], [0, 0, 1, 1], [], []>} : vector<2x16xf32>, vector<16x16xf32>, vector<2x16xf32> -> vector<2x16xf32>
    %cst_40 = arith.constant dense<0.000000e+00> : vector<2x16xf32>
    %43 = tpu.matmul %40, %35, %cst_40 {dimension_numbers = #tpu.dot_dimension_numbers<[1], [0], [0], [1], [0, 0, 1, 1], [], []>} : vector<2x16xf32>, vector<16x16xf32>, vector<2x16xf32> -> vector<2x16xf32>
    %44 = arith.addf %43, %39 : vector<2x16xf32>
    %45 = vector.extract_strided_slice %11 {offsets = [0, 0], sizes = [2, 16], strides = [1, 1]} : vector<16x16xf32> to vector<2x16xf32>
    %46 = arith.addf %45, %41 : vector<2x16xf32>
    %cst_41 = arith.constant 0.000000e+00 : f32
    %47 = vector.broadcast %cst_41 : f32 to vector<2x16xf32>
    %48 = arith.subf %47, %46 : vector<2x16xf32>
    %49 = math.exp %48 : vector<2x16xf32>
    %cst_42 = arith.constant 1.000000e+00 : f32
    %50 = vector.broadcast %cst_42 : f32 to vector<2x16xf32>
    %51 = arith.addf %50, %49 : vector<2x16xf32>
    %cst_43 = arith.constant 1.000000e+00 : f32
    %52 = vector.broadcast %cst_43 : f32 to vector<2x16xf32>
    %53 = arith.divf %52, %51 : vector<2x16xf32>
    %54 = vector.extract_strided_slice %22 {offsets = [0, 0], sizes = [2, 16], strides = [1, 1]} : vector<16x16xf32> to vector<2x16xf32>
    %55 = arith.addf %54, %42 : vector<2x16xf32>
    %cst_44 = arith.constant 0.000000e+00 : f32
    %56 = vector.broadcast %cst_44 : f32 to vector<2x16xf32>
    %57 = arith.subf %56, %55 : vector<2x16xf32>
    %58 = math.exp %57 : vector<2x16xf32>
    %cst_45 = arith.constant 1.000000e+00 : f32
    %59 = vector.broadcast %cst_45 : f32 to vector<2x16xf32>
    %60 = arith.addf %59, %58 : vector<2x16xf32>
    %cst_46 = arith.constant 1.000000e+00 : f32
    %61 = vector.broadcast %cst_46 : f32 to vector<2x16xf32>
    %62 = arith.divf %61, %60 : vector<2x16xf32>
    %63 = vector.extract_strided_slice %29 {offsets = [0, 0], sizes = [2, 16], strides = [1, 1]} : vector<16x16xf32> to vector<2x16xf32>
    %64 = arith.mulf %53, %44 : vector<2x16xf32>
    %65 = arith.addf %63, %64 : vector<2x16xf32>
    %cst_47 = arith.constant -2.000000e+00 : f32
    %66 = vector.broadcast %cst_47 : f32 to vector<2x16xf32>
    %67 = arith.mulf %66, %65 : vector<2x16xf32>
    %68 = math.exp %67 : vector<2x16xf32>
    %cst_48 = arith.constant 1.000000e+00 : f32
    %69 = vector.broadcast %cst_48 : f32 to vector<2x16xf32>
    %70 = arith.addf %69, %68 : vector<2x16xf32>
    %cst_49 = arith.constant 2.000000e+00 : f32
    %71 = vector.broadcast %cst_49 : f32 to vector<2x16xf32>
    %72 = arith.divf %71, %70 : vector<2x16xf32>
    %cst_50 = arith.constant 1.000000e+00 : f32
    %73 = vector.broadcast %cst_50 : f32 to vector<2x16xf32>
    %74 = arith.subf %72, %73 : vector<2x16xf32>
    %cst_51 = arith.constant 1.000000e+00 : f32
    %75 = vector.broadcast %cst_51 : f32 to vector<2x16xf32>
    %76 = arith.subf %75, %62 : vector<2x16xf32>
    %77 = arith.mulf %76, %74 : vector<2x16xf32>
    %78 = arith.mulf %62, %40 : vector<2x16xf32>
    %79 = arith.addf %77, %78 : vector<2x16xf32>
    %c0_52 = arith.constant 0 : index
    %c0_53 = arith.constant 0 : index
    %80 = vector.load %arg8[%c0_52, %c0_53] : memref<16x32xf32, #tpu.memory_space<vmem>>, vector<2x16xf32>
    tpu.vector_store %arg8[%c0_52, %c0_53], %79 {strides = array<i32>} : memref<16x32xf32, #tpu.memory_space<vmem>>, vector<2x16xf32>,
    %cst_54 = arith.constant dense<0.000000e+00> : vector<2x16xf32>
    %81 = tpu.matmul %79, %31, %cst_54 {dimension_numbers = #tpu.dot_dimension_numbers<[1], [0], [0], [1], [0, 0, 1, 1], [], []>} : vector<2x16xf32>, vector<16x16xf32>, vector<2x16xf32> -> vector<2x16xf32>
    %cst_55 = arith.constant dense<0.000000e+00> : vector<2x16xf32>
    %82 = tpu.matmul %79, %33, %cst_55 {dimension_numbers = #tpu.dot_dimension_numbers<[1], [0], [0], [1], [0, 0, 1, 1], [], []>} : vector<2x16xf32>, vector<16x16xf32>, vector<2x16xf32> -> vector<2x16xf32>
    %cst_56 = arith.constant dense<0.000000e+00> : vector<2x16xf32>
    %83 = tpu.matmul %79, %35, %cst_56 {dimension_numbers = #tpu.dot_dimension_numbers<[1], [0], [0], [1], [0, 0, 1, 1], [], []>} : vector<2x16xf32>, vector<16x16xf32>, vector<2x16xf32> -> vector<2x16xf32>
    %84 = arith.addf %83, %39 : vector<2x16xf32>
    %85 = vector.extract_strided_slice %11 {offsets = [2, 0], sizes = [2, 16], strides = [1, 1]} : vector<16x16xf32> to vector<2x16xf32>
    %86 = arith.addf %85, %81 : vector<2x16xf32>
    %cst_57 = arith.constant 0.000000e+00 : f32
    %87 = vector.broadcast %cst_57 : f32 to vector<2x16xf32>
    %88 = arith.subf %87, %86 : vector<2x16xf32>
    %89 = math.exp %88 : vector<2x16xf32>
    %cst_58 = arith.constant 1.000000e+00 : f32
    %90 = vector.broadcast %cst_58 : f32 to vector<2x16xf32>
    %91 = arith.addf %90, %89 : vector<2x16xf32>
    %cst_59 = arith.constant 1.000000e+00 : f32
    %92 = vector.broadcast %cst_59 : f32 to vector<2x16xf32>
    %93 = arith.divf %92, %91 : vector<2x16xf32>
    %94 = vector.extract_strided_slice %22 {offsets = [2, 0], sizes = [2, 16], strides = [1, 1]} : vector<16x16xf32> to vector<2x16xf32>
    %95 = arith.addf %94, %82 : vector<2x16xf32>
    %cst_60 = arith.constant 0.000000e+00 : f32
    %96 = vector.broadcast %cst_60 : f32 to vector<2x16xf32>
    %97 = arith.subf %96, %95 : vector<2x16xf32>
    %98 = math.exp %97 : vector<2x16xf32>
    %cst_61 = arith.constant 1.000000e+00 : f32
    %99 = vector.broadcast %cst_61 : f32 to vector<2x16xf32>
    %100 = arith.addf %99, %98 : vector<2x16xf32>
    %cst_62 = arith.constant 1.000000e+00 : f32
    %101 = vector.broadcast %cst_62 : f32 to vector<2x16xf32>
    %102 = arith.divf %101, %100 : vector<2x16xf32>
    %103 = vector.extract_strided_slice %29 {offsets = [2, 0], sizes = [2, 16], strides = [1, 1]} : vector<16x16xf32> to vector<2x16xf32>
    %104 = arith.mulf %93, %84 : vector<2x16xf32>
    %105 = arith.addf %103, %104 : vector<2x16xf32>
    %cst_63 = arith.constant -2.000000e+00 : f32
    %106 = vector.broadcast %cst_63 : f32 to vector<2x16xf32>
    %107 = arith.mulf %106, %105 : vector<2x16xf32>
    %108 = math.exp %107 : vector<2x16xf32>
    %cst_64 = arith.constant 1.000000e+00 : f32
    %109 = vector.broadcast %cst_64 : f32 to vector<2x16xf32>
    %110 = arith.addf %109, %108 : vector<2x16xf32>
    %cst_65 = arith.constant 2.000000e+00 : f32
    %111 = vector.broadcast %cst_65 : f32 to vector<2x16xf32>
    %112 = arith.divf %111, %110 : vector<2x16xf32>
    %cst_66 = arith.constant 1.000000e+00 : f32
    %113 = vector.broadcast %cst_66 : f32 to vector<2x16xf32>
    %114 = arith.subf %112, %113 : vector<2x16xf32>
    %cst_67 = arith.constant 1.000000e+00 : f32
    %115 = vector.broadcast %cst_67 : f32 to vector<2x16xf32>
    %116 = arith.subf %115, %102 : vector<2x16xf32>
    %117 = arith.mulf %116, %114 : vector<2x16xf32>
    %118 = arith.mulf %102, %79 : vector<2x16xf32>
    %119 = arith.addf %117, %118 : vector<2x16xf32>
    %c2_68 = arith.constant 2 : index
    %c0_69 = arith.constant 0 : index
    %120 = vector.load %arg8[%c2_68, %c0_69] : memref<16x32xf32, #tpu.memory_space<vmem>>, vector<2x16xf32>
    tpu.vector_store %arg8[%c2_68, %c0_69], %119 {strides = array<i32>} : memref<16x32xf32, #tpu.memory_space<vmem>>, vector<2x16xf32>,
    %cst_70 = arith.constant dense<0.000000e+00> : vector<2x16xf32>
    %121 = tpu.matmul %119, %31, %cst_70 {dimension_numbers = #tpu.dot_dimension_numbers<[1], [0], [0], [1], [0, 0, 1, 1], [], []>} : vector<2x16xf32>, vector<16x16xf32>, vector<2x16xf32> -> vector<2x16xf32>
    %cst_71 = arith.constant dense<0.000000e+00> : vector<2x16xf32>
    %122 = tpu.matmul %119, %33, %cst_71 {dimension_numbers = #tpu.dot_dimension_numbers<[1], [0], [0], [1], [0, 0, 1, 1], [], []>} : vector<2x16xf32>, vector<16x16xf32>, vector<2x16xf32> -> vector<2x16xf32>
    %cst_72 = arith.constant dense<0.000000e+00> : vector<2x16xf32>
    %123 = tpu.matmul %119, %35, %cst_72 {dimension_numbers = #tpu.dot_dimension_numbers<[1], [0], [0], [1], [0, 0, 1, 1], [], []>} : vector<2x16xf32>, vector<16x16xf32>, vector<2x16xf32> -> vector<2x16xf32>
    %124 = arith.addf %123, %39 : vector<2x16xf32>
    %125 = vector.extract_strided_slice %11 {offsets = [4, 0], sizes = [2, 16], strides = [1, 1]} : vector<16x16xf32> to vector<2x16xf32>
    %126 = arith.addf %125, %121 : vector<2x16xf32>
    %cst_73 = arith.constant 0.000000e+00 : f32
    %127 = vector.broadcast %cst_73 : f32 to vector<2x16xf32>
    %128 = arith.subf %127, %126 : vector<2x16xf32>
    %129 = math.exp %128 : vector<2x16xf32>
    %cst_74 = arith.constant 1.000000e+00 : f32
    %130 = vector.broadcast %cst_74 : f32 to vector<2x16xf32>
    %131 = arith.addf %130, %129 : vector<2x16xf32>
    %cst_75 = arith.constant 1.000000e+00 : f32
    %132 = vector.broadcast %cst_75 : f32 to vector<2x16xf32>
    %133 = arith.divf %132, %131 : vector<2x16xf32>
    %134 = vector.extract_strided_slice %22 {offsets = [4, 0], sizes = [2, 16], strides = [1, 1]} : vector<16x16xf32> to vector<2x16xf32>
    %135 = arith.addf %134, %122 : vector<2x16xf32>
    %cst_76 = arith.constant 0.000000e+00 : f32
    %136 = vector.broadcast %cst_76 : f32 to vector<2x16xf32>
    %137 = arith.subf %136, %135 : vector<2x16xf32>
    %138 = math.exp %137 : vector<2x16xf32>
    %cst_77 = arith.constant 1.000000e+00 : f32
    %139 = vector.broadcast %cst_77 : f32 to vector<2x16xf32>
    %140 = arith.addf %139, %138 : vector<2x16xf32>
    %cst_78 = arith.constant 1.000000e+00 : f32
    %141 = vector.broadcast %cst_78 : f32 to vector<2x16xf32>
    %142 = arith.divf %141, %140 : vector<2x16xf32>
    %143 = vector.extract_strided_slice %29 {offsets = [4, 0], sizes = [2, 16], strides = [1, 1]} : vector<16x16xf32> to vector<2x16xf32>
    %144 = arith.mulf %133, %124 : vector<2x16xf32>
    %145 = arith.addf %143, %144 : vector<2x16xf32>
    %cst_79 = arith.constant -2.000000e+00 : f32
    %146 = vector.broadcast %cst_79 : f32 to vector<2x16xf32>
    %147 = arith.mulf %146, %145 : vector<2x16xf32>
    %148 = math.exp %147 : vector<2x16xf32>
    %cst_80 = arith.constant 1.000000e+00 : f32
    %149 = vector.broadcast %cst_80 : f32 to vector<2x16xf32>
    %150 = arith.addf %149, %148 : vector<2x16xf32>
    %cst_81 = arith.constant 2.000000e+00 : f32
    %151 = vector.broadcast %cst_81 : f32 to vector<2x16xf32>
    %152 = arith.divf %151, %150 : vector<2x16xf32>
    %cst_82 = arith.constant 1.000000e+00 : f32
    %153 = vector.broadcast %cst_82 : f32 to vector<2x16xf32>
    %154 = arith.subf %152, %153 : vector<2x16xf32>
    %cst_83 = arith.constant 1.000000e+00 : f32
    %155 = vector.broadcast %cst_83 : f32 to vector<2x16xf32>
    %156 = arith.subf %155, %142 : vector<2x16xf32>
    %157 = arith.mulf %156, %154 : vector<2x16xf32>
    %158 = arith.mulf %142, %119 : vector<2x16xf32>
    %159 = arith.addf %157, %158 : vector<2x16xf32>
    %c4 = arith.constant 4 : index
    %c0_84 = arith.constant 0 : index
    %160 = vector.load %arg8[%c4, %c0_84] : memref<16x32xf32, #tpu.memory_space<vmem>>, vector<2x16xf32>
    tpu.vector_store %arg8[%c4, %c0_84], %159 {strides = array<i32>} : memref<16x32xf32, #tpu.memory_space<vmem>>, vector<2x16xf32>,
    %cst_85 = arith.constant dense<0.000000e+00> : vector<2x16xf32>
    %161 = tpu.matmul %159, %31, %cst_85 {dimension_numbers = #tpu.dot_dimension_numbers<[1], [0], [0], [1], [0, 0, 1, 1], [], []>} : vector<2x16xf32>, vector<16x16xf32>, vector<2x16xf32> -> vector<2x16xf32>
    %cst_86 = arith.constant dense<0.000000e+00> : vector<2x16xf32>
    %162 = tpu.matmul %159, %33, %cst_86 {dimension_numbers = #tpu.dot_dimension_numbers<[1], [0], [0], [1], [0, 0, 1, 1], [], []>} : vector<2x16xf32>, vector<16x16xf32>, vector<2x16xf32> -> vector<2x16xf32>
    %cst_87 = arith.constant dense<0.000000e+00> : vector<2x16xf32>
    %163 = tpu.matmul %159, %35, %cst_87 {dimension_numbers = #tpu.dot_dimension_numbers<[1], [0], [0], [1], [0, 0, 1, 1], [], []>} : vector<2x16xf32>, vector<16x16xf32>, vector<2x16xf32> -> vector<2x16xf32>
    %164 = arith.addf %163, %39 : vector<2x16xf32>
    %165 = vector.extract_strided_slice %11 {offsets = [6, 0], sizes = [2, 16], strides = [1, 1]} : vector<16x16xf32> to vector<2x16xf32>
    %166 = arith.addf %165, %161 : vector<2x16xf32>
    %cst_88 = arith.constant 0.000000e+00 : f32
    %167 = vector.broadcast %cst_88 : f32 to vector<2x16xf32>
    %168 = arith.subf %167, %166 : vector<2x16xf32>
    %169 = math.exp %168 : vector<2x16xf32>
    %cst_89 = arith.constant 1.000000e+00 : f32
    %170 = vector.broadcast %cst_89 : f32 to vector<2x16xf32>
    %171 = arith.addf %170, %169 : vector<2x16xf32>
    %cst_90 = arith.constant 1.000000e+00 : f32
    %172 = vector.broadcast %cst_90 : f32 to vector<2x16xf32>
    %173 = arith.divf %172, %171 : vector<2x16xf32>
    %174 = vector.extract_strided_slice %22 {offsets = [6, 0], sizes = [2, 16], strides = [1, 1]} : vector<16x16xf32> to vector<2x16xf32>
    %175 = arith.addf %174, %162 : vector<2x16xf32>
    %cst_91 = arith.constant 0.000000e+00 : f32
    %176 = vector.broadcast %cst_91 : f32 to vector<2x16xf32>
    %177 = arith.subf %176, %175 : vector<2x16xf32>
    %178 = math.exp %177 : vector<2x16xf32>
    %cst_92 = arith.constant 1.000000e+00 : f32
    %179 = vector.broadcast %cst_92 : f32 to vector<2x16xf32>
    %180 = arith.addf %179, %178 : vector<2x16xf32>
    %cst_93 = arith.constant 1.000000e+00 : f32
    %181 = vector.broadcast %cst_93 : f32 to vector<2x16xf32>
    %182 = arith.divf %181, %180 : vector<2x16xf32>
    %183 = vector.extract_strided_slice %29 {offsets = [6, 0], sizes = [2, 16], strides = [1, 1]} : vector<16x16xf32> to vector<2x16xf32>
    %184 = arith.mulf %173, %164 : vector<2x16xf32>
    %185 = arith.addf %183, %184 : vector<2x16xf32>
    %cst_94 = arith.constant -2.000000e+00 : f32
    %186 = vector.broadcast %cst_94 : f32 to vector<2x16xf32>
    %187 = arith.mulf %186, %185 : vector<2x16xf32>
    %188 = math.exp %187 : vector<2x16xf32>
    %cst_95 = arith.constant 1.000000e+00 : f32
    %189 = vector.broadcast %cst_95 : f32 to vector<2x16xf32>
    %190 = arith.addf %189, %188 : vector<2x16xf32>
    %cst_96 = arith.constant 2.000000e+00 : f32
    %191 = vector.broadcast %cst_96 : f32 to vector<2x16xf32>
    %192 = arith.divf %191, %190 : vector<2x16xf32>
    %cst_97 = arith.constant 1.000000e+00 : f32
    %193 = vector.broadcast %cst_97 : f32 to vector<2x16xf32>
    %194 = arith.subf %192, %193 : vector<2x16xf32>
    %cst_98 = arith.constant 1.000000e+00 : f32
    %195 = vector.broadcast %cst_98 : f32 to vector<2x16xf32>
    %196 = arith.subf %195, %182 : vector<2x16xf32>
    %197 = arith.mulf %196, %194 : vector<2x16xf32>
    %198 = arith.mulf %182, %159 : vector<2x16xf32>
    %199 = arith.addf %197, %198 : vector<2x16xf32>
    %c6 = arith.constant 6 : index
    %c0_99 = arith.constant 0 : index
    %200 = vector.load %arg8[%c6, %c0_99] : memref<16x32xf32, #tpu.memory_space<vmem>>, vector<2x16xf32>
    tpu.vector_store %arg8[%c6, %c0_99], %199 {strides = array<i32>} : memref<16x32xf32, #tpu.memory_space<vmem>>, vector<2x16xf32>,
    %cst_100 = arith.constant dense<0.000000e+00> : vector<2x16xf32>
    %201 = tpu.matmul %199, %31, %cst_100 {dimension_numbers = #tpu.dot_dimension_numbers<[1], [0], [0], [1], [0, 0, 1, 1], [], []>} : vector<2x16xf32>, vector<16x16xf32>, vector<2x16xf32> -> vector<2x16xf32>
    %cst_101 = arith.constant dense<0.000000e+00> : vector<2x16xf32>
    %202 = tpu.matmul %199, %33, %cst_101 {dimension_numbers = #tpu.dot_dimension_numbers<[1], [0], [0], [1], [0, 0, 1, 1], [], []>} : vector<2x16xf32>, vector<16x16xf32>, vector<2x16xf32> -> vector<2x16xf32>
    %cst_102 = arith.constant dense<0.000000e+00> : vector<2x16xf32>
    %203 = tpu.matmul %199, %35, %cst_102 {dimension_numbers = #tpu.dot_dimension_numbers<[1], [0], [0], [1], [0, 0, 1, 1], [], []>} : vector<2x16xf32>, vector<16x16xf32>, vector<2x16xf32> -> vector<2x16xf32>
    %204 = arith.addf %203, %39 : vector<2x16xf32>
    %205 = vector.extract_strided_slice %11 {offsets = [8, 0], sizes = [2, 16], strides = [1, 1]} : vector<16x16xf32> to vector<2x16xf32>
    %206 = arith.addf %205, %201 : vector<2x16xf32>
    %cst_103 = arith.constant 0.000000e+00 : f32
    %207 = vector.broadcast %cst_103 : f32 to vector<2x16xf32>
    %208 = arith.subf %207, %206 : vector<2x16xf32>
    %209 = math.exp %208 : vector<2x16xf32>
    %cst_104 = arith.constant 1.000000e+00 : f32
    %210 = vector.broadcast %cst_104 : f32 to vector<2x16xf32>
    %211 = arith.addf %210, %209 : vector<2x16xf32>
    %cst_105 = arith.constant 1.000000e+00 : f32
    %212 = vector.broadcast %cst_105 : f32 to vector<2x16xf32>
    %213 = arith.divf %212, %211 : vector<2x16xf32>
    %214 = vector.extract_strided_slice %22 {offsets = [8, 0], sizes = [2, 16], strides = [1, 1]} : vector<16x16xf32> to vector<2x16xf32>
    %215 = arith.addf %214, %202 : vector<2x16xf32>
    %cst_106 = arith.constant 0.000000e+00 : f32
    %216 = vector.broadcast %cst_106 : f32 to vector<2x16xf32>
    %217 = arith.subf %216, %215 : vector<2x16xf32>
    %218 = math.exp %217 : vector<2x16xf32>
    %cst_107 = arith.constant 1.000000e+00 : f32
    %219 = vector.broadcast %cst_107 : f32 to vector<2x16xf32>
    %220 = arith.addf %219, %218 : vector<2x16xf32>
    %cst_108 = arith.constant 1.000000e+00 : f32
    %221 = vector.broadcast %cst_108 : f32 to vector<2x16xf32>
    %222 = arith.divf %221, %220 : vector<2x16xf32>
    %223 = vector.extract_strided_slice %29 {offsets = [8, 0], sizes = [2, 16], strides = [1, 1]} : vector<16x16xf32> to vector<2x16xf32>
    %224 = arith.mulf %213, %204 : vector<2x16xf32>
    %225 = arith.addf %223, %224 : vector<2x16xf32>
    %cst_109 = arith.constant -2.000000e+00 : f32
    %226 = vector.broadcast %cst_109 : f32 to vector<2x16xf32>
    %227 = arith.mulf %226, %225 : vector<2x16xf32>
    %228 = math.exp %227 : vector<2x16xf32>
    %cst_110 = arith.constant 1.000000e+00 : f32
    %229 = vector.broadcast %cst_110 : f32 to vector<2x16xf32>
    %230 = arith.addf %229, %228 : vector<2x16xf32>
    %cst_111 = arith.constant 2.000000e+00 : f32
    %231 = vector.broadcast %cst_111 : f32 to vector<2x16xf32>
    %232 = arith.divf %231, %230 : vector<2x16xf32>
    %cst_112 = arith.constant 1.000000e+00 : f32
    %233 = vector.broadcast %cst_112 : f32 to vector<2x16xf32>
    %234 = arith.subf %232, %233 : vector<2x16xf32>
    %cst_113 = arith.constant 1.000000e+00 : f32
    %235 = vector.broadcast %cst_113 : f32 to vector<2x16xf32>
    %236 = arith.subf %235, %222 : vector<2x16xf32>
    %237 = arith.mulf %236, %234 : vector<2x16xf32>
    %238 = arith.mulf %222, %199 : vector<2x16xf32>
    %239 = arith.addf %237, %238 : vector<2x16xf32>
    %c8 = arith.constant 8 : index
    %c0_114 = arith.constant 0 : index
    %240 = vector.load %arg8[%c8, %c0_114] : memref<16x32xf32, #tpu.memory_space<vmem>>, vector<2x16xf32>
    tpu.vector_store %arg8[%c8, %c0_114], %239 {strides = array<i32>} : memref<16x32xf32, #tpu.memory_space<vmem>>, vector<2x16xf32>,
    %cst_115 = arith.constant dense<0.000000e+00> : vector<2x16xf32>
    %241 = tpu.matmul %239, %31, %cst_115 {dimension_numbers = #tpu.dot_dimension_numbers<[1], [0], [0], [1], [0, 0, 1, 1], [], []>} : vector<2x16xf32>, vector<16x16xf32>, vector<2x16xf32> -> vector<2x16xf32>
    %cst_116 = arith.constant dense<0.000000e+00> : vector<2x16xf32>
    %242 = tpu.matmul %239, %33, %cst_116 {dimension_numbers = #tpu.dot_dimension_numbers<[1], [0], [0], [1], [0, 0, 1, 1], [], []>} : vector<2x16xf32>, vector<16x16xf32>, vector<2x16xf32> -> vector<2x16xf32>
    %cst_117 = arith.constant dense<0.000000e+00> : vector<2x16xf32>
    %243 = tpu.matmul %239, %35, %cst_117 {dimension_numbers = #tpu.dot_dimension_numbers<[1], [0], [0], [1], [0, 0, 1, 1], [], []>} : vector<2x16xf32>, vector<16x16xf32>, vector<2x16xf32> -> vector<2x16xf32>
    %244 = arith.addf %243, %39 : vector<2x16xf32>
    %245 = vector.extract_strided_slice %11 {offsets = [10, 0], sizes = [2, 16], strides = [1, 1]} : vector<16x16xf32> to vector<2x16xf32>
    %246 = arith.addf %245, %241 : vector<2x16xf32>
    %cst_118 = arith.constant 0.000000e+00 : f32
    %247 = vector.broadcast %cst_118 : f32 to vector<2x16xf32>
    %248 = arith.subf %247, %246 : vector<2x16xf32>
    %249 = math.exp %248 : vector<2x16xf32>
    %cst_119 = arith.constant 1.000000e+00 : f32
    %250 = vector.broadcast %cst_119 : f32 to vector<2x16xf32>
    %251 = arith.addf %250, %249 : vector<2x16xf32>
    %cst_120 = arith.constant 1.000000e+00 : f32
    %252 = vector.broadcast %cst_120 : f32 to vector<2x16xf32>
    %253 = arith.divf %252, %251 : vector<2x16xf32>
    %254 = vector.extract_strided_slice %22 {offsets = [10, 0], sizes = [2, 16], strides = [1, 1]} : vector<16x16xf32> to vector<2x16xf32>
    %255 = arith.addf %254, %242 : vector<2x16xf32>
    %cst_121 = arith.constant 0.000000e+00 : f32
    %256 = vector.broadcast %cst_121 : f32 to vector<2x16xf32>
    %257 = arith.subf %256, %255 : vector<2x16xf32>
    %258 = math.exp %257 : vector<2x16xf32>
    %cst_122 = arith.constant 1.000000e+00 : f32
    %259 = vector.broadcast %cst_122 : f32 to vector<2x16xf32>
    %260 = arith.addf %259, %258 : vector<2x16xf32>
    %cst_123 = arith.constant 1.000000e+00 : f32
    %261 = vector.broadcast %cst_123 : f32 to vector<2x16xf32>
    %262 = arith.divf %261, %260 : vector<2x16xf32>
    %263 = vector.extract_strided_slice %29 {offsets = [10, 0], sizes = [2, 16], strides = [1, 1]} : vector<16x16xf32> to vector<2x16xf32>
    %264 = arith.mulf %253, %244 : vector<2x16xf32>
    %265 = arith.addf %263, %264 : vector<2x16xf32>
    %cst_124 = arith.constant -2.000000e+00 : f32
    %266 = vector.broadcast %cst_124 : f32 to vector<2x16xf32>
    %267 = arith.mulf %266, %265 : vector<2x16xf32>
    %268 = math.exp %267 : vector<2x16xf32>
    %cst_125 = arith.constant 1.000000e+00 : f32
    %269 = vector.broadcast %cst_125 : f32 to vector<2x16xf32>
    %270 = arith.addf %269, %268 : vector<2x16xf32>
    %cst_126 = arith.constant 2.000000e+00 : f32
    %271 = vector.broadcast %cst_126 : f32 to vector<2x16xf32>
    %272 = arith.divf %271, %270 : vector<2x16xf32>
    %cst_127 = arith.constant 1.000000e+00 : f32
    %273 = vector.broadcast %cst_127 : f32 to vector<2x16xf32>
    %274 = arith.subf %272, %273 : vector<2x16xf32>
    %cst_128 = arith.constant 1.000000e+00 : f32
    %275 = vector.broadcast %cst_128 : f32 to vector<2x16xf32>
    %276 = arith.subf %275, %262 : vector<2x16xf32>
    %277 = arith.mulf %276, %274 : vector<2x16xf32>
    %278 = arith.mulf %262, %239 : vector<2x16xf32>
    %279 = arith.addf %277, %278 : vector<2x16xf32>
    %c10 = arith.constant 10 : index
    %c0_129 = arith.constant 0 : index
    %280 = vector.load %arg8[%c10, %c0_129] : memref<16x32xf32, #tpu.memory_space<vmem>>, vector<2x16xf32>
    tpu.vector_store %arg8[%c10, %c0_129], %279 {strides = array<i32>} : memref<16x32xf32, #tpu.memory_space<vmem>>, vector<2x16xf32>,
    %cst_130 = arith.constant dense<0.000000e+00> : vector<2x16xf32>
    %281 = tpu.matmul %279, %31, %cst_130 {dimension_numbers = #tpu.dot_dimension_numbers<[1], [0], [0], [1], [0, 0, 1, 1], [], []>} : vector<2x16xf32>, vector<16x16xf32>, vector<2x16xf32> -> vector<2x16xf32>
    %cst_131 = arith.constant dense<0.000000e+00> : vector<2x16xf32>
    %282 = tpu.matmul %279, %33, %cst_131 {dimension_numbers = #tpu.dot_dimension_numbers<[1], [0], [0], [1], [0, 0, 1, 1], [], []>} : vector<2x16xf32>, vector<16x16xf32>, vector<2x16xf32> -> vector<2x16xf32>
    %cst_132 = arith.constant dense<0.000000e+00> : vector<2x16xf32>
    %283 = tpu.matmul %279, %35, %cst_132 {dimension_numbers = #tpu.dot_dimension_numbers<[1], [0], [0], [1], [0, 0, 1, 1], [], []>} : vector<2x16xf32>, vector<16x16xf32>, vector<2x16xf32> -> vector<2x16xf32>
    %284 = arith.addf %283, %39 : vector<2x16xf32>
    %285 = vector.extract_strided_slice %11 {offsets = [12, 0], sizes = [2, 16], strides = [1, 1]} : vector<16x16xf32> to vector<2x16xf32>
    %286 = arith.addf %285, %281 : vector<2x16xf32>
    %cst_133 = arith.constant 0.000000e+00 : f32
    %287 = vector.broadcast %cst_133 : f32 to vector<2x16xf32>
    %288 = arith.subf %287, %286 : vector<2x16xf32>
    %289 = math.exp %288 : vector<2x16xf32>
    %cst_134 = arith.constant 1.000000e+00 : f32
    %290 = vector.broadcast %cst_134 : f32 to vector<2x16xf32>
    %291 = arith.addf %290, %289 : vector<2x16xf32>
    %cst_135 = arith.constant 1.000000e+00 : f32
    %292 = vector.broadcast %cst_135 : f32 to vector<2x16xf32>
    %293 = arith.divf %292, %291 : vector<2x16xf32>
    %294 = vector.extract_strided_slice %22 {offsets = [12, 0], sizes = [2, 16], strides = [1, 1]} : vector<16x16xf32> to vector<2x16xf32>
    %295 = arith.addf %294, %282 : vector<2x16xf32>
    %cst_136 = arith.constant 0.000000e+00 : f32
    %296 = vector.broadcast %cst_136 : f32 to vector<2x16xf32>
    %297 = arith.subf %296, %295 : vector<2x16xf32>
    %298 = math.exp %297 : vector<2x16xf32>
    %cst_137 = arith.constant 1.000000e+00 : f32
    %299 = vector.broadcast %cst_137 : f32 to vector<2x16xf32>
    %300 = arith.addf %299, %298 : vector<2x16xf32>
    %cst_138 = arith.constant 1.000000e+00 : f32
    %301 = vector.broadcast %cst_138 : f32 to vector<2x16xf32>
    %302 = arith.divf %301, %300 : vector<2x16xf32>
    %303 = vector.extract_strided_slice %29 {offsets = [12, 0], sizes = [2, 16], strides = [1, 1]} : vector<16x16xf32> to vector<2x16xf32>
    %304 = arith.mulf %293, %284 : vector<2x16xf32>
    %305 = arith.addf %303, %304 : vector<2x16xf32>
    %cst_139 = arith.constant -2.000000e+00 : f32
    %306 = vector.broadcast %cst_139 : f32 to vector<2x16xf32>
    %307 = arith.mulf %306, %305 : vector<2x16xf32>
    %308 = math.exp %307 : vector<2x16xf32>
    %cst_140 = arith.constant 1.000000e+00 : f32
    %309 = vector.broadcast %cst_140 : f32 to vector<2x16xf32>
    %310 = arith.addf %309, %308 : vector<2x16xf32>
    %cst_141 = arith.constant 2.000000e+00 : f32
    %311 = vector.broadcast %cst_141 : f32 to vector<2x16xf32>
    %312 = arith.divf %311, %310 : vector<2x16xf32>
    %cst_142 = arith.constant 1.000000e+00 : f32
    %313 = vector.broadcast %cst_142 : f32 to vector<2x16xf32>
    %314 = arith.subf %312, %313 : vector<2x16xf32>
    %cst_143 = arith.constant 1.000000e+00 : f32
    %315 = vector.broadcast %cst_143 : f32 to vector<2x16xf32>
    %316 = arith.subf %315, %302 : vector<2x16xf32>
    %317 = arith.mulf %316, %314 : vector<2x16xf32>
    %318 = arith.mulf %302, %279 : vector<2x16xf32>
    %319 = arith.addf %317, %318 : vector<2x16xf32>
    %c12 = arith.constant 12 : index
    %c0_144 = arith.constant 0 : index
    %320 = vector.load %arg8[%c12, %c0_144] : memref<16x32xf32, #tpu.memory_space<vmem>>, vector<2x16xf32>
    tpu.vector_store %arg8[%c12, %c0_144], %319 {strides = array<i32>} : memref<16x32xf32, #tpu.memory_space<vmem>>, vector<2x16xf32>,
    %cst_145 = arith.constant dense<0.000000e+00> : vector<2x16xf32>
    %321 = tpu.matmul %319, %31, %cst_145 {dimension_numbers = #tpu.dot_dimension_numbers<[1], [0], [0], [1], [0, 0, 1, 1], [], []>} : vector<2x16xf32>, vector<16x16xf32>, vector<2x16xf32> -> vector<2x16xf32>
    %cst_146 = arith.constant dense<0.000000e+00> : vector<2x16xf32>
    %322 = tpu.matmul %319, %33, %cst_146 {dimension_numbers = #tpu.dot_dimension_numbers<[1], [0], [0], [1], [0, 0, 1, 1], [], []>} : vector<2x16xf32>, vector<16x16xf32>, vector<2x16xf32> -> vector<2x16xf32>
    %cst_147 = arith.constant dense<0.000000e+00> : vector<2x16xf32>
    %323 = tpu.matmul %319, %35, %cst_147 {dimension_numbers = #tpu.dot_dimension_numbers<[1], [0], [0], [1], [0, 0, 1, 1], [], []>} : vector<2x16xf32>, vector<16x16xf32>, vector<2x16xf32> -> vector<2x16xf32>
    %324 = arith.addf %323, %39 : vector<2x16xf32>
    %325 = vector.extract_strided_slice %11 {offsets = [14, 0], sizes = [2, 16], strides = [1, 1]} : vector<16x16xf32> to vector<2x16xf32>
    %326 = arith.addf %325, %321 : vector<2x16xf32>
    %cst_148 = arith.constant 0.000000e+00 : f32
    %327 = vector.broadcast %cst_148 : f32 to vector<2x16xf32>
    %328 = arith.subf %327, %326 : vector<2x16xf32>
    %329 = math.exp %328 : vector<2x16xf32>
    %cst_149 = arith.constant 1.000000e+00 : f32
    %330 = vector.broadcast %cst_149 : f32 to vector<2x16xf32>
    %331 = arith.addf %330, %329 : vector<2x16xf32>
    %cst_150 = arith.constant 1.000000e+00 : f32
    %332 = vector.broadcast %cst_150 : f32 to vector<2x16xf32>
    %333 = arith.divf %332, %331 : vector<2x16xf32>
    %334 = vector.extract_strided_slice %22 {offsets = [14, 0], sizes = [2, 16], strides = [1, 1]} : vector<16x16xf32> to vector<2x16xf32>
    %335 = arith.addf %334, %322 : vector<2x16xf32>
    %cst_151 = arith.constant 0.000000e+00 : f32
    %336 = vector.broadcast %cst_151 : f32 to vector<2x16xf32>
    %337 = arith.subf %336, %335 : vector<2x16xf32>
    %338 = math.exp %337 : vector<2x16xf32>
    %cst_152 = arith.constant 1.000000e+00 : f32
    %339 = vector.broadcast %cst_152 : f32 to vector<2x16xf32>
    %340 = arith.addf %339, %338 : vector<2x16xf32>
    %cst_153 = arith.constant 1.000000e+00 : f32
    %341 = vector.broadcast %cst_153 : f32 to vector<2x16xf32>
    %342 = arith.divf %341, %340 : vector<2x16xf32>
    %343 = vector.extract_strided_slice %29 {offsets = [14, 0], sizes = [2, 16], strides = [1, 1]} : vector<16x16xf32> to vector<2x16xf32>
    %344 = arith.mulf %333, %324 : vector<2x16xf32>
    %345 = arith.addf %343, %344 : vector<2x16xf32>
    %cst_154 = arith.constant -2.000000e+00 : f32
    %346 = vector.broadcast %cst_154 : f32 to vector<2x16xf32>
    %347 = arith.mulf %346, %345 : vector<2x16xf32>
    %348 = math.exp %347 : vector<2x16xf32>
    %cst_155 = arith.constant 1.000000e+00 : f32
    %349 = vector.broadcast %cst_155 : f32 to vector<2x16xf32>
    %350 = arith.addf %349, %348 : vector<2x16xf32>
    %cst_156 = arith.constant 2.000000e+00 : f32
    %351 = vector.broadcast %cst_156 : f32 to vector<2x16xf32>
    %352 = arith.divf %351, %350 : vector<2x16xf32>
    %cst_157 = arith.constant 1.000000e+00 : f32
    %353 = vector.broadcast %cst_157 : f32 to vector<2x16xf32>
    %354 = arith.subf %352, %353 : vector<2x16xf32>
    %cst_158 = arith.constant 1.000000e+00 : f32
    %355 = vector.broadcast %cst_158 : f32 to vector<2x16xf32>
    %356 = arith.subf %355, %342 : vector<2x16xf32>
    %357 = arith.mulf %356, %354 : vector<2x16xf32>
    %358 = arith.mulf %342, %319 : vector<2x16xf32>
    %359 = arith.addf %357, %358 : vector<2x16xf32>
    %c14 = arith.constant 14 : index
    %c0_159 = arith.constant 0 : index
    %360 = vector.load %arg8[%c14, %c0_159] : memref<16x32xf32, #tpu.memory_space<vmem>>, vector<2x16xf32>
    tpu.vector_store %arg8[%c14, %c0_159], %359 {strides = array<i32>} : memref<16x32xf32, #tpu.memory_space<vmem>>, vector<2x16xf32>,
    %c3 = arith.constant 3 : index
    %c0_160 = arith.constant 0 : index
    %c0_161 = arith.constant 0 : index
    %361 = vector.load %arg1[%c3, %c0_160, %c0_161] : memref<12x32x16xf32, #tpu.memory_space<vmem>>, vector<1x32x16xf32>
    %362 = vector.shape_cast %361 : vector<1x32x16xf32> to vector<32x16xf32>
    %cst_162 = arith.constant dense<0.000000e+00> : vector<16x16xf32>
    %363 = tpu.matmul %0, %362, %cst_162 {dimension_numbers = #tpu.dot_dimension_numbers<[1], [0], [0], [1], [0, 0, 1, 1], [], []>} : vector<16x32xf32>, vector<32x16xf32>, vector<16x16xf32> -> vector<16x16xf32>
    %c3_163 = arith.constant 3 : index
    %c0_164 = arith.constant 0 : index
    %c0_165 = arith.constant 0 : index
    %364 = vector.load %arg2[%c3_163, %c0_164, %c0_165] : memref<12x1x16xf32, #tpu.memory_space<vmem>>, vector<1x1x16xf32>
    %365 = vector.shape_cast %364 : vector<1x1x16xf32> to vector<1x16xf32>
    %366 = vector.broadcast %365 : vector<1x16xf32> to vector<16x16xf32>
    %367 = arith.addf %363, %366 : vector<16x16xf32>
    %c3_166 = arith.constant 3 : index
    %c0_167 = arith.constant 0 : index
    %c0_168 = arith.constant 0 : index
    %368 = vector.load %arg4[%c3_166, %c0_167, %c0_168] : memref<12x1x16xf32, #tpu.memory_space<vmem>>, vector<1x1x16xf32>
    %369 = vector.shape_cast %368 : vector<1x1x16xf32> to vector<1x16xf32>
    %370 = vector.broadcast %369 : vector<1x16xf32> to vector<16x16xf32>
    %371 = arith.addf %367, %370 : vector<16x16xf32>
    %c4_169 = arith.constant 4 : index
    %c0_170 = arith.constant 0 : index
    %c0_171 = arith.constant 0 : index
    %372 = vector.load %arg1[%c4_169, %c0_170, %c0_171] : memref<12x32x16xf32, #tpu.memory_space<vmem>>, vector<1x32x16xf32>
    %373 = vector.shape_cast %372 : vector<1x32x16xf32> to vector<32x16xf32>
    %cst_172 = arith.constant dense<0.000000e+00> : vector<16x16xf32>
    %374 = tpu.matmul %0, %373, %cst_172 {dimension_numbers = #tpu.dot_dimension_numbers<[1], [0], [0], [1], [0, 0, 1, 1], [], []>} : vector<16x32xf32>, vector<32x16xf32>, vector<16x16xf32> -> vector<16x16xf32>
    %c4_173 = arith.constant 4 : index
    %c0_174 = arith.constant 0 : index
    %c0_175 = arith.constant 0 : index
    %375 = vector.load %arg2[%c4_173, %c0_174, %c0_175] : memref<12x1x16xf32, #tpu.memory_space<vmem>>, vector<1x1x16xf32>
    %376 = vector.shape_cast %375 : vector<1x1x16xf32> to vector<1x16xf32>
    %377 = vector.broadcast %376 : vector<1x16xf32> to vector<16x16xf32>
    %378 = arith.addf %374, %377 : vector<16x16xf32>
    %c4_176 = arith.constant 4 : index
    %c0_177 = arith.constant 0 : index
    %c0_178 = arith.constant 0 : index
    %379 = vector.load %arg4[%c4_176, %c0_177, %c0_178] : memref<12x1x16xf32, #tpu.memory_space<vmem>>, vector<1x1x16xf32>
    %380 = vector.shape_cast %379 : vector<1x1x16xf32> to vector<1x16xf32>
    %381 = vector.broadcast %380 : vector<1x16xf32> to vector<16x16xf32>
    %382 = arith.addf %378, %381 : vector<16x16xf32>
    %c5 = arith.constant 5 : index
    %c0_179 = arith.constant 0 : index
    %c0_180 = arith.constant 0 : index
    %383 = vector.load %arg1[%c5, %c0_179, %c0_180] : memref<12x32x16xf32, #tpu.memory_space<vmem>>, vector<1x32x16xf32>
    %384 = vector.shape_cast %383 : vector<1x32x16xf32> to vector<32x16xf32>
    %cst_181 = arith.constant dense<0.000000e+00> : vector<16x16xf32>
    %385 = tpu.matmul %0, %384, %cst_181 {dimension_numbers = #tpu.dot_dimension_numbers<[1], [0], [0], [1], [0, 0, 1, 1], [], []>} : vector<16x32xf32>, vector<32x16xf32>, vector<16x16xf32> -> vector<16x16xf32>
    %c5_182 = arith.constant 5 : index
    %c0_183 = arith.constant 0 : index
    %c0_184 = arith.constant 0 : index
    %386 = vector.load %arg2[%c5_182, %c0_183, %c0_184] : memref<12x1x16xf32, #tpu.memory_space<vmem>>, vector<1x1x16xf32>
    %387 = vector.shape_cast %386 : vector<1x1x16xf32> to vector<1x16xf32>
    %388 = vector.broadcast %387 : vector<1x16xf32> to vector<16x16xf32>
    %389 = arith.addf %385, %388 : vector<16x16xf32>
    %c3_185 = arith.constant 3 : index
    %c0_186 = arith.constant 0 : index
    %c0_187 = arith.constant 0 : index
    %390 = vector.load %arg3[%c3_185, %c0_186, %c0_187] : memref<12x16x16xf32, #tpu.memory_space<vmem>>, vector<1x16x16xf32>
    %391 = vector.shape_cast %390 : vector<1x16x16xf32> to vector<16x16xf32>
    %c4_188 = arith.constant 4 : index
    %c0_189 = arith.constant 0 : index
    %c0_190 = arith.constant 0 : index
    %392 = vector.load %arg3[%c4_188, %c0_189, %c0_190] : memref<12x16x16xf32, #tpu.memory_space<vmem>>, vector<1x16x16xf32>
    %393 = vector.shape_cast %392 : vector<1x16x16xf32> to vector<16x16xf32>
    %c5_191 = arith.constant 5 : index
    %c0_192 = arith.constant 0 : index
    %c0_193 = arith.constant 0 : index
    %394 = vector.load %arg3[%c5_191, %c0_192, %c0_193] : memref<12x16x16xf32, #tpu.memory_space<vmem>>, vector<1x16x16xf32>
    %395 = vector.shape_cast %394 : vector<1x16x16xf32> to vector<16x16xf32>
    %c5_194 = arith.constant 5 : index
    %c0_195 = arith.constant 0 : index
    %c0_196 = arith.constant 0 : index
    %396 = vector.load %arg4[%c5_194, %c0_195, %c0_196] : memref<12x1x16xf32, #tpu.memory_space<vmem>>, vector<1x1x16xf32>
    %397 = vector.shape_cast %396 : vector<1x1x16xf32> to vector<1x16xf32>
    %398 = vector.shape_cast %397 : vector<1x16xf32> to vector<1x16xf32>
    %399 = vector.broadcast %398 : vector<1x16xf32> to vector<2x16xf32>
    %cst_197 = arith.constant 0.000000e+00 : f32
    %400 = vector.broadcast %cst_197 : f32 to vector<2x16xf32>
    %cst_198 = arith.constant dense<0.000000e+00> : vector<2x16xf32>
    %401 = tpu.matmul %400, %391, %cst_198 {dimension_numbers = #tpu.dot_dimension_numbers<[1], [0], [0], [1], [0, 0, 1, 1], [], []>} : vector<2x16xf32>, vector<16x16xf32>, vector<2x16xf32> -> vector<2x16xf32>
    %cst_199 = arith.constant dense<0.000000e+00> : vector<2x16xf32>
    %402 = tpu.matmul %400, %393, %cst_199 {dimension_numbers = #tpu.dot_dimension_numbers<[1], [0], [0], [1], [0, 0, 1, 1], [], []>} : vector<2x16xf32>, vector<16x16xf32>, vector<2x16xf32> -> vector<2x16xf32>
    %cst_200 = arith.constant dense<0.000000e+00> : vector<2x16xf32>
    %403 = tpu.matmul %400, %395, %cst_200 {dimension_numbers = #tpu.dot_dimension_numbers<[1], [0], [0], [1], [0, 0, 1, 1], [], []>} : vector<2x16xf32>, vector<16x16xf32>, vector<2x16xf32> -> vector<2x16xf32>
    %404 = arith.addf %403, %399 : vector<2x16xf32>
    %405 = vector.extract_strided_slice %371 {offsets = [14, 0], sizes = [2, 16], strides = [1, 1]} : vector<16x16xf32> to vector<2x16xf32>
    %406 = arith.addf %405, %401 : vector<2x16xf32>
    %cst_201 = arith.constant 0.000000e+00 : f32
    %407 = vector.broadcast %cst_201 : f32 to vector<2x16xf32>
    %408 = arith.subf %407, %406 : vector<2x16xf32>
    %409 = math.exp %408 : vector<2x16xf32>
    %cst_202 = arith.constant 1.000000e+00 : f32
    %410 = vector.broadcast %cst_202 : f32 to vector<2x16xf32>
    %411 = arith.addf %410, %409 : vector<2x16xf32>
    %cst_203 = arith.constant 1.000000e+00 : f32
    %412 = vector.broadcast %cst_203 : f32 to vector<2x16xf32>
    %413 = arith.divf %412, %411 : vector<2x16xf32>
    %414 = vector.extract_strided_slice %382 {offsets = [14, 0], sizes = [2, 16], strides = [1, 1]} : vector<16x16xf32> to vector<2x16xf32>
    %415 = arith.addf %414, %402 : vector<2x16xf32>
    %cst_204 = arith.constant 0.000000e+00 : f32
    %416 = vector.broadcast %cst_204 : f32 to vector<2x16xf32>
    %417 = arith.subf %416, %415 : vector<2x16xf32>
    %418 = math.exp %417 : vector<2x16xf32>
    %cst_205 = arith.constant 1.000000e+00 : f32
    %419 = vector.broadcast %cst_205 : f32 to vector<2x16xf32>
    %420 = arith.addf %419, %418 : vector<2x16xf32>
    %cst_206 = arith.constant 1.000000e+00 : f32
    %421 = vector.broadcast %cst_206 : f32 to vector<2x16xf32>
    %422 = arith.divf %421, %420 : vector<2x16xf32>
    %423 = vector.extract_strided_slice %389 {offsets = [14, 0], sizes = [2, 16], strides = [1, 1]} : vector<16x16xf32> to vector<2x16xf32>
    %424 = arith.mulf %413, %404 : vector<2x16xf32>
    %425 = arith.addf %423, %424 : vector<2x16xf32>
    %cst_207 = arith.constant -2.000000e+00 : f32
    %426 = vector.broadcast %cst_207 : f32 to vector<2x16xf32>
    %427 = arith.mulf %426, %425 : vector<2x16xf32>
    %428 = math.exp %427 : vector<2x16xf32>
    %cst_208 = arith.constant 1.000000e+00 : f32
    %429 = vector.broadcast %cst_208 : f32 to vector<2x16xf32>
    %430 = arith.addf %429, %428 : vector<2x16xf32>
    %cst_209 = arith.constant 2.000000e+00 : f32
    %431 = vector.broadcast %cst_209 : f32 to vector<2x16xf32>
    %432 = arith.divf %431, %430 : vector<2x16xf32>
    %cst_210 = arith.constant 1.000000e+00 : f32
    %433 = vector.broadcast %cst_210 : f32 to vector<2x16xf32>
    %434 = arith.subf %432, %433 : vector<2x16xf32>
    %cst_211 = arith.constant 1.000000e+00 : f32
    %435 = vector.broadcast %cst_211 : f32 to vector<2x16xf32>
    %436 = arith.subf %435, %422 : vector<2x16xf32>
    %437 = arith.mulf %436, %434 : vector<2x16xf32>
    %438 = arith.mulf %422, %400 : vector<2x16xf32>
    %439 = arith.addf %437, %438 : vector<2x16xf32>
    %c14_212 = arith.constant 14 : index
    %c16 = arith.constant 16 : index
    %440 = vector.load %arg8[%c14_212, %c16] : memref<16x32xf32, #tpu.memory_space<vmem>>, vector<2x16xf32>
    tpu.vector_store %arg8[%c14_212, %c16], %439 {strides = array<i32>} : memref<16x32xf32, #tpu.memory_space<vmem>>, vector<2x16xf32>,
    %cst_213 = arith.constant dense<0.000000e+00> : vector<2x16xf32>
    %441 = tpu.matmul %439, %391, %cst_213 {dimension_numbers = #tpu.dot_dimension_numbers<[1], [0], [0], [1], [0, 0, 1, 1], [], []>} : vector<2x16xf32>, vector<16x16xf32>, vector<2x16xf32> -> vector<2x16xf32>
    %cst_214 = arith.constant dense<0.000000e+00> : vector<2x16xf32>
    %442 = tpu.matmul %439, %393, %cst_214 {dimension_numbers = #tpu.dot_dimension_numbers<[1], [0], [0], [1], [0, 0, 1, 1], [], []>} : vector<2x16xf32>, vector<16x16xf32>, vector<2x16xf32> -> vector<2x16xf32>
    %cst_215 = arith.constant dense<0.000000e+00> : vector<2x16xf32>
    %443 = tpu.matmul %439, %395, %cst_215 {dimension_numbers = #tpu.dot_dimension_numbers<[1], [0], [0], [1], [0, 0, 1, 1], [], []>} : vector<2x16xf32>, vector<16x16xf32>, vector<2x16xf32> -> vector<2x16xf32>
    %444 = arith.addf %443, %399 : vector<2x16xf32>
    %445 = vector.extract_strided_slice %371 {offsets = [12, 0], sizes = [2, 16], strides = [1, 1]} : vector<16x16xf32> to vector<2x16xf32>
    %446 = arith.addf %445, %441 : vector<2x16xf32>
    %cst_216 = arith.constant 0.000000e+00 : f32
    %447 = vector.broadcast %cst_216 : f32 to vector<2x16xf32>
    %448 = arith.subf %447, %446 : vector<2x16xf32>
    %449 = math.exp %448 : vector<2x16xf32>
    %cst_217 = arith.constant 1.000000e+00 : f32
    %450 = vector.broadcast %cst_217 : f32 to vector<2x16xf32>
    %451 = arith.addf %450, %449 : vector<2x16xf32>
    %cst_218 = arith.constant 1.000000e+00 : f32
    %452 = vector.broadcast %cst_218 : f32 to vector<2x16xf32>
    %453 = arith.divf %452, %451 : vector<2x16xf32>
    %454 = vector.extract_strided_slice %382 {offsets = [12, 0], sizes = [2, 16], strides = [1, 1]} : vector<16x16xf32> to vector<2x16xf32>
    %455 = arith.addf %454, %442 : vector<2x16xf32>
    %cst_219 = arith.constant 0.000000e+00 : f32
    %456 = vector.broadcast %cst_219 : f32 to vector<2x16xf32>
    %457 = arith.subf %456, %455 : vector<2x16xf32>
    %458 = math.exp %457 : vector<2x16xf32>
    %cst_220 = arith.constant 1.000000e+00 : f32
    %459 = vector.broadcast %cst_220 : f32 to vector<2x16xf32>
    %460 = arith.addf %459, %458 : vector<2x16xf32>
    %cst_221 = arith.constant 1.000000e+00 : f32
    %461 = vector.broadcast %cst_221 : f32 to vector<2x16xf32>
    %462 = arith.divf %461, %460 : vector<2x16xf32>
    %463 = vector.extract_strided_slice %389 {offsets = [12, 0], sizes = [2, 16], strides = [1, 1]} : vector<16x16xf32> to vector<2x16xf32>
    %464 = arith.mulf %453, %444 : vector<2x16xf32>
    %465 = arith.addf %463, %464 : vector<2x16xf32>
    %cst_222 = arith.constant -2.000000e+00 : f32
    %466 = vector.broadcast %cst_222 : f32 to vector<2x16xf32>
    %467 = arith.mulf %466, %465 : vector<2x16xf32>
    %468 = math.exp %467 : vector<2x16xf32>
    %cst_223 = arith.constant 1.000000e+00 : f32
    %469 = vector.broadcast %cst_223 : f32 to vector<2x16xf32>
    %470 = arith.addf %469, %468 : vector<2x16xf32>
    %cst_224 = arith.constant 2.000000e+00 : f32
    %471 = vector.broadcast %cst_224 : f32 to vector<2x16xf32>
    %472 = arith.divf %471, %470 : vector<2x16xf32>
    %cst_225 = arith.constant 1.000000e+00 : f32
    %473 = vector.broadcast %cst_225 : f32 to vector<2x16xf32>
    %474 = arith.subf %472, %473 : vector<2x16xf32>
    %cst_226 = arith.constant 1.000000e+00 : f32
    %475 = vector.broadcast %cst_226 : f32 to vector<2x16xf32>
    %476 = arith.subf %475, %462 : vector<2x16xf32>
    %477 = arith.mulf %476, %474 : vector<2x16xf32>
    %478 = arith.mulf %462, %439 : vector<2x16xf32>
    %479 = arith.addf %477, %478 : vector<2x16xf32>
    %c12_227 = arith.constant 12 : index
    %c16_228 = arith.constant 16 : index
    %480 = vector.load %arg8[%c12_227, %c16_228] : memref<16x32xf32, #tpu.memory_space<vmem>>, vector<2x16xf32>
    tpu.vector_store %arg8[%c12_227, %c16_228], %479 {strides = array<i32>} : memref<16x32xf32, #tpu.memory_space<vmem>>, vector<2x16xf32>,
    %cst_229 = arith.constant dense<0.000000e+00> : vector<2x16xf32>
    %481 = tpu.matmul %479, %391, %cst_229 {dimension_numbers = #tpu.dot_dimension_numbers<[1], [0], [0], [1], [0, 0, 1, 1], [], []>} : vector<2x16xf32>, vector<16x16xf32>, vector<2x16xf32> -> vector<2x16xf32>
    %cst_230 = arith.constant dense<0.000000e+00> : vector<2x16xf32>
    %482 = tpu.matmul %479, %393, %cst_230 {dimension_numbers = #tpu.dot_dimension_numbers<[1], [0], [0], [1], [0, 0, 1, 1], [], []>} : vector<2x16xf32>, vector<16x16xf32>, vector<2x16xf32> -> vector<2x16xf32>
    %cst_231 = arith.constant dense<0.000000e+00> : vector<2x16xf32>
    %483 = tpu.matmul %479, %395, %cst_231 {dimension_numbers = #tpu.dot_dimension_numbers<[1], [0], [0], [1], [0, 0, 1, 1], [], []>} : vector<2x16xf32>, vector<16x16xf32>, vector<2x16xf32> -> vector<2x16xf32>
    %484 = arith.addf %483, %399 : vector<2x16xf32>
    %485 = vector.extract_strided_slice %371 {offsets = [10, 0], sizes = [2, 16], strides = [1, 1]} : vector<16x16xf32> to vector<2x16xf32>
    %486 = arith.addf %485, %481 : vector<2x16xf32>
    %cst_232 = arith.constant 0.000000e+00 : f32
    %487 = vector.broadcast %cst_232 : f32 to vector<2x16xf32>
    %488 = arith.subf %487, %486 : vector<2x16xf32>
    %489 = math.exp %488 : vector<2x16xf32>
    %cst_233 = arith.constant 1.000000e+00 : f32
    %490 = vector.broadcast %cst_233 : f32 to vector<2x16xf32>
    %491 = arith.addf %490, %489 : vector<2x16xf32>
    %cst_234 = arith.constant 1.000000e+00 : f32
    %492 = vector.broadcast %cst_234 : f32 to vector<2x16xf32>
    %493 = arith.divf %492, %491 : vector<2x16xf32>
    %494 = vector.extract_strided_slice %382 {offsets = [10, 0], sizes = [2, 16], strides = [1, 1]} : vector<16x16xf32> to vector<2x16xf32>
    %495 = arith.addf %494, %482 : vector<2x16xf32>
    %cst_235 = arith.constant 0.000000e+00 : f32
    %496 = vector.broadcast %cst_235 : f32 to vector<2x16xf32>
    %497 = arith.subf %496, %495 : vector<2x16xf32>
    %498 = math.exp %497 : vector<2x16xf32>
    %cst_236 = arith.constant 1.000000e+00 : f32
    %499 = vector.broadcast %cst_236 : f32 to vector<2x16xf32>
    %500 = arith.addf %499, %498 : vector<2x16xf32>
    %cst_237 = arith.constant 1.000000e+00 : f32
    %501 = vector.broadcast %cst_237 : f32 to vector<2x16xf32>
    %502 = arith.divf %501, %500 : vector<2x16xf32>
    %503 = vector.extract_strided_slice %389 {offsets = [10, 0], sizes = [2, 16], strides = [1, 1]} : vector<16x16xf32> to vector<2x16xf32>
    %504 = arith.mulf %493, %484 : vector<2x16xf32>
    %505 = arith.addf %503, %504 : vector<2x16xf32>
    %cst_238 = arith.constant -2.000000e+00 : f32
    %506 = vector.broadcast %cst_238 : f32 to vector<2x16xf32>
    %507 = arith.mulf %506, %505 : vector<2x16xf32>
    %508 = math.exp %507 : vector<2x16xf32>
    %cst_239 = arith.constant 1.000000e+00 : f32
    %509 = vector.broadcast %cst_239 : f32 to vector<2x16xf32>
    %510 = arith.addf %509, %508 : vector<2x16xf32>
    %cst_240 = arith.constant 2.000000e+00 : f32
    %511 = vector.broadcast %cst_240 : f32 to vector<2x16xf32>
    %512 = arith.divf %511, %510 : vector<2x16xf32>
    %cst_241 = arith.constant 1.000000e+00 : f32
    %513 = vector.broadcast %cst_241 : f32 to vector<2x16xf32>
    %514 = arith.subf %512, %513 : vector<2x16xf32>
    %cst_242 = arith.constant 1.000000e+00 : f32
    %515 = vector.broadcast %cst_242 : f32 to vector<2x16xf32>
    %516 = arith.subf %515, %502 : vector<2x16xf32>
    %517 = arith.mulf %516, %514 : vector<2x16xf32>
    %518 = arith.mulf %502, %479 : vector<2x16xf32>
    %519 = arith.addf %517, %518 : vector<2x16xf32>
    %c10_243 = arith.constant 10 : index
    %c16_244 = arith.constant 16 : index
    %520 = vector.load %arg8[%c10_243, %c16_244] : memref<16x32xf32, #tpu.memory_space<vmem>>, vector<2x16xf32>
    tpu.vector_store %arg8[%c10_243, %c16_244], %519 {strides = array<i32>} : memref<16x32xf32, #tpu.memory_space<vmem>>, vector<2x16xf32>,
    %cst_245 = arith.constant dense<0.000000e+00> : vector<2x16xf32>
    %521 = tpu.matmul %519, %391, %cst_245 {dimension_numbers = #tpu.dot_dimension_numbers<[1], [0], [0], [1], [0, 0, 1, 1], [], []>} : vector<2x16xf32>, vector<16x16xf32>, vector<2x16xf32> -> vector<2x16xf32>
    %cst_246 = arith.constant dense<0.000000e+00> : vector<2x16xf32>
    %522 = tpu.matmul %519, %393, %cst_246 {dimension_numbers = #tpu.dot_dimension_numbers<[1], [0], [0], [1], [0, 0, 1, 1], [], []>} : vector<2x16xf32>, vector<16x16xf32>, vector<2x16xf32> -> vector<2x16xf32>
    %cst_247 = arith.constant dense<0.000000e+00> : vector<2x16xf32>
    %523 = tpu.matmul %519, %395, %cst_247 {dimension_numbers = #tpu.dot_dimension_numbers<[1], [0], [0], [1], [0, 0, 1, 1], [], []>} : vector<2x16xf32>, vector<16x16xf32>, vector<2x16xf32> -> vector<2x16xf32>
    %524 = arith.addf %523, %399 : vector<2x16xf32>
    %525 = vector.extract_strided_slice %371 {offsets = [8, 0], sizes = [2, 16], strides = [1, 1]} : vector<16x16xf32> to vector<2x16xf32>
    %526 = arith.addf %525, %521 : vector<2x16xf32>
    %cst_248 = arith.constant 0.000000e+00 : f32
    %527 = vector.broadcast %cst_248 : f32 to vector<2x16xf32>
    %528 = arith.subf %527, %526 : vector<2x16xf32>
    %529 = math.exp %528 : vector<2x16xf32>
    %cst_249 = arith.constant 1.000000e+00 : f32
    %530 = vector.broadcast %cst_249 : f32 to vector<2x16xf32>
    %531 = arith.addf %530, %529 : vector<2x16xf32>
    %cst_250 = arith.constant 1.000000e+00 : f32
    %532 = vector.broadcast %cst_250 : f32 to vector<2x16xf32>
    %533 = arith.divf %532, %531 : vector<2x16xf32>
    %534 = vector.extract_strided_slice %382 {offsets = [8, 0], sizes = [2, 16], strides = [1, 1]} : vector<16x16xf32> to vector<2x16xf32>
    %535 = arith.addf %534, %522 : vector<2x16xf32>
    %cst_251 = arith.constant 0.000000e+00 : f32
    %536 = vector.broadcast %cst_251 : f32 to vector<2x16xf32>
    %537 = arith.subf %536, %535 : vector<2x16xf32>
    %538 = math.exp %537 : vector<2x16xf32>
    %cst_252 = arith.constant 1.000000e+00 : f32
    %539 = vector.broadcast %cst_252 : f32 to vector<2x16xf32>
    %540 = arith.addf %539, %538 : vector<2x16xf32>
    %cst_253 = arith.constant 1.000000e+00 : f32
    %541 = vector.broadcast %cst_253 : f32 to vector<2x16xf32>
    %542 = arith.divf %541, %540 : vector<2x16xf32>
    %543 = vector.extract_strided_slice %389 {offsets = [8, 0], sizes = [2, 16], strides = [1, 1]} : vector<16x16xf32> to vector<2x16xf32>
    %544 = arith.mulf %533, %524 : vector<2x16xf32>
    %545 = arith.addf %543, %544 : vector<2x16xf32>
    %cst_254 = arith.constant -2.000000e+00 : f32
    %546 = vector.broadcast %cst_254 : f32 to vector<2x16xf32>
    %547 = arith.mulf %546, %545 : vector<2x16xf32>
    %548 = math.exp %547 : vector<2x16xf32>
    %cst_255 = arith.constant 1.000000e+00 : f32
    %549 = vector.broadcast %cst_255 : f32 to vector<2x16xf32>
    %550 = arith.addf %549, %548 : vector<2x16xf32>
    %cst_256 = arith.constant 2.000000e+00 : f32
    %551 = vector.broadcast %cst_256 : f32 to vector<2x16xf32>
    %552 = arith.divf %551, %550 : vector<2x16xf32>
    %cst_257 = arith.constant 1.000000e+00 : f32
    %553 = vector.broadcast %cst_257 : f32 to vector<2x16xf32>
    %554 = arith.subf %552, %553 : vector<2x16xf32>
    %cst_258 = arith.constant 1.000000e+00 : f32
    %555 = vector.broadcast %cst_258 : f32 to vector<2x16xf32>
    %556 = arith.subf %555, %542 : vector<2x16xf32>
    %557 = arith.mulf %556, %554 : vector<2x16xf32>
    %558 = arith.mulf %542, %519 : vector<2x16xf32>
    %559 = arith.addf %557, %558 : vector<2x16xf32>
    %c8_259 = arith.constant 8 : index
    %c16_260 = arith.constant 16 : index
    %560 = vector.load %arg8[%c8_259, %c16_260] : memref<16x32xf32, #tpu.memory_space<vmem>>, vector<2x16xf32>
    tpu.vector_store %arg8[%c8_259, %c16_260], %559 {strides = array<i32>} : memref<16x32xf32, #tpu.memory_space<vmem>>, vector<2x16xf32>,
    %cst_261 = arith.constant dense<0.000000e+00> : vector<2x16xf32>
    %561 = tpu.matmul %559, %391, %cst_261 {dimension_numbers = #tpu.dot_dimension_numbers<[1], [0], [0], [1], [0, 0, 1, 1], [], []>} : vector<2x16xf32>, vector<16x16xf32>, vector<2x16xf32> -> vector<2x16xf32>
    %cst_262 = arith.constant dense<0.000000e+00> : vector<2x16xf32>
    %562 = tpu.matmul %559, %393, %cst_262 {dimension_numbers = #tpu.dot_dimension_numbers<[1], [0], [0], [1], [0, 0, 1, 1], [], []>} : vector<2x16xf32>, vector<16x16xf32>, vector<2x16xf32> -> vector<2x16xf32>
    %cst_263 = arith.constant dense<0.000000e+00> : vector<2x16xf32>
    %563 = tpu.matmul %559, %395, %cst_263 {dimension_numbers = #tpu.dot_dimension_numbers<[1], [0], [0], [1], [0, 0, 1, 1], [], []>} : vector<2x16xf32>, vector<16x16xf32>, vector<2x16xf32> -> vector<2x16xf32>
    %564 = arith.addf %563, %399 : vector<2x16xf32>
    %565 = vector.extract_strided_slice %371 {offsets = [6, 0], sizes = [2, 16], strides = [1, 1]} : vector<16x16xf32> to vector<2x16xf32>
    %566 = arith.addf %565, %561 : vector<2x16xf32>
    %cst_264 = arith.constant 0.000000e+00 : f32
    %567 = vector.broadcast %cst_264 : f32 to vector<2x16xf32>
    %568 = arith.subf %567, %566 : vector<2x16xf32>
    %569 = math.exp %568 : vector<2x16xf32>
    %cst_265 = arith.constant 1.000000e+00 : f32
    %570 = vector.broadcast %cst_265 : f32 to vector<2x16xf32>
    %571 = arith.addf %570, %569 : vector<2x16xf32>
    %cst_266 = arith.constant 1.000000e+00 : f32
    %572 = vector.broadcast %cst_266 : f32 to vector<2x16xf32>
    %573 = arith.divf %572, %571 : vector<2x16xf32>
    %574 = vector.extract_strided_slice %382 {offsets = [6, 0], sizes = [2, 16], strides = [1, 1]} : vector<16x16xf32> to vector<2x16xf32>
    %575 = arith.addf %574, %562 : vector<2x16xf32>
    %cst_267 = arith.constant 0.000000e+00 : f32
    %576 = vector.broadcast %cst_267 : f32 to vector<2x16xf32>
    %577 = arith.subf %576, %575 : vector<2x16xf32>
    %578 = math.exp %577 : vector<2x16xf32>
    %cst_268 = arith.constant 1.000000e+00 : f32
    %579 = vector.broadcast %cst_268 : f32 to vector<2x16xf32>
    %580 = arith.addf %579, %578 : vector<2x16xf32>
    %cst_269 = arith.constant 1.000000e+00 : f32
    %581 = vector.broadcast %cst_269 : f32 to vector<2x16xf32>
    %582 = arith.divf %581, %580 : vector<2x16xf32>
    %583 = vector.extract_strided_slice %389 {offsets = [6, 0], sizes = [2, 16], strides = [1, 1]} : vector<16x16xf32> to vector<2x16xf32>
    %584 = arith.mulf %573, %564 : vector<2x16xf32>
    %585 = arith.addf %583, %584 : vector<2x16xf32>
    %cst_270 = arith.constant -2.000000e+00 : f32
    %586 = vector.broadcast %cst_270 : f32 to vector<2x16xf32>
    %587 = arith.mulf %586, %585 : vector<2x16xf32>
    %588 = math.exp %587 : vector<2x16xf32>
    %cst_271 = arith.constant 1.000000e+00 : f32
    %589 = vector.broadcast %cst_271 : f32 to vector<2x16xf32>
    %590 = arith.addf %589, %588 : vector<2x16xf32>
    %cst_272 = arith.constant 2.000000e+00 : f32
    %591 = vector.broadcast %cst_272 : f32 to vector<2x16xf32>
    %592 = arith.divf %591, %590 : vector<2x16xf32>
    %cst_273 = arith.constant 1.000000e+00 : f32
    %593 = vector.broadcast %cst_273 : f32 to vector<2x16xf32>
    %594 = arith.subf %592, %593 : vector<2x16xf32>
    %cst_274 = arith.constant 1.000000e+00 : f32
    %595 = vector.broadcast %cst_274 : f32 to vector<2x16xf32>
    %596 = arith.subf %595, %582 : vector<2x16xf32>
    %597 = arith.mulf %596, %594 : vector<2x16xf32>
    %598 = arith.mulf %582, %559 : vector<2x16xf32>
    %599 = arith.addf %597, %598 : vector<2x16xf32>
    %c6_275 = arith.constant 6 : index
    %c16_276 = arith.constant 16 : index
    %600 = vector.load %arg8[%c6_275, %c16_276] : memref<16x32xf32, #tpu.memory_space<vmem>>, vector<2x16xf32>
    tpu.vector_store %arg8[%c6_275, %c16_276], %599 {strides = array<i32>} : memref<16x32xf32, #tpu.memory_space<vmem>>, vector<2x16xf32>,
    %cst_277 = arith.constant dense<0.000000e+00> : vector<2x16xf32>
    %601 = tpu.matmul %599, %391, %cst_277 {dimension_numbers = #tpu.dot_dimension_numbers<[1], [0], [0], [1], [0, 0, 1, 1], [], []>} : vector<2x16xf32>, vector<16x16xf32>, vector<2x16xf32> -> vector<2x16xf32>
    %cst_278 = arith.constant dense<0.000000e+00> : vector<2x16xf32>
    %602 = tpu.matmul %599, %393, %cst_278 {dimension_numbers = #tpu.dot_dimension_numbers<[1], [0], [0], [1], [0, 0, 1, 1], [], []>} : vector<2x16xf32>, vector<16x16xf32>, vector<2x16xf32> -> vector<2x16xf32>
    %cst_279 = arith.constant dense<0.000000e+00> : vector<2x16xf32>
    %603 = tpu.matmul %599, %395, %cst_279 {dimension_numbers = #tpu.dot_dimension_numbers<[1], [0], [0], [1], [0, 0, 1, 1], [], []>} : vector<2x16xf32>, vector<16x16xf32>, vector<2x16xf32> -> vector<2x16xf32>
    %604 = arith.addf %603, %399 : vector<2x16xf32>
    %605 = vector.extract_strided_slice %371 {offsets = [4, 0], sizes = [2, 16], strides = [1, 1]} : vector<16x16xf32> to vector<2x16xf32>
    %606 = arith.addf %605, %601 : vector<2x16xf32>
    %cst_280 = arith.constant 0.000000e+00 : f32
    %607 = vector.broadcast %cst_280 : f32 to vector<2x16xf32>
    %608 = arith.subf %607, %606 : vector<2x16xf32>
    %609 = math.exp %608 : vector<2x16xf32>
    %cst_281 = arith.constant 1.000000e+00 : f32
    %610 = vector.broadcast %cst_281 : f32 to vector<2x16xf32>
    %611 = arith.addf %610, %609 : vector<2x16xf32>
    %cst_282 = arith.constant 1.000000e+00 : f32
    %612 = vector.broadcast %cst_282 : f32 to vector<2x16xf32>
    %613 = arith.divf %612, %611 : vector<2x16xf32>
    %614 = vector.extract_strided_slice %382 {offsets = [4, 0], sizes = [2, 16], strides = [1, 1]} : vector<16x16xf32> to vector<2x16xf32>
    %615 = arith.addf %614, %602 : vector<2x16xf32>
    %cst_283 = arith.constant 0.000000e+00 : f32
    %616 = vector.broadcast %cst_283 : f32 to vector<2x16xf32>
    %617 = arith.subf %616, %615 : vector<2x16xf32>
    %618 = math.exp %617 : vector<2x16xf32>
    %cst_284 = arith.constant 1.000000e+00 : f32
    %619 = vector.broadcast %cst_284 : f32 to vector<2x16xf32>
    %620 = arith.addf %619, %618 : vector<2x16xf32>
    %cst_285 = arith.constant 1.000000e+00 : f32
    %621 = vector.broadcast %cst_285 : f32 to vector<2x16xf32>
    %622 = arith.divf %621, %620 : vector<2x16xf32>
    %623 = vector.extract_strided_slice %389 {offsets = [4, 0], sizes = [2, 16], strides = [1, 1]} : vector<16x16xf32> to vector<2x16xf32>
    %624 = arith.mulf %613, %604 : vector<2x16xf32>
    %625 = arith.addf %623, %624 : vector<2x16xf32>
    %cst_286 = arith.constant -2.000000e+00 : f32
    %626 = vector.broadcast %cst_286 : f32 to vector<2x16xf32>
    %627 = arith.mulf %626, %625 : vector<2x16xf32>
    %628 = math.exp %627 : vector<2x16xf32>
    %cst_287 = arith.constant 1.000000e+00 : f32
    %629 = vector.broadcast %cst_287 : f32 to vector<2x16xf32>
    %630 = arith.addf %629, %628 : vector<2x16xf32>
    %cst_288 = arith.constant 2.000000e+00 : f32
    %631 = vector.broadcast %cst_288 : f32 to vector<2x16xf32>
    %632 = arith.divf %631, %630 : vector<2x16xf32>
    %cst_289 = arith.constant 1.000000e+00 : f32
    %633 = vector.broadcast %cst_289 : f32 to vector<2x16xf32>
    %634 = arith.subf %632, %633 : vector<2x16xf32>
    %cst_290 = arith.constant 1.000000e+00 : f32
    %635 = vector.broadcast %cst_290 : f32 to vector<2x16xf32>
    %636 = arith.subf %635, %622 : vector<2x16xf32>
    %637 = arith.mulf %636, %634 : vector<2x16xf32>
    %638 = arith.mulf %622, %599 : vector<2x16xf32>
    %639 = arith.addf %637, %638 : vector<2x16xf32>
    %c4_291 = arith.constant 4 : index
    %c16_292 = arith.constant 16 : index
    %640 = vector.load %arg8[%c4_291, %c16_292] : memref<16x32xf32, #tpu.memory_space<vmem>>, vector<2x16xf32>
    tpu.vector_store %arg8[%c4_291, %c16_292], %639 {strides = array<i32>} : memref<16x32xf32, #tpu.memory_space<vmem>>, vector<2x16xf32>,
    %cst_293 = arith.constant dense<0.000000e+00> : vector<2x16xf32>
    %641 = tpu.matmul %639, %391, %cst_293 {dimension_numbers = #tpu.dot_dimension_numbers<[1], [0], [0], [1], [0, 0, 1, 1], [], []>} : vector<2x16xf32>, vector<16x16xf32>, vector<2x16xf32> -> vector<2x16xf32>
    %cst_294 = arith.constant dense<0.000000e+00> : vector<2x16xf32>
    %642 = tpu.matmul %639, %393, %cst_294 {dimension_numbers = #tpu.dot_dimension_numbers<[1], [0], [0], [1], [0, 0, 1, 1], [], []>} : vector<2x16xf32>, vector<16x16xf32>, vector<2x16xf32> -> vector<2x16xf32>
    %cst_295 = arith.constant dense<0.000000e+00> : vector<2x16xf32>
    %643 = tpu.matmul %639, %395, %cst_295 {dimension_numbers = #tpu.dot_dimension_numbers<[1], [0], [0], [1], [0, 0, 1, 1], [], []>} : vector<2x16xf32>, vector<16x16xf32>, vector<2x16xf32> -> vector<2x16xf32>
    %644 = arith.addf %643, %399 : vector<2x16xf32>
    %645 = vector.extract_strided_slice %371 {offsets = [2, 0], sizes = [2, 16], strides = [1, 1]} : vector<16x16xf32> to vector<2x16xf32>
    %646 = arith.addf %645, %641 : vector<2x16xf32>
    %cst_296 = arith.constant 0.000000e+00 : f32
    %647 = vector.broadcast %cst_296 : f32 to vector<2x16xf32>
    %648 = arith.subf %647, %646 : vector<2x16xf32>
    %649 = math.exp %648 : vector<2x16xf32>
    %cst_297 = arith.constant 1.000000e+00 : f32
    %650 = vector.broadcast %cst_297 : f32 to vector<2x16xf32>
    %651 = arith.addf %650, %649 : vector<2x16xf32>
    %cst_298 = arith.constant 1.000000e+00 : f32
    %652 = vector.broadcast %cst_298 : f32 to vector<2x16xf32>
    %653 = arith.divf %652, %651 : vector<2x16xf32>
    %654 = vector.extract_strided_slice %382 {offsets = [2, 0], sizes = [2, 16], strides = [1, 1]} : vector<16x16xf32> to vector<2x16xf32>
    %655 = arith.addf %654, %642 : vector<2x16xf32>
    %cst_299 = arith.constant 0.000000e+00 : f32
    %656 = vector.broadcast %cst_299 : f32 to vector<2x16xf32>
    %657 = arith.subf %656, %655 : vector<2x16xf32>
    %658 = math.exp %657 : vector<2x16xf32>
    %cst_300 = arith.constant 1.000000e+00 : f32
    %659 = vector.broadcast %cst_300 : f32 to vector<2x16xf32>
    %660 = arith.addf %659, %658 : vector<2x16xf32>
    %cst_301 = arith.constant 1.000000e+00 : f32
    %661 = vector.broadcast %cst_301 : f32 to vector<2x16xf32>
    %662 = arith.divf %661, %660 : vector<2x16xf32>
    %663 = vector.extract_strided_slice %389 {offsets = [2, 0], sizes = [2, 16], strides = [1, 1]} : vector<16x16xf32> to vector<2x16xf32>
    %664 = arith.mulf %653, %644 : vector<2x16xf32>
    %665 = arith.addf %663, %664 : vector<2x16xf32>
    %cst_302 = arith.constant -2.000000e+00 : f32
    %666 = vector.broadcast %cst_302 : f32 to vector<2x16xf32>
    %667 = arith.mulf %666, %665 : vector<2x16xf32>
    %668 = math.exp %667 : vector<2x16xf32>
    %cst_303 = arith.constant 1.000000e+00 : f32
    %669 = vector.broadcast %cst_303 : f32 to vector<2x16xf32>
    %670 = arith.addf %669, %668 : vector<2x16xf32>
    %cst_304 = arith.constant 2.000000e+00 : f32
    %671 = vector.broadcast %cst_304 : f32 to vector<2x16xf32>
    %672 = arith.divf %671, %670 : vector<2x16xf32>
    %cst_305 = arith.constant 1.000000e+00 : f32
    %673 = vector.broadcast %cst_305 : f32 to vector<2x16xf32>
    %674 = arith.subf %672, %673 : vector<2x16xf32>
    %cst_306 = arith.constant 1.000000e+00 : f32
    %675 = vector.broadcast %cst_306 : f32 to vector<2x16xf32>
    %676 = arith.subf %675, %662 : vector<2x16xf32>
    %677 = arith.mulf %676, %674 : vector<2x16xf32>
    %678 = arith.mulf %662, %639 : vector<2x16xf32>
    %679 = arith.addf %677, %678 : vector<2x16xf32>
    %c2_307 = arith.constant 2 : index
    %c16_308 = arith.constant 16 : index
    %680 = vector.load %arg8[%c2_307, %c16_308] : memref<16x32xf32, #tpu.memory_space<vmem>>, vector<2x16xf32>
    tpu.vector_store %arg8[%c2_307, %c16_308], %679 {strides = array<i32>} : memref<16x32xf32, #tpu.memory_space<vmem>>, vector<2x16xf32>,
    %cst_309 = arith.constant dense<0.000000e+00> : vector<2x16xf32>
    %681 = tpu.matmul %679, %391, %cst_309 {dimension_numbers = #tpu.dot_dimension_numbers<[1], [0], [0], [1], [0, 0, 1, 1], [], []>} : vector<2x16xf32>, vector<16x16xf32>, vector<2x16xf32> -> vector<2x16xf32>
    %cst_310 = arith.constant dense<0.000000e+00> : vector<2x16xf32>
    %682 = tpu.matmul %679, %393, %cst_310 {dimension_numbers = #tpu.dot_dimension_numbers<[1], [0], [0], [1], [0, 0, 1, 1], [], []>} : vector<2x16xf32>, vector<16x16xf32>, vector<2x16xf32> -> vector<2x16xf32>
    %cst_311 = arith.constant dense<0.000000e+00> : vector<2x16xf32>
    %683 = tpu.matmul %679, %395, %cst_311 {dimension_numbers = #tpu.dot_dimension_numbers<[1], [0], [0], [1], [0, 0, 1, 1], [], []>} : vector<2x16xf32>, vector<16x16xf32>, vector<2x16xf32> -> vector<2x16xf32>
    %684 = arith.addf %683, %399 : vector<2x16xf32>
    %685 = vector.extract_strided_slice %371 {offsets = [0, 0], sizes = [2, 16], strides = [1, 1]} : vector<16x16xf32> to vector<2x16xf32>
    %686 = arith.addf %685, %681 : vector<2x16xf32>
    %cst_312 = arith.constant 0.000000e+00 : f32
    %687 = vector.broadcast %cst_312 : f32 to vector<2x16xf32>
    %688 = arith.subf %687, %686 : vector<2x16xf32>
    %689 = math.exp %688 : vector<2x16xf32>
    %cst_313 = arith.constant 1.000000e+00 : f32
    %690 = vector.broadcast %cst_313 : f32 to vector<2x16xf32>
    %691 = arith.addf %690, %689 : vector<2x16xf32>
    %cst_314 = arith.constant 1.000000e+00 : f32
    %692 = vector.broadcast %cst_314 : f32 to vector<2x16xf32>
    %693 = arith.divf %692, %691 : vector<2x16xf32>
    %694 = vector.extract_strided_slice %382 {offsets = [0, 0], sizes = [2, 16], strides = [1, 1]} : vector<16x16xf32> to vector<2x16xf32>
    %695 = arith.addf %694, %682 : vector<2x16xf32>
    %cst_315 = arith.constant 0.000000e+00 : f32
    %696 = vector.broadcast %cst_315 : f32 to vector<2x16xf32>
    %697 = arith.subf %696, %695 : vector<2x16xf32>
    %698 = math.exp %697 : vector<2x16xf32>
    %cst_316 = arith.constant 1.000000e+00 : f32
    %699 = vector.broadcast %cst_316 : f32 to vector<2x16xf32>
    %700 = arith.addf %699, %698 : vector<2x16xf32>
    %cst_317 = arith.constant 1.000000e+00 : f32
    %701 = vector.broadcast %cst_317 : f32 to vector<2x16xf32>
    %702 = arith.divf %701, %700 : vector<2x16xf32>
    %703 = vector.extract_strided_slice %389 {offsets = [0, 0], sizes = [2, 16], strides = [1, 1]} : vector<16x16xf32> to vector<2x16xf32>
    %704 = arith.mulf %693, %684 : vector<2x16xf32>
    %705 = arith.addf %703, %704 : vector<2x16xf32>
    %cst_318 = arith.constant -2.000000e+00 : f32
    %706 = vector.broadcast %cst_318 : f32 to vector<2x16xf32>
    %707 = arith.mulf %706, %705 : vector<2x16xf32>
    %708 = math.exp %707 : vector<2x16xf32>
    %cst_319 = arith.constant 1.000000e+00 : f32
    %709 = vector.broadcast %cst_319 : f32 to vector<2x16xf32>
    %710 = arith.addf %709, %708 : vector<2x16xf32>
    %cst_320 = arith.constant 2.000000e+00 : f32
    %711 = vector.broadcast %cst_320 : f32 to vector<2x16xf32>
    %712 = arith.divf %711, %710 : vector<2x16xf32>
    %cst_321 = arith.constant 1.000000e+00 : f32
    %713 = vector.broadcast %cst_321 : f32 to vector<2x16xf32>
    %714 = arith.subf %712, %713 : vector<2x16xf32>
    %cst_322 = arith.constant 1.000000e+00 : f32
    %715 = vector.broadcast %cst_322 : f32 to vector<2x16xf32>
    %716 = arith.subf %715, %702 : vector<2x16xf32>
    %717 = arith.mulf %716, %714 : vector<2x16xf32>
    %718 = arith.mulf %702, %679 : vector<2x16xf32>
    %719 = arith.addf %717, %718 : vector<2x16xf32>
    %c0_323 = arith.constant 0 : index
    %c16_324 = arith.constant 16 : index
    %720 = vector.load %arg8[%c0_323, %c16_324] : memref<16x32xf32, #tpu.memory_space<vmem>>, vector<2x16xf32>
    tpu.vector_store %arg8[%c0_323, %c16_324], %719 {strides = array<i32>} : memref<16x32xf32, #tpu.memory_space<vmem>>, vector<2x16xf32>,
    %c0_325 = arith.constant 0 : index
    %c0_326 = arith.constant 0 : index
    %721 = vector.load %arg8[%c0_325, %c0_326] : memref<16x32xf32, #tpu.memory_space<vmem>>, vector<16x32xf32>
    %c6_327 = arith.constant 6 : index
    %c0_328 = arith.constant 0 : index
    %c0_329 = arith.constant 0 : index
    %722 = vector.load %arg1[%c6_327, %c0_328, %c0_329] : memref<12x32x16xf32, #tpu.memory_space<vmem>>, vector<1x32x16xf32>
    %723 = vector.shape_cast %722 : vector<1x32x16xf32> to vector<32x16xf32>
    %cst_330 = arith.constant dense<0.000000e+00> : vector<16x16xf32>
    %724 = tpu.matmul %721, %723, %cst_330 {dimension_numbers = #tpu.dot_dimension_numbers<[1], [0], [0], [1], [0, 0, 1, 1], [], []>} : vector<16x32xf32>, vector<32x16xf32>, vector<16x16xf32> -> vector<16x16xf32>
    %c6_331 = arith.constant 6 : index
    %c0_332 = arith.constant 0 : index
    %c0_333 = arith.constant 0 : index
    %725 = vector.load %arg2[%c6_331, %c0_332, %c0_333] : memref<12x1x16xf32, #tpu.memory_space<vmem>>, vector<1x1x16xf32>
    %726 = vector.shape_cast %725 : vector<1x1x16xf32> to vector<1x16xf32>
    %727 = vector.broadcast %726 : vector<1x16xf32> to vector<16x16xf32>
    %728 = arith.addf %724, %727 : vector<16x16xf32>
    %c6_334 = arith.constant 6 : index
    %c0_335 = arith.constant 0 : index
    %c0_336 = arith.constant 0 : index
    %729 = vector.load %arg4[%c6_334, %c0_335, %c0_336] : memref<12x1x16xf32, #tpu.memory_space<vmem>>, vector<1x1x16xf32>
    %730 = vector.shape_cast %729 : vector<1x1x16xf32> to vector<1x16xf32>
    %731 = vector.broadcast %730 : vector<1x16xf32> to vector<16x16xf32>
    %732 = arith.addf %728, %731 : vector<16x16xf32>
    %c7 = arith.constant 7 : index
    %c0_337 = arith.constant 0 : index
    %c0_338 = arith.constant 0 : index
    %733 = vector.load %arg1[%c7, %c0_337, %c0_338] : memref<12x32x16xf32, #tpu.memory_space<vmem>>, vector<1x32x16xf32>
    %734 = vector.shape_cast %733 : vector<1x32x16xf32> to vector<32x16xf32>
    %cst_339 = arith.constant dense<0.000000e+00> : vector<16x16xf32>
    %735 = tpu.matmul %721, %734, %cst_339 {dimension_numbers = #tpu.dot_dimension_numbers<[1], [0], [0], [1], [0, 0, 1, 1], [], []>} : vector<16x32xf32>, vector<32x16xf32>, vector<16x16xf32> -> vector<16x16xf32>
    %c7_340 = arith.constant 7 : index
    %c0_341 = arith.constant 0 : index
    %c0_342 = arith.constant 0 : index
    %736 = vector.load %arg2[%c7_340, %c0_341, %c0_342] : memref<12x1x16xf32, #tpu.memory_space<vmem>>, vector<1x1x16xf32>
    %737 = vector.shape_cast %736 : vector<1x1x16xf32> to vector<1x16xf32>
    %738 = vector.broadcast %737 : vector<1x16xf32> to vector<16x16xf32>
    %739 = arith.addf %735, %738 : vector<16x16xf32>
    %c7_343 = arith.constant 7 : index
    %c0_344 = arith.constant 0 : index
    %c0_345 = arith.constant 0 : index
    %740 = vector.load %arg4[%c7_343, %c0_344, %c0_345] : memref<12x1x16xf32, #tpu.memory_space<vmem>>, vector<1x1x16xf32>
    %741 = vector.shape_cast %740 : vector<1x1x16xf32> to vector<1x16xf32>
    %742 = vector.broadcast %741 : vector<1x16xf32> to vector<16x16xf32>
    %743 = arith.addf %739, %742 : vector<16x16xf32>
    %c8_346 = arith.constant 8 : index
    %c0_347 = arith.constant 0 : index
    %c0_348 = arith.constant 0 : index
    %744 = vector.load %arg1[%c8_346, %c0_347, %c0_348] : memref<12x32x16xf32, #tpu.memory_space<vmem>>, vector<1x32x16xf32>
    %745 = vector.shape_cast %744 : vector<1x32x16xf32> to vector<32x16xf32>
    %cst_349 = arith.constant dense<0.000000e+00> : vector<16x16xf32>
    %746 = tpu.matmul %721, %745, %cst_349 {dimension_numbers = #tpu.dot_dimension_numbers<[1], [0], [0], [1], [0, 0, 1, 1], [], []>} : vector<16x32xf32>, vector<32x16xf32>, vector<16x16xf32> -> vector<16x16xf32>
    %c8_350 = arith.constant 8 : index
    %c0_351 = arith.constant 0 : index
    %c0_352 = arith.constant 0 : index
    %747 = vector.load %arg2[%c8_350, %c0_351, %c0_352] : memref<12x1x16xf32, #tpu.memory_space<vmem>>, vector<1x1x16xf32>
    %748 = vector.shape_cast %747 : vector<1x1x16xf32> to vector<1x16xf32>
    %749 = vector.broadcast %748 : vector<1x16xf32> to vector<16x16xf32>
    %750 = arith.addf %746, %749 : vector<16x16xf32>
    %c6_353 = arith.constant 6 : index
    %c0_354 = arith.constant 0 : index
    %c0_355 = arith.constant 0 : index
    %751 = vector.load %arg3[%c6_353, %c0_354, %c0_355] : memref<12x16x16xf32, #tpu.memory_space<vmem>>, vector<1x16x16xf32>
    %752 = vector.shape_cast %751 : vector<1x16x16xf32> to vector<16x16xf32>
    %c7_356 = arith.constant 7 : index
    %c0_357 = arith.constant 0 : index
    %c0_358 = arith.constant 0 : index
    %753 = vector.load %arg3[%c7_356, %c0_357, %c0_358] : memref<12x16x16xf32, #tpu.memory_space<vmem>>, vector<1x16x16xf32>
    %754 = vector.shape_cast %753 : vector<1x16x16xf32> to vector<16x16xf32>
    %c8_359 = arith.constant 8 : index
    %c0_360 = arith.constant 0 : index
    %c0_361 = arith.constant 0 : index
    %755 = vector.load %arg3[%c8_359, %c0_360, %c0_361] : memref<12x16x16xf32, #tpu.memory_space<vmem>>, vector<1x16x16xf32>
    %756 = vector.shape_cast %755 : vector<1x16x16xf32> to vector<16x16xf32>
    %c8_362 = arith.constant 8 : index
    %c0_363 = arith.constant 0 : index
    %c0_364 = arith.constant 0 : index
    %757 = vector.load %arg4[%c8_362, %c0_363, %c0_364] : memref<12x1x16xf32, #tpu.memory_space<vmem>>, vector<1x1x16xf32>
    %758 = vector.shape_cast %757 : vector<1x1x16xf32> to vector<1x16xf32>
    %759 = vector.shape_cast %758 : vector<1x16xf32> to vector<1x16xf32>
    %760 = vector.broadcast %759 : vector<1x16xf32> to vector<2x16xf32>
    %cst_365 = arith.constant 0.000000e+00 : f32
    %761 = vector.broadcast %cst_365 : f32 to vector<2x16xf32>
    %cst_366 = arith.constant dense<0.000000e+00> : vector<2x16xf32>
    %762 = tpu.matmul %761, %752, %cst_366 {dimension_numbers = #tpu.dot_dimension_numbers<[1], [0], [0], [1], [0, 0, 1, 1], [], []>} : vector<2x16xf32>, vector<16x16xf32>, vector<2x16xf32> -> vector<2x16xf32>
    %cst_367 = arith.constant dense<0.000000e+00> : vector<2x16xf32>
    %763 = tpu.matmul %761, %754, %cst_367 {dimension_numbers = #tpu.dot_dimension_numbers<[1], [0], [0], [1], [0, 0, 1, 1], [], []>} : vector<2x16xf32>, vector<16x16xf32>, vector<2x16xf32> -> vector<2x16xf32>
    %cst_368 = arith.constant dense<0.000000e+00> : vector<2x16xf32>
    %764 = tpu.matmul %761, %756, %cst_368 {dimension_numbers = #tpu.dot_dimension_numbers<[1], [0], [0], [1], [0, 0, 1, 1], [], []>} : vector<2x16xf32>, vector<16x16xf32>, vector<2x16xf32> -> vector<2x16xf32>
    %765 = arith.addf %764, %760 : vector<2x16xf32>
    %766 = vector.extract_strided_slice %732 {offsets = [0, 0], sizes = [2, 16], strides = [1, 1]} : vector<16x16xf32> to vector<2x16xf32>
    %767 = arith.addf %766, %762 : vector<2x16xf32>
    %cst_369 = arith.constant 0.000000e+00 : f32
    %768 = vector.broadcast %cst_369 : f32 to vector<2x16xf32>
    %769 = arith.subf %768, %767 : vector<2x16xf32>
    %770 = math.exp %769 : vector<2x16xf32>
    %cst_370 = arith.constant 1.000000e+00 : f32
    %771 = vector.broadcast %cst_370 : f32 to vector<2x16xf32>
    %772 = arith.addf %771, %770 : vector<2x16xf32>
    %cst_371 = arith.constant 1.000000e+00 : f32
    %773 = vector.broadcast %cst_371 : f32 to vector<2x16xf32>
    %774 = arith.divf %773, %772 : vector<2x16xf32>
    %775 = vector.extract_strided_slice %743 {offsets = [0, 0], sizes = [2, 16], strides = [1, 1]} : vector<16x16xf32> to vector<2x16xf32>
    %776 = arith.addf %775, %763 : vector<2x16xf32>
    %cst_372 = arith.constant 0.000000e+00 : f32
    %777 = vector.broadcast %cst_372 : f32 to vector<2x16xf32>
    %778 = arith.subf %777, %776 : vector<2x16xf32>
    %779 = math.exp %778 : vector<2x16xf32>
    %cst_373 = arith.constant 1.000000e+00 : f32
    %780 = vector.broadcast %cst_373 : f32 to vector<2x16xf32>
    %781 = arith.addf %780, %779 : vector<2x16xf32>
    %cst_374 = arith.constant 1.000000e+00 : f32
    %782 = vector.broadcast %cst_374 : f32 to vector<2x16xf32>
    %783 = arith.divf %782, %781 : vector<2x16xf32>
    %784 = vector.extract_strided_slice %750 {offsets = [0, 0], sizes = [2, 16], strides = [1, 1]} : vector<16x16xf32> to vector<2x16xf32>
    %785 = arith.mulf %774, %765 : vector<2x16xf32>
    %786 = arith.addf %784, %785 : vector<2x16xf32>
    %cst_375 = arith.constant -2.000000e+00 : f32
    %787 = vector.broadcast %cst_375 : f32 to vector<2x16xf32>
    %788 = arith.mulf %787, %786 : vector<2x16xf32>
    %789 = math.exp %788 : vector<2x16xf32>
    %cst_376 = arith.constant 1.000000e+00 : f32
    %790 = vector.broadcast %cst_376 : f32 to vector<2x16xf32>
    %791 = arith.addf %790, %789 : vector<2x16xf32>
    %cst_377 = arith.constant 2.000000e+00 : f32
    %792 = vector.broadcast %cst_377 : f32 to vector<2x16xf32>
    %793 = arith.divf %792, %791 : vector<2x16xf32>
    %cst_378 = arith.constant 1.000000e+00 : f32
    %794 = vector.broadcast %cst_378 : f32 to vector<2x16xf32>
    %795 = arith.subf %793, %794 : vector<2x16xf32>
    %cst_379 = arith.constant 1.000000e+00 : f32
    %796 = vector.broadcast %cst_379 : f32 to vector<2x16xf32>
    %797 = arith.subf %796, %783 : vector<2x16xf32>
    %798 = arith.mulf %797, %795 : vector<2x16xf32>
    %799 = arith.mulf %783, %761 : vector<2x16xf32>
    %800 = arith.addf %798, %799 : vector<2x16xf32>
    %c0_380 = arith.constant 0 : index
    %c0_381 = arith.constant 0 : index
    %801 = vector.load %arg8[%c0_380, %c0_381] : memref<16x32xf32, #tpu.memory_space<vmem>>, vector<2x16xf32>
    tpu.vector_store %arg8[%c0_380, %c0_381], %800 {strides = array<i32>} : memref<16x32xf32, #tpu.memory_space<vmem>>, vector<2x16xf32>,
    %cst_382 = arith.constant dense<0.000000e+00> : vector<2x16xf32>
    %802 = tpu.matmul %800, %752, %cst_382 {dimension_numbers = #tpu.dot_dimension_numbers<[1], [0], [0], [1], [0, 0, 1, 1], [], []>} : vector<2x16xf32>, vector<16x16xf32>, vector<2x16xf32> -> vector<2x16xf32>
    %cst_383 = arith.constant dense<0.000000e+00> : vector<2x16xf32>
    %803 = tpu.matmul %800, %754, %cst_383 {dimension_numbers = #tpu.dot_dimension_numbers<[1], [0], [0], [1], [0, 0, 1, 1], [], []>} : vector<2x16xf32>, vector<16x16xf32>, vector<2x16xf32> -> vector<2x16xf32>
    %cst_384 = arith.constant dense<0.000000e+00> : vector<2x16xf32>
    %804 = tpu.matmul %800, %756, %cst_384 {dimension_numbers = #tpu.dot_dimension_numbers<[1], [0], [0], [1], [0, 0, 1, 1], [], []>} : vector<2x16xf32>, vector<16x16xf32>, vector<2x16xf32> -> vector<2x16xf32>
    %805 = arith.addf %804, %760 : vector<2x16xf32>
    %806 = vector.extract_strided_slice %732 {offsets = [2, 0], sizes = [2, 16], strides = [1, 1]} : vector<16x16xf32> to vector<2x16xf32>
    %807 = arith.addf %806, %802 : vector<2x16xf32>
    %cst_385 = arith.constant 0.000000e+00 : f32
    %808 = vector.broadcast %cst_385 : f32 to vector<2x16xf32>
    %809 = arith.subf %808, %807 : vector<2x16xf32>
    %810 = math.exp %809 : vector<2x16xf32>
    %cst_386 = arith.constant 1.000000e+00 : f32
    %811 = vector.broadcast %cst_386 : f32 to vector<2x16xf32>
    %812 = arith.addf %811, %810 : vector<2x16xf32>
    %cst_387 = arith.constant 1.000000e+00 : f32
    %813 = vector.broadcast %cst_387 : f32 to vector<2x16xf32>
    %814 = arith.divf %813, %812 : vector<2x16xf32>
    %815 = vector.extract_strided_slice %743 {offsets = [2, 0], sizes = [2, 16], strides = [1, 1]} : vector<16x16xf32> to vector<2x16xf32>
    %816 = arith.addf %815, %803 : vector<2x16xf32>
    %cst_388 = arith.constant 0.000000e+00 : f32
    %817 = vector.broadcast %cst_388 : f32 to vector<2x16xf32>
    %818 = arith.subf %817, %816 : vector<2x16xf32>
    %819 = math.exp %818 : vector<2x16xf32>
    %cst_389 = arith.constant 1.000000e+00 : f32
    %820 = vector.broadcast %cst_389 : f32 to vector<2x16xf32>
    %821 = arith.addf %820, %819 : vector<2x16xf32>
    %cst_390 = arith.constant 1.000000e+00 : f32
    %822 = vector.broadcast %cst_390 : f32 to vector<2x16xf32>
    %823 = arith.divf %822, %821 : vector<2x16xf32>
    %824 = vector.extract_strided_slice %750 {offsets = [2, 0], sizes = [2, 16], strides = [1, 1]} : vector<16x16xf32> to vector<2x16xf32>
    %825 = arith.mulf %814, %805 : vector<2x16xf32>
    %826 = arith.addf %824, %825 : vector<2x16xf32>
    %cst_391 = arith.constant -2.000000e+00 : f32
    %827 = vector.broadcast %cst_391 : f32 to vector<2x16xf32>
    %828 = arith.mulf %827, %826 : vector<2x16xf32>
    %829 = math.exp %828 : vector<2x16xf32>
    %cst_392 = arith.constant 1.000000e+00 : f32
    %830 = vector.broadcast %cst_392 : f32 to vector<2x16xf32>
    %831 = arith.addf %830, %829 : vector<2x16xf32>
    %cst_393 = arith.constant 2.000000e+00 : f32
    %832 = vector.broadcast %cst_393 : f32 to vector<2x16xf32>
    %833 = arith.divf %832, %831 : vector<2x16xf32>
    %cst_394 = arith.constant 1.000000e+00 : f32
    %834 = vector.broadcast %cst_394 : f32 to vector<2x16xf32>
    %835 = arith.subf %833, %834 : vector<2x16xf32>
    %cst_395 = arith.constant 1.000000e+00 : f32
    %836 = vector.broadcast %cst_395 : f32 to vector<2x16xf32>
    %837 = arith.subf %836, %823 : vector<2x16xf32>
    %838 = arith.mulf %837, %835 : vector<2x16xf32>
    %839 = arith.mulf %823, %800 : vector<2x16xf32>
    %840 = arith.addf %838, %839 : vector<2x16xf32>
    %c2_396 = arith.constant 2 : index
    %c0_397 = arith.constant 0 : index
    %841 = vector.load %arg8[%c2_396, %c0_397] : memref<16x32xf32, #tpu.memory_space<vmem>>, vector<2x16xf32>
    tpu.vector_store %arg8[%c2_396, %c0_397], %840 {strides = array<i32>} : memref<16x32xf32, #tpu.memory_space<vmem>>, vector<2x16xf32>,
    %cst_398 = arith.constant dense<0.000000e+00> : vector<2x16xf32>
    %842 = tpu.matmul %840, %752, %cst_398 {dimension_numbers = #tpu.dot_dimension_numbers<[1], [0], [0], [1], [0, 0, 1, 1], [], []>} : vector<2x16xf32>, vector<16x16xf32>, vector<2x16xf32> -> vector<2x16xf32>
    %cst_399 = arith.constant dense<0.000000e+00> : vector<2x16xf32>
    %843 = tpu.matmul %840, %754, %cst_399 {dimension_numbers = #tpu.dot_dimension_numbers<[1], [0], [0], [1], [0, 0, 1, 1], [], []>} : vector<2x16xf32>, vector<16x16xf32>, vector<2x16xf32> -> vector<2x16xf32>
    %cst_400 = arith.constant dense<0.000000e+00> : vector<2x16xf32>
    %844 = tpu.matmul %840, %756, %cst_400 {dimension_numbers = #tpu.dot_dimension_numbers<[1], [0], [0], [1], [0, 0, 1, 1], [], []>} : vector<2x16xf32>, vector<16x16xf32>, vector<2x16xf32> -> vector<2x16xf32>
    %845 = arith.addf %844, %760 : vector<2x16xf32>
    %846 = vector.extract_strided_slice %732 {offsets = [4, 0], sizes = [2, 16], strides = [1, 1]} : vector<16x16xf32> to vector<2x16xf32>
    %847 = arith.addf %846, %842 : vector<2x16xf32>
    %cst_401 = arith.constant 0.000000e+00 : f32
    %848 = vector.broadcast %cst_401 : f32 to vector<2x16xf32>
    %849 = arith.subf %848, %847 : vector<2x16xf32>
    %850 = math.exp %849 : vector<2x16xf32>
    %cst_402 = arith.constant 1.000000e+00 : f32
    %851 = vector.broadcast %cst_402 : f32 to vector<2x16xf32>
    %852 = arith.addf %851, %850 : vector<2x16xf32>
    %cst_403 = arith.constant 1.000000e+00 : f32
    %853 = vector.broadcast %cst_403 : f32 to vector<2x16xf32>
    %854 = arith.divf %853, %852 : vector<2x16xf32>
    %855 = vector.extract_strided_slice %743 {offsets = [4, 0], sizes = [2, 16], strides = [1, 1]} : vector<16x16xf32> to vector<2x16xf32>
    %856 = arith.addf %855, %843 : vector<2x16xf32>
    %cst_404 = arith.constant 0.000000e+00 : f32
    %857 = vector.broadcast %cst_404 : f32 to vector<2x16xf32>
    %858 = arith.subf %857, %856 : vector<2x16xf32>
    %859 = math.exp %858 : vector<2x16xf32>
    %cst_405 = arith.constant 1.000000e+00 : f32
    %860 = vector.broadcast %cst_405 : f32 to vector<2x16xf32>
    %861 = arith.addf %860, %859 : vector<2x16xf32>
    %cst_406 = arith.constant 1.000000e+00 : f32
    %862 = vector.broadcast %cst_406 : f32 to vector<2x16xf32>
    %863 = arith.divf %862, %861 : vector<2x16xf32>
    %864 = vector.extract_strided_slice %750 {offsets = [4, 0], sizes = [2, 16], strides = [1, 1]} : vector<16x16xf32> to vector<2x16xf32>
    %865 = arith.mulf %854, %845 : vector<2x16xf32>
    %866 = arith.addf %864, %865 : vector<2x16xf32>
    %cst_407 = arith.constant -2.000000e+00 : f32
    %867 = vector.broadcast %cst_407 : f32 to vector<2x16xf32>
    %868 = arith.mulf %867, %866 : vector<2x16xf32>
    %869 = math.exp %868 : vector<2x16xf32>
    %cst_408 = arith.constant 1.000000e+00 : f32
    %870 = vector.broadcast %cst_408 : f32 to vector<2x16xf32>
    %871 = arith.addf %870, %869 : vector<2x16xf32>
    %cst_409 = arith.constant 2.000000e+00 : f32
    %872 = vector.broadcast %cst_409 : f32 to vector<2x16xf32>
    %873 = arith.divf %872, %871 : vector<2x16xf32>
    %cst_410 = arith.constant 1.000000e+00 : f32
    %874 = vector.broadcast %cst_410 : f32 to vector<2x16xf32>
    %875 = arith.subf %873, %874 : vector<2x16xf32>
    %cst_411 = arith.constant 1.000000e+00 : f32
    %876 = vector.broadcast %cst_411 : f32 to vector<2x16xf32>
    %877 = arith.subf %876, %863 : vector<2x16xf32>
    %878 = arith.mulf %877, %875 : vector<2x16xf32>
    %879 = arith.mulf %863, %840 : vector<2x16xf32>
    %880 = arith.addf %878, %879 : vector<2x16xf32>
    %c4_412 = arith.constant 4 : index
    %c0_413 = arith.constant 0 : index
    %881 = vector.load %arg8[%c4_412, %c0_413] : memref<16x32xf32, #tpu.memory_space<vmem>>, vector<2x16xf32>
    tpu.vector_store %arg8[%c4_412, %c0_413], %880 {strides = array<i32>} : memref<16x32xf32, #tpu.memory_space<vmem>>, vector<2x16xf32>,
    %cst_414 = arith.constant dense<0.000000e+00> : vector<2x16xf32>
    %882 = tpu.matmul %880, %752, %cst_414 {dimension_numbers = #tpu.dot_dimension_numbers<[1], [0], [0], [1], [0, 0, 1, 1], [], []>} : vector<2x16xf32>, vector<16x16xf32>, vector<2x16xf32> -> vector<2x16xf32>
    %cst_415 = arith.constant dense<0.000000e+00> : vector<2x16xf32>
    %883 = tpu.matmul %880, %754, %cst_415 {dimension_numbers = #tpu.dot_dimension_numbers<[1], [0], [0], [1], [0, 0, 1, 1], [], []>} : vector<2x16xf32>, vector<16x16xf32>, vector<2x16xf32> -> vector<2x16xf32>
    %cst_416 = arith.constant dense<0.000000e+00> : vector<2x16xf32>
    %884 = tpu.matmul %880, %756, %cst_416 {dimension_numbers = #tpu.dot_dimension_numbers<[1], [0], [0], [1], [0, 0, 1, 1], [], []>} : vector<2x16xf32>, vector<16x16xf32>, vector<2x16xf32> -> vector<2x16xf32>
    %885 = arith.addf %884, %760 : vector<2x16xf32>
    %886 = vector.extract_strided_slice %732 {offsets = [6, 0], sizes = [2, 16], strides = [1, 1]} : vector<16x16xf32> to vector<2x16xf32>
    %887 = arith.addf %886, %882 : vector<2x16xf32>
    %cst_417 = arith.constant 0.000000e+00 : f32
    %888 = vector.broadcast %cst_417 : f32 to vector<2x16xf32>
    %889 = arith.subf %888, %887 : vector<2x16xf32>
    %890 = math.exp %889 : vector<2x16xf32>
    %cst_418 = arith.constant 1.000000e+00 : f32
    %891 = vector.broadcast %cst_418 : f32 to vector<2x16xf32>
    %892 = arith.addf %891, %890 : vector<2x16xf32>
    %cst_419 = arith.constant 1.000000e+00 : f32
    %893 = vector.broadcast %cst_419 : f32 to vector<2x16xf32>
    %894 = arith.divf %893, %892 : vector<2x16xf32>
    %895 = vector.extract_strided_slice %743 {offsets = [6, 0], sizes = [2, 16], strides = [1, 1]} : vector<16x16xf32> to vector<2x16xf32>
    %896 = arith.addf %895, %883 : vector<2x16xf32>
    %cst_420 = arith.constant 0.000000e+00 : f32
    %897 = vector.broadcast %cst_420 : f32 to vector<2x16xf32>
    %898 = arith.subf %897, %896 : vector<2x16xf32>
    %899 = math.exp %898 : vector<2x16xf32>
    %cst_421 = arith.constant 1.000000e+00 : f32
    %900 = vector.broadcast %cst_421 : f32 to vector<2x16xf32>
    %901 = arith.addf %900, %899 : vector<2x16xf32>
    %cst_422 = arith.constant 1.000000e+00 : f32
    %902 = vector.broadcast %cst_422 : f32 to vector<2x16xf32>
    %903 = arith.divf %902, %901 : vector<2x16xf32>
    %904 = vector.extract_strided_slice %750 {offsets = [6, 0], sizes = [2, 16], strides = [1, 1]} : vector<16x16xf32> to vector<2x16xf32>
    %905 = arith.mulf %894, %885 : vector<2x16xf32>
    %906 = arith.addf %904, %905 : vector<2x16xf32>
    %cst_423 = arith.constant -2.000000e+00 : f32
    %907 = vector.broadcast %cst_423 : f32 to vector<2x16xf32>
    %908 = arith.mulf %907, %906 : vector<2x16xf32>
    %909 = math.exp %908 : vector<2x16xf32>
    %cst_424 = arith.constant 1.000000e+00 : f32
    %910 = vector.broadcast %cst_424 : f32 to vector<2x16xf32>
    %911 = arith.addf %910, %909 : vector<2x16xf32>
    %cst_425 = arith.constant 2.000000e+00 : f32
    %912 = vector.broadcast %cst_425 : f32 to vector<2x16xf32>
    %913 = arith.divf %912, %911 : vector<2x16xf32>
    %cst_426 = arith.constant 1.000000e+00 : f32
    %914 = vector.broadcast %cst_426 : f32 to vector<2x16xf32>
    %915 = arith.subf %913, %914 : vector<2x16xf32>
    %cst_427 = arith.constant 1.000000e+00 : f32
    %916 = vector.broadcast %cst_427 : f32 to vector<2x16xf32>
    %917 = arith.subf %916, %903 : vector<2x16xf32>
    %918 = arith.mulf %917, %915 : vector<2x16xf32>
    %919 = arith.mulf %903, %880 : vector<2x16xf32>
    %920 = arith.addf %918, %919 : vector<2x16xf32>
    %c6_428 = arith.constant 6 : index
    %c0_429 = arith.constant 0 : index
    %921 = vector.load %arg8[%c6_428, %c0_429] : memref<16x32xf32, #tpu.memory_space<vmem>>, vector<2x16xf32>
    tpu.vector_store %arg8[%c6_428, %c0_429], %920 {strides = array<i32>} : memref<16x32xf32, #tpu.memory_space<vmem>>, vector<2x16xf32>,
    %cst_430 = arith.constant dense<0.000000e+00> : vector<2x16xf32>
    %922 = tpu.matmul %920, %752, %cst_430 {dimension_numbers = #tpu.dot_dimension_numbers<[1], [0], [0], [1], [0, 0, 1, 1], [], []>} : vector<2x16xf32>, vector<16x16xf32>, vector<2x16xf32> -> vector<2x16xf32>
    %cst_431 = arith.constant dense<0.000000e+00> : vector<2x16xf32>
    %923 = tpu.matmul %920, %754, %cst_431 {dimension_numbers = #tpu.dot_dimension_numbers<[1], [0], [0], [1], [0, 0, 1, 1], [], []>} : vector<2x16xf32>, vector<16x16xf32>, vector<2x16xf32> -> vector<2x16xf32>
    %cst_432 = arith.constant dense<0.000000e+00> : vector<2x16xf32>
    %924 = tpu.matmul %920, %756, %cst_432 {dimension_numbers = #tpu.dot_dimension_numbers<[1], [0], [0], [1], [0, 0, 1, 1], [], []>} : vector<2x16xf32>, vector<16x16xf32>, vector<2x16xf32> -> vector<2x16xf32>
    %925 = arith.addf %924, %760 : vector<2x16xf32>
    %926 = vector.extract_strided_slice %732 {offsets = [8, 0], sizes = [2, 16], strides = [1, 1]} : vector<16x16xf32> to vector<2x16xf32>
    %927 = arith.addf %926, %922 : vector<2x16xf32>
    %cst_433 = arith.constant 0.000000e+00 : f32
    %928 = vector.broadcast %cst_433 : f32 to vector<2x16xf32>
    %929 = arith.subf %928, %927 : vector<2x16xf32>
    %930 = math.exp %929 : vector<2x16xf32>
    %cst_434 = arith.constant 1.000000e+00 : f32
    %931 = vector.broadcast %cst_434 : f32 to vector<2x16xf32>
    %932 = arith.addf %931, %930 : vector<2x16xf32>
    %cst_435 = arith.constant 1.000000e+00 : f32
    %933 = vector.broadcast %cst_435 : f32 to vector<2x16xf32>
    %934 = arith.divf %933, %932 : vector<2x16xf32>
    %935 = vector.extract_strided_slice %743 {offsets = [8, 0], sizes = [2, 16], strides = [1, 1]} : vector<16x16xf32> to vector<2x16xf32>
    %936 = arith.addf %935, %923 : vector<2x16xf32>
    %cst_436 = arith.constant 0.000000e+00 : f32
    %937 = vector.broadcast %cst_436 : f32 to vector<2x16xf32>
    %938 = arith.subf %937, %936 : vector<2x16xf32>
    %939 = math.exp %938 : vector<2x16xf32>
    %cst_437 = arith.constant 1.000000e+00 : f32
    %940 = vector.broadcast %cst_437 : f32 to vector<2x16xf32>
    %941 = arith.addf %940, %939 : vector<2x16xf32>
    %cst_438 = arith.constant 1.000000e+00 : f32
    %942 = vector.broadcast %cst_438 : f32 to vector<2x16xf32>
    %943 = arith.divf %942, %941 : vector<2x16xf32>
    %944 = vector.extract_strided_slice %750 {offsets = [8, 0], sizes = [2, 16], strides = [1, 1]} : vector<16x16xf32> to vector<2x16xf32>
    %945 = arith.mulf %934, %925 : vector<2x16xf32>
    %946 = arith.addf %944, %945 : vector<2x16xf32>
    %cst_439 = arith.constant -2.000000e+00 : f32
    %947 = vector.broadcast %cst_439 : f32 to vector<2x16xf32>
    %948 = arith.mulf %947, %946 : vector<2x16xf32>
    %949 = math.exp %948 : vector<2x16xf32>
    %cst_440 = arith.constant 1.000000e+00 : f32
    %950 = vector.broadcast %cst_440 : f32 to vector<2x16xf32>
    %951 = arith.addf %950, %949 : vector<2x16xf32>
    %cst_441 = arith.constant 2.000000e+00 : f32
    %952 = vector.broadcast %cst_441 : f32 to vector<2x16xf32>
    %953 = arith.divf %952, %951 : vector<2x16xf32>
    %cst_442 = arith.constant 1.000000e+00 : f32
    %954 = vector.broadcast %cst_442 : f32 to vector<2x16xf32>
    %955 = arith.subf %953, %954 : vector<2x16xf32>
    %cst_443 = arith.constant 1.000000e+00 : f32
    %956 = vector.broadcast %cst_443 : f32 to vector<2x16xf32>
    %957 = arith.subf %956, %943 : vector<2x16xf32>
    %958 = arith.mulf %957, %955 : vector<2x16xf32>
    %959 = arith.mulf %943, %920 : vector<2x16xf32>
    %960 = arith.addf %958, %959 : vector<2x16xf32>
    %c8_444 = arith.constant 8 : index
    %c0_445 = arith.constant 0 : index
    %961 = vector.load %arg8[%c8_444, %c0_445] : memref<16x32xf32, #tpu.memory_space<vmem>>, vector<2x16xf32>
    tpu.vector_store %arg8[%c8_444, %c0_445], %960 {strides = array<i32>} : memref<16x32xf32, #tpu.memory_space<vmem>>, vector<2x16xf32>,
    %cst_446 = arith.constant dense<0.000000e+00> : vector<2x16xf32>
    %962 = tpu.matmul %960, %752, %cst_446 {dimension_numbers = #tpu.dot_dimension_numbers<[1], [0], [0], [1], [0, 0, 1, 1], [], []>} : vector<2x16xf32>, vector<16x16xf32>, vector<2x16xf32> -> vector<2x16xf32>
    %cst_447 = arith.constant dense<0.000000e+00> : vector<2x16xf32>
    %963 = tpu.matmul %960, %754, %cst_447 {dimension_numbers = #tpu.dot_dimension_numbers<[1], [0], [0], [1], [0, 0, 1, 1], [], []>} : vector<2x16xf32>, vector<16x16xf32>, vector<2x16xf32> -> vector<2x16xf32>
    %cst_448 = arith.constant dense<0.000000e+00> : vector<2x16xf32>
    %964 = tpu.matmul %960, %756, %cst_448 {dimension_numbers = #tpu.dot_dimension_numbers<[1], [0], [0], [1], [0, 0, 1, 1], [], []>} : vector<2x16xf32>, vector<16x16xf32>, vector<2x16xf32> -> vector<2x16xf32>
    %965 = arith.addf %964, %760 : vector<2x16xf32>
    %966 = vector.extract_strided_slice %732 {offsets = [10, 0], sizes = [2, 16], strides = [1, 1]} : vector<16x16xf32> to vector<2x16xf32>
    %967 = arith.addf %966, %962 : vector<2x16xf32>
    %cst_449 = arith.constant 0.000000e+00 : f32
    %968 = vector.broadcast %cst_449 : f32 to vector<2x16xf32>
    %969 = arith.subf %968, %967 : vector<2x16xf32>
    %970 = math.exp %969 : vector<2x16xf32>
    %cst_450 = arith.constant 1.000000e+00 : f32
    %971 = vector.broadcast %cst_450 : f32 to vector<2x16xf32>
    %972 = arith.addf %971, %970 : vector<2x16xf32>
    %cst_451 = arith.constant 1.000000e+00 : f32
    %973 = vector.broadcast %cst_451 : f32 to vector<2x16xf32>
    %974 = arith.divf %973, %972 : vector<2x16xf32>
    %975 = vector.extract_strided_slice %743 {offsets = [10, 0], sizes = [2, 16], strides = [1, 1]} : vector<16x16xf32> to vector<2x16xf32>
    %976 = arith.addf %975, %963 : vector<2x16xf32>
    %cst_452 = arith.constant 0.000000e+00 : f32
    %977 = vector.broadcast %cst_452 : f32 to vector<2x16xf32>
    %978 = arith.subf %977, %976 : vector<2x16xf32>
    %979 = math.exp %978 : vector<2x16xf32>
    %cst_453 = arith.constant 1.000000e+00 : f32
    %980 = vector.broadcast %cst_453 : f32 to vector<2x16xf32>
    %981 = arith.addf %980, %979 : vector<2x16xf32>
    %cst_454 = arith.constant 1.000000e+00 : f32
    %982 = vector.broadcast %cst_454 : f32 to vector<2x16xf32>
    %983 = arith.divf %982, %981 : vector<2x16xf32>
    %984 = vector.extract_strided_slice %750 {offsets = [10, 0], sizes = [2, 16], strides = [1, 1]} : vector<16x16xf32> to vector<2x16xf32>
    %985 = arith.mulf %974, %965 : vector<2x16xf32>
    %986 = arith.addf %984, %985 : vector<2x16xf32>
    %cst_455 = arith.constant -2.000000e+00 : f32
    %987 = vector.broadcast %cst_455 : f32 to vector<2x16xf32>
    %988 = arith.mulf %987, %986 : vector<2x16xf32>
    %989 = math.exp %988 : vector<2x16xf32>
    %cst_456 = arith.constant 1.000000e+00 : f32
    %990 = vector.broadcast %cst_456 : f32 to vector<2x16xf32>
    %991 = arith.addf %990, %989 : vector<2x16xf32>
    %cst_457 = arith.constant 2.000000e+00 : f32
    %992 = vector.broadcast %cst_457 : f32 to vector<2x16xf32>
    %993 = arith.divf %992, %991 : vector<2x16xf32>
    %cst_458 = arith.constant 1.000000e+00 : f32
    %994 = vector.broadcast %cst_458 : f32 to vector<2x16xf32>
    %995 = arith.subf %993, %994 : vector<2x16xf32>
    %cst_459 = arith.constant 1.000000e+00 : f32
    %996 = vector.broadcast %cst_459 : f32 to vector<2x16xf32>
    %997 = arith.subf %996, %983 : vector<2x16xf32>
    %998 = arith.mulf %997, %995 : vector<2x16xf32>
    %999 = arith.mulf %983, %960 : vector<2x16xf32>
    %1000 = arith.addf %998, %999 : vector<2x16xf32>
    %c10_460 = arith.constant 10 : index
    %c0_461 = arith.constant 0 : index
    %1001 = vector.load %arg8[%c10_460, %c0_461] : memref<16x32xf32, #tpu.memory_space<vmem>>, vector<2x16xf32>
    tpu.vector_store %arg8[%c10_460, %c0_461], %1000 {strides = array<i32>} : memref<16x32xf32, #tpu.memory_space<vmem>>, vector<2x16xf32>,
    %cst_462 = arith.constant dense<0.000000e+00> : vector<2x16xf32>
    %1002 = tpu.matmul %1000, %752, %cst_462 {dimension_numbers = #tpu.dot_dimension_numbers<[1], [0], [0], [1], [0, 0, 1, 1], [], []>} : vector<2x16xf32>, vector<16x16xf32>, vector<2x16xf32> -> vector<2x16xf32>
    %cst_463 = arith.constant dense<0.000000e+00> : vector<2x16xf32>
    %1003 = tpu.matmul %1000, %754, %cst_463 {dimension_numbers = #tpu.dot_dimension_numbers<[1], [0], [0], [1], [0, 0, 1, 1], [], []>} : vector<2x16xf32>, vector<16x16xf32>, vector<2x16xf32> -> vector<2x16xf32>
    %cst_464 = arith.constant dense<0.000000e+00> : vector<2x16xf32>
    %1004 = tpu.matmul %1000, %756, %cst_464 {dimension_numbers = #tpu.dot_dimension_numbers<[1], [0], [0], [1], [0, 0, 1, 1], [], []>} : vector<2x16xf32>, vector<16x16xf32>, vector<2x16xf32> -> vector<2x16xf32>
    %1005 = arith.addf %1004, %760 : vector<2x16xf32>
    %1006 = vector.extract_strided_slice %732 {offsets = [12, 0], sizes = [2, 16], strides = [1, 1]} : vector<16x16xf32> to vector<2x16xf32>
    %1007 = arith.addf %1006, %1002 : vector<2x16xf32>
    %cst_465 = arith.constant 0.000000e+00 : f32
    %1008 = vector.broadcast %cst_465 : f32 to vector<2x16xf32>
    %1009 = arith.subf %1008, %1007 : vector<2x16xf32>
    %1010 = math.exp %1009 : vector<2x16xf32>
    %cst_466 = arith.constant 1.000000e+00 : f32
    %1011 = vector.broadcast %cst_466 : f32 to vector<2x16xf32>
    %1012 = arith.addf %1011, %1010 : vector<2x16xf32>
    %cst_467 = arith.constant 1.000000e+00 : f32
    %1013 = vector.broadcast %cst_467 : f32 to vector<2x16xf32>
    %1014 = arith.divf %1013, %1012 : vector<2x16xf32>
    %1015 = vector.extract_strided_slice %743 {offsets = [12, 0], sizes = [2, 16], strides = [1, 1]} : vector<16x16xf32> to vector<2x16xf32>
    %1016 = arith.addf %1015, %1003 : vector<2x16xf32>
    %cst_468 = arith.constant 0.000000e+00 : f32
    %1017 = vector.broadcast %cst_468 : f32 to vector<2x16xf32>
    %1018 = arith.subf %1017, %1016 : vector<2x16xf32>
    %1019 = math.exp %1018 : vector<2x16xf32>
    %cst_469 = arith.constant 1.000000e+00 : f32
    %1020 = vector.broadcast %cst_469 : f32 to vector<2x16xf32>
    %1021 = arith.addf %1020, %1019 : vector<2x16xf32>
    %cst_470 = arith.constant 1.000000e+00 : f32
    %1022 = vector.broadcast %cst_470 : f32 to vector<2x16xf32>
    %1023 = arith.divf %1022, %1021 : vector<2x16xf32>
    %1024 = vector.extract_strided_slice %750 {offsets = [12, 0], sizes = [2, 16], strides = [1, 1]} : vector<16x16xf32> to vector<2x16xf32>
    %1025 = arith.mulf %1014, %1005 : vector<2x16xf32>
    %1026 = arith.addf %1024, %1025 : vector<2x16xf32>
    %cst_471 = arith.constant -2.000000e+00 : f32
    %1027 = vector.broadcast %cst_471 : f32 to vector<2x16xf32>
    %1028 = arith.mulf %1027, %1026 : vector<2x16xf32>
    %1029 = math.exp %1028 : vector<2x16xf32>
    %cst_472 = arith.constant 1.000000e+00 : f32
    %1030 = vector.broadcast %cst_472 : f32 to vector<2x16xf32>
    %1031 = arith.addf %1030, %1029 : vector<2x16xf32>
    %cst_473 = arith.constant 2.000000e+00 : f32
    %1032 = vector.broadcast %cst_473 : f32 to vector<2x16xf32>
    %1033 = arith.divf %1032, %1031 : vector<2x16xf32>
    %cst_474 = arith.constant 1.000000e+00 : f32
    %1034 = vector.broadcast %cst_474 : f32 to vector<2x16xf32>
    %1035 = arith.subf %1033, %1034 : vector<2x16xf32>
    %cst_475 = arith.constant 1.000000e+00 : f32
    %1036 = vector.broadcast %cst_475 : f32 to vector<2x16xf32>
    %1037 = arith.subf %1036, %1023 : vector<2x16xf32>
    %1038 = arith.mulf %1037, %1035 : vector<2x16xf32>
    %1039 = arith.mulf %1023, %1000 : vector<2x16xf32>
    %1040 = arith.addf %1038, %1039 : vector<2x16xf32>
    %c12_476 = arith.constant 12 : index
    %c0_477 = arith.constant 0 : index
    %1041 = vector.load %arg8[%c12_476, %c0_477] : memref<16x32xf32, #tpu.memory_space<vmem>>, vector<2x16xf32>
    tpu.vector_store %arg8[%c12_476, %c0_477], %1040 {strides = array<i32>} : memref<16x32xf32, #tpu.memory_space<vmem>>, vector<2x16xf32>,
    %cst_478 = arith.constant dense<0.000000e+00> : vector<2x16xf32>
    %1042 = tpu.matmul %1040, %752, %cst_478 {dimension_numbers = #tpu.dot_dimension_numbers<[1], [0], [0], [1], [0, 0, 1, 1], [], []>} : vector<2x16xf32>, vector<16x16xf32>, vector<2x16xf32> -> vector<2x16xf32>
    %cst_479 = arith.constant dense<0.000000e+00> : vector<2x16xf32>
    %1043 = tpu.matmul %1040, %754, %cst_479 {dimension_numbers = #tpu.dot_dimension_numbers<[1], [0], [0], [1], [0, 0, 1, 1], [], []>} : vector<2x16xf32>, vector<16x16xf32>, vector<2x16xf32> -> vector<2x16xf32>
    %cst_480 = arith.constant dense<0.000000e+00> : vector<2x16xf32>
    %1044 = tpu.matmul %1040, %756, %cst_480 {dimension_numbers = #tpu.dot_dimension_numbers<[1], [0], [0], [1], [0, 0, 1, 1], [], []>} : vector<2x16xf32>, vector<16x16xf32>, vector<2x16xf32> -> vector<2x16xf32>
    %1045 = arith.addf %1044, %760 : vector<2x16xf32>
    %1046 = vector.extract_strided_slice %732 {offsets = [14, 0], sizes = [2, 16], strides = [1, 1]} : vector<16x16xf32> to vector<2x16xf32>
    %1047 = arith.addf %1046, %1042 : vector<2x16xf32>
    %cst_481 = arith.constant 0.000000e+00 : f32
    %1048 = vector.broadcast %cst_481 : f32 to vector<2x16xf32>
    %1049 = arith.subf %1048, %1047 : vector<2x16xf32>
    %1050 = math.exp %1049 : vector<2x16xf32>
    %cst_482 = arith.constant 1.000000e+00 : f32
    %1051 = vector.broadcast %cst_482 : f32 to vector<2x16xf32>
    %1052 = arith.addf %1051, %1050 : vector<2x16xf32>
    %cst_483 = arith.constant 1.000000e+00 : f32
    %1053 = vector.broadcast %cst_483 : f32 to vector<2x16xf32>
    %1054 = arith.divf %1053, %1052 : vector<2x16xf32>
    %1055 = vector.extract_strided_slice %743 {offsets = [14, 0], sizes = [2, 16], strides = [1, 1]} : vector<16x16xf32> to vector<2x16xf32>
    %1056 = arith.addf %1055, %1043 : vector<2x16xf32>
    %cst_484 = arith.constant 0.000000e+00 : f32
    %1057 = vector.broadcast %cst_484 : f32 to vector<2x16xf32>
    %1058 = arith.subf %1057, %1056 : vector<2x16xf32>
    %1059 = math.exp %1058 : vector<2x16xf32>
    %cst_485 = arith.constant 1.000000e+00 : f32
    %1060 = vector.broadcast %cst_485 : f32 to vector<2x16xf32>
    %1061 = arith.addf %1060, %1059 : vector<2x16xf32>
    %cst_486 = arith.constant 1.000000e+00 : f32
    %1062 = vector.broadcast %cst_486 : f32 to vector<2x16xf32>
    %1063 = arith.divf %1062, %1061 : vector<2x16xf32>
    %1064 = vector.extract_strided_slice %750 {offsets = [14, 0], sizes = [2, 16], strides = [1, 1]} : vector<16x16xf32> to vector<2x16xf32>
    %1065 = arith.mulf %1054, %1045 : vector<2x16xf32>
    %1066 = arith.addf %1064, %1065 : vector<2x16xf32>
    %cst_487 = arith.constant -2.000000e+00 : f32
    %1067 = vector.broadcast %cst_487 : f32 to vector<2x16xf32>
    %1068 = arith.mulf %1067, %1066 : vector<2x16xf32>
    %1069 = math.exp %1068 : vector<2x16xf32>
    %cst_488 = arith.constant 1.000000e+00 : f32
    %1070 = vector.broadcast %cst_488 : f32 to vector<2x16xf32>
    %1071 = arith.addf %1070, %1069 : vector<2x16xf32>
    %cst_489 = arith.constant 2.000000e+00 : f32
    %1072 = vector.broadcast %cst_489 : f32 to vector<2x16xf32>
    %1073 = arith.divf %1072, %1071 : vector<2x16xf32>
    %cst_490 = arith.constant 1.000000e+00 : f32
    %1074 = vector.broadcast %cst_490 : f32 to vector<2x16xf32>
    %1075 = arith.subf %1073, %1074 : vector<2x16xf32>
    %cst_491 = arith.constant 1.000000e+00 : f32
    %1076 = vector.broadcast %cst_491 : f32 to vector<2x16xf32>
    %1077 = arith.subf %1076, %1063 : vector<2x16xf32>
    %1078 = arith.mulf %1077, %1075 : vector<2x16xf32>
    %1079 = arith.mulf %1063, %1040 : vector<2x16xf32>
    %1080 = arith.addf %1078, %1079 : vector<2x16xf32>
    %c14_492 = arith.constant 14 : index
    %c0_493 = arith.constant 0 : index
    %1081 = vector.load %arg8[%c14_492, %c0_493] : memref<16x32xf32, #tpu.memory_space<vmem>>, vector<2x16xf32>
    tpu.vector_store %arg8[%c14_492, %c0_493], %1080 {strides = array<i32>} : memref<16x32xf32, #tpu.memory_space<vmem>>, vector<2x16xf32>,
    %c9 = arith.constant 9 : index
    %c0_494 = arith.constant 0 : index
    %c0_495 = arith.constant 0 : index
    %1082 = vector.load %arg1[%c9, %c0_494, %c0_495] : memref<12x32x16xf32, #tpu.memory_space<vmem>>, vector<1x32x16xf32>
    %1083 = vector.shape_cast %1082 : vector<1x32x16xf32> to vector<32x16xf32>
    %cst_496 = arith.constant dense<0.000000e+00> : vector<16x16xf32>
    %1084 = tpu.matmul %721, %1083, %cst_496 {dimension_numbers = #tpu.dot_dimension_numbers<[1], [0], [0], [1], [0, 0, 1, 1], [], []>} : vector<16x32xf32>, vector<32x16xf32>, vector<16x16xf32> -> vector<16x16xf32>
    %c9_497 = arith.constant 9 : index
    %c0_498 = arith.constant 0 : index
    %c0_499 = arith.constant 0 : index
    %1085 = vector.load %arg2[%c9_497, %c0_498, %c0_499] : memref<12x1x16xf32, #tpu.memory_space<vmem>>, vector<1x1x16xf32>
    %1086 = vector.shape_cast %1085 : vector<1x1x16xf32> to vector<1x16xf32>
    %1087 = vector.broadcast %1086 : vector<1x16xf32> to vector<16x16xf32>
    %1088 = arith.addf %1084, %1087 : vector<16x16xf32>
    %c9_500 = arith.constant 9 : index
    %c0_501 = arith.constant 0 : index
    %c0_502 = arith.constant 0 : index
    %1089 = vector.load %arg4[%c9_500, %c0_501, %c0_502] : memref<12x1x16xf32, #tpu.memory_space<vmem>>, vector<1x1x16xf32>
    %1090 = vector.shape_cast %1089 : vector<1x1x16xf32> to vector<1x16xf32>
    %1091 = vector.broadcast %1090 : vector<1x16xf32> to vector<16x16xf32>
    %1092 = arith.addf %1088, %1091 : vector<16x16xf32>
    %c10_503 = arith.constant 10 : index
    %c0_504 = arith.constant 0 : index
    %c0_505 = arith.constant 0 : index
    %1093 = vector.load %arg1[%c10_503, %c0_504, %c0_505] : memref<12x32x16xf32, #tpu.memory_space<vmem>>, vector<1x32x16xf32>
    %1094 = vector.shape_cast %1093 : vector<1x32x16xf32> to vector<32x16xf32>
    %cst_506 = arith.constant dense<0.000000e+00> : vector<16x16xf32>
    %1095 = tpu.matmul %721, %1094, %cst_506 {dimension_numbers = #tpu.dot_dimension_numbers<[1], [0], [0], [1], [0, 0, 1, 1], [], []>} : vector<16x32xf32>, vector<32x16xf32>, vector<16x16xf32> -> vector<16x16xf32>
    %c10_507 = arith.constant 10 : index
    %c0_508 = arith.constant 0 : index
    %c0_509 = arith.constant 0 : index
    %1096 = vector.load %arg2[%c10_507, %c0_508, %c0_509] : memref<12x1x16xf32, #tpu.memory_space<vmem>>, vector<1x1x16xf32>
    %1097 = vector.shape_cast %1096 : vector<1x1x16xf32> to vector<1x16xf32>
    %1098 = vector.broadcast %1097 : vector<1x16xf32> to vector<16x16xf32>
    %1099 = arith.addf %1095, %1098 : vector<16x16xf32>
    %c10_510 = arith.constant 10 : index
    %c0_511 = arith.constant 0 : index
    %c0_512 = arith.constant 0 : index
    %1100 = vector.load %arg4[%c10_510, %c0_511, %c0_512] : memref<12x1x16xf32, #tpu.memory_space<vmem>>, vector<1x1x16xf32>
    %1101 = vector.shape_cast %1100 : vector<1x1x16xf32> to vector<1x16xf32>
    %1102 = vector.broadcast %1101 : vector<1x16xf32> to vector<16x16xf32>
    %1103 = arith.addf %1099, %1102 : vector<16x16xf32>
    %c11 = arith.constant 11 : index
    %c0_513 = arith.constant 0 : index
    %c0_514 = arith.constant 0 : index
    %1104 = vector.load %arg1[%c11, %c0_513, %c0_514] : memref<12x32x16xf32, #tpu.memory_space<vmem>>, vector<1x32x16xf32>
    %1105 = vector.shape_cast %1104 : vector<1x32x16xf32> to vector<32x16xf32>
    %cst_515 = arith.constant dense<0.000000e+00> : vector<16x16xf32>
    %1106 = tpu.matmul %721, %1105, %cst_515 {dimension_numbers = #tpu.dot_dimension_numbers<[1], [0], [0], [1], [0, 0, 1, 1], [], []>} : vector<16x32xf32>, vector<32x16xf32>, vector<16x16xf32> -> vector<16x16xf32>
    %c11_516 = arith.constant 11 : index
    %c0_517 = arith.constant 0 : index
    %c0_518 = arith.constant 0 : index
    %1107 = vector.load %arg2[%c11_516, %c0_517, %c0_518] : memref<12x1x16xf32, #tpu.memory_space<vmem>>, vector<1x1x16xf32>
    %1108 = vector.shape_cast %1107 : vector<1x1x16xf32> to vector<1x16xf32>
    %1109 = vector.broadcast %1108 : vector<1x16xf32> to vector<16x16xf32>
    %1110 = arith.addf %1106, %1109 : vector<16x16xf32>
    %c9_519 = arith.constant 9 : index
    %c0_520 = arith.constant 0 : index
    %c0_521 = arith.constant 0 : index
    %1111 = vector.load %arg3[%c9_519, %c0_520, %c0_521] : memref<12x16x16xf32, #tpu.memory_space<vmem>>, vector<1x16x16xf32>
    %1112 = vector.shape_cast %1111 : vector<1x16x16xf32> to vector<16x16xf32>
    %c10_522 = arith.constant 10 : index
    %c0_523 = arith.constant 0 : index
    %c0_524 = arith.constant 0 : index
    %1113 = vector.load %arg3[%c10_522, %c0_523, %c0_524] : memref<12x16x16xf32, #tpu.memory_space<vmem>>, vector<1x16x16xf32>
    %1114 = vector.shape_cast %1113 : vector<1x16x16xf32> to vector<16x16xf32>
    %c11_525 = arith.constant 11 : index
    %c0_526 = arith.constant 0 : index
    %c0_527 = arith.constant 0 : index
    %1115 = vector.load %arg3[%c11_525, %c0_526, %c0_527] : memref<12x16x16xf32, #tpu.memory_space<vmem>>, vector<1x16x16xf32>
    %1116 = vector.shape_cast %1115 : vector<1x16x16xf32> to vector<16x16xf32>
    %c11_528 = arith.constant 11 : index
    %c0_529 = arith.constant 0 : index
    %c0_530 = arith.constant 0 : index
    %1117 = vector.load %arg4[%c11_528, %c0_529, %c0_530] : memref<12x1x16xf32, #tpu.memory_space<vmem>>, vector<1x1x16xf32>
    %1118 = vector.shape_cast %1117 : vector<1x1x16xf32> to vector<1x16xf32>
    %1119 = vector.shape_cast %1118 : vector<1x16xf32> to vector<1x16xf32>
    %1120 = vector.broadcast %1119 : vector<1x16xf32> to vector<2x16xf32>
    %cst_531 = arith.constant 0.000000e+00 : f32
    %1121 = vector.broadcast %cst_531 : f32 to vector<2x16xf32>
    %cst_532 = arith.constant dense<0.000000e+00> : vector<2x16xf32>
    %1122 = tpu.matmul %1121, %1112, %cst_532 {dimension_numbers = #tpu.dot_dimension_numbers<[1], [0], [0], [1], [0, 0, 1, 1], [], []>} : vector<2x16xf32>, vector<16x16xf32>, vector<2x16xf32> -> vector<2x16xf32>
    %cst_533 = arith.constant dense<0.000000e+00> : vector<2x16xf32>
    %1123 = tpu.matmul %1121, %1114, %cst_533 {dimension_numbers = #tpu.dot_dimension_numbers<[1], [0], [0], [1], [0, 0, 1, 1], [], []>} : vector<2x16xf32>, vector<16x16xf32>, vector<2x16xf32> -> vector<2x16xf32>
    %cst_534 = arith.constant dense<0.000000e+00> : vector<2x16xf32>
    %1124 = tpu.matmul %1121, %1116, %cst_534 {dimension_numbers = #tpu.dot_dimension_numbers<[1], [0], [0], [1], [0, 0, 1, 1], [], []>} : vector<2x16xf32>, vector<16x16xf32>, vector<2x16xf32> -> vector<2x16xf32>
    %1125 = arith.addf %1124, %1120 : vector<2x16xf32>
    %1126 = vector.extract_strided_slice %1092 {offsets = [14, 0], sizes = [2, 16], strides = [1, 1]} : vector<16x16xf32> to vector<2x16xf32>
    %1127 = arith.addf %1126, %1122 : vector<2x16xf32>
    %cst_535 = arith.constant 0.000000e+00 : f32
    %1128 = vector.broadcast %cst_535 : f32 to vector<2x16xf32>
    %1129 = arith.subf %1128, %1127 : vector<2x16xf32>
    %1130 = math.exp %1129 : vector<2x16xf32>
    %cst_536 = arith.constant 1.000000e+00 : f32
    %1131 = vector.broadcast %cst_536 : f32 to vector<2x16xf32>
    %1132 = arith.addf %1131, %1130 : vector<2x16xf32>
    %cst_537 = arith.constant 1.000000e+00 : f32
    %1133 = vector.broadcast %cst_537 : f32 to vector<2x16xf32>
    %1134 = arith.divf %1133, %1132 : vector<2x16xf32>
    %1135 = vector.extract_strided_slice %1103 {offsets = [14, 0], sizes = [2, 16], strides = [1, 1]} : vector<16x16xf32> to vector<2x16xf32>
    %1136 = arith.addf %1135, %1123 : vector<2x16xf32>
    %cst_538 = arith.constant 0.000000e+00 : f32
    %1137 = vector.broadcast %cst_538 : f32 to vector<2x16xf32>
    %1138 = arith.subf %1137, %1136 : vector<2x16xf32>
    %1139 = math.exp %1138 : vector<2x16xf32>
    %cst_539 = arith.constant 1.000000e+00 : f32
    %1140 = vector.broadcast %cst_539 : f32 to vector<2x16xf32>
    %1141 = arith.addf %1140, %1139 : vector<2x16xf32>
    %cst_540 = arith.constant 1.000000e+00 : f32
    %1142 = vector.broadcast %cst_540 : f32 to vector<2x16xf32>
    %1143 = arith.divf %1142, %1141 : vector<2x16xf32>
    %1144 = vector.extract_strided_slice %1110 {offsets = [14, 0], sizes = [2, 16], strides = [1, 1]} : vector<16x16xf32> to vector<2x16xf32>
    %1145 = arith.mulf %1134, %1125 : vector<2x16xf32>
    %1146 = arith.addf %1144, %1145 : vector<2x16xf32>
    %cst_541 = arith.constant -2.000000e+00 : f32
    %1147 = vector.broadcast %cst_541 : f32 to vector<2x16xf32>
    %1148 = arith.mulf %1147, %1146 : vector<2x16xf32>
    %1149 = math.exp %1148 : vector<2x16xf32>
    %cst_542 = arith.constant 1.000000e+00 : f32
    %1150 = vector.broadcast %cst_542 : f32 to vector<2x16xf32>
    %1151 = arith.addf %1150, %1149 : vector<2x16xf32>
    %cst_543 = arith.constant 2.000000e+00 : f32
    %1152 = vector.broadcast %cst_543 : f32 to vector<2x16xf32>
    %1153 = arith.divf %1152, %1151 : vector<2x16xf32>
    %cst_544 = arith.constant 1.000000e+00 : f32
    %1154 = vector.broadcast %cst_544 : f32 to vector<2x16xf32>
    %1155 = arith.subf %1153, %1154 : vector<2x16xf32>
    %cst_545 = arith.constant 1.000000e+00 : f32
    %1156 = vector.broadcast %cst_545 : f32 to vector<2x16xf32>
    %1157 = arith.subf %1156, %1143 : vector<2x16xf32>
    %1158 = arith.mulf %1157, %1155 : vector<2x16xf32>
    %1159 = arith.mulf %1143, %1121 : vector<2x16xf32>
    %1160 = arith.addf %1158, %1159 : vector<2x16xf32>
    %c14_546 = arith.constant 14 : index
    %c16_547 = arith.constant 16 : index
    %1161 = vector.load %arg8[%c14_546, %c16_547] : memref<16x32xf32, #tpu.memory_space<vmem>>, vector<2x16xf32>
    tpu.vector_store %arg8[%c14_546, %c16_547], %1160 {strides = array<i32>} : memref<16x32xf32, #tpu.memory_space<vmem>>, vector<2x16xf32>,
    %cst_548 = arith.constant dense<0.000000e+00> : vector<2x16xf32>
    %1162 = tpu.matmul %1160, %1112, %cst_548 {dimension_numbers = #tpu.dot_dimension_numbers<[1], [0], [0], [1], [0, 0, 1, 1], [], []>} : vector<2x16xf32>, vector<16x16xf32>, vector<2x16xf32> -> vector<2x16xf32>
    %cst_549 = arith.constant dense<0.000000e+00> : vector<2x16xf32>
    %1163 = tpu.matmul %1160, %1114, %cst_549 {dimension_numbers = #tpu.dot_dimension_numbers<[1], [0], [0], [1], [0, 0, 1, 1], [], []>} : vector<2x16xf32>, vector<16x16xf32>, vector<2x16xf32> -> vector<2x16xf32>
    %cst_550 = arith.constant dense<0.000000e+00> : vector<2x16xf32>
    %1164 = tpu.matmul %1160, %1116, %cst_550 {dimension_numbers = #tpu.dot_dimension_numbers<[1], [0], [0], [1], [0, 0, 1, 1], [], []>} : vector<2x16xf32>, vector<16x16xf32>, vector<2x16xf32> -> vector<2x16xf32>
    %1165 = arith.addf %1164, %1120 : vector<2x16xf32>
    %1166 = vector.extract_strided_slice %1092 {offsets = [12, 0], sizes = [2, 16], strides = [1, 1]} : vector<16x16xf32> to vector<2x16xf32>
    %1167 = arith.addf %1166, %1162 : vector<2x16xf32>
    %cst_551 = arith.constant 0.000000e+00 : f32
    %1168 = vector.broadcast %cst_551 : f32 to vector<2x16xf32>
    %1169 = arith.subf %1168, %1167 : vector<2x16xf32>
    %1170 = math.exp %1169 : vector<2x16xf32>
    %cst_552 = arith.constant 1.000000e+00 : f32
    %1171 = vector.broadcast %cst_552 : f32 to vector<2x16xf32>
    %1172 = arith.addf %1171, %1170 : vector<2x16xf32>
    %cst_553 = arith.constant 1.000000e+00 : f32
    %1173 = vector.broadcast %cst_553 : f32 to vector<2x16xf32>
    %1174 = arith.divf %1173, %1172 : vector<2x16xf32>
    %1175 = vector.extract_strided_slice %1103 {offsets = [12, 0], sizes = [2, 16], strides = [1, 1]} : vector<16x16xf32> to vector<2x16xf32>
    %1176 = arith.addf %1175, %1163 : vector<2x16xf32>
    %cst_554 = arith.constant 0.000000e+00 : f32
    %1177 = vector.broadcast %cst_554 : f32 to vector<2x16xf32>
    %1178 = arith.subf %1177, %1176 : vector<2x16xf32>
    %1179 = math.exp %1178 : vector<2x16xf32>
    %cst_555 = arith.constant 1.000000e+00 : f32
    %1180 = vector.broadcast %cst_555 : f32 to vector<2x16xf32>
    %1181 = arith.addf %1180, %1179 : vector<2x16xf32>
    %cst_556 = arith.constant 1.000000e+00 : f32
    %1182 = vector.broadcast %cst_556 : f32 to vector<2x16xf32>
    %1183 = arith.divf %1182, %1181 : vector<2x16xf32>
    %1184 = vector.extract_strided_slice %1110 {offsets = [12, 0], sizes = [2, 16], strides = [1, 1]} : vector<16x16xf32> to vector<2x16xf32>
    %1185 = arith.mulf %1174, %1165 : vector<2x16xf32>
    %1186 = arith.addf %1184, %1185 : vector<2x16xf32>
    %cst_557 = arith.constant -2.000000e+00 : f32
    %1187 = vector.broadcast %cst_557 : f32 to vector<2x16xf32>
    %1188 = arith.mulf %1187, %1186 : vector<2x16xf32>
    %1189 = math.exp %1188 : vector<2x16xf32>
    %cst_558 = arith.constant 1.000000e+00 : f32
    %1190 = vector.broadcast %cst_558 : f32 to vector<2x16xf32>
    %1191 = arith.addf %1190, %1189 : vector<2x16xf32>
    %cst_559 = arith.constant 2.000000e+00 : f32
    %1192 = vector.broadcast %cst_559 : f32 to vector<2x16xf32>
    %1193 = arith.divf %1192, %1191 : vector<2x16xf32>
    %cst_560 = arith.constant 1.000000e+00 : f32
    %1194 = vector.broadcast %cst_560 : f32 to vector<2x16xf32>
    %1195 = arith.subf %1193, %1194 : vector<2x16xf32>
    %cst_561 = arith.constant 1.000000e+00 : f32
    %1196 = vector.broadcast %cst_561 : f32 to vector<2x16xf32>
    %1197 = arith.subf %1196, %1183 : vector<2x16xf32>
    %1198 = arith.mulf %1197, %1195 : vector<2x16xf32>
    %1199 = arith.mulf %1183, %1160 : vector<2x16xf32>
    %1200 = arith.addf %1198, %1199 : vector<2x16xf32>
    %c12_562 = arith.constant 12 : index
    %c16_563 = arith.constant 16 : index
    %1201 = vector.load %arg8[%c12_562, %c16_563] : memref<16x32xf32, #tpu.memory_space<vmem>>, vector<2x16xf32>
    tpu.vector_store %arg8[%c12_562, %c16_563], %1200 {strides = array<i32>} : memref<16x32xf32, #tpu.memory_space<vmem>>, vector<2x16xf32>,
    %cst_564 = arith.constant dense<0.000000e+00> : vector<2x16xf32>
    %1202 = tpu.matmul %1200, %1112, %cst_564 {dimension_numbers = #tpu.dot_dimension_numbers<[1], [0], [0], [1], [0, 0, 1, 1], [], []>} : vector<2x16xf32>, vector<16x16xf32>, vector<2x16xf32> -> vector<2x16xf32>
    %cst_565 = arith.constant dense<0.000000e+00> : vector<2x16xf32>
    %1203 = tpu.matmul %1200, %1114, %cst_565 {dimension_numbers = #tpu.dot_dimension_numbers<[1], [0], [0], [1], [0, 0, 1, 1], [], []>} : vector<2x16xf32>, vector<16x16xf32>, vector<2x16xf32> -> vector<2x16xf32>
    %cst_566 = arith.constant dense<0.000000e+00> : vector<2x16xf32>
    %1204 = tpu.matmul %1200, %1116, %cst_566 {dimension_numbers = #tpu.dot_dimension_numbers<[1], [0], [0], [1], [0, 0, 1, 1], [], []>} : vector<2x16xf32>, vector<16x16xf32>, vector<2x16xf32> -> vector<2x16xf32>
    %1205 = arith.addf %1204, %1120 : vector<2x16xf32>
    %1206 = vector.extract_strided_slice %1092 {offsets = [10, 0], sizes = [2, 16], strides = [1, 1]} : vector<16x16xf32> to vector<2x16xf32>
    %1207 = arith.addf %1206, %1202 : vector<2x16xf32>
    %cst_567 = arith.constant 0.000000e+00 : f32
    %1208 = vector.broadcast %cst_567 : f32 to vector<2x16xf32>
    %1209 = arith.subf %1208, %1207 : vector<2x16xf32>
    %1210 = math.exp %1209 : vector<2x16xf32>
    %cst_568 = arith.constant 1.000000e+00 : f32
    %1211 = vector.broadcast %cst_568 : f32 to vector<2x16xf32>
    %1212 = arith.addf %1211, %1210 : vector<2x16xf32>
    %cst_569 = arith.constant 1.000000e+00 : f32
    %1213 = vector.broadcast %cst_569 : f32 to vector<2x16xf32>
    %1214 = arith.divf %1213, %1212 : vector<2x16xf32>
    %1215 = vector.extract_strided_slice %1103 {offsets = [10, 0], sizes = [2, 16], strides = [1, 1]} : vector<16x16xf32> to vector<2x16xf32>
    %1216 = arith.addf %1215, %1203 : vector<2x16xf32>
    %cst_570 = arith.constant 0.000000e+00 : f32
    %1217 = vector.broadcast %cst_570 : f32 to vector<2x16xf32>
    %1218 = arith.subf %1217, %1216 : vector<2x16xf32>
    %1219 = math.exp %1218 : vector<2x16xf32>
    %cst_571 = arith.constant 1.000000e+00 : f32
    %1220 = vector.broadcast %cst_571 : f32 to vector<2x16xf32>
    %1221 = arith.addf %1220, %1219 : vector<2x16xf32>
    %cst_572 = arith.constant 1.000000e+00 : f32
    %1222 = vector.broadcast %cst_572 : f32 to vector<2x16xf32>
    %1223 = arith.divf %1222, %1221 : vector<2x16xf32>
    %1224 = vector.extract_strided_slice %1110 {offsets = [10, 0], sizes = [2, 16], strides = [1, 1]} : vector<16x16xf32> to vector<2x16xf32>
    %1225 = arith.mulf %1214, %1205 : vector<2x16xf32>
    %1226 = arith.addf %1224, %1225 : vector<2x16xf32>
    %cst_573 = arith.constant -2.000000e+00 : f32
    %1227 = vector.broadcast %cst_573 : f32 to vector<2x16xf32>
    %1228 = arith.mulf %1227, %1226 : vector<2x16xf32>
    %1229 = math.exp %1228 : vector<2x16xf32>
    %cst_574 = arith.constant 1.000000e+00 : f32
    %1230 = vector.broadcast %cst_574 : f32 to vector<2x16xf32>
    %1231 = arith.addf %1230, %1229 : vector<2x16xf32>
    %cst_575 = arith.constant 2.000000e+00 : f32
    %1232 = vector.broadcast %cst_575 : f32 to vector<2x16xf32>
    %1233 = arith.divf %1232, %1231 : vector<2x16xf32>
    %cst_576 = arith.constant 1.000000e+00 : f32
    %1234 = vector.broadcast %cst_576 : f32 to vector<2x16xf32>
    %1235 = arith.subf %1233, %1234 : vector<2x16xf32>
    %cst_577 = arith.constant 1.000000e+00 : f32
    %1236 = vector.broadcast %cst_577 : f32 to vector<2x16xf32>
    %1237 = arith.subf %1236, %1223 : vector<2x16xf32>
    %1238 = arith.mulf %1237, %1235 : vector<2x16xf32>
    %1239 = arith.mulf %1223, %1200 : vector<2x16xf32>
    %1240 = arith.addf %1238, %1239 : vector<2x16xf32>
    %c10_578 = arith.constant 10 : index
    %c16_579 = arith.constant 16 : index
    %1241 = vector.load %arg8[%c10_578, %c16_579] : memref<16x32xf32, #tpu.memory_space<vmem>>, vector<2x16xf32>
    tpu.vector_store %arg8[%c10_578, %c16_579], %1240 {strides = array<i32>} : memref<16x32xf32, #tpu.memory_space<vmem>>, vector<2x16xf32>,
    %cst_580 = arith.constant dense<0.000000e+00> : vector<2x16xf32>
    %1242 = tpu.matmul %1240, %1112, %cst_580 {dimension_numbers = #tpu.dot_dimension_numbers<[1], [0], [0], [1], [0, 0, 1, 1], [], []>} : vector<2x16xf32>, vector<16x16xf32>, vector<2x16xf32> -> vector<2x16xf32>
    %cst_581 = arith.constant dense<0.000000e+00> : vector<2x16xf32>
    %1243 = tpu.matmul %1240, %1114, %cst_581 {dimension_numbers = #tpu.dot_dimension_numbers<[1], [0], [0], [1], [0, 0, 1, 1], [], []>} : vector<2x16xf32>, vector<16x16xf32>, vector<2x16xf32> -> vector<2x16xf32>
    %cst_582 = arith.constant dense<0.000000e+00> : vector<2x16xf32>
    %1244 = tpu.matmul %1240, %1116, %cst_582 {dimension_numbers = #tpu.dot_dimension_numbers<[1], [0], [0], [1], [0, 0, 1, 1], [], []>} : vector<2x16xf32>, vector<16x16xf32>, vector<2x16xf32> -> vector<2x16xf32>
    %1245 = arith.addf %1244, %1120 : vector<2x16xf32>
    %1246 = vector.extract_strided_slice %1092 {offsets = [8, 0], sizes = [2, 16], strides = [1, 1]} : vector<16x16xf32> to vector<2x16xf32>
    %1247 = arith.addf %1246, %1242 : vector<2x16xf32>
    %cst_583 = arith.constant 0.000000e+00 : f32
    %1248 = vector.broadcast %cst_583 : f32 to vector<2x16xf32>
    %1249 = arith.subf %1248, %1247 : vector<2x16xf32>
    %1250 = math.exp %1249 : vector<2x16xf32>
    %cst_584 = arith.constant 1.000000e+00 : f32
    %1251 = vector.broadcast %cst_584 : f32 to vector<2x16xf32>
    %1252 = arith.addf %1251, %1250 : vector<2x16xf32>
    %cst_585 = arith.constant 1.000000e+00 : f32
    %1253 = vector.broadcast %cst_585 : f32 to vector<2x16xf32>
    %1254 = arith.divf %1253, %1252 : vector<2x16xf32>
    %1255 = vector.extract_strided_slice %1103 {offsets = [8, 0], sizes = [2, 16], strides = [1, 1]} : vector<16x16xf32> to vector<2x16xf32>
    %1256 = arith.addf %1255, %1243 : vector<2x16xf32>
    %cst_586 = arith.constant 0.000000e+00 : f32
    %1257 = vector.broadcast %cst_586 : f32 to vector<2x16xf32>
    %1258 = arith.subf %1257, %1256 : vector<2x16xf32>
    %1259 = math.exp %1258 : vector<2x16xf32>
    %cst_587 = arith.constant 1.000000e+00 : f32
    %1260 = vector.broadcast %cst_587 : f32 to vector<2x16xf32>
    %1261 = arith.addf %1260, %1259 : vector<2x16xf32>
    %cst_588 = arith.constant 1.000000e+00 : f32
    %1262 = vector.broadcast %cst_588 : f32 to vector<2x16xf32>
    %1263 = arith.divf %1262, %1261 : vector<2x16xf32>
    %1264 = vector.extract_strided_slice %1110 {offsets = [8, 0], sizes = [2, 16], strides = [1, 1]} : vector<16x16xf32> to vector<2x16xf32>
    %1265 = arith.mulf %1254, %1245 : vector<2x16xf32>
    %1266 = arith.addf %1264, %1265 : vector<2x16xf32>
    %cst_589 = arith.constant -2.000000e+00 : f32
    %1267 = vector.broadcast %cst_589 : f32 to vector<2x16xf32>
    %1268 = arith.mulf %1267, %1266 : vector<2x16xf32>
    %1269 = math.exp %1268 : vector<2x16xf32>
    %cst_590 = arith.constant 1.000000e+00 : f32
    %1270 = vector.broadcast %cst_590 : f32 to vector<2x16xf32>
    %1271 = arith.addf %1270, %1269 : vector<2x16xf32>
    %cst_591 = arith.constant 2.000000e+00 : f32
    %1272 = vector.broadcast %cst_591 : f32 to vector<2x16xf32>
    %1273 = arith.divf %1272, %1271 : vector<2x16xf32>
    %cst_592 = arith.constant 1.000000e+00 : f32
    %1274 = vector.broadcast %cst_592 : f32 to vector<2x16xf32>
    %1275 = arith.subf %1273, %1274 : vector<2x16xf32>
    %cst_593 = arith.constant 1.000000e+00 : f32
    %1276 = vector.broadcast %cst_593 : f32 to vector<2x16xf32>
    %1277 = arith.subf %1276, %1263 : vector<2x16xf32>
    %1278 = arith.mulf %1277, %1275 : vector<2x16xf32>
    %1279 = arith.mulf %1263, %1240 : vector<2x16xf32>
    %1280 = arith.addf %1278, %1279 : vector<2x16xf32>
    %c8_594 = arith.constant 8 : index
    %c16_595 = arith.constant 16 : index
    %1281 = vector.load %arg8[%c8_594, %c16_595] : memref<16x32xf32, #tpu.memory_space<vmem>>, vector<2x16xf32>
    tpu.vector_store %arg8[%c8_594, %c16_595], %1280 {strides = array<i32>} : memref<16x32xf32, #tpu.memory_space<vmem>>, vector<2x16xf32>,
    %cst_596 = arith.constant dense<0.000000e+00> : vector<2x16xf32>
    %1282 = tpu.matmul %1280, %1112, %cst_596 {dimension_numbers = #tpu.dot_dimension_numbers<[1], [0], [0], [1], [0, 0, 1, 1], [], []>} : vector<2x16xf32>, vector<16x16xf32>, vector<2x16xf32> -> vector<2x16xf32>
    %cst_597 = arith.constant dense<0.000000e+00> : vector<2x16xf32>
    %1283 = tpu.matmul %1280, %1114, %cst_597 {dimension_numbers = #tpu.dot_dimension_numbers<[1], [0], [0], [1], [0, 0, 1, 1], [], []>} : vector<2x16xf32>, vector<16x16xf32>, vector<2x16xf32> -> vector<2x16xf32>
    %cst_598 = arith.constant dense<0.000000e+00> : vector<2x16xf32>
    %1284 = tpu.matmul %1280, %1116, %cst_598 {dimension_numbers = #tpu.dot_dimension_numbers<[1], [0], [0], [1], [0, 0, 1, 1], [], []>} : vector<2x16xf32>, vector<16x16xf32>, vector<2x16xf32> -> vector<2x16xf32>
    %1285 = arith.addf %1284, %1120 : vector<2x16xf32>
    %1286 = vector.extract_strided_slice %1092 {offsets = [6, 0], sizes = [2, 16], strides = [1, 1]} : vector<16x16xf32> to vector<2x16xf32>
    %1287 = arith.addf %1286, %1282 : vector<2x16xf32>
    %cst_599 = arith.constant 0.000000e+00 : f32
    %1288 = vector.broadcast %cst_599 : f32 to vector<2x16xf32>
    %1289 = arith.subf %1288, %1287 : vector<2x16xf32>
    %1290 = math.exp %1289 : vector<2x16xf32>
    %cst_600 = arith.constant 1.000000e+00 : f32
    %1291 = vector.broadcast %cst_600 : f32 to vector<2x16xf32>
    %1292 = arith.addf %1291, %1290 : vector<2x16xf32>
    %cst_601 = arith.constant 1.000000e+00 : f32
    %1293 = vector.broadcast %cst_601 : f32 to vector<2x16xf32>
    %1294 = arith.divf %1293, %1292 : vector<2x16xf32>
    %1295 = vector.extract_strided_slice %1103 {offsets = [6, 0], sizes = [2, 16], strides = [1, 1]} : vector<16x16xf32> to vector<2x16xf32>
    %1296 = arith.addf %1295, %1283 : vector<2x16xf32>
    %cst_602 = arith.constant 0.000000e+00 : f32
    %1297 = vector.broadcast %cst_602 : f32 to vector<2x16xf32>
    %1298 = arith.subf %1297, %1296 : vector<2x16xf32>
    %1299 = math.exp %1298 : vector<2x16xf32>
    %cst_603 = arith.constant 1.000000e+00 : f32
    %1300 = vector.broadcast %cst_603 : f32 to vector<2x16xf32>
    %1301 = arith.addf %1300, %1299 : vector<2x16xf32>
    %cst_604 = arith.constant 1.000000e+00 : f32
    %1302 = vector.broadcast %cst_604 : f32 to vector<2x16xf32>
    %1303 = arith.divf %1302, %1301 : vector<2x16xf32>
    %1304 = vector.extract_strided_slice %1110 {offsets = [6, 0], sizes = [2, 16], strides = [1, 1]} : vector<16x16xf32> to vector<2x16xf32>
    %1305 = arith.mulf %1294, %1285 : vector<2x16xf32>
    %1306 = arith.addf %1304, %1305 : vector<2x16xf32>
    %cst_605 = arith.constant -2.000000e+00 : f32
    %1307 = vector.broadcast %cst_605 : f32 to vector<2x16xf32>
    %1308 = arith.mulf %1307, %1306 : vector<2x16xf32>
    %1309 = math.exp %1308 : vector<2x16xf32>
    %cst_606 = arith.constant 1.000000e+00 : f32
    %1310 = vector.broadcast %cst_606 : f32 to vector<2x16xf32>
    %1311 = arith.addf %1310, %1309 : vector<2x16xf32>
    %cst_607 = arith.constant 2.000000e+00 : f32
    %1312 = vector.broadcast %cst_607 : f32 to vector<2x16xf32>
    %1313 = arith.divf %1312, %1311 : vector<2x16xf32>
    %cst_608 = arith.constant 1.000000e+00 : f32
    %1314 = vector.broadcast %cst_608 : f32 to vector<2x16xf32>
    %1315 = arith.subf %1313, %1314 : vector<2x16xf32>
    %cst_609 = arith.constant 1.000000e+00 : f32
    %1316 = vector.broadcast %cst_609 : f32 to vector<2x16xf32>
    %1317 = arith.subf %1316, %1303 : vector<2x16xf32>
    %1318 = arith.mulf %1317, %1315 : vector<2x16xf32>
    %1319 = arith.mulf %1303, %1280 : vector<2x16xf32>
    %1320 = arith.addf %1318, %1319 : vector<2x16xf32>
    %c6_610 = arith.constant 6 : index
    %c16_611 = arith.constant 16 : index
    %1321 = vector.load %arg8[%c6_610, %c16_611] : memref<16x32xf32, #tpu.memory_space<vmem>>, vector<2x16xf32>
    tpu.vector_store %arg8[%c6_610, %c16_611], %1320 {strides = array<i32>} : memref<16x32xf32, #tpu.memory_space<vmem>>, vector<2x16xf32>,
    %cst_612 = arith.constant dense<0.000000e+00> : vector<2x16xf32>
    %1322 = tpu.matmul %1320, %1112, %cst_612 {dimension_numbers = #tpu.dot_dimension_numbers<[1], [0], [0], [1], [0, 0, 1, 1], [], []>} : vector<2x16xf32>, vector<16x16xf32>, vector<2x16xf32> -> vector<2x16xf32>
    %cst_613 = arith.constant dense<0.000000e+00> : vector<2x16xf32>
    %1323 = tpu.matmul %1320, %1114, %cst_613 {dimension_numbers = #tpu.dot_dimension_numbers<[1], [0], [0], [1], [0, 0, 1, 1], [], []>} : vector<2x16xf32>, vector<16x16xf32>, vector<2x16xf32> -> vector<2x16xf32>
    %cst_614 = arith.constant dense<0.000000e+00> : vector<2x16xf32>
    %1324 = tpu.matmul %1320, %1116, %cst_614 {dimension_numbers = #tpu.dot_dimension_numbers<[1], [0], [0], [1], [0, 0, 1, 1], [], []>} : vector<2x16xf32>, vector<16x16xf32>, vector<2x16xf32> -> vector<2x16xf32>
    %1325 = arith.addf %1324, %1120 : vector<2x16xf32>
    %1326 = vector.extract_strided_slice %1092 {offsets = [4, 0], sizes = [2, 16], strides = [1, 1]} : vector<16x16xf32> to vector<2x16xf32>
    %1327 = arith.addf %1326, %1322 : vector<2x16xf32>
    %cst_615 = arith.constant 0.000000e+00 : f32
    %1328 = vector.broadcast %cst_615 : f32 to vector<2x16xf32>
    %1329 = arith.subf %1328, %1327 : vector<2x16xf32>
    %1330 = math.exp %1329 : vector<2x16xf32>
    %cst_616 = arith.constant 1.000000e+00 : f32
    %1331 = vector.broadcast %cst_616 : f32 to vector<2x16xf32>
    %1332 = arith.addf %1331, %1330 : vector<2x16xf32>
    %cst_617 = arith.constant 1.000000e+00 : f32
    %1333 = vector.broadcast %cst_617 : f32 to vector<2x16xf32>
    %1334 = arith.divf %1333, %1332 : vector<2x16xf32>
    %1335 = vector.extract_strided_slice %1103 {offsets = [4, 0], sizes = [2, 16], strides = [1, 1]} : vector<16x16xf32> to vector<2x16xf32>
    %1336 = arith.addf %1335, %1323 : vector<2x16xf32>
    %cst_618 = arith.constant 0.000000e+00 : f32
    %1337 = vector.broadcast %cst_618 : f32 to vector<2x16xf32>
    %1338 = arith.subf %1337, %1336 : vector<2x16xf32>
    %1339 = math.exp %1338 : vector<2x16xf32>
    %cst_619 = arith.constant 1.000000e+00 : f32
    %1340 = vector.broadcast %cst_619 : f32 to vector<2x16xf32>
    %1341 = arith.addf %1340, %1339 : vector<2x16xf32>
    %cst_620 = arith.constant 1.000000e+00 : f32
    %1342 = vector.broadcast %cst_620 : f32 to vector<2x16xf32>
    %1343 = arith.divf %1342, %1341 : vector<2x16xf32>
    %1344 = vector.extract_strided_slice %1110 {offsets = [4, 0], sizes = [2, 16], strides = [1, 1]} : vector<16x16xf32> to vector<2x16xf32>
    %1345 = arith.mulf %1334, %1325 : vector<2x16xf32>
    %1346 = arith.addf %1344, %1345 : vector<2x16xf32>
    %cst_621 = arith.constant -2.000000e+00 : f32
    %1347 = vector.broadcast %cst_621 : f32 to vector<2x16xf32>
    %1348 = arith.mulf %1347, %1346 : vector<2x16xf32>
    %1349 = math.exp %1348 : vector<2x16xf32>
    %cst_622 = arith.constant 1.000000e+00 : f32
    %1350 = vector.broadcast %cst_622 : f32 to vector<2x16xf32>
    %1351 = arith.addf %1350, %1349 : vector<2x16xf32>
    %cst_623 = arith.constant 2.000000e+00 : f32
    %1352 = vector.broadcast %cst_623 : f32 to vector<2x16xf32>
    %1353 = arith.divf %1352, %1351 : vector<2x16xf32>
    %cst_624 = arith.constant 1.000000e+00 : f32
    %1354 = vector.broadcast %cst_624 : f32 to vector<2x16xf32>
    %1355 = arith.subf %1353, %1354 : vector<2x16xf32>
    %cst_625 = arith.constant 1.000000e+00 : f32
    %1356 = vector.broadcast %cst_625 : f32 to vector<2x16xf32>
    %1357 = arith.subf %1356, %1343 : vector<2x16xf32>
    %1358 = arith.mulf %1357, %1355 : vector<2x16xf32>
    %1359 = arith.mulf %1343, %1320 : vector<2x16xf32>
    %1360 = arith.addf %1358, %1359 : vector<2x16xf32>
    %c4_626 = arith.constant 4 : index
    %c16_627 = arith.constant 16 : index
    %1361 = vector.load %arg8[%c4_626, %c16_627] : memref<16x32xf32, #tpu.memory_space<vmem>>, vector<2x16xf32>
    tpu.vector_store %arg8[%c4_626, %c16_627], %1360 {strides = array<i32>} : memref<16x32xf32, #tpu.memory_space<vmem>>, vector<2x16xf32>,
    %cst_628 = arith.constant dense<0.000000e+00> : vector<2x16xf32>
    %1362 = tpu.matmul %1360, %1112, %cst_628 {dimension_numbers = #tpu.dot_dimension_numbers<[1], [0], [0], [1], [0, 0, 1, 1], [], []>} : vector<2x16xf32>, vector<16x16xf32>, vector<2x16xf32> -> vector<2x16xf32>
    %cst_629 = arith.constant dense<0.000000e+00> : vector<2x16xf32>
    %1363 = tpu.matmul %1360, %1114, %cst_629 {dimension_numbers = #tpu.dot_dimension_numbers<[1], [0], [0], [1], [0, 0, 1, 1], [], []>} : vector<2x16xf32>, vector<16x16xf32>, vector<2x16xf32> -> vector<2x16xf32>
    %cst_630 = arith.constant dense<0.000000e+00> : vector<2x16xf32>
    %1364 = tpu.matmul %1360, %1116, %cst_630 {dimension_numbers = #tpu.dot_dimension_numbers<[1], [0], [0], [1], [0, 0, 1, 1], [], []>} : vector<2x16xf32>, vector<16x16xf32>, vector<2x16xf32> -> vector<2x16xf32>
    %1365 = arith.addf %1364, %1120 : vector<2x16xf32>
    %1366 = vector.extract_strided_slice %1092 {offsets = [2, 0], sizes = [2, 16], strides = [1, 1]} : vector<16x16xf32> to vector<2x16xf32>
    %1367 = arith.addf %1366, %1362 : vector<2x16xf32>
    %cst_631 = arith.constant 0.000000e+00 : f32
    %1368 = vector.broadcast %cst_631 : f32 to vector<2x16xf32>
    %1369 = arith.subf %1368, %1367 : vector<2x16xf32>
    %1370 = math.exp %1369 : vector<2x16xf32>
    %cst_632 = arith.constant 1.000000e+00 : f32
    %1371 = vector.broadcast %cst_632 : f32 to vector<2x16xf32>
    %1372 = arith.addf %1371, %1370 : vector<2x16xf32>
    %cst_633 = arith.constant 1.000000e+00 : f32
    %1373 = vector.broadcast %cst_633 : f32 to vector<2x16xf32>
    %1374 = arith.divf %1373, %1372 : vector<2x16xf32>
    %1375 = vector.extract_strided_slice %1103 {offsets = [2, 0], sizes = [2, 16], strides = [1, 1]} : vector<16x16xf32> to vector<2x16xf32>
    %1376 = arith.addf %1375, %1363 : vector<2x16xf32>
    %cst_634 = arith.constant 0.000000e+00 : f32
    %1377 = vector.broadcast %cst_634 : f32 to vector<2x16xf32>
    %1378 = arith.subf %1377, %1376 : vector<2x16xf32>
    %1379 = math.exp %1378 : vector<2x16xf32>
    %cst_635 = arith.constant 1.000000e+00 : f32
    %1380 = vector.broadcast %cst_635 : f32 to vector<2x16xf32>
    %1381 = arith.addf %1380, %1379 : vector<2x16xf32>
    %cst_636 = arith.constant 1.000000e+00 : f32
    %1382 = vector.broadcast %cst_636 : f32 to vector<2x16xf32>
    %1383 = arith.divf %1382, %1381 : vector<2x16xf32>
    %1384 = vector.extract_strided_slice %1110 {offsets = [2, 0], sizes = [2, 16], strides = [1, 1]} : vector<16x16xf32> to vector<2x16xf32>
    %1385 = arith.mulf %1374, %1365 : vector<2x16xf32>
    %1386 = arith.addf %1384, %1385 : vector<2x16xf32>
    %cst_637 = arith.constant -2.000000e+00 : f32
    %1387 = vector.broadcast %cst_637 : f32 to vector<2x16xf32>
    %1388 = arith.mulf %1387, %1386 : vector<2x16xf32>
    %1389 = math.exp %1388 : vector<2x16xf32>
    %cst_638 = arith.constant 1.000000e+00 : f32
    %1390 = vector.broadcast %cst_638 : f32 to vector<2x16xf32>
    %1391 = arith.addf %1390, %1389 : vector<2x16xf32>
    %cst_639 = arith.constant 2.000000e+00 : f32
    %1392 = vector.broadcast %cst_639 : f32 to vector<2x16xf32>
    %1393 = arith.divf %1392, %1391 : vector<2x16xf32>
    %cst_640 = arith.constant 1.000000e+00 : f32
    %1394 = vector.broadcast %cst_640 : f32 to vector<2x16xf32>
    %1395 = arith.subf %1393, %1394 : vector<2x16xf32>
    %cst_641 = arith.constant 1.000000e+00 : f32
    %1396 = vector.broadcast %cst_641 : f32 to vector<2x16xf32>
    %1397 = arith.subf %1396, %1383 : vector<2x16xf32>
    %1398 = arith.mulf %1397, %1395 : vector<2x16xf32>
    %1399 = arith.mulf %1383, %1360 : vector<2x16xf32>
    %1400 = arith.addf %1398, %1399 : vector<2x16xf32>
    %c2_642 = arith.constant 2 : index
    %c16_643 = arith.constant 16 : index
    %1401 = vector.load %arg8[%c2_642, %c16_643] : memref<16x32xf32, #tpu.memory_space<vmem>>, vector<2x16xf32>
    tpu.vector_store %arg8[%c2_642, %c16_643], %1400 {strides = array<i32>} : memref<16x32xf32, #tpu.memory_space<vmem>>, vector<2x16xf32>,
    %cst_644 = arith.constant dense<0.000000e+00> : vector<2x16xf32>
    %1402 = tpu.matmul %1400, %1112, %cst_644 {dimension_numbers = #tpu.dot_dimension_numbers<[1], [0], [0], [1], [0, 0, 1, 1], [], []>} : vector<2x16xf32>, vector<16x16xf32>, vector<2x16xf32> -> vector<2x16xf32>
    %cst_645 = arith.constant dense<0.000000e+00> : vector<2x16xf32>
    %1403 = tpu.matmul %1400, %1114, %cst_645 {dimension_numbers = #tpu.dot_dimension_numbers<[1], [0], [0], [1], [0, 0, 1, 1], [], []>} : vector<2x16xf32>, vector<16x16xf32>, vector<2x16xf32> -> vector<2x16xf32>
    %cst_646 = arith.constant dense<0.000000e+00> : vector<2x16xf32>
    %1404 = tpu.matmul %1400, %1116, %cst_646 {dimension_numbers = #tpu.dot_dimension_numbers<[1], [0], [0], [1], [0, 0, 1, 1], [], []>} : vector<2x16xf32>, vector<16x16xf32>, vector<2x16xf32> -> vector<2x16xf32>
    %1405 = arith.addf %1404, %1120 : vector<2x16xf32>
    %1406 = vector.extract_strided_slice %1092 {offsets = [0, 0], sizes = [2, 16], strides = [1, 1]} : vector<16x16xf32> to vector<2x16xf32>
    %1407 = arith.addf %1406, %1402 : vector<2x16xf32>
    %cst_647 = arith.constant 0.000000e+00 : f32
    %1408 = vector.broadcast %cst_647 : f32 to vector<2x16xf32>
    %1409 = arith.subf %1408, %1407 : vector<2x16xf32>
    %1410 = math.exp %1409 : vector<2x16xf32>
    %cst_648 = arith.constant 1.000000e+00 : f32
    %1411 = vector.broadcast %cst_648 : f32 to vector<2x16xf32>
    %1412 = arith.addf %1411, %1410 : vector<2x16xf32>
    %cst_649 = arith.constant 1.000000e+00 : f32
    %1413 = vector.broadcast %cst_649 : f32 to vector<2x16xf32>
    %1414 = arith.divf %1413, %1412 : vector<2x16xf32>
    %1415 = vector.extract_strided_slice %1103 {offsets = [0, 0], sizes = [2, 16], strides = [1, 1]} : vector<16x16xf32> to vector<2x16xf32>
    %1416 = arith.addf %1415, %1403 : vector<2x16xf32>
    %cst_650 = arith.constant 0.000000e+00 : f32
    %1417 = vector.broadcast %cst_650 : f32 to vector<2x16xf32>
    %1418 = arith.subf %1417, %1416 : vector<2x16xf32>
    %1419 = math.exp %1418 : vector<2x16xf32>
    %cst_651 = arith.constant 1.000000e+00 : f32
    %1420 = vector.broadcast %cst_651 : f32 to vector<2x16xf32>
    %1421 = arith.addf %1420, %1419 : vector<2x16xf32>
    %cst_652 = arith.constant 1.000000e+00 : f32
    %1422 = vector.broadcast %cst_652 : f32 to vector<2x16xf32>
    %1423 = arith.divf %1422, %1421 : vector<2x16xf32>
    %1424 = vector.extract_strided_slice %1110 {offsets = [0, 0], sizes = [2, 16], strides = [1, 1]} : vector<16x16xf32> to vector<2x16xf32>
    %1425 = arith.mulf %1414, %1405 : vector<2x16xf32>
    %1426 = arith.addf %1424, %1425 : vector<2x16xf32>
    %cst_653 = arith.constant -2.000000e+00 : f32
    %1427 = vector.broadcast %cst_653 : f32 to vector<2x16xf32>
    %1428 = arith.mulf %1427, %1426 : vector<2x16xf32>
    %1429 = math.exp %1428 : vector<2x16xf32>
    %cst_654 = arith.constant 1.000000e+00 : f32
    %1430 = vector.broadcast %cst_654 : f32 to vector<2x16xf32>
    %1431 = arith.addf %1430, %1429 : vector<2x16xf32>
    %cst_655 = arith.constant 2.000000e+00 : f32
    %1432 = vector.broadcast %cst_655 : f32 to vector<2x16xf32>
    %1433 = arith.divf %1432, %1431 : vector<2x16xf32>
    %cst_656 = arith.constant 1.000000e+00 : f32
    %1434 = vector.broadcast %cst_656 : f32 to vector<2x16xf32>
    %1435 = arith.subf %1433, %1434 : vector<2x16xf32>
    %cst_657 = arith.constant 1.000000e+00 : f32
    %1436 = vector.broadcast %cst_657 : f32 to vector<2x16xf32>
    %1437 = arith.subf %1436, %1423 : vector<2x16xf32>
    %1438 = arith.mulf %1437, %1435 : vector<2x16xf32>
    %1439 = arith.mulf %1423, %1400 : vector<2x16xf32>
    %1440 = arith.addf %1438, %1439 : vector<2x16xf32>
    %c0_658 = arith.constant 0 : index
    %c16_659 = arith.constant 16 : index
    %1441 = vector.load %arg8[%c0_658, %c16_659] : memref<16x32xf32, #tpu.memory_space<vmem>>, vector<2x16xf32>
    tpu.vector_store %arg8[%c0_658, %c16_659], %1440 {strides = array<i32>} : memref<16x32xf32, #tpu.memory_space<vmem>>, vector<2x16xf32>,
    %c0_660 = arith.constant 0 : index
    %c0_661 = arith.constant 0 : index
    %1442 = vector.load %arg8[%c0_660, %c0_661] : memref<16x32xf32, #tpu.memory_space<vmem>>, vector<16x32xf32>
    %1443 = arith.addf %1442, %0 : vector<16x32xf32>
    %cst_662 = arith.constant dense<0.000000e+00> : vector<16xf32>
    %1444 = vector.multi_reduction <add>, %1443, %cst_662 [1] : vector<16x32xf32> to vector<16xf32>
    %1445 = vector.shape_cast %1444 : vector<16xf32> to vector<16x1xf32>
    %cst_663 = arith.constant 3.200000e+01 : f32
    %1446 = vector.broadcast %cst_663 : f32 to vector<16x1xf32>
    %1447 = arith.divf %1445, %1446 : vector<16x1xf32>
    %1448 = vector.broadcast %1447 : vector<16x1xf32> to vector<16x32xf32>
    %1449 = arith.subf %1443, %1448 : vector<16x32xf32>
    %1450 = vector.broadcast %1447 : vector<16x1xf32> to vector<16x32xf32>
    %1451 = arith.subf %1443, %1450 : vector<16x32xf32>
    %1452 = arith.mulf %1449, %1451 : vector<16x32xf32>
    %cst_664 = arith.constant dense<0.000000e+00> : vector<16xf32>
    %1453 = vector.multi_reduction <add>, %1452, %cst_664 [1] : vector<16x32xf32> to vector<16xf32>
    %1454 = vector.shape_cast %1453 : vector<16xf32> to vector<16x1xf32>
    %cst_665 = arith.constant 3.200000e+01 : f32
    %1455 = vector.broadcast %cst_665 : f32 to vector<16x1xf32>
    %1456 = arith.divf %1454, %1455 : vector<16x1xf32>
    %1457 = vector.broadcast %1447 : vector<16x1xf32> to vector<16x32xf32>
    %1458 = arith.subf %1443, %1457 : vector<16x32xf32>
    %cst_666 = arith.constant 9.99999974E-6 : f32
    %1459 = vector.broadcast %cst_666 : f32 to vector<16x1xf32>
    %1460 = arith.addf %1456, %1459 : vector<16x1xf32>
    %1461 = math.rsqrt %1460 : vector<16x1xf32>
    %1462 = vector.broadcast %1461 : vector<16x1xf32> to vector<16x32xf32>
    %1463 = arith.mulf %1458, %1462 : vector<16x32xf32>
    %c0_667 = arith.constant 0 : index
    %c0_668 = arith.constant 0 : index
    %1464 = vector.load %arg5[%c0_667, %c0_668] : memref<1x32xf32, #tpu.memory_space<vmem>>, vector<1x32xf32>
    %1465 = vector.broadcast %1464 : vector<1x32xf32> to vector<16x32xf32>
    %1466 = arith.mulf %1463, %1465 : vector<16x32xf32>
    %c0_669 = arith.constant 0 : index
    %c0_670 = arith.constant 0 : index
    %1467 = vector.load %arg6[%c0_669, %c0_670] : memref<1x32xf32, #tpu.memory_space<vmem>>, vector<1x32xf32>
    %1468 = vector.broadcast %1467 : vector<1x32xf32> to vector<16x32xf32>
    %1469 = arith.addf %1466, %1468 : vector<16x32xf32>
    %c0_671 = arith.constant 0 : index
    %c0_672 = arith.constant 0 : index
    %1470 = vector.load %arg7[%c0_671, %c0_672] : memref<16x32xf32, #tpu.memory_space<vmem>>, vector<16x32xf32>
    tpu.vector_store %arg7[%c0_671, %c0_672], %1469 {strides = array<i32>} : memref<16x32xf32, #tpu.memory_space<vmem>>, vector<16x32xf32>,
    return
  }
}

</mosaic_0001>

<bundles_post_ra>
// kernel: tpu_custom_call.1
= control target key start
LH: loop header
LB: loop body
LE: loop exit
PB: predicated region body
PF: predicated region fallthrough
CT: control target
= control target key end

     0   :  { %v5827_v9 = vmov 0.0   ;;  %vm37_vm0 = vcmask 261120   ;;  %s7128_s0 = inlined_call_operand.vmem [shape: f32[16,32], index: 0, kind: input, shape index: {}]   ;;  %s7129_s1 = inlined_call_operand.vmem [shape: f32[12,32,16], index: 1, kind: input, shape index: {}]   ;;  %s7130_s2 = inlined_call_operand.vmem [shape: f32[12,1,16], index: 2, kind: input, shape index: {}]   ;;  %s7131_s3 = inlined_call_operand.vmem [shape: f32[12,16,16], index: 3, kind: input, shape index: {}]   ;;  %s7132_s4 = inlined_call_operand.vmem [shape: f32[12,1,16], index: 4, kind: input, shape index: {}]   ;;  %s7133_s5 = inlined_call_operand.vmem [shape: f32[1,32], index: 5, kind: input, shape index: {}]   ;;  %s7134_s6 = inlined_call_operand.vmem [shape: f32[1,32], index: 6, kind: input, shape index: {}]   ;;  %s7135_s7 = inlined_call_operand.hbm [shape: f32[16,32], index: 7, kind: output, shape index: {}]  }
   0x1   :  { %v32_v0 = vld [vmem:[%s7129_s1 + $0x18] sm:$0xff]  ;;  %v31_v1 = vld [vmem:[%s7129_s1 + $0x10] sm:$0xff]  ;;  %v5882_v2 = vld [vmem:[%s7131_s3 + $0x8] sm:$0xff] }
   0x2   :  { %56 = vmatpush.msra.mxu0 %v32_v0  ;;  %177 = vmatpush.msra.mxu3 %v5882_v2  ;;  %v5888_v3 = vld [vmem:[%s7131_s3] sm:$0xff]  ;;  %v30_v4 = vld [vmem:[%s7129_s1 + $0x8] sm:$0xff]  ;;  %v5138_v5 = vld [vmem:[%s7129_s1 + $0x38] sm:$0xff] }
   0x3   :  { %v29_v6 = vld [vmem:[%s7129_s1] sm:$0xff]  ;;  %v5137_v7 = vld [vmem:[%s7129_s1 + $0x30] sm:$0xff]  ;;  %v5906_v8 = vld [vmem:[%s7131_s3 + $0x18] sm:$0xff]  ;;  %95 = vmatpush.msra.mxu1 %v5138_v5 }
   0x4   :  { %57 = vmatpush.msra.mxu0 %v31_v1  ;;  %178 = vmatpush.msra.mxu3 %v5888_v3  ;;  %v27_v10 = vld [vmem:[%s7128_s0] sm:$0xff]  ;;  %v5915_v11 = vld [vmem:[%s7131_s3 + $0x10] sm:$0xff]  ;;  %v5146_v12 = vld [vmem:[%s7129_s1 + $0x58] sm:$0xff] }
   0x5   :  { %179 = vmatmul.f32.vlgmr.msra.gmra.mxu3 %v5827_v9  ;;  %v5136_v13 = vld [vmem:[%s7129_s1 + $0x28] sm:$0xff]  ;;  %v5135_v14 = vld [vmem:[%s7129_s1 + $0x20] sm:$0xff]  ;;  %96 = vmatpush.msra.mxu1 %v5137_v7  ;;  %v5145_v17 = vld [vmem:[%s7129_s1 + $0x50] sm:$0xff] }
   0x6   :  { %58 = vmatpush.msra.mxu0 %v30_v4  ;;  %197 = vmatpush.msrb.mxu3 %v5906_v8  ;;  %v5930_v15 = vld [vmem:[%s7131_s3 + $0x28] sm:$0xff]  ;;  %v5935_v16 = vld [vmem:[%s7131_s3 + $0x20] sm:$0xff] }
   0x7   :  { %135 = vmatpush.msra.mxu2 %v5146_v12  ;;  %v5144_v18 = vld [vmem:[%s7129_s1 + $0x48] sm:$0xff]  ;;  %97 = vmatpush.msra.mxu1 %v5136_v13  ;;  %v5143_v19 = vld [vmem:[%s7129_s1 + $0x40] sm:$0xff] }
   0x8   :  { %59 = vmatpush.msra.mxu0 %v29_v6  ;;  %198 = vmatpush.msrb.mxu3 %v5915_v11 }
   0x9   :  { %5133 = vmatmul.msk.f32.vlgmr.msra.gmra.mxu0 %vm37_vm0, %v27_v10  ;;  %136 = vmatpush.msra.mxu2 %v5145_v17 }
   0xa   :  { %217 = vmatpush.msra.mxu3 %v5930_v15  ;;  %98 = vmatpush.msra.mxu1 %v5135_v14 }
   0xb   :  { %308 = vmatpush.msrb.mxu0 %v5882_v2  ;;  %5140 = vmatmul.msk.f32.vlgmr.msra.gmra.mxu1 %vm37_vm0, %v27_v10 }
   0xc   :  { %218 = vmatpush.msra.mxu3 %v5935_v16  ;;  %137 = vmatpush.msra.mxu2 %v5144_v18 }
   0xd   :  { %199 = vmatmul.f32.vlgmr.msrb.gmra.mxu3 %v5827_v9  ;;  %309 = vmatpush.msrb.mxu0 %v5888_v3 }
   0xe   :  { %328 = vmatpush.msrb.mxu1 %v5906_v8  ;;  %138 = vmatpush.msra.mxu2 %v5143_v19 }
   0xf   :  { %451 = vmatpush.msrb.mxu3 %v5882_v2  ;;  %5148 = vmatmul.msk.f32.vlgmr.msra.gmra.mxu2 %vm37_vm0, %v27_v10 }
  0x10   :  { %329 = vmatpush.msrb.mxu1 %v5915_v11 }
  0x11   :  { %12 = vsyncpa [#allocation4], 0  ;;  %348 = vmatpush.msrb.mxu2 %v5930_v15  ;;  %452 = vmatpush.msrb.mxu3 %v5888_v3  ;;  %v5973_v20 = vld [vmem:[%s7130_s2] ss:$0 sm:$0xff]  ;;  %v5988_v27 = vld [vmem:[%s7130_s2 + $0x1] ss:$0 sm:$0xff] }
  0x12   :  { %471 = vmatpush.msra.mxu0 %v5906_v8  ;;  %491 = vmatpush.msra.mxu1 %v5930_v15  ;;  %v5978_v21 = vld [vmem:[%s7132_s4] ss:$0 sm:$0xff]  ;;  %v5994_v32 = vld [vmem:[%s7132_s4 + $0x1] ss:$0 sm:$0xff]  ;;  %v6003_v42 = vld [vmem:[%s7132_s4 + $0x2] ss:$0 sm:$0xff] }
  0x13   :  { %349 = vmatpush.msrb.mxu2 %v5935_v16  ;;  %v6008_v48 = vld [vmem:[%s7130_s2 + $0x2] ss:$0 sm:$0xff]  ;;  %v28_v49 = vld [vmem:[%s7128_s0 + $0x8] sm:$0xff]  ;;  %vm159_vm13 = vcmask 130048   ;;  %vm289_vm14 = vcmask 123904   ;;  %s5828_s19 = smov 16  }
  0x14   :  { %472 = vmatpush.msra.mxu0 %v5915_v11  ;;  %492 = vmatpush.msra.mxu1 %v5935_v16  ;;  %s5121_s8 = sshll.u32 %s7135_s7, 4  ;;  %s5831_s9 = smov 128   ;;  %s5122_s8 = int_to_ptr.hbm [resolvable:$true] %s5121_s8 }
  0x15   :  { %219 = vmatmul.f32.vlgmr.msra.gmra.mxu3 %v5827_v9  ;;  %594 = vmatpush.msra.mxu2 %v5882_v2  ;;  %s5832_s10 = smov 8  }
  0x16   :  { %614 = vmatpush.msra.mxu3 %v5906_v8  ;;  %5134 = vmatmul.msk.f32.gmra.mxu0 %vm37_vm0, %v28_v49 }
  0x17   :  { %595 = vmatpush.msra.mxu2 %v5888_v3  ;;  %5141 = vmatmul.msk.f32.gmra.mxu1 %vm37_vm0, %v28_v49 }
  0x18   :  { %615 = vmatpush.msra.mxu3 %v5915_v11  ;;  %5149 = vmatmul.msk.f32.gmra.mxu2 %vm37_vm0, %v28_v49 }
  0x86   :  { %v61_v22 = vpop.f32.mrf.mxu0 }
  0x87   :  { %v62_v23 = vadd.f32 %v5973_v20, %v61_v22 }
  0x88   :  { %v180_v24 = vpop.f32.mrf.mxu3  ;;  %v100_v28 = vpop.f32.mrf.mxu1 }
  0x89   :  { %v5982_v25 = vadd.f32 %v5978_v21, %v62_v23  ;;  %v101_v31 = vadd.f32 %v5988_v27, %v100_v28 }
  0x8b   :  { %v223_v26 = vadd.f32 %v180_v24, %v5982_v25  ;;  %v5997_v33 = vadd.f32 %v5994_v32, %v101_v31 }
  0x8d   :  { %v224_v29 = vsub.f32 0.0, %v223_v26 }
  0x8f   :  { %v225_v30 = vmul.f32 1.442695, %v224_v29 }
  0x90   :  { %v200_v34 = vpop.f32.mrf.mxu3 }
  0x91   :  { %5393 = vpow2.f32 %v225_v30  ;;  %v243_v36 = vadd.f32 %v200_v34, %v5997_v33 }
  0x92   :  { %v140_v50 = vpop.f32.mrf.mxu2 }
  0x93   :  { %v244_v38 = vsub.f32 0.0, %v243_v36  ;;  %v6018_v56 = vadd.f32 %v6008_v48, %v140_v50 }
  0x95   :  { %v245_v39 = vmul.f32 1.442695, %v244_v38 }
  0x97   :  { %v5394_v35 = vpop.eup %5393 }
  0x98   :  { %v227_v37 = vadd.f32 1.0, %v5394_v35  ;;  %v220_v44 = vpop.f32.mrf.mxu3 }
  0x99   :  { %v221_v51 = vadd.f32 %v6003_v42, %v220_v44 }
  0x9a   :  { %5395 = vrcp.f32 %v227_v37  ;;  %v239_v45 = vand.u32 2147483648, %v227_v37  ;;  %v237_v47 = vand.u32 2147483647, %v227_v37  ;;  %vm233_vm2 = vweird.f32 %v227_v37 }
  0x9b   :  { %5397 = vpow2.f32 %v245_v39 }
  0x9c   :  { %v240_v53 = vor.u32 1.1754944e-38, %v239_v45  ;;  %vm238_vm4 = vcmp.eq.f32.partialorder %v237_v47, 8.507059e+37 }
  0xa0   :  { %v5396_v40 = vpop.eup %5395 }
  0xa1   :  { %v229_v41 = vmul.f32 %v5396_v40, %v227_v37  ;;  %vm234_vm1 = vweird.f32 %v5396_v40  ;;  %v5398_v54 = vpop.eup %5397 }
  0xa2   :  { %vm235_vm3 = vmor %vm233_vm2, %vm234_vm1  ;;  %v247_v59 = vadd.f32 1.0, %v5398_v54 }
  0xa3   :  { %v230_v43 = vsub.f32 1.0, %v229_v41  ;;  %v6039_v41 = vpop.f32.mrf.mxu1 }
  0xa4   :  { %5399 = vrcp.f32 %v247_v59  ;;  %vm253_vm5 = vweird.f32 %v247_v59  ;;  %v259_v12 = vand.u32 2147483648, %v247_v59  ;;  %v257_v13 = vand.u32 2147483647, %v247_v59 }
  0xa5   :  { %v231_v46 = vmul.f32 %v5396_v40, %v230_v43 }
  0xa6   :  { %v260_v23 = vor.u32 1.1754944e-38, %v259_v12  ;;  %vm258_vm9 = vcmp.eq.f32.partialorder %v257_v13, 8.507059e+37 }
  0xa7   :  { %v232_v52 = vadd.f32 %v5396_v40, %v231_v46 }
  0xa9   :  { %v236_v55 = vsel %vm235_vm3, %v5396_v40, %v232_v52  ;;  %v6037_v40 = vpop.f32.mrf.mxu0 }
  0xaa   :  { %v241_v57 = vsel %vm238_vm4, %v240_v53, %v236_v55  ;;  %v5400_v63 = vpop.eup %5399  ;;  %v6043_v53 = vpop.f32.mrf.mxu2 }
  0xab   :  { %v263_v58 = vmul.f32 %v241_v57, %v221_v51  ;;  %v249_v1 = vmul.f32 %v5400_v63, %v247_v59  ;;  %vm254_vm6 = vweird.f32 %v5400_v63 }
  0xac   :  { %vm255_vm7 = vmor %vm253_vm5, %vm254_vm6 }
  0xad   :  { %v264_v60 = vadd.f32 %v263_v58, %v6018_v56  ;;  %v250_v5 = vsub.f32 1.0, %v249_v1 }
  0xaf   :  { %v265_v61 = vmul.f32 -2.0, %v264_v60  ;;  %v251_v6 = vmul.f32 %v5400_v63, %v250_v5 }
  0xb1   :  { %v266_v62 = vmul.f32 1.442695, %v265_v61  ;;  %v252_v17 = vadd.f32 %v5400_v63, %v251_v6 }
  0xb3   :  { %5401 = vpow2.f32 %v266_v62  ;;  %v256_v24 = vsel %vm255_vm7, %v5400_v63, %v252_v17 }
  0xb4   :  { %v261_v30 = vsel %vm258_vm9, %v260_v23, %v256_v24 }
  0xb5   :  { %v285_v36 = vsub.f32 1.0, %v261_v30  ;;  %v287_v38 = vmul.f32 0.0, %v261_v30 }
  0xb9   :  { %v5402_v0 = vpop.eup %5401 }
  0xba   :  { %v268_v4 = vadd.f32 1.0, %v5402_v0 }
  0xbc   :  { %5403 = vrcp.f32 %v268_v4  ;;  %v280_v18 = vand.u32 2147483648, %v268_v4  ;;  %v278_v22 = vand.u32 2147483647, %v268_v4  ;;  %vm274_vm10 = vweird.f32 %v268_v4 }
  0xbe   :  { %v281_v28 = vor.u32 1.1754944e-38, %v280_v18  ;;  %vm279_vm12 = vcmp.eq.f32.partialorder %v278_v22, 8.507059e+37 }
  0xc2   :  { %v5404_v7 = vpop.eup %5403 }
  0xc3   :  { %v270_v10 = vmul.f32 %v5404_v7, %v268_v4  ;;  %vm275_vm8 = vweird.f32 %v5404_v7 }
  0xc4   :  { %vm276_vm11 = vmor %vm274_vm10, %vm275_vm8 }
  0xc5   :  { %v271_v14 = vsub.f32 1.0, %v270_v10 }
  0xc7   :  { %v272_v19 = vmul.f32 %v5404_v7, %v271_v14 }
  0xc9   :  { %v273_v26 = vadd.f32 %v5404_v7, %v272_v19 }
  0xcb   :  { %v277_v29 = vsel %vm276_vm11, %v5404_v7, %v273_v26 }
  0xcc   :  { %v282_v31 = vsel %vm279_vm12, %v281_v28, %v277_v29  ;;  %vm431_vm12 = vcmask 125954  }
  0xcd   :  { %v283_v34 = vmul.f32 2.0, %v282_v31 }
  0xcf   :  { %v5155_v35 = vadd.f32 -1.0, %v283_v34 }
  0xd1   :  { %v286_v37 = vmul.f32 %v5155_v35, %v285_v36 }
  0xd3   :  { %v6021_v39 = vadd.f32 %v287_v38, %v286_v37 }
  0xd5   :  { %5156 = vmatmul.msk.f32.vlgmr.msrb.gmra.mxu0 %vm159_vm13, %v6021_v39  ;;  %5157 = vmatmul.msk.f32.vlgmr.msrb.gmra.mxu1 %vm159_vm13, %v6021_v39  ;;  %290 = vst.msk [vmem:[#allocation2] sm:$0x3] %vm289_vm14, %v6021_v39 }
  0xd6   :  { %5158 = vmatmul.msk.f32.vlgmr.msrb.gmra.mxu2 %vm159_vm13, %v6021_v39  ;;  %634 = vmatpush.msrb.mxu0 %v5930_v15 }
  0xd7   :  { %737 = vmatpush.msrb.mxu1 %v5882_v2  ;;  %757 = vmatpush.msrb.mxu2 %v5906_v8 }
  0xd8   :  { %635 = vmatpush.msrb.mxu0 %v5935_v16 }
  0xd9   :  { %738 = vmatpush.msrb.mxu1 %v5888_v3  ;;  %758 = vmatpush.msrb.mxu2 %v5915_v11 }
 0x152   :  { %v311_v43 = vpop.f32.mrf.mxu0  ;;  %v331_v49 = vpop.f32.mrf.mxu1 }
 0x153   :  { %v355_v44 = vrot.slane %v311_v43, 6  ;;  %v378_v50 = vrot.slane %v331_v49, 6 }
 0x155   :  { %v357_v45 = vadd.f32 %v355_v44, %v5982_v25  ;;  %v380_v52 = vadd.f32 %v378_v50, %v5997_v33 }
 0x157   :  { %v358_v46 = vsub.f32 0.0, %v357_v45  ;;  %v381_v55 = vsub.f32 0.0, %v380_v52 }
 0x159   :  { %v359_v47 = vmul.f32 1.442695, %v358_v46  ;;  %v382_v57 = vmul.f32 1.442695, %v381_v55  ;;  %v351_v60 = vpop.f32.mrf.mxu2 }
 0x15a   :  { %v352_v63 = vadd.f32 %v6003_v42, %v351_v60 }
 0x15b   :  { %5405 = vpow2.f32 %v359_v47 }
 0x15c   :  { %v401_v10 = vrot.slane %v352_v63, 6 }
 0x161   :  { %v5406_v51 = vpop.eup %5405 }
 0x162   :  { %v361_v54 = vadd.f32 1.0, %v5406_v51 }
 0x164   :  { %5407 = vrcp.f32 %v361_v54  ;;  %v373_v62 = vand.u32 2147483648, %v361_v54  ;;  %v371_v1 = vand.u32 2147483647, %v361_v54  ;;  %vm367_vm1 = vweird.f32 %v361_v54 }
 0x165   :  { %5409 = vpow2.f32 %v382_v57 }
 0x166   :  { %v374_v5 = vor.u32 1.1754944e-38, %v373_v62  ;;  %vm372_vm3 = vcmp.eq.f32.partialorder %v371_v1, 8.507059e+37 }
 0x16a   :  { %v5408_v58 = vpop.eup %5407 }
 0x16b   :  { %v363_v59 = vmul.f32 %v5408_v58, %v361_v54  ;;  %vm368_vm15 = vweird.f32 %v5408_v58  ;;  %v5410_v6 = vpop.eup %5409 }
 0x16c   :  { %vm369_vm2 = vmor %vm367_vm1, %vm368_vm15  ;;  %v384_v14 = vadd.f32 1.0, %v5410_v6 }
 0x16d   :  { %v364_v61 = vsub.f32 1.0, %v363_v59 }
 0x16e   :  { %5411 = vrcp.f32 %v384_v14  ;;  %vm390_vm5 = vweird.f32 %v384_v14  ;;  %v396_v36 = vand.u32 2147483648, %v384_v14  ;;  %v394_v38 = vand.u32 2147483647, %v384_v14 }
 0x16f   :  { %v365_v0 = vmul.f32 %v5408_v58, %v364_v61 }
 0x170   :  { %v397_v47 = vor.u32 1.1754944e-38, %v396_v36  ;;  %vm395_vm10 = vcmp.eq.f32.partialorder %v394_v38, 8.507059e+37 }
 0x171   :  { %v366_v4 = vadd.f32 %v5408_v58, %v365_v0 }
 0x173   :  { %v370_v7 = vsel %vm369_vm2, %v5408_v58, %v366_v4  ;;  %v427_v58 = vrot.slane %v6021_v39, 6 }
 0x174   :  { %v375_v12 = vsel %vm372_vm3, %v374_v5, %v370_v7  ;;  %v5412_v22 = vpop.eup %5411 }
 0x175   :  { %v403_v13 = vmul.f32 %v401_v10, %v375_v12  ;;  %v386_v24 = vmul.f32 %v5412_v22, %v384_v14  ;;  %vm391_vm4 = vweird.f32 %v5412_v22 }
 0x176   :  { %vm392_vm7 = vmor %vm390_vm5, %vm391_vm4 }
 0x177   :  { %v404_v17 = vadd.f32 %v403_v13, %v6018_v56  ;;  %v387_v28 = vsub.f32 1.0, %v386_v24 }
 0x179   :  { %v405_v18 = vmul.f32 -2.0, %v404_v17  ;;  %v388_v29 = vmul.f32 %v5412_v22, %v387_v28 }
 0x17b   :  { %v406_v19 = vmul.f32 1.442695, %v405_v18  ;;  %v389_v34 = vadd.f32 %v5412_v22, %v388_v29 }
 0x17d   :  { %5413 = vpow2.f32 %v406_v19  ;;  %v393_v46 = vsel %vm392_vm7, %v5412_v22, %v389_v34 }
 0x17e   :  { %v398_v51 = vsel %vm395_vm10, %v397_v47, %v393_v46 }
 0x17f   :  { %v425_v57 = vsub.f32 1.0, %v398_v51  ;;  %v429_v60 = vmul.f32 %v427_v58, %v398_v51 }
 0x183   :  { %v5414_v23 = vpop.eup %5413 }
 0x184   :  { %v408_v26 = vadd.f32 1.0, %v5414_v23 }
 0x186   :  { %5415 = vrcp.f32 %v408_v26  ;;  %v420_v37 = vand.u32 2147483648, %v408_v26  ;;  %v418_v44 = vand.u32 2147483647, %v408_v26  ;;  %vm414_vm8 = vweird.f32 %v408_v26 }
 0x188   :  { %v421_v49 = vor.u32 1.1754944e-38, %v420_v37  ;;  %vm419_vm11 = vcmp.eq.f32.partialorder %v418_v44, 8.507059e+37 }
 0x18c   :  { %v5416_v30 = vpop.eup %5415 }
 0x18d   :  { %v410_v31 = vmul.f32 %v5416_v30, %v408_v26  ;;  %vm415_vm6 = vweird.f32 %v5416_v30 }
 0x18e   :  { %vm416_vm9 = vmor %vm414_vm8, %vm415_vm6 }
 0x18f   :  { %v411_v35 = vsub.f32 1.0, %v410_v31 }
 0x191   :  { %v412_v43 = vmul.f32 %v5416_v30, %v411_v35 }
 0x193   :  { %v413_v45 = vadd.f32 %v5416_v30, %v412_v43 }
 0x195   :  { %v417_v50 = vsel %vm416_vm9, %v5416_v30, %v413_v45 }
 0x196   :  { %v422_v52 = vsel %vm419_vm11, %v421_v49, %v417_v50 }
 0x197   :  { %v423_v54 = vmul.f32 2.0, %v422_v52 }
 0x199   :  { %v5159_v55 = vadd.f32 -1.0, %v423_v54 }
 0x19b   :  { %v426_v59 = vmul.f32 %v5159_v55, %v425_v57 }
 0x19d   :  { %v6048_v61 = vadd.f32 %v429_v60, %v426_v59 }
 0x19f   :  { %v434_v62 = vrot.slane %v6048_v61, 2  ;;  %432 = vst.msk [vmem:[#allocation2] sm:$0xc] %vm431_vm12, %v6048_v61 }
 0x1a1   :  { %5160 = vmatmul.msk.f32.vlgmr.msrb.gmra.mxu3 %vm159_vm13, %v434_v62  ;;  %5161 = vmatmul.msk.f32.vlgmr.msra.gmra.mxu0 %vm159_vm13, %v434_v62 }
 0x1a2   :  { %5162 = vmatmul.msk.f32.vlgmr.msra.gmra.mxu1 %vm159_vm13, %v434_v62  ;;  %777 = vmatpush.msrb.mxu3 %v5930_v15 }
 0x1a3   :  { %868 = vmatpush.msra.mxu0 %v5882_v2  ;;  %888 = vmatpush.msra.mxu1 %v5906_v8 }
 0x1a4   :  { %778 = vmatpush.msrb.mxu3 %v5935_v16 }
 0x1a5   :  { %869 = vmatpush.msra.mxu0 %v5888_v3  ;;  %889 = vmatpush.msra.mxu1 %v5915_v11 }
 0x21e   :  { %v474_v5 = vpop.f32.mrf.mxu0 }
 0x21f   :  { %v521_v6 = vrot.slane %v474_v5, 4  ;;  %v494_v19 = vpop.f32.mrf.mxu1 }
 0x220   :  { %v495_v24 = vadd.f32 %v6003_v42, %v494_v19 }
 0x221   :  { %v523_v10 = vadd.f32 %v521_v6, %v5997_v33 }
 0x222   :  { %v544_v34 = vrot.slane %v495_v24, 4 }
 0x223   :  { %v524_v13 = vsub.f32 0.0, %v523_v10 }
 0x224   :  { %v454_v39 = vpop.f32.mrf.mxu3 }
 0x225   :  { %v498_v63 = vrot.slane %v454_v39, 4  ;;  %v525_v14 = vmul.f32 1.442695, %v524_v13 }
 0x227   :  { %v500_v0 = vadd.f32 %v498_v63, %v5982_v25 }
 0x229   :  { %v501_v1 = vsub.f32 0.0, %v500_v0 }
 0x22b   :  { %v502_v4 = vmul.f32 1.442695, %v501_v1 }
 0x22d   :  { %5417 = vpow2.f32 %v502_v4 }
 0x233   :  { %v5418_v7 = vpop.eup %5417 }
 0x234   :  { %v504_v12 = vadd.f32 1.0, %v5418_v7 }
 0x236   :  { %5419 = vrcp.f32 %v504_v12  ;;  %v516_v23 = vand.u32 2147483648, %v504_v12  ;;  %v514_v28 = vand.u32 2147483647, %v504_v12  ;;  %vm510_vm1 = vweird.f32 %v504_v12 }
 0x237   :  { %5421 = vpow2.f32 %v525_v14 }
 0x238   :  { %v517_v30 = vor.u32 1.1754944e-38, %v516_v23  ;;  %vm515_vm3 = vcmp.eq.f32.partialorder %v514_v28, 8.507059e+37 }
 0x23c   :  { %v5420_v17 = vpop.eup %5419 }
 0x23d   :  { %v506_v18 = vmul.f32 %v5420_v17, %v504_v12  ;;  %vm511_vm15 = vweird.f32 %v5420_v17  ;;  %v5422_v31 = vpop.eup %5421 }
 0x23e   :  { %vm512_vm2 = vmor %vm510_vm1, %vm511_vm15  ;;  %v527_v38 = vadd.f32 1.0, %v5422_v31  ;;  %vm574_vm15 = vcmask 128004  }
 0x23f   :  { %v507_v22 = vsub.f32 1.0, %v506_v18 }
 0x240   :  { %5423 = vrcp.f32 %v527_v38  ;;  %vm533_vm5 = vweird.f32 %v527_v38  ;;  %v539_v59 = vand.u32 2147483648, %v527_v38  ;;  %v537_v62 = vand.u32 2147483647, %v527_v38 }
 0x241   :  { %v508_v26 = vmul.f32 %v5420_v17, %v507_v22 }
 0x242   :  { %v540_v4 = vor.u32 1.1754944e-38, %v539_v59  ;;  %vm538_vm10 = vcmp.eq.f32.partialorder %v537_v62, 8.507059e+37 }
 0x243   :  { %v509_v29 = vadd.f32 %v5420_v17, %v508_v26 }
 0x245   :  { %v513_v35 = vsel %vm512_vm2, %v5420_v17, %v509_v29  ;;  %v570_v17 = vrot.slane %v6048_v61, 6 }
 0x246   :  { %v518_v36 = vsel %vm515_vm3, %v517_v30, %v513_v35  ;;  %v5424_v46 = vpop.eup %5423 }
 0x247   :  { %v546_v37 = vmul.f32 %v544_v34, %v518_v36  ;;  %v529_v49 = vmul.f32 %v5424_v46, %v527_v38  ;;  %vm534_vm4 = vweird.f32 %v5424_v46 }
 0x248   :  { %vm535_vm7 = vmor %vm533_vm5, %vm534_vm4 }
 0x249   :  { %v547_v43 = vadd.f32 %v546_v37, %v6018_v56  ;;  %v530_v51 = vsub.f32 1.0, %v529_v49 }
 0x24b   :  { %v548_v44 = vmul.f32 -2.0, %v547_v43  ;;  %v531_v52 = vmul.f32 %v5424_v46, %v530_v51 }
 0x24d   :  { %v549_v45 = vmul.f32 1.442695, %v548_v44  ;;  %v532_v57 = vadd.f32 %v5424_v46, %v531_v52 }
 0x24f   :  { %5425 = vpow2.f32 %v549_v45  ;;  %v536_v0 = vsel %vm535_vm7, %v5424_v46, %v532_v57 }
 0x250   :  { %v541_v7 = vsel %vm538_vm10, %v540_v4, %v536_v0 }
 0x251   :  { %v568_v14 = vsub.f32 1.0, %v541_v7  ;;  %v572_v19 = vmul.f32 %v570_v17, %v541_v7 }
 0x255   :  { %v5426_v47 = vpop.eup %5425 }
 0x256   :  { %v551_v50 = vadd.f32 1.0, %v5426_v47 }
 0x258   :  { %5427 = vrcp.f32 %v551_v50  ;;  %v563_v60 = vand.u32 2147483648, %v551_v50  ;;  %v561_v63 = vand.u32 2147483647, %v551_v50  ;;  %vm557_vm8 = vweird.f32 %v551_v50 }
 0x25a   :  { %v564_v5 = vor.u32 1.1754944e-38, %v563_v60  ;;  %vm562_vm11 = vcmp.eq.f32.partialorder %v561_v63, 8.507059e+37 }
 0x25e   :  { %v5428_v54 = vpop.eup %5427 }
 0x25f   :  { %v553_v55 = vmul.f32 %v5428_v54, %v551_v50  ;;  %vm558_vm6 = vweird.f32 %v5428_v54 }
 0x260   :  { %vm559_vm9 = vmor %vm557_vm8, %vm558_vm6 }
 0x261   :  { %v554_v58 = vsub.f32 1.0, %v553_v55 }
 0x263   :  { %v555_v39 = vmul.f32 %v5428_v54, %v554_v58 }
 0x265   :  { %v556_v1 = vadd.f32 %v5428_v54, %v555_v39 }
 0x267   :  { %v560_v6 = vsel %vm559_vm9, %v5428_v54, %v556_v1 }
 0x268   :  { %v565_v10 = vsel %vm562_vm11, %v564_v5, %v560_v6 }
 0x269   :  { %v566_v12 = vmul.f32 2.0, %v565_v10 }
 0x26b   :  { %v5163_v13 = vadd.f32 -1.0, %v566_v12 }
 0x26d   :  { %v569_v18 = vmul.f32 %v5163_v13, %v568_v14 }
 0x26f   :  { %v6067_v22 = vadd.f32 %v572_v19, %v569_v18 }
 0x271   :  { %v577_v23 = vrot.slane %v6067_v22, 4  ;;  %575 = vst.msk [vmem:[#allocation2] sm:$0x30] %vm574_vm15, %v6067_v22 }
 0x273   :  { %5164 = vmatmul.msk.f32.vlgmr.msra.gmra.mxu2 %vm159_vm13, %v577_v23  ;;  %5165 = vmatmul.msk.f32.vlgmr.msra.gmra.mxu3 %vm159_vm13, %v577_v23 }
 0x274   :  { %5166 = vmatmul.msk.f32.vlgmr.msrb.gmra.mxu0 %vm159_vm13, %v577_v23  ;;  %908 = vmatpush.msra.mxu2 %v5930_v15 }
 0x275   :  { %1010 = vmatpush.msra.mxu3 %v5882_v2  ;;  %1030 = vmatpush.msrb.mxu0 %v5906_v8 }
 0x276   :  { %909 = vmatpush.msra.mxu2 %v5935_v16 }
 0x277   :  { %1011 = vmatpush.msra.mxu3 %v5888_v3  ;;  %1031 = vmatpush.msrb.mxu0 %v5915_v11 }
 0x2f1   :  { %v637_v45 = vpop.f32.mrf.mxu0 }
 0x2f6   :  { %v597_v61 = vpop.f32.mrf.mxu2  ;;  %v617_v30 = vpop.f32.mrf.mxu3 }
 0x2f7   :  { %v641_v24 = vrot.slane %v597_v61, 2  ;;  %v664_v31 = vrot.slane %v617_v30, 2 }
 0x2f9   :  { %v643_v26 = vadd.f32 %v641_v24, %v5982_v25  ;;  %v666_v35 = vadd.f32 %v664_v31, %v5997_v33  ;;  %v638_v25 = vadd.f32 %v6003_v42, %v637_v45 }
 0x2fb   :  { %v644_v28 = vsub.f32 0.0, %v643_v26  ;;  %v667_v37 = vsub.f32 0.0, %v666_v35  ;;  %v687_v54 = vrot.slane %v638_v25, 2 }
 0x2fd   :  { %v645_v29 = vmul.f32 1.442695, %v644_v28  ;;  %v668_v38 = vmul.f32 1.442695, %v667_v37 }
 0x2ff   :  { %5429 = vpow2.f32 %v645_v29 }
 0x305   :  { %v5430_v34 = vpop.eup %5429 }
 0x306   :  { %v647_v36 = vadd.f32 1.0, %v5430_v34 }
 0x308   :  { %5431 = vrcp.f32 %v647_v36  ;;  %v659_v47 = vand.u32 2147483648, %v647_v36  ;;  %v657_v50 = vand.u32 2147483647, %v647_v36  ;;  %vm653_vm2 = vweird.f32 %v647_v36 }
 0x309   :  { %5433 = vpow2.f32 %v668_v38 }
 0x30a   :  { %v660_v52 = vor.u32 1.1754944e-38, %v659_v47  ;;  %vm658_vm4 = vcmp.eq.f32.partialorder %v657_v50, 8.507059e+37 }
 0x30e   :  { %v5432_v43 = vpop.eup %5431 }
 0x30f   :  { %v649_v44 = vmul.f32 %v5432_v43, %v647_v36  ;;  %vm654_vm1 = vweird.f32 %v5432_v43  ;;  %v5434_v33 = vpop.eup %5433  ;;  %v713_v36 = vrot.slane %v6067_v22, 6  ;;  %v65_v22 = vadd.f32 %v5973_v20, %v6037_v40 }
 0x310   :  { %vm655_vm3 = vmor %vm653_vm2, %vm654_vm1  ;;  %v670_v59 = vadd.f32 1.0, %v5434_v33  ;;  %vm717_vm2 = vcmask 130054  }
 0x311   :  { %v650_v46 = vsub.f32 1.0, %v649_v44  ;;  %v6104_v45 = vadd.f32 %v5978_v21, %v65_v22  ;;  %v5783_v22 = vld [vmem:[%s7131_s3 + $0x28] sm:$0xff] }
 0x312   :  { %5435 = vrcp.f32 %v670_v59  ;;  %vm676_vm6 = vweird.f32 %v670_v59  ;;  %v682_v14 = vand.u32 2147483648, %v670_v59 }
 0x313   :  { %v651_v49 = vmul.f32 %v5432_v43, %v650_v46 }
 0x314   :  { %v683_v24 = vor.u32 1.1754944e-38, %v682_v14 }
 0x315   :  { %v652_v51 = vadd.f32 %v5432_v43, %v651_v49 }
 0x317   :  { %v656_v55 = vsel %vm655_vm3, %v5432_v43, %v652_v51 }
 0x318   :  { %v661_v57 = vsel %vm658_vm4, %v660_v52, %v656_v55  ;;  %v5436_v63 = vpop.eup %5435 }
 0x319   :  { %v689_v58 = vmul.f32 %v687_v54, %v661_v57  ;;  %v672_v1 = vmul.f32 %v5436_v63, %v670_v59  ;;  %vm677_vm5 = vweird.f32 %v5436_v63 }
 0x31a   :  { %vm678_vm8 = vmor %vm676_vm6, %vm677_vm5 }
 0x31b   :  { %v690_v60 = vadd.f32 %v689_v58, %v6018_v56  ;;  %v673_v5 = vsub.f32 1.0, %v672_v1  ;;  %v680_v56 = vand.u32 2147483647, %v670_v59 }
 0x31d   :  { %v691_v62 = vmul.f32 -2.0, %v690_v60  ;;  %v674_v6 = vmul.f32 %v5436_v63, %v673_v5  ;;  %vm681_vm11 = vcmp.eq.f32.partialorder %v680_v56, 8.507059e+37  ;;  %v6116_v60 = vadd.f32 %v6008_v48, %v6043_v53 }
 0x31f   :  { %v692_v39 = vmul.f32 1.442695, %v691_v62  ;;  %v675_v12 = vadd.f32 %v5436_v63, %v674_v6 }
 0x321   :  { %5437 = vpow2.f32 %v692_v39  ;;  %v679_v23 = vsel %vm678_vm8, %v5436_v63, %v675_v12 }
 0x322   :  { %v684_v29 = vsel %vm681_vm11, %v683_v24, %v679_v23 }
 0x323   :  { %v711_v35 = vsub.f32 1.0, %v684_v29  ;;  %v715_v38 = vmul.f32 %v713_v36, %v684_v29 }
 0x327   :  { %v5438_v0 = vpop.eup %5437 }
 0x328   :  { %v694_v4 = vadd.f32 1.0, %v5438_v0 }
 0x32a   :  { %5439 = vrcp.f32 %v694_v4  ;;  %v706_v17 = vand.u32 2147483648, %v694_v4  ;;  %v704_v19 = vand.u32 2147483647, %v694_v4  ;;  %vm700_vm9 = vweird.f32 %v694_v4 }
 0x32c   :  { %v707_v26 = vor.u32 1.1754944e-38, %v706_v17  ;;  %vm705_vm1 = vcmp.eq.f32.partialorder %v704_v19, 8.507059e+37 }
 0x330   :  { %v5440_v7 = vpop.eup %5439 }
 0x331   :  { %v696_v10 = vmul.f32 %v5440_v7, %v694_v4  ;;  %vm701_vm7 = vweird.f32 %v5440_v7 }
 0x332   :  { %vm702_vm10 = vmor %vm700_vm9, %vm701_vm7 }
 0x333   :  { %v697_v13 = vsub.f32 1.0, %v696_v10 }
 0x335   :  { %v698_v18 = vmul.f32 %v5440_v7, %v697_v13 }
 0x337   :  { %v699_v61 = vadd.f32 %v5440_v7, %v698_v18 }
 0x339   :  { %v703_v28 = vsel %vm702_vm10, %v5440_v7, %v699_v61 }
 0x33a   :  { %v708_v30 = vsel %vm705_vm1, %v707_v26, %v703_v28 }
 0x33b   :  { %v709_v31 = vmul.f32 2.0, %v708_v30 }
 0x33d   :  { %v5167_v34 = vadd.f32 -1.0, %v709_v31 }
 0x33f   :  { %v712_v37 = vmul.f32 %v5167_v34, %v711_v35 }
 0x341   :  { %v716_v43 = vadd.f32 %v715_v38, %v712_v37 }
 0x343   :  { %v6086_v44 = vrot.slane %v716_v43, 6  ;;  %718 = vst.msk [vmem:[#allocation2] sm:$0xc0] %vm717_vm2, %v716_v43 }
 0x345   :  { %5168 = vmatmul.msk.f32.vlgmr.msrb.gmra.mxu1 %vm159_vm13, %v6086_v44  ;;  %5169 = vmatmul.msk.f32.vlgmr.msrb.gmra.mxu2 %vm159_vm13, %v6086_v44 }
 0x346   :  { %5170 = vmatmul.msk.f32.vlgmr.msrb.gmra.mxu3 %vm159_vm13, %v6086_v44  ;;  %1050 = vmatpush.msrb.mxu1 %v5930_v15 }
 0x347   :  { %1152 = vmatpush.msrb.mxu2 %v5882_v2  ;;  %1172 = vmatpush.msrb.mxu3 %v5906_v8  ;;  %v104_v2 = vadd.f32 %v5988_v27, %v6039_v41 }
 0x348   :  { %1051 = vmatpush.msrb.mxu1 %v5935_v16 }
 0x349   :  { %1153 = vmatpush.msrb.mxu2 %v5888_v3  ;;  %1173 = vmatpush.msrb.mxu3 %v5915_v11  ;;  %v6110_v3 = vadd.f32 %v5994_v32, %v104_v2 }
 0x3c2   :  { %v740_v46 = vpop.f32.mrf.mxu1 }
 0x3c3   :  { %v783_v47 = vadd.f32 %v740_v46, %v6104_v45 }
 0x3c5   :  { %v784_v15 = vsub.f32 0.0, %v783_v47 }
 0x3c7   :  { %v785_v25 = vmul.f32 1.442695, %v784_v15 }
 0x3c8   :  { %v760_v8 = vpop.f32.mrf.mxu2 }
 0x3c9   :  { %5441 = vpow2.f32 %v785_v25  ;;  %v803_v16 = vadd.f32 %v760_v8, %v6110_v3  ;;  %v780_v41 = vpop.f32.mrf.mxu3 }
 0x3ca   :  { %v781_v57 = vadd.f32 %v6003_v42, %v780_v41 }
 0x3cb   :  { %v804_v21 = vsub.f32 0.0, %v803_v16 }
 0x3cd   :  { %v805_v40 = vmul.f32 1.442695, %v804_v21 }
 0x3cf   :  { %v5442_v11 = vpop.eup %5441 }
 0x3d0   :  { %v787_v20 = vadd.f32 1.0, %v5442_v11 }
 0x3d2   :  { %5443 = vrcp.f32 %v787_v20  ;;  %v799_v52 = vand.u32 2147483648, %v787_v20  ;;  %v797_v27 = vand.u32 2147483647, %v787_v20  ;;  %vm793_vm4 = vweird.f32 %v787_v20 }
 0x3d3   :  { %5445 = vpow2.f32 %v805_v40 }
 0x3d4   :  { %v800_v32 = vor.u32 1.1754944e-38, %v799_v52  ;;  %vm798_vm6 = vcmp.eq.f32.partialorder %v797_v27, 8.507059e+37 }
 0x3d8   :  { %v5444_v49 = vpop.eup %5443 }
 0x3d9   :  { %v789_v50 = vmul.f32 %v5444_v49, %v787_v20  ;;  %vm794_vm3 = vweird.f32 %v5444_v49  ;;  %v5446_v55 = vpop.eup %5445 }
 0x3da   :  { %vm795_vm5 = vmor %vm793_vm4, %vm794_vm3  ;;  %v807_v39 = vadd.f32 1.0, %v5446_v55 }
 0x3db   :  { %v790_v51 = vsub.f32 1.0, %v789_v50 }
 0x3dc   :  { %5447 = vrcp.f32 %v807_v39  ;;  %vm813_vm8 = vweird.f32 %v807_v39  ;;  %v819_v17 = vand.u32 2147483648, %v807_v39  ;;  %v817_v18 = vand.u32 2147483647, %v807_v39 }
 0x3dd   :  { %v791_v33 = vmul.f32 %v5444_v49, %v790_v51 }
 0x3de   :  { %v820_v26 = vor.u32 1.1754944e-38, %v819_v17  ;;  %vm818_vm3 = vcmp.eq.f32.partialorder %v817_v18, 8.507059e+37 }
 0x3df   :  { %v792_v54 = vadd.f32 %v5444_v49, %v791_v33 }
 0x3e1   :  { %v796_v58 = vsel %vm795_vm5, %v5444_v49, %v792_v54 }
 0x3e2   :  { %v801_v59 = vsel %vm798_vm6, %v800_v32, %v796_v58  ;;  %v5448_v4 = vpop.eup %5447 }
 0x3e3   :  { %v823_v62 = vmul.f32 %v801_v59, %v781_v57  ;;  %v809_v6 = vmul.f32 %v5448_v4, %v807_v39  ;;  %vm814_vm7 = vweird.f32 %v5448_v4 }
 0x3e4   :  { %vm815_vm10 = vmor %vm813_vm8, %vm814_vm7 }
 0x3e5   :  { %v824_v63 = vadd.f32 %v823_v62, %v6116_v60  ;;  %v810_v10 = vsub.f32 1.0, %v809_v6 }
 0x3e7   :  { %v825_v0 = vmul.f32 -2.0, %v824_v63  ;;  %v811_v12 = vmul.f32 %v5448_v4, %v810_v10 }
 0x3e9   :  { %v826_v1 = vmul.f32 1.442695, %v825_v0  ;;  %v812_v53 = vadd.f32 %v5448_v4, %v811_v12 }
 0x3eb   :  { %5449 = vpow2.f32 %v826_v1  ;;  %v816_v61 = vsel %vm815_vm10, %v5448_v4, %v812_v53 }
 0x3ec   :  { %v821_v30 = vsel %vm818_vm3, %v820_v26, %v816_v61 }
 0x3ed   :  { %v845_v36 = vsub.f32 1.0, %v821_v30  ;;  %v848_v38 = vmul.f32 %v821_v30, %v6086_v44  ;;  %v5784_v44 = vld [vmem:[%s7131_s3 + $0x20] sm:$0xff] }
 0x3f1   :  { %v5450_v5 = vpop.eup %5449 }
 0x3f2   :  { %v828_v7 = vadd.f32 1.0, %v5450_v5 }
 0x3f4   :  { %5451 = vrcp.f32 %v828_v7  ;;  %v840_v56 = vand.u32 2147483648, %v828_v7  ;;  %v838_v23 = vand.u32 2147483647, %v828_v7  ;;  %vm834_vm11 = vweird.f32 %v828_v7 }
 0x3f6   :  { %v841_v28 = vor.u32 1.1754944e-38, %v840_v56  ;;  %vm839_vm4 = vcmp.eq.f32.partialorder %v838_v23, 8.507059e+37 }
 0x3fa   :  { %v5452_v13 = vpop.eup %5451 }
 0x3fb   :  { %v830_v14 = vmul.f32 %v5452_v13, %v828_v7  ;;  %vm835_vm9 = vweird.f32 %v5452_v13 }
 0x3fc   :  { %vm836_vm1 = vmor %vm834_vm11, %vm835_vm9 }
 0x3fd   :  { %v831_v48 = vsub.f32 1.0, %v830_v14 }
 0x3ff   :  { %v832_v19 = vmul.f32 %v5452_v13, %v831_v48 }
 0x401   :  { %v833_v24 = vadd.f32 %v5452_v13, %v832_v19 }
 0x403   :  { %v837_v29 = vsel %vm836_vm1, %v5452_v13, %v833_v24 }
 0x404   :  { %v842_v31 = vsel %vm839_vm4, %v841_v28, %v837_v29 }
 0x405   :  { %v843_v34 = vmul.f32 2.0, %v842_v31 }
 0x407   :  { %v5171_v35 = vadd.f32 -1.0, %v843_v34 }
 0x409   :  { %v846_v37 = vmul.f32 %v5171_v35, %v845_v36 }
 0x40b   :  { %v6120_v43 = vadd.f32 %v848_v38, %v846_v37 }
 0x40d   :  { %5172 = vmatmul.msk.f32.vlgmr.msra.gmra.mxu0 %vm159_vm13, %v6120_v43  ;;  %5173 = vmatmul.msk.f32.vlgmr.msra.gmra.mxu1 %vm159_vm13, %v6120_v43  ;;  %850 = vst.msk [vmem:[#allocation2 + $0x8] sm:$0x3] %vm289_vm14, %v6120_v43  ;;  %v987_v38 = vrot.slane %v6120_v43, 6 }
 0x40e   :  { %5174 = vmatmul.msk.f32.vlgmr.msra.gmra.mxu2 %vm159_vm13, %v6120_v43  ;;  %1192 = vmatpush.msra.mxu0 %v5783_v22 }
 0x410   :  { %1193 = vmatpush.msra.mxu0 %v5784_v44 }
 0x48a   :  { %v871_v46 = vpop.f32.mrf.mxu0  ;;  %v891_v8 = vpop.f32.mrf.mxu1 }
 0x48b   :  { %v915_v47 = vrot.slane %v871_v46, 6  ;;  %v938_v11 = vrot.slane %v891_v8, 6 }
 0x48d   :  { %v917_v15 = vadd.f32 %v915_v47, %v6104_v45  ;;  %v940_v20 = vadd.f32 %v938_v11, %v6110_v3 }
 0x48f   :  { %v918_v25 = vsub.f32 0.0, %v917_v15  ;;  %v941_v40 = vsub.f32 0.0, %v940_v20 }
 0x491   :  { %v919_v2 = vmul.f32 1.442695, %v918_v25  ;;  %v942_v49 = vmul.f32 1.442695, %v941_v40  ;;  %v911_v52 = vpop.f32.mrf.mxu2 }
 0x492   :  { %v912_v41 = vadd.f32 %v6003_v42, %v911_v52  ;;  %v5185_v52 = vld [vmem:[%s7129_s1 + $0x68] sm:$0xff] }
 0x493   :  { %5453 = vpow2.f32 %v919_v2 }
 0x494   :  { %v961_v62 = vrot.slane %v912_v41, 6  ;;  %v5184_v41 = vld [vmem:[%s7129_s1 + $0x60] sm:$0xff] }
 0x499   :  { %v5454_v16 = vpop.eup %5453 }
 0x49a   :  { %v921_v21 = vadd.f32 1.0, %v5454_v16 }
 0x49c   :  { %5455 = vrcp.f32 %v921_v21  ;;  %v933_v27 = vand.u32 2147483648, %v921_v21  ;;  %v931_v32 = vand.u32 2147483647, %v921_v21  ;;  %vm927_vm6 = vweird.f32 %v921_v21 }
 0x49d   :  { %5457 = vpow2.f32 %v942_v49 }
 0x49e   :  { %v934_v57 = vor.u32 1.1754944e-38, %v933_v27  ;;  %vm932_vm8 = vcmp.eq.f32.partialorder %v931_v32, 8.507059e+37 }
 0x4a2   :  { %v5456_v50 = vpop.eup %5455 }
 0x4a3   :  { %v923_v51 = vmul.f32 %v5456_v50, %v921_v21  ;;  %vm928_vm5 = vweird.f32 %v5456_v50  ;;  %v5458_v58 = vpop.eup %5457 }
 0x4a4   :  { %vm929_vm7 = vmor %vm927_vm6, %vm928_vm5  ;;  %v944_v0 = vadd.f32 1.0, %v5458_v58  ;;  %v6166_v58 = vld [vmem:[%s7128_s0] sm:$0xff] }
 0x4a5   :  { %v924_v33 = vsub.f32 1.0, %v923_v51  ;;  %v5186_v51 = vld [vmem:[%s7129_s1 + $0x70] sm:$0xff] }
 0x4a6   :  { %5459 = vrcp.f32 %v944_v0  ;;  %vm950_vm10 = vweird.f32 %v944_v0  ;;  %v956_v56 = vand.u32 2147483648, %v944_v0  ;;  %v954_v19 = vand.u32 2147483647, %v944_v0 }
 0x4a7   :  { %v925_v54 = vmul.f32 %v5456_v50, %v924_v33 }
 0x4a8   :  { %v957_v28 = vor.u32 1.1754944e-38, %v956_v56  ;;  %vm955_vm5 = vcmp.eq.f32.partialorder %v954_v19, 8.507059e+37  ;;  %v6192_v56 = vld [vmem:[%s7131_s3 + $0x30] sm:$0xff] }
 0x4a9   :  { %v926_v55 = vadd.f32 %v5456_v50, %v925_v54 }
 0x4ab   :  { %v930_v59 = vsel %vm929_vm7, %v5456_v50, %v926_v55  ;;  %v5187_v50 = vld [vmem:[%s7129_s1 + $0x78] sm:$0xff] }
 0x4ac   :  { %v935_v39 = vsel %vm932_vm8, %v934_v57, %v930_v59  ;;  %v5460_v42 = vpop.eup %5459  ;;  %1298 = vmatpush.msra.mxu1 %v5187_v50  ;;  %v6173_v59 = vld [vmem:[%s7132_s4 + $0x2] ss:$0 sm:$0xff] }
 0x4ad   :  { %v963_v63 = vmul.f32 %v961_v62, %v935_v39  ;;  %v946_v7 = vmul.f32 %v5460_v42, %v944_v0  ;;  %vm951_vm9 = vweird.f32 %v5460_v42 }
 0x4ae   :  { %vm952_vm1 = vmor %vm950_vm10, %vm951_vm9  ;;  %1299 = vmatpush.msra.mxu1 %v5186_v51 }
 0x4af   :  { %v964_v1 = vadd.f32 %v963_v63, %v6116_v60  ;;  %v947_v12 = vsub.f32 1.0, %v946_v7 }
 0x4b0   :  { %1300 = vmatpush.msra.mxu1 %v5185_v52 }
 0x4b1   :  { %v965_v4 = vmul.f32 -2.0, %v964_v1  ;;  %v948_v13 = vmul.f32 %v5460_v42, %v947_v12  ;;  %v6179_v12 = vld [vmem:[%s7128_s0 + $0x8] sm:$0xff] }
 0x4b2   :  { %1301 = vmatpush.msra.mxu1 %v5184_v41 }
 0x4b3   :  { %v966_v5 = vmul.f32 1.442695, %v965_v4  ;;  %v949_v53 = vadd.f32 %v5460_v42, %v948_v13 }
 0x4b5   :  { %5461 = vpow2.f32 %v966_v5  ;;  %v953_v26 = vsel %vm952_vm1, %v5460_v42, %v949_v53 }
 0x4b6   :  { %v958_v31 = vsel %vm955_vm5, %v957_v28, %v953_v26  ;;  %v5194_v26 = vld [vmem:[%s7129_s1 + $0x90] sm:$0xff]  ;;  %v5193_v28 = vld [vmem:[%s7129_s1 + $0x88] sm:$0xff] }
 0x4b7   :  { %v985_v37 = vsub.f32 1.0, %v958_v31  ;;  %v989_v44 = vmul.f32 %v987_v38, %v958_v31  ;;  %v5202_v31 = vld [vmem:[%s7129_s1 + $0xb0] sm:$0xff] }
 0x4bb   :  { %v5462_v6 = vpop.eup %5461 }
 0x4bc   :  { %v968_v10 = vadd.f32 1.0, %v5462_v6 }
 0x4be   :  { %5463 = vrcp.f32 %v968_v10  ;;  %v980_v18 = vand.u32 2147483648, %v968_v10  ;;  %v978_v61 = vand.u32 2147483647, %v968_v10  ;;  %vm974_vm3 = vweird.f32 %v968_v10 }
 0x4c0   :  { %v981_v29 = vor.u32 1.1754944e-38, %v980_v18  ;;  %vm979_vm6 = vcmp.eq.f32.partialorder %v978_v61, 8.507059e+37  ;;  %v5195_v18 = vld [vmem:[%s7129_s1 + $0x98] sm:$0xff] }
 0x4c1   :  { %1338 = vmatpush.msra.mxu2 %v5195_v18 }
 0x4c3   :  { %1339 = vmatpush.msra.mxu2 %v5194_v26  ;;  %v5375_v26 = vld [vmem:[%s7130_s2 + $0x4] ss:$0 sm:$0xff] }
 0x4c4   :  { %v5464_v14 = vpop.eup %5463 }
 0x4c5   :  { %v970_v48 = vmul.f32 %v5464_v14, %v968_v10  ;;  %vm975_vm11 = vweird.f32 %v5464_v14  ;;  %1340 = vmatpush.msra.mxu2 %v5193_v28 }
 0x4c6   :  { %vm976_vm4 = vmor %vm974_vm3, %vm975_vm11 }
 0x4c7   :  { %v971_v17 = vsub.f32 1.0, %v970_v48 }
 0x4c9   :  { %v972_v23 = vmul.f32 %v5464_v14, %v971_v17  ;;  %v6187_v17 = vld [vmem:[%s7131_s3 + $0x38] sm:$0xff] }
 0x4cb   :  { %v973_v24 = vadd.f32 %v5464_v14, %v972_v23 }
 0x4cd   :  { %v977_v30 = vsel %vm976_vm4, %v5464_v14, %v973_v24 }
 0x4ce   :  { %v982_v34 = vsel %vm979_vm6, %v981_v29, %v977_v30  ;;  %v5203_v30 = vld [vmem:[%s7129_s1 + $0xb8] sm:$0xff] }
 0x4cf   :  { %v983_v35 = vmul.f32 2.0, %v982_v34  ;;  %v6214_v34 = vld [vmem:[%s7131_s3 + $0x58] sm:$0xff] }
 0x4d1   :  { %v5175_v36 = vadd.f32 -1.0, %v983_v35 }
 0x4d3   :  { %v986_v22 = vmul.f32 %v5175_v36, %v985_v37  ;;  %v5192_v36 = vld [vmem:[%s7129_s1 + $0x80] sm:$0xff] }
 0x4d4   :  { %1341 = vmatpush.msra.mxu2 %v5192_v36 }
 0x4d5   :  { %v6141_v46 = vadd.f32 %v989_v44, %v986_v22 }
 0x4d7   :  { %v993_v47 = vrot.slane %v6141_v46, 2  ;;  %991 = vst.msk [vmem:[#allocation2 + $0x8] sm:$0xc] %vm431_vm12, %v6141_v46 }
 0x4d9   :  { %5176 = vmatmul.msk.f32.vlgmr.msra.gmra.mxu3 %vm159_vm13, %v993_v47  ;;  %5177 = vmatmul.msk.f32.vlgmr.msrb.gmra.mxu0 %vm159_vm13, %v993_v47 }
 0x4da   :  { %5178 = vmatmul.msk.f32.vlgmr.msrb.gmra.mxu1 %vm159_vm13, %v993_v47  ;;  %1417 = vmatpush.msrb.mxu0 %v6187_v17 }
 0x4db   :  { %1378 = vmatpush.msra.mxu3 %v5203_v30  ;;  %1457 = vmatpush.msrb.mxu1 %v6214_v34 }
 0x4dc   :  { %1418 = vmatpush.msrb.mxu0 %v6192_v56 }
 0x4dd   :  { %1379 = vmatpush.msra.mxu3 %v5202_v31  ;;  %v5376_v31 = vld [vmem:[%s7132_s4 + $0x4] ss:$0 sm:$0xff] }
 0x4e2   :  { %5189 = vmatmul.msk.f32.vlgmr.msra.gmra.mxu1 %vm37_vm0, %v6166_v58 }
 0x4ea   :  { %5190 = vmatmul.msk.f32.gmra.mxu1 %vm37_vm0, %v6179_v12 }
 0x556   :  { %v1033_v11 = vpop.f32.mrf.mxu0 }
 0x557   :  { %v1080_v16 = vrot.slane %v1033_v11, 4  ;;  %v1053_v32 = vpop.f32.mrf.mxu1 }
 0x558   :  { %v1054_v62 = vadd.f32 %v6173_v59, %v1053_v32  ;;  %v1129_v32 = vrot.slane %v6141_v46, 6  ;;  %v5373_v46 = vld [vmem:[%s7130_s2 + $0x3] ss:$0 sm:$0xff] }
 0x559   :  { %v1082_v21 = vadd.f32 %v1080_v16, %v6110_v3  ;;  %v6233_v16 = vld [vmem:[%s7131_s3 + $0x50] sm:$0xff] }
 0x55a   :  { %v1103_v5 = vrot.slane %v1054_v62, 4  ;;  %1458 = vmatpush.msrb.mxu1 %v6233_v16 }
 0x55b   :  { %v1083_v49 = vsub.f32 0.0, %v1082_v21  ;;  %1459 = vmatmul.f32.vlgmr.msrb.gmra.mxu1 %v5827_v9 }
 0x55c   :  { %v1013_v15 = vpop.f32.mrf.mxu3  ;;  %1707 = vmatpush.msra.mxu1 %v6187_v17 }
 0x55d   :  { %v1057_v25 = vrot.slane %v1013_v15, 4  ;;  %v1084_v33 = vmul.f32 1.442695, %v1083_v49 }
 0x55e   :  { %1708 = vmatpush.msra.mxu1 %v6192_v56 }
 0x55f   :  { %v1059_v2 = vadd.f32 %v1057_v25, %v6104_v45 }
 0x561   :  { %v1060_v43 = vsub.f32 0.0, %v1059_v2 }
 0x563   :  { %v1061_v8 = vmul.f32 1.442695, %v1060_v43  ;;  %v5201_v43 = vld [vmem:[%s7129_s1 + $0xa8] sm:$0xff] }
 0x564   :  { %1380 = vmatpush.msra.mxu3 %v5201_v43 }
 0x565   :  { %5465 = vpow2.f32 %v1061_v8  ;;  %v5200_v8 = vld [vmem:[%s7129_s1 + $0xa0] sm:$0xff] }
 0x566   :  { %1381 = vmatpush.msra.mxu3 %v5200_v8 }
 0x56b   :  { %v5466_v20 = vpop.eup %5465 }
 0x56c   :  { %v1063_v40 = vadd.f32 1.0, %v5466_v20 }
 0x56e   :  { %5467 = vrcp.f32 %v1063_v40  ;;  %v1075_v57 = vand.u32 2147483648, %v1063_v40  ;;  %v1073_v63 = vand.u32 2147483647, %v1063_v40  ;;  %vm1069_vm8 = vweird.f32 %v1063_v40 }
 0x56f   :  { %5469 = vpow2.f32 %v1084_v33 }
 0x570   :  { %v1076_v1 = vor.u32 1.1754944e-38, %v1075_v57  ;;  %vm1074_vm10 = vcmp.eq.f32.partialorder %v1073_v63, 8.507059e+37 }
 0x574   :  { %v5468_v27 = vpop.eup %5467 }
 0x575   :  { %v1065_v54 = vmul.f32 %v5468_v27, %v1063_v40  ;;  %vm1070_vm7 = vweird.f32 %v5468_v27  ;;  %v5470_v4 = vpop.eup %5469 }
 0x576   :  { %vm1071_vm9 = vmor %vm1069_vm8, %vm1070_vm7  ;;  %v1086_v10 = vadd.f32 1.0, %v5470_v4 }
 0x577   :  { %v1066_v55 = vsub.f32 1.0, %v1065_v54 }
 0x578   :  { %5471 = vrcp.f32 %v1086_v10  ;;  %vm1092_vm1 = vweird.f32 %v1086_v10  ;;  %v1098_v44 = vand.u32 2147483648, %v1086_v10  ;;  %v1096_v15 = vand.u32 2147483647, %v1086_v10 }
 0x579   :  { %v1067_v39 = vmul.f32 %v5468_v27, %v1066_v55  ;;  %v6251_v55 = vld [vmem:[%s7131_s3 + $0x40] sm:$0xff] }
 0x57a   :  { %v1099_v40 = vor.u32 1.1754944e-38, %v1098_v44  ;;  %vm1097_vm7 = vcmp.eq.f32.partialorder %v1096_v15, 8.507059e+37 }
 0x57b   :  { %v1068_v0 = vadd.f32 %v5468_v27, %v1067_v39 }
 0x57d   :  { %v1072_v42 = vsel %vm1071_vm9, %v5468_v27, %v1068_v0  ;;  %v6243_v27 = vld [vmem:[%s7131_s3 + $0x48] sm:$0xff]  ;;  %v1303_v0 = vpop.f32.mrf.mxu1 }
 0x57e   :  { %v1077_v6 = vsel %vm1074_vm10, %v1076_v1, %v1072_v42  ;;  %v5472_v53 = vpop.eup %5471  ;;  %1873 = vmatpush.msrb.mxu1 %v6243_v27  ;;  %v1304_v1 = vadd.f32 %v5373_v46, %v1303_v0 }
 0x57f   :  { %v1105_v7 = vmul.f32 %v1103_v5, %v1077_v6  ;;  %v1088_v23 = vmul.f32 %v5472_v53, %v1086_v10  ;;  %vm1093_vm11 = vweird.f32 %v5472_v53 }
 0x580   :  { %vm6226_vm4 = vmor %vm1092_vm1, %vm1093_vm11  ;;  %1874 = vmatpush.msrb.mxu1 %v6251_v55 }
 0x581   :  { %v1106_v13 = vadd.f32 %v1105_v7, %v6116_v60  ;;  %v1089_v24 = vsub.f32 1.0, %v1088_v23 }
 0x583   :  { %v1107_v14 = vmul.f32 -2.0, %v1106_v13  ;;  %v1090_v29 = vmul.f32 %v5472_v53, %v1089_v24 }
 0x585   :  { %v1108_v48 = vmul.f32 1.442695, %v1107_v14  ;;  %v1091_v38 = vadd.f32 %v5472_v53, %v1090_v29  ;;  %v1306_v42 = vpop.f32.mrf.mxu1 }
 0x586   :  { %v1307_v6 = vadd.f32 %v5373_v46, %v1306_v42 }
 0x587   :  { %5473 = vpow2.f32 %v1108_v48  ;;  %v1095_v20 = vsel %vm6226_vm4, %v5472_v53, %v1091_v38 }
 0x588   :  { %v1100_v51 = vsel %vm1097_vm7, %v1099_v40, %v1095_v20 }
 0x589   :  { %v1127_v54 = vsub.f32 1.0, %v1100_v51  ;;  %v1131_v62 = vmul.f32 %v1129_v32, %v1100_v51 }
 0x58d   :  { %v5474_v19 = vpop.eup %5473 }
 0x58e   :  { %v1110_v61 = vadd.f32 1.0, %v5474_v19  ;;  %v6300_v19 = vld [vmem:[%s7130_s2 + $0x5] ss:$0 sm:$0xff] }
 0x590   :  { %5475 = vrcp.f32 %v1110_v61  ;;  %v1122_v47 = vand.u32 2147483648, %v1110_v61  ;;  %v1120_v2 = vand.u32 2147483647, %v1110_v61  ;;  %vm1116_vm5 = vweird.f32 %v1110_v61 }
 0x592   :  { %v1123_v49 = vor.u32 1.1754944e-38, %v1122_v47  ;;  %vm1121_vm8 = vcmp.eq.f32.partialorder %v1120_v2, 8.507059e+37 }
 0x596   :  { %v5476_v35 = vpop.eup %5475 }
 0x597   :  { %v1112_v37 = vmul.f32 %v5476_v35, %v1110_v61  ;;  %vm1117_vm3 = vweird.f32 %v5476_v35 }
 0x598   :  { %vm1118_vm6 = vmor %vm1116_vm5, %vm1117_vm3 }
 0x599   :  { %v1113_v22 = vsub.f32 1.0, %v1112_v37 }
 0x59b   :  { %v1114_v25 = vmul.f32 %v5476_v35, %v1113_v22 }
 0x59d   :  { %v1115_v21 = vadd.f32 %v5476_v35, %v1114_v25 }
 0x59f   :  { %v1119_v50 = vsel %vm1118_vm6, %v5476_v35, %v1115_v21 }
 0x5a0   :  { %v1124_v52 = vsel %vm1121_vm8, %v1123_v49, %v1119_v50 }
 0x5a1   :  { %v1125_v33 = vmul.f32 2.0, %v1124_v52  ;;  %v6321_v52 = vld [vmem:[%s7132_s4 + $0x5] ss:$0 sm:$0xff] }
 0x5a3   :  { %v5179_v41 = vadd.f32 -1.0, %v1125_v33 }
 0x5a5   :  { %v1128_v57 = vmul.f32 %v5179_v41, %v1127_v54 }
 0x5a7   :  { %v6254_v39 = vadd.f32 %v1131_v62, %v1128_v57 }
 0x5a9   :  { %v1135_v63 = vrot.slane %v6254_v39, 4  ;;  %1133 = vst.msk [vmem:[#allocation2 + $0x8] sm:$0x30] %vm574_vm15, %v6254_v39 }
 0x5ab   :  { %5180 = vmatmul.msk.f32.vlgmr.msrb.gmra.mxu2 %vm159_vm13, %v1135_v63  ;;  %5181 = vmatmul.msk.f32.vlgmr.msrb.gmra.mxu3 %vm159_vm13, %v1135_v63 }
 0x5ac   :  { %5182 = vmatmul.msk.f32.vlgmr.msra.gmra.mxu0 %vm159_vm13, %v1135_v63  ;;  %1561 = vmatpush.msrb.mxu2 %v6187_v17 }
 0x5ad   :  { %1437 = vmatpush.msra.mxu0 %v6243_v27  ;;  %1581 = vmatpush.msrb.mxu3 %v6243_v27 }
 0x5ae   :  { %1562 = vmatpush.msrb.mxu2 %v6192_v56 }
 0x5af   :  { %1438 = vmatpush.msra.mxu0 %v6251_v55  ;;  %1582 = vmatpush.msrb.mxu3 %v6251_v55 }
 0x5b3   :  { %5197 = vmatmul.msk.f32.vlgmr.msra.gmra.mxu2 %vm37_vm0, %v6166_v58  ;;  %5205 = vmatmul.msk.f32.vlgmr.msra.gmra.mxu3 %vm37_vm0, %v6166_v58  ;;  %v5374_v58 = vld [vmem:[%s7132_s4 + $0x3] ss:$0 sm:$0xff] }
 0x5b4   :  { %1419 = vmatmul.f32.vlgmr.msrb.gmra.mxu0 %v5827_v9  ;;  %1727 = vmatpush.msra.mxu2 %v6243_v27  ;;  %v6292_v4 = vadd.f32 %v5374_v58, %v1304_v1  ;;  %v6294_v13 = vadd.f32 %v5374_v58, %v1307_v6 }
 0x5b5   :  { %1601 = vmatpush.msrb.mxu0 %v6214_v34  ;;  %1747 = vmatpush.msra.mxu3 %v6214_v34 }
 0x5b6   :  { %1728 = vmatpush.msra.mxu2 %v6251_v55 }
 0x5b7   :  { %1602 = vmatpush.msrb.mxu0 %v6233_v16  ;;  %1748 = vmatpush.msra.mxu3 %v6233_v16 }
 0x5bb   :  { %5198 = vmatmul.msk.f32.gmra.mxu2 %vm37_vm0, %v6179_v12  ;;  %5206 = vmatmul.msk.f32.gmra.mxu3 %vm37_vm0, %v6179_v12 }
 0x5bc   :  { %1439 = vmatmul.f32.vlgmr.msra.gmra.mxu0 %v5827_v9 }
 0x5bd   :  { %1853 = vmatpush.msra.mxu0 %v6187_v17 }
 0x5bf   :  { %1854 = vmatpush.msra.mxu0 %v6192_v56 }
 0x5d8   :  { %v1460_v54 = vpop.f32.mrf.mxu1 }
 0x5d9   :  { %v1461_v0 = vadd.f32 %v6321_v52, %v1460_v54 }
 0x629   :  { %v1195_v5 = vpop.f32.mrf.mxu0 }
 0x62a   :  { %v1196_v57 = vadd.f32 %v6173_v59, %v1195_v5 }
 0x62c   :  { %v1245_v59 = vrot.slane %v1196_v57, 2 }
 0x62e   :  { %v1155_v7 = vpop.f32.mrf.mxu2  ;;  %v1175_v10 = vpop.f32.mrf.mxu3 }
 0x62f   :  { %v1199_v12 = vrot.slane %v1155_v7, 2  ;;  %v1222_v23 = vrot.slane %v1175_v10, 2 }
 0x631   :  { %v1201_v14 = vadd.f32 %v1199_v12, %v6104_v45  ;;  %v1420_v48 = vpop.f32.mrf.mxu0  ;;  %v1224_v36 = vadd.f32 %v1222_v23, %v6110_v3  ;;  %v1510_v23 = vrot.slane %v1461_v0, 2 }
 0x632   :  { %v1464_v53 = vrot.slane %v1420_v48, 2 }
 0x633   :  { %v1202_v18 = vsub.f32 0.0, %v1201_v14  ;;  %v1225_v22 = vsub.f32 0.0, %v1224_v36 }
 0x634   :  { %v1466_v61 = vadd.f32 %v1464_v53, %v6294_v13 }
 0x635   :  { %v1203_v24 = vmul.f32 1.442695, %v1202_v18  ;;  %v1226_v11 = vmul.f32 1.442695, %v1225_v22 }
 0x636   :  { %v1467_v28 = vsub.f32 0.0, %v1466_v61  ;;  %v1343_v29 = vpop.f32.mrf.mxu2  ;;  %v1383_v30 = vpop.f32.mrf.mxu3 }
 0x637   :  { %5477 = vpow2.f32 %v1203_v24  ;;  %v1344_v45 = vadd.f32 %v5375_v26, %v1343_v29  ;;  %v6310_v35 = vadd.f32 %v6300_v19, %v1383_v30 }
 0x638   :  { %v1468_v37 = vmul.f32 1.442695, %v1467_v28 }
 0x639   :  { %v6313_v38 = vadd.f32 %v5376_v31, %v1344_v45  ;;  %v1440_v44 = vpop.f32.mrf.mxu0 }
 0x63a   :  { %5479 = vpow2.f32 %v1468_v37  ;;  %v1487_v43 = vrot.slane %v1440_v44, 2 }
 0x63d   :  { %v5478_v47 = vpop.eup %5477 }
 0x63e   :  { %v1205_v15 = vadd.f32 1.0, %v5478_v47  ;;  %v1346_v25 = vpop.f32.mrf.mxu2  ;;  %v1386_v48 = vpop.f32.mrf.mxu3 }
 0x63f   :  { %v1347_v2 = vadd.f32 %v5375_v26, %v1346_v25  ;;  %v6329_v29 = vadd.f32 %v6300_v19, %v1386_v48 }
 0x640   :  { %v5480_v8 = vpop.eup %5479  ;;  %5481 = vrcp.f32 %v1205_v15  ;;  %v1217_v62 = vand.u32 2147483648, %v1205_v15  ;;  %v1215_v58 = vand.u32 2147483647, %v1205_v15  ;;  %vm1211_vm10 = vweird.f32 %v1205_v15 }
 0x641   :  { %v1470_v20 = vadd.f32 1.0, %v5480_v8  ;;  %v6315_v21 = vadd.f32 %v5376_v31, %v1347_v2 }
 0x642   :  { %v1218_v10 = vor.u32 1.1754944e-38, %v1217_v62  ;;  %vm1216_vm3 = vcmp.eq.f32.partialorder %v1215_v58, 8.507059e+37 }
 0x643   :  { %5483 = vrcp.f32 %v1470_v20  ;;  %v1489_v3 = vadd.f32 %v1487_v43, %v6315_v21  ;;  %v1482_v7 = vand.u32 2147483648, %v1470_v20  ;;  %v1480_v14 = vand.u32 2147483647, %v1470_v20 }
 0x644   :  { %5485 = vpow2.f32 %v1226_v11  ;;  %vm1476_vm4 = vweird.f32 %v1470_v20 }
 0x645   :  { %v1490_v40 = vsub.f32 0.0, %v1489_v3  ;;  %v1483_v26 = vor.u32 1.1754944e-38, %v1482_v7  ;;  %vm1481_vm6 = vcmp.eq.f32.partialorder %v1480_v14, 8.507059e+37 }
 0x646   :  { %v5482_v49 = vpop.eup %5481 }
 0x647   :  { %v1207_v50 = vmul.f32 %v5482_v49, %v1205_v15  ;;  %v1491_v51 = vmul.f32 1.442695, %v1490_v40  ;;  %vm1212_vm9 = vweird.f32 %v5482_v49 }
 0x648   :  { %vm1213_vm11 = vmor %vm1211_vm10, %vm1212_vm9 }
 0x649   :  { %v5484_v33 = vpop.eup %5483  ;;  %v1208_v41 = vsub.f32 1.0, %v1207_v50  ;;  %5487 = vpow2.f32 %v1491_v51 }
 0x64a   :  { %v5486_v32 = vpop.eup %5485  ;;  %v1472_v63 = vmul.f32 %v5484_v33, %v1470_v20  ;;  %vm1477_vm1 = vweird.f32 %v5484_v33 }
 0x64b   :  { %v1209_v46 = vmul.f32 %v5482_v49, %v1208_v41  ;;  %v6325_v6 = vadd.f32 1.0, %v5486_v32  ;;  %vm1478_vm5 = vmor %vm1476_vm4, %vm1477_vm1 }
 0x64c   :  { %v1473_v1 = vsub.f32 1.0, %v1472_v63 }
 0x64d   :  { %v1210_v42 = vadd.f32 %v5482_v49, %v1209_v46  ;;  %5489 = vrcp.f32 %v6325_v6  ;;  %v1240_v51 = vand.u32 2147483648, %v6325_v6  ;;  %vm1234_vm8 = vweird.f32 %v6325_v6 }
 0x64e   :  { %v1474_v12 = vmul.f32 %v5484_v33, %v1473_v1  ;;  %v1238_v57 = vand.u32 2147483647, %v6325_v6 }
 0x64f   :  { %v1214_v5 = vsel %vm1213_vm11, %v5482_v49, %v1210_v42  ;;  %v5488_v61 = vpop.eup %5487  ;;  %v1241_v46 = vor.u32 1.1754944e-38, %v1240_v51 }
 0x650   :  { %v1219_v53 = vsel %vm1216_vm3, %v1218_v10, %v1214_v5  ;;  %v1475_v18 = vadd.f32 %v5484_v33, %v1474_v12  ;;  %v1493_v31 = vadd.f32 1.0, %v5488_v61  ;;  %vm1239_vm3 = vcmp.eq.f32.partialorder %v1238_v57, 8.507059e+37 }
 0x651   :  { %v1247_v24 = vmul.f32 %v1245_v59, %v1219_v53 }
 0x652   :  { %v1479_v28 = vsel %vm1478_vm5, %v5484_v33, %v1475_v18  ;;  %5491 = vrcp.f32 %v1493_v31  ;;  %vm1499_vm10 = vweird.f32 %v1493_v31  ;;  %v1503_v0 = vand.u32 2147483647, %v1493_v31 }
 0x653   :  { %v1248_v30 = vadd.f32 %v1247_v24, %v6116_v60  ;;  %v1484_v45 = vsel %vm1481_vm6, %v1483_v26, %v1479_v28  ;;  %v5490_v47 = vpop.eup %5489  ;;  %v1505_v7 = vand.u32 2147483648, %v1493_v31 }
 0x654   :  { %v1512_v36 = vmul.f32 %v1510_v23, %v1484_v45  ;;  %v1230_v2 = vmul.f32 %v5490_v47, %v6325_v6  ;;  %vm1235_vm7 = vweird.f32 %v5490_v47 }
 0x655   :  { %v1249_v37 = vmul.f32 -2.0, %v1248_v30  ;;  %vm6336_vm9 = vmor %vm1234_vm8, %vm1235_vm7  ;;  %vm1504_vm8 = vcmp.eq.f32.partialorder %v1503_v0, 8.507059e+37  ;;  %v1506_v24 = vor.u32 1.1754944e-38, %v1505_v7 }
 0x656   :  { %v1513_v22 = vadd.f32 %v1512_v36, %v6329_v29  ;;  %v1231_v8 = vsub.f32 1.0, %v1230_v2 }
 0x657   :  { %v1250_v44 = vmul.f32 1.442695, %v1249_v37 }
 0x658   :  { %v1514_v15 = vmul.f32 -2.0, %v1513_v22  ;;  %v5492_v43 = vpop.eup %5491  ;;  %v1232_v40 = vmul.f32 %v5490_v47, %v1231_v8  ;;  %v1271_v22 = vrot.slane %v6254_v39, 6 }
 0x659   :  { %5493 = vpow2.f32 %v1250_v44  ;;  %v1495_v20 = vmul.f32 %v5492_v43, %v1493_v31  ;;  %vm1500_vm11 = vweird.f32 %v5492_v43 }
 0x65a   :  { %v1515_v25 = vmul.f32 1.442695, %v1514_v15  ;;  %v1233_v50 = vadd.f32 %v5490_v47, %v1232_v40  ;;  %vm6344_vm4 = vmor %vm1499_vm10, %vm1500_vm11 }
 0x65b   :  { %v1496_v49 = vsub.f32 1.0, %v1495_v20 }
 0x65c   :  { %5495 = vpow2.f32 %v1515_v25  ;;  %v1237_v63 = vsel %vm6336_vm9, %v5490_v47, %v1233_v50 }
 0x65d   :  { %v1497_v54 = vmul.f32 %v5492_v43, %v1496_v49  ;;  %v1242_v48 = vsel %vm1239_vm3, %v1241_v46, %v1237_v63 }
 0x65e   :  { %v1269_v15 = vsub.f32 1.0, %v1242_v48 }
 0x65f   :  { %v5494_v19 = vpop.eup %5493  ;;  %v1498_v14 = vadd.f32 %v5492_v43, %v1497_v54 }
 0x660   :  { %v1252_v11 = vadd.f32 1.0, %v5494_v19  ;;  %v1273_v19 = vmul.f32 %v1271_v22, %v1242_v48 }
 0x661   :  { %v1502_v28 = vsel %vm6344_vm4, %v5492_v43, %v1498_v14 }
 0x662   :  { %v5496_v60 = vpop.eup %5495  ;;  %5497 = vrcp.f32 %v1252_v11  ;;  %v1264_v42 = vand.u32 2147483648, %v1252_v11  ;;  %v1262_v12 = vand.u32 2147483647, %v1252_v11  ;;  %vm1258_vm5 = vweird.f32 %v1252_v11 }
 0x663   :  { %v1517_v3 = vadd.f32 1.0, %v5496_v60  ;;  %v1507_v44 = vsel %vm1504_vm8, %v1506_v24, %v1502_v28 }
 0x664   :  { %v1265_v61 = vor.u32 1.1754944e-38, %v1264_v42  ;;  %vm1263_vm9 = vcmp.eq.f32.partialorder %v1262_v12, 8.507059e+37  ;;  %v1534_v60 = vsub.f32 1.0, %v1507_v44 }
 0x665   :  { %5499 = vrcp.f32 %v1517_v3  ;;  %v1529_v5 = vand.u32 2147483648, %v1517_v3  ;;  %v1527_v23 = vand.u32 2147483647, %v1517_v3  ;;  %vm1523_vm10 = vweird.f32 %v1517_v3 }
 0x667   :  { %v1530_v31 = vor.u32 1.1754944e-38, %v1529_v5  ;;  %vm1528_vm3 = vcmp.eq.f32.partialorder %v1527_v23, 8.507059e+37 }
 0x668   :  { %v5498_v33 = vpop.eup %5497 }
 0x669   :  { %v1254_v41 = vmul.f32 %v5498_v33, %v1252_v11  ;;  %vm1259_vm1 = vweird.f32 %v5498_v33 }
 0x66a   :  { %vm1260_vm7 = vmor %vm1258_vm5, %vm1259_vm1  ;;  %vm1542_vm1 = vcmask 261254  }
 0x66b   :  { %v5500_v62 = vpop.eup %5499  ;;  %v1255_v58 = vsub.f32 1.0, %v1254_v41 }
 0x66c   :  { %v1519_v1 = vmul.f32 %v5500_v62, %v1517_v3  ;;  %vm1524_vm6 = vweird.f32 %v5500_v62  ;;  %v1536_v3 = vmul.f32 0.0, %v1507_v44 }
 0x66d   :  { %v1256_v10 = vmul.f32 %v5498_v33, %v1255_v58  ;;  %vm1525_vm11 = vmor %vm1523_vm10, %vm1524_vm6 }
 0x66e   :  { %v1520_v59 = vsub.f32 1.0, %v1519_v1 }
 0x66f   :  { %v1257_v53 = vadd.f32 %v5498_v33, %v1256_v10 }
 0x670   :  { %v1521_v18 = vmul.f32 %v5500_v62, %v1520_v59 }
 0x671   :  { %v1261_v26 = vsel %vm1260_vm7, %v5498_v33, %v1257_v53 }
 0x672   :  { %v1522_v30 = vadd.f32 %v5500_v62, %v1521_v18  ;;  %v1266_v45 = vsel %vm1263_vm9, %v1265_v61, %v1261_v26 }
 0x673   :  { %v1267_v36 = vmul.f32 2.0, %v1266_v45 }
 0x674   :  { %v1526_v37 = vsel %vm1525_vm11, %v5500_v62, %v1522_v30 }
 0x675   :  { %v1531_v47 = vsel %vm1528_vm3, %v1530_v31, %v1526_v37  ;;  %v5183_v25 = vadd.f32 -1.0, %v1267_v36 }
 0x676   :  { %v1532_v2 = vmul.f32 2.0, %v1531_v47 }
 0x677   :  { %v1270_v8 = vmul.f32 %v5183_v25, %v1269_v15 }
 0x678   :  { %v5214_v11 = vadd.f32 -1.0, %v1532_v2 }
 0x679   :  { %v1274_v43 = vadd.f32 %v1273_v19, %v1270_v8 }
 0x67a   :  { %v1535_v20 = vmul.f32 %v5214_v11, %v1534_v60 }
 0x67b   :  { %1275 = vst.msk [vmem:[#allocation2 + $0x8] sm:$0xc0] %vm717_vm2, %v1274_v43 }
 0x67c   :  { %v6352_v40 = vadd.f32 %v1536_v3, %v1535_v20 }
 0x67e   :  { %1539 = vrot.lane.b32.xlu2 %v6352_v40, %s5828_s19  ;;  %v1544_v39 = vrot.slane %v6352_v40, 6 }
 0x680   :  { %5215 = vmatmul.msk.f32.vlgmr.msrb.gmra.mxu2 %vm159_vm13, %v1544_v39  ;;  %5216 = vmatmul.msk.f32.vlgmr.msrb.gmra.mxu3 %vm159_vm13, %v1544_v39 }
 0x681   :  { %5217 = vmatmul.msk.f32.vlgmr.msrb.gmra.mxu0 %vm159_vm13, %v1544_v39  ;;  %1893 = vmatpush.msrb.mxu2 %v6214_v34 }
 0x682   :  { %1988 = vmatpush.msrb.mxu3 %v6187_v17  ;;  %2008 = vmatpush.msrb.mxu0 %v6243_v27 }
 0x683   :  { %1894 = vmatpush.msrb.mxu2 %v6233_v16 }
 0x684   :  { %1989 = vmatpush.msrb.mxu3 %v6192_v56  ;;  %2009 = vmatpush.msrb.mxu0 %v6251_v55 }
 0x6d8   :  { %v1540_v49 = vpop.permute.xlu2 %1539 }
 0x6d9   :  { %1543 = vst.msk [vmem:[#allocation2 + $0x8] sm:$0xc0] %vm1542_vm1, %v1540_v49 }
 0x6fe   :  { %v1604_v7 = vpop.f32.mrf.mxu0 }
 0x6ff   :  { %v1605_v14 = vadd.f32 %v6321_v52, %v1604_v7 }
 0x701   :  { %v1654_v18 = vrot.slane %v1605_v14, 4 }
 0x703   :  { %v1564_v50 = vpop.f32.mrf.mxu2  ;;  %v1584_v32 = vpop.f32.mrf.mxu3 }
 0x704   :  { %v1608_v51 = vrot.slane %v1564_v50, 4  ;;  %v1631_v57 = vrot.slane %v1584_v32, 4 }
 0x706   :  { %v1610_v33 = vadd.f32 %v1608_v51, %v6294_v13  ;;  %v1633_v63 = vadd.f32 %v1631_v57, %v6315_v21 }
 0x708   :  { %v1611_v41 = vsub.f32 0.0, %v1610_v33  ;;  %v1634_v58 = vsub.f32 0.0, %v1633_v63 }
 0x70a   :  { %v1612_v54 = vmul.f32 1.442695, %v1611_v41  ;;  %v1635_v0 = vmul.f32 1.442695, %v1634_v58 }
 0x70c   :  { %5501 = vpow2.f32 %v1612_v54 }
 0x712   :  { %v5502_v62 = vpop.eup %5501 }
 0x713   :  { %v1614_v46 = vadd.f32 1.0, %v5502_v62  ;;  %v1680_v62 = vrot.slane %v6352_v40, 2 }
 0x715   :  { %5503 = vrcp.f32 %v1614_v46  ;;  %v1626_v12 = vand.u32 2147483648, %v1614_v46  ;;  %v1624_v6 = vand.u32 2147483647, %v1614_v46  ;;  %vm1620_vm5 = vweird.f32 %v1614_v46 }
 0x716   :  { %5505 = vpow2.f32 %v1635_v0 }
 0x717   :  { %v1627_v48 = vor.u32 1.1754944e-38, %v1626_v12  ;;  %vm1625_vm7 = vcmp.eq.f32.partialorder %v1624_v6, 8.507059e+37 }
 0x71b   :  { %v5504_v1 = vpop.eup %5503 }
 0x71c   :  { %v1616_v42 = vmul.f32 %v5504_v1, %v1614_v46  ;;  %vm1621_vm4 = vweird.f32 %v5504_v1  ;;  %v5506_v53 = vpop.eup %5505 }
 0x71d   :  { %vm1622_vm6 = vmor %vm1620_vm5, %vm1621_vm4  ;;  %v1637_v26 = vadd.f32 1.0, %v5506_v53 }
 0x71e   :  { %v1617_v10 = vsub.f32 1.0, %v1616_v42 }
 0x71f   :  { %5507 = vrcp.f32 %v1637_v26  ;;  %vm1643_vm9 = vweird.f32 %v1637_v26  ;;  %v1649_v8 = vand.u32 2147483648, %v1637_v26  ;;  %v1647_v60 = vand.u32 2147483647, %v1637_v26 }
 0x720   :  { %v1618_v59 = vmul.f32 %v5504_v1, %v1617_v10 }
 0x721   :  { %v1650_v49 = vor.u32 1.1754944e-38, %v1649_v8  ;;  %vm1648_vm5 = vcmp.eq.f32.partialorder %v1647_v60, 8.507059e+37 }
 0x722   :  { %v1619_v5 = vadd.f32 %v5504_v1, %v1618_v59 }
 0x724   :  { %v1623_v23 = vsel %vm1622_vm6, %v5504_v1, %v1619_v5 }
 0x725   :  { %v1628_v61 = vsel %vm1625_vm7, %v1627_v48, %v1623_v23  ;;  %v5508_v31 = vpop.eup %5507  ;;  %vm7136_vm7 = vcmask 259204  }
 0x726   :  { %v1656_v24 = vmul.f32 %v1654_v18, %v1628_v61  ;;  %v1639_v37 = vmul.f32 %v5508_v31, %v1637_v26  ;;  %vm1644_vm8 = vweird.f32 %v5508_v31 }
 0x727   :  { %vm1645_vm11 = vmor %vm1643_vm9, %vm1644_vm8 }
 0x728   :  { %v1657_v28 = vadd.f32 %v1656_v24, %v6329_v29  ;;  %v1640_v44 = vsub.f32 1.0, %v1639_v37 }
 0x72a   :  { %v1658_v30 = vmul.f32 -2.0, %v1657_v28  ;;  %v1641_v47 = vmul.f32 %v5508_v31, %v1640_v44 }
 0x72c   :  { %v1659_v45 = vmul.f32 1.442695, %v1658_v30  ;;  %v1642_v2 = vadd.f32 %v5508_v31, %v1641_v47 }
 0x72e   :  { %5509 = vpow2.f32 %v1659_v45  ;;  %v1646_v3 = vsel %vm1645_vm11, %v5508_v31, %v1642_v2 }
 0x72f   :  { %v1651_v33 = vsel %vm1648_vm5, %v1650_v49, %v1646_v3 }
 0x730   :  { %v1678_v57 = vsub.f32 1.0, %v1651_v33  ;;  %v1682_v46 = vmul.f32 %v1680_v62, %v1651_v33 }
 0x734   :  { %v5510_v36 = vpop.eup %5509 }
 0x735   :  { %v1661_v22 = vadd.f32 1.0, %v5510_v36 }
 0x737   :  { %5511 = vrcp.f32 %v1661_v22  ;;  %v1673_v11 = vand.u32 2147483648, %v1661_v22  ;;  %v1671_v20 = vand.u32 2147483647, %v1661_v22  ;;  %vm1667_vm3 = vweird.f32 %v1661_v22 }
 0x739   :  { %v1674_v50 = vor.u32 1.1754944e-38, %v1673_v11  ;;  %vm1672_vm6 = vcmp.eq.f32.partialorder %v1671_v20, 8.507059e+37 }
 0x73d   :  { %v5512_v15 = vpop.eup %5511 }
 0x73e   :  { %v1663_v25 = vmul.f32 %v5512_v15, %v1661_v22  ;;  %vm1668_vm10 = vweird.f32 %v5512_v15 }
 0x73f   :  { %vm1669_vm4 = vmor %vm1667_vm3, %vm1668_vm10 }
 0x740   :  { %v1664_v19 = vsub.f32 1.0, %v1663_v25 }
 0x742   :  { %v1665_v43 = vmul.f32 %v5512_v15, %v1664_v19 }
 0x744   :  { %v1666_v39 = vadd.f32 %v5512_v15, %v1665_v43 }
 0x746   :  { %v1670_v51 = vsel %vm1669_vm4, %v5512_v15, %v1666_v39 }
 0x747   :  { %v1675_v41 = vsel %vm1672_vm6, %v1674_v50, %v1670_v51 }
 0x748   :  { %v1676_v54 = vmul.f32 2.0, %v1675_v41 }
 0x74a   :  { %v5218_v32 = vadd.f32 -1.0, %v1676_v54 }
 0x74c   :  { %v1679_v63 = vmul.f32 %v5218_v32, %v1678_v57 }
 0x74e   :  { %v6372_v58 = vadd.f32 %v1682_v46, %v1679_v63 }
 0x750   :  { %1685 = vrot.lane.b32.xlu2 %v6372_v58, %s5828_s19  ;;  %v1690_v0 = vrot.slane %v6372_v58, 4 }
 0x752   :  { %5219 = vmatmul.msk.f32.vlgmr.msra.gmra.mxu1 %vm159_vm13, %v1690_v0  ;;  %5220 = vmatmul.msk.f32.vlgmr.msra.gmra.mxu2 %vm159_vm13, %v1690_v0 }
 0x753   :  { %5221 = vmatmul.msk.f32.vlgmr.msra.gmra.mxu3 %vm159_vm13, %v1690_v0  ;;  %2028 = vmatpush.msra.mxu1 %v6214_v34 }
 0x754   :  { %2133 = vmatpush.msra.mxu2 %v6187_v17  ;;  %2153 = vmatpush.msra.mxu3 %v6243_v27 }
 0x755   :  { %2029 = vmatpush.msra.mxu1 %v6233_v16 }
 0x756   :  { %2134 = vmatpush.msra.mxu2 %v6192_v56  ;;  %2154 = vmatpush.msra.mxu3 %v6251_v55 }
 0x7aa   :  { %v1686_v40 = vpop.permute.xlu2 %1685 }
 0x7ab   :  { %1689 = vst.msk [vmem:[#allocation2 + $0x8] sm:$0x30] %vm7136_vm7, %v1686_v40 }
 0x7cf   :  { %v1710_v1 = vpop.f32.mrf.mxu1 }
 0x7d0   :  { %v1754_v42 = vrot.slane %v1710_v1, 6 }
 0x7d2   :  { %v1756_v7 = vadd.f32 %v1754_v42, %v6294_v13 }
 0x7d4   :  { %v1757_v10 = vsub.f32 0.0, %v1756_v7 }
 0x7d5   :  { %v1730_v14 = vpop.f32.mrf.mxu2 }
 0x7d6   :  { %v1758_v12 = vmul.f32 1.442695, %v1757_v10  ;;  %v1777_v59 = vrot.slane %v1730_v14, 6  ;;  %v1750_v24 = vpop.f32.mrf.mxu3  ;;  %v1826_v14 = vrot.slane %v6372_v58, 2 }
 0x7d7   :  { %v1751_v30 = vadd.f32 %v6321_v52, %v1750_v24 }
 0x7d8   :  { %5513 = vpow2.f32 %v1758_v12  ;;  %v1779_v5 = vadd.f32 %v1777_v59, %v6315_v21 }
 0x7d9   :  { %v1800_v47 = vrot.slane %v1751_v30, 6 }
 0x7da   :  { %v1780_v53 = vsub.f32 0.0, %v1779_v5 }
 0x7dc   :  { %v1781_v18 = vmul.f32 1.442695, %v1780_v53 }
 0x7de   :  { %v5514_v6 = vpop.eup %5513 }
 0x7df   :  { %v1760_v48 = vadd.f32 1.0, %v5514_v6 }
 0x7e1   :  { %5515 = vrcp.f32 %v1760_v48  ;;  %v1772_v28 = vand.u32 2147483648, %v1760_v48  ;;  %v1770_v31 = vand.u32 2147483647, %v1760_v48  ;;  %vm1766_vm9 = vweird.f32 %v1760_v48 }
 0x7e2   :  { %5517 = vpow2.f32 %v1781_v18 }
 0x7e3   :  { %v1773_v37 = vor.u32 1.1754944e-38, %v1772_v28  ;;  %vm1771_vm11 = vcmp.eq.f32.partialorder %v1770_v31, 8.507059e+37 }
 0x7e7   :  { %v5516_v23 = vpop.eup %5515 }
 0x7e8   :  { %v1762_v61 = vmul.f32 %v5516_v23, %v1760_v48  ;;  %vm1767_vm8 = vweird.f32 %v5516_v23  ;;  %v5518_v22 = vpop.eup %5517 }
 0x7e9   :  { %vm1768_vm10 = vmor %vm1766_vm9, %vm1767_vm8  ;;  %v1783_v2 = vadd.f32 1.0, %v5518_v22 }
 0x7ea   :  { %v1763_v26 = vsub.f32 1.0, %v1762_v61 }
 0x7eb   :  { %5519 = vrcp.f32 %v1783_v2  ;;  %vm1789_vm4 = vweird.f32 %v1783_v2  ;;  %v1795_v54 = vand.u32 2147483648, %v1783_v2  ;;  %v1793_v57 = vand.u32 2147483647, %v1783_v2 }
 0x7ec   :  { %v1764_v45 = vmul.f32 %v5516_v23, %v1763_v26 }
 0x7ed   :  { %v1796_v40 = vor.u32 1.1754944e-38, %v1795_v54 }
 0x7ee   :  { %v1765_v36 = vadd.f32 %v5516_v23, %v1764_v45 }
 0x7f0   :  { %v1769_v44 = vsel %vm1768_vm10, %v5516_v23, %v1765_v36  ;;  %vm1794_vm10 = vcmp.eq.f32.partialorder %v1793_v57, 8.507059e+37 }
 0x7f1   :  { %v1774_v15 = vsel %vm1771_vm11, %v1773_v37, %v1769_v44  ;;  %v5520_v60 = vpop.eup %5519 }
 0x7f2   :  { %v1802_v25 = vmul.f32 %v1800_v47, %v1774_v15  ;;  %v1785_v20 = vmul.f32 %v5520_v60, %v1783_v2  ;;  %vm1790_vm3 = vweird.f32 %v5520_v60 }
 0x7f3   :  { %vm1791_vm6 = vmor %vm1789_vm4, %vm1790_vm3 }
 0x7f4   :  { %v1803_v19 = vadd.f32 %v1802_v25, %v6329_v29  ;;  %v1786_v39 = vsub.f32 1.0, %v1785_v20 }
 0x7f6   :  { %v1804_v8 = vmul.f32 -2.0, %v1803_v19  ;;  %v1787_v49 = vmul.f32 %v5520_v60, %v1786_v39 }
 0x7f8   :  { %v1805_v11 = vmul.f32 1.442695, %v1804_v8  ;;  %v1788_v33 = vadd.f32 %v5520_v60, %v1787_v49 }
 0x7fa   :  { %5521 = vpow2.f32 %v1805_v11  ;;  %v1792_v0 = vsel %vm1791_vm6, %v5520_v60, %v1788_v33 }
 0x7fb   :  { %v1797_v7 = vsel %vm1794_vm10, %v1796_v40, %v1792_v0 }
 0x7fc   :  { %v1824_v6 = vsub.f32 1.0, %v1797_v7  ;;  %v1828_v48 = vmul.f32 %v1826_v14, %v1797_v7 }
 0x800   :  { %v5522_v43 = vpop.eup %5521 }
 0x801   :  { %v1807_v3 = vadd.f32 1.0, %v5522_v43 }
 0x803   :  { %5523 = vrcp.f32 %v1807_v3  ;;  %v1819_v32 = vand.u32 2147483648, %v1807_v3  ;;  %v1817_v63 = vand.u32 2147483647, %v1807_v3  ;;  %vm1813_vm8 = vweird.f32 %v1807_v3 }
 0x805   :  { %v1820_v1 = vor.u32 1.1754944e-38, %v1819_v32  ;;  %vm1818_vm11 = vcmp.eq.f32.partialorder %v1817_v63, 8.507059e+37 }
 0x809   :  { %v5524_v50 = vpop.eup %5523 }
 0x80a   :  { %v1809_v51 = vmul.f32 %v5524_v50, %v1807_v3  ;;  %vm1814_vm5 = vweird.f32 %v5524_v50 }
 0x80b   :  { %vm1815_vm9 = vmor %vm1813_vm8, %vm1814_vm5 }
 0x80c   :  { %v1810_v41 = vsub.f32 1.0, %v1809_v51 }
 0x80e   :  { %v1811_v62 = vmul.f32 %v5524_v50, %v1810_v41 }
 0x810   :  { %v1812_v46 = vadd.f32 %v5524_v50, %v1811_v62 }
 0x812   :  { %v1816_v42 = vsel %vm1815_vm9, %v5524_v50, %v1812_v46 }
 0x813   :  { %v1821_v10 = vsel %vm1818_vm11, %v1820_v1, %v1816_v42 }
 0x814   :  { %v1822_v12 = vmul.f32 2.0, %v1821_v10 }
 0x816   :  { %v5222_v59 = vadd.f32 -1.0, %v1822_v12 }
 0x818   :  { %v1825_v5 = vmul.f32 %v5222_v59, %v1824_v6 }
 0x81a   :  { %v6392_v53 = vadd.f32 %v1828_v48, %v1825_v5 }
 0x81c   :  { %v6395_v18 = vrot.slane %v6392_v53, 2 }
 0x81e   :  { %5223 = vmatmul.msk.f32.vlgmr.msra.gmra.mxu0 %vm159_vm13, %v6395_v18  ;;  %5224 = vmatmul.msk.f32.vlgmr.msrb.gmra.mxu1 %vm159_vm13, %v6395_v18 }
 0x81f   :  { %5225 = vmatmul.msk.f32.vlgmr.msrb.gmra.mxu2 %vm159_vm13, %v6395_v18  ;;  %2173 = vmatpush.msra.mxu0 %v6214_v34 }
 0x820   :  { %2278 = vmatpush.msrb.mxu1 %v6187_v17  ;;  %2298 = vmatpush.msrb.mxu2 %v6243_v27 }
 0x821   :  { %2174 = vmatpush.msra.mxu0 %v6233_v16 }
 0x822   :  { %2279 = vmatpush.msrb.mxu1 %v6192_v56  ;;  %2299 = vmatpush.msrb.mxu2 %v6251_v55 }
 0x89b   :  { %v1856_v58 = vpop.f32.mrf.mxu0  ;;  %v1876_v26 = vpop.f32.mrf.mxu1 }
 0x89c   :  { %v1899_v23 = vadd.f32 %v1856_v58, %v6294_v13  ;;  %v1919_v34 = vadd.f32 %v1876_v26, %v6315_v21 }
 0x89e   :  { %v1900_v61 = vsub.f32 0.0, %v1899_v23  ;;  %v1920_v17 = vsub.f32 0.0, %v1919_v34 }
 0x8a0   :  { %v1901_v24 = vmul.f32 1.442695, %v1900_v61  ;;  %v1921_v45 = vmul.f32 1.442695, %v1920_v17  ;;  %v6425_v61 = vld [vmem:[%s7131_s3 + $0x58] sm:$0xff] }
 0x8a2   :  { %5525 = vpow2.f32 %v1901_v24  ;;  %v1896_v13 = vpop.f32.mrf.mxu2  ;;  %v5790_v24 = vld [vmem:[%s7131_s3 + $0x30] sm:$0xff] }
 0x8a3   :  { %v1897_v21 = vadd.f32 %v6321_v52, %v1896_v13 }
 0x8a8   :  { %v5526_v28 = vpop.eup %5525 }
 0x8a9   :  { %v1903_v30 = vadd.f32 1.0, %v5526_v28 }
 0x8ab   :  { %5527 = vrcp.f32 %v1903_v30  ;;  %v1915_v37 = vand.u32 2147483648, %v1903_v30  ;;  %v1913_v44 = vand.u32 2147483647, %v1903_v30  ;;  %vm1909_vm4 = vweird.f32 %v1903_v30 }
 0x8ac   :  { %5529 = vpow2.f32 %v1921_v45 }
 0x8ad   :  { %v1916_v15 = vor.u32 1.1754944e-38, %v1915_v37  ;;  %vm1914_vm6 = vcmp.eq.f32.partialorder %v1913_v44, 8.507059e+37 }
 0x8b1   :  { %v5528_v31 = vpop.eup %5527 }
 0x8b2   :  { %v1905_v36 = vmul.f32 %v5528_v31, %v1903_v30  ;;  %vm1910_vm3 = vweird.f32 %v5528_v31  ;;  %v5530_v25 = vpop.eup %5529 }
 0x8b3   :  { %vm1911_vm5 = vmor %vm1909_vm4, %vm1910_vm3  ;;  %v1923_v11 = vadd.f32 1.0, %v5530_v25 }
 0x8b4   :  { %v1906_v56 = vsub.f32 1.0, %v1905_v36 }
 0x8b5   :  { %5531 = vrcp.f32 %v1923_v11  ;;  %vm1929_vm9 = vweird.f32 %v1923_v11  ;;  %v1935_v62 = vand.u32 2147483648, %v1923_v11 }
 0x8b6   :  { %v1907_v22 = vmul.f32 %v5528_v31, %v1906_v56 }
 0x8b7   :  { %v1936_v42 = vor.u32 1.1754944e-38, %v1935_v62 }
 0x8b8   :  { %v1908_v47 = vadd.f32 %v5528_v31, %v1907_v22 }
 0x8ba   :  { %v1912_v2 = vsel %vm1911_vm5, %v5528_v31, %v1908_v47 }
 0x8bb   :  { %v1917_v19 = vsel %vm1914_vm6, %v1916_v15, %v1912_v2  ;;  %v5532_v3 = vpop.eup %5531 }
 0x8bc   :  { %v1939_v8 = vmul.f32 %v1917_v19, %v1897_v21  ;;  %v1925_v49 = vmul.f32 %v5532_v3, %v1923_v11  ;;  %vm1930_vm8 = vweird.f32 %v5532_v3 }
 0x8bd   :  { %vm1931_vm11 = vmor %vm1929_vm9, %vm1930_vm8 }
 0x8be   :  { %v1940_v60 = vadd.f32 %v1939_v8, %v6329_v29  ;;  %v1926_v51 = vsub.f32 1.0, %v1925_v49  ;;  %v1933_v29 = vand.u32 2147483647, %v1923_v11 }
 0x8c0   :  { %v1941_v43 = vmul.f32 -2.0, %v1940_v60  ;;  %v1927_v33 = vmul.f32 %v5532_v3, %v1926_v51  ;;  %vm1934_vm5 = vcmp.eq.f32.partialorder %v1933_v29, 8.507059e+37 }
 0x8c2   :  { %v1942_v20 = vmul.f32 1.442695, %v1941_v43  ;;  %v1928_v32 = vadd.f32 %v5532_v3, %v1927_v33 }
 0x8c4   :  { %5533 = vpow2.f32 %v1942_v20  ;;  %v1932_v40 = vsel %vm1931_vm11, %v5532_v3, %v1928_v32 }
 0x8c5   :  { %v1937_v12 = vsel %vm1934_vm5, %v1936_v42, %v1932_v40 }
 0x8c6   :  { %v1961_v5 = vsub.f32 1.0, %v1937_v12  ;;  %v1964_v58 = vmul.f32 %v1937_v12, %v6395_v18  ;;  %v5789_v18 = vld [vmem:[%s7131_s3 + $0x38] sm:$0xff] }
 0x8ca   :  { %v5534_v39 = vpop.eup %5533 }
 0x8cb   :  { %v1944_v50 = vadd.f32 1.0, %v5534_v39 }
 0x8cd   :  { %5535 = vrcp.f32 %v1944_v50  ;;  %v1956_v63 = vand.u32 2147483648, %v1944_v50  ;;  %v1954_v0 = vand.u32 2147483647, %v1944_v50  ;;  %vm1950_vm3 = vweird.f32 %v1944_v50 }
 0x8cf   :  { %v1957_v7 = vor.u32 1.1754944e-38, %v1956_v63  ;;  %vm1955_vm6 = vcmp.eq.f32.partialorder %v1954_v0, 8.507059e+37 }
 0x8d3   :  { %v5536_v41 = vpop.eup %5535 }
 0x8d4   :  { %v1946_v54 = vmul.f32 %v5536_v41, %v1944_v50  ;;  %vm1951_vm10 = vweird.f32 %v5536_v41 }
 0x8d5   :  { %vm1952_vm4 = vmor %vm1950_vm3, %vm1951_vm10 }
 0x8d6   :  { %v1947_v57 = vsub.f32 1.0, %v1946_v54 }
 0x8d8   :  { %v1948_v46 = vmul.f32 %v5536_v41, %v1947_v57 }
 0x8da   :  { %v1949_v1 = vadd.f32 %v5536_v41, %v1948_v46 }
 0x8dc   :  { %v1953_v10 = vsel %vm1952_vm4, %v5536_v41, %v1949_v1 }
 0x8dd   :  { %v1958_v14 = vsel %vm1955_vm6, %v1957_v7, %v1953_v10 }
 0x8de   :  { %v1959_v59 = vmul.f32 2.0, %v1958_v14 }
 0x8e0   :  { %v5226_v6 = vadd.f32 -1.0, %v1959_v59 }
 0x8e2   :  { %v1962_v48 = vmul.f32 %v5226_v6, %v1961_v5 }
 0x8e4   :  { %v6414_v23 = vadd.f32 %v1964_v58, %v1962_v48 }
 0x8e6   :  { %5227 = vmatmul.msk.f32.vlgmr.msrb.gmra.mxu3 %vm159_vm13, %v6414_v23  ;;  %5228 = vmatmul.msk.f32.vlgmr.msrb.gmra.mxu0 %vm159_vm13, %v6414_v23 }
 0x8e7   :  { %5229 = vmatmul.msk.f32.vlgmr.msra.gmra.mxu1 %vm159_vm13, %v6414_v23  ;;  %2318 = vmatpush.msrb.mxu3 %v6425_v61 }
 0x8e8   :  { %2423 = vmatpush.msrb.mxu0 %v5789_v18  ;;  %2443 = vmatpush.msra.mxu1 %v6243_v27 }
 0x8e9   :  { %2319 = vmatpush.msrb.mxu3 %v6233_v16 }
 0x8ea   :  { %2424 = vmatpush.msrb.mxu0 %v5790_v24  ;;  %2444 = vmatpush.msra.mxu1 %v6251_v55  ;;  %v2107_v24 = vrot.slane %v6414_v23, 2 }
 0x963   :  { %v2011_v45 = vpop.f32.mrf.mxu0 }
 0x964   :  { %v2058_v31 = vrot.slane %v2011_v45, 2  ;;  %v2031_v13 = vpop.f32.mrf.mxu1 }
 0x965   :  { %v2032_v15 = vadd.f32 %v6321_v52, %v2031_v13 }
 0x966   :  { %v2060_v27 = vadd.f32 %v2058_v31, %v6313_v38 }
 0x967   :  { %v2081_v11 = vrot.slane %v2032_v15, 2 }
 0x968   :  { %v2061_v56 = vsub.f32 0.0, %v2060_v27 }
 0x969   :  { %v1991_v26 = vpop.f32.mrf.mxu3 }
 0x96a   :  { %v2035_v28 = vrot.slane %v1991_v26, 2  ;;  %v2062_v37 = vmul.f32 1.442695, %v2061_v56 }
 0x96c   :  { %v2037_v34 = vadd.f32 %v2035_v28, %v6292_v4 }
 0x96e   :  { %v2038_v30 = vsub.f32 0.0, %v2037_v34 }
 0x970   :  { %v2039_v17 = vmul.f32 1.442695, %v2038_v30 }
 0x972   :  { %5537 = vpow2.f32 %v2039_v17  ;;  %v5791_v17 = vld [vmem:[%s7131_s3 + $0x50] sm:$0xff] }
 0x978   :  { %v5538_v36 = vpop.eup %5537 }
 0x979   :  { %v2041_v16 = vadd.f32 1.0, %v5538_v36 }
 0x97b   :  { %5539 = vrcp.f32 %v2041_v16  ;;  %v2053_v47 = vand.u32 2147483648, %v2041_v16  ;;  %v2051_v21 = vand.u32 2147483647, %v2041_v16  ;;  %vm2047_vm9 = vweird.f32 %v2041_v16 }
 0x97c   :  { %5541 = vpow2.f32 %v2062_v37 }
 0x97d   :  { %v2054_v19 = vor.u32 1.1754944e-38, %v2053_v47  ;;  %vm2052_vm11 = vcmp.eq.f32.partialorder %v2051_v21, 8.507059e+37 }
 0x981   :  { %v5540_v22 = vpop.eup %5539 }
 0x982   :  { %v2043_v44 = vmul.f32 %v5540_v22, %v2041_v16  ;;  %vm2048_vm8 = vweird.f32 %v5540_v22  ;;  %v5542_v8 = vpop.eup %5541 }
 0x983   :  { %vm2049_vm10 = vmor %vm2047_vm9, %vm2048_vm8  ;;  %v2064_v3 = vadd.f32 1.0, %v5542_v8  ;;  %v6460_v8 = vld [vmem:[%s7132_s4 + $0x5] ss:$0 sm:$0xff] }
 0x984   :  { %v2044_v55 = vsub.f32 1.0, %v2043_v44 }
 0x985   :  { %5543 = vrcp.f32 %v2064_v3  ;;  %vm2070_vm4 = vweird.f32 %v2064_v3  ;;  %v2076_v46 = vand.u32 2147483648, %v2064_v3  ;;  %v2074_v40 = vand.u32 2147483647, %v2064_v3 }
 0x986   :  { %v2045_v25 = vmul.f32 %v5540_v22, %v2044_v55 }
 0x987   :  { %v2077_v12 = vor.u32 1.1754944e-38, %v2076_v46 }
 0x988   :  { %v2046_v2 = vadd.f32 %v5540_v22, %v2045_v25 }
 0x98a   :  { %v2050_v60 = vsel %vm2049_vm10, %v5540_v22, %v2046_v2  ;;  %vm2075_vm10 = vcmp.eq.f32.partialorder %v2074_v40, 8.507059e+37 }
 0x98b   :  { %v2055_v43 = vsel %vm2052_vm11, %v2054_v19, %v2050_v60  ;;  %v5544_v52 = vpop.eup %5543 }
 0x98c   :  { %v2083_v20 = vmul.f32 %v2081_v11, %v2055_v43  ;;  %v2066_v33 = vmul.f32 %v5544_v52, %v2064_v3  ;;  %vm2071_vm3 = vweird.f32 %v5544_v52 }
 0x98d   :  { %vm2072_vm6 = vmor %vm2070_vm4, %vm2071_vm3 }
 0x98e   :  { %v2084_v39 = vadd.f32 %v2083_v20, %v6310_v35  ;;  %v2067_v54 = vsub.f32 1.0, %v2066_v33 }
 0x990   :  { %v2085_v49 = vmul.f32 -2.0, %v2084_v39  ;;  %v2068_v32 = vmul.f32 %v5544_v52, %v2067_v54 }
 0x992   :  { %v2086_v50 = vmul.f32 1.442695, %v2085_v49  ;;  %v2069_v63 = vadd.f32 %v5544_v52, %v2068_v32 }
 0x994   :  { %5545 = vpow2.f32 %v2086_v50  ;;  %v2073_v7 = vsel %vm2072_vm6, %v5544_v52, %v2069_v63 }
 0x995   :  { %v2078_v6 = vsel %vm2075_vm10, %v2077_v12, %v2073_v7 }
 0x996   :  { %v2105_v18 = vsub.f32 1.0, %v2078_v6  ;;  %v2109_v28 = vmul.f32 %v2107_v24, %v2078_v6 }
 0x99a   :  { %v5546_v51 = vpop.eup %5545 }
 0x99b   :  { %v2088_v41 = vadd.f32 1.0, %v5546_v51 }
 0x99d   :  { %5547 = vrcp.f32 %v2088_v41  ;;  %v2100_v0 = vand.u32 2147483648, %v2088_v41  ;;  %v2098_v42 = vand.u32 2147483647, %v2088_v41  ;;  %vm2094_vm8 = vweird.f32 %v2088_v41 }
 0x99f   :  { %v2101_v14 = vor.u32 1.1754944e-38, %v2100_v0  ;;  %vm2099_vm11 = vcmp.eq.f32.partialorder %v2098_v42, 8.507059e+37 }
 0x9a3   :  { %v5548_v57 = vpop.eup %5547 }
 0x9a4   :  { %v2090_v62 = vmul.f32 %v5548_v57, %v2088_v41  ;;  %vm2095_vm5 = vweird.f32 %v5548_v57 }
 0x9a5   :  { %vm2096_vm9 = vmor %vm2094_vm8, %vm2095_vm5 }
 0x9a6   :  { %v2091_v29 = vsub.f32 1.0, %v2090_v62 }
 0x9a8   :  { %v2092_v1 = vmul.f32 %v5548_v57, %v2091_v29 }
 0x9aa   :  { %v2093_v10 = vadd.f32 %v5548_v57, %v2092_v1 }
 0x9ac   :  { %v2097_v59 = vsel %vm2096_vm9, %v5548_v57, %v2093_v10 }
 0x9ad   :  { %v2102_v5 = vsel %vm2099_vm11, %v2101_v14, %v2097_v59 }
 0x9ae   :  { %v2103_v48 = vmul.f32 2.0, %v2102_v5 }
 0x9b0   :  { %v5230_v58 = vadd.f32 -1.0, %v2103_v48 }
 0x9b2   :  { %v2106_v26 = vmul.f32 %v5230_v58, %v2105_v18 }
 0x9b4   :  { %v6442_v34 = vadd.f32 %v2109_v28, %v2106_v26 }
 0x9b6   :  { %2112 = vrot.lane.b32.xlu0 %v6442_v34, %s5828_s19  ;;  %v2116_v30 = vrot.slane %v6442_v34, 6 }
 0x9b8   :  { %5231 = vmatmul.msk.f32.vlgmr.msra.gmra.mxu2 %vm159_vm13, %v2116_v30  ;;  %5232 = vmatmul.msk.f32.vlgmr.msra.gmra.mxu3 %vm159_vm13, %v2116_v30 }
 0x9b9   :  { %5233 = vmatmul.msk.f32.vlgmr.msra.gmra.mxu0 %vm159_vm13, %v2116_v30  ;;  %2463 = vmatpush.msra.mxu2 %v6425_v61 }
 0x9bb   :  { %2464 = vmatpush.msra.mxu2 %v5791_v17 }
 0xa28   :  { %v2113_v45 = vpop.permute.xlu0 %2112 }
 0xa29   :  { %2115 = vst.msk [vmem:[#allocation2] sm:$0xc0] %vm1542_vm1, %v2113_v45 }
 0xa36   :  { %v2176_v21 = vpop.f32.mrf.mxu0 }
 0xa37   :  { %v2177_v11 = vadd.f32 %v6460_v8, %v2176_v21 }
 0xa39   :  { %v2226_v49 = vrot.slane %v2177_v11, 4 }
 0xa3b   :  { %v2136_v31 = vpop.f32.mrf.mxu2  ;;  %v2156_v37 = vpop.f32.mrf.mxu3 }
 0xa3c   :  { %v2180_v36 = vrot.slane %v2136_v31, 4  ;;  %v2203_v22 = vrot.slane %v2156_v37, 4  ;;  %v2252_v31 = vrot.slane %v6442_v34, 2 }
 0xa3e   :  { %v2182_v27 = vadd.f32 %v2180_v36, %v6292_v4  ;;  %v2205_v61 = vadd.f32 %v2203_v22, %v6313_v38 }
 0xa40   :  { %v2183_v16 = vsub.f32 0.0, %v2182_v27  ;;  %v2206_v55 = vsub.f32 0.0, %v2205_v61 }
 0xa42   :  { %v2184_v56 = vmul.f32 1.442695, %v2183_v16  ;;  %v2207_v47 = vmul.f32 1.442695, %v2206_v55 }
 0xa44   :  { %5549 = vpow2.f32 %v2184_v56 }
 0xa4a   :  { %v5550_v44 = vpop.eup %5549 }
 0xa4b   :  { %v2186_v13 = vadd.f32 1.0, %v5550_v44 }
 0xa4d   :  { %5551 = vrcp.f32 %v2186_v13  ;;  %v2198_v19 = vand.u32 2147483648, %v2186_v13  ;;  %v2196_v43 = vand.u32 2147483647, %v2186_v13  ;;  %vm2192_vm4 = vweird.f32 %v2186_v13 }
 0xa4e   :  { %5553 = vpow2.f32 %v2207_v47 }
 0xa4f   :  { %v2199_v3 = vor.u32 1.1754944e-38, %v2198_v19  ;;  %vm2197_vm6 = vcmp.eq.f32.partialorder %v2196_v43, 8.507059e+37 }
 0xa53   :  { %v5552_v15 = vpop.eup %5551 }
 0xa54   :  { %v2188_v25 = vmul.f32 %v5552_v15, %v2186_v13  ;;  %vm2193_vm3 = vweird.f32 %v5552_v15  ;;  %v5554_v39 = vpop.eup %5553 }
 0xa55   :  { %vm2194_vm5 = vmor %vm2192_vm4, %vm2193_vm3  ;;  %v2209_v33 = vadd.f32 1.0, %v5554_v39 }
 0xa56   :  { %v2189_v2 = vsub.f32 1.0, %v2188_v25 }
 0xa57   :  { %5555 = vrcp.f32 %v2209_v33  ;;  %vm2215_vm9 = vweird.f32 %v2209_v33  ;;  %v2221_v10 = vand.u32 2147483648, %v2209_v33  ;;  %v2219_v14 = vand.u32 2147483647, %v2209_v33 }
 0xa58   :  { %v2190_v60 = vmul.f32 %v5552_v15, %v2189_v2 }
 0xa59   :  { %v2222_v58 = vor.u32 1.1754944e-38, %v2221_v10 }
 0xa5a   :  { %v2191_v20 = vadd.f32 %v5552_v15, %v2190_v60 }
 0xa5c   :  { %v2195_v50 = vsel %vm2194_vm5, %v5552_v15, %v2191_v20  ;;  %vm2220_vm5 = vcmp.eq.f32.partialorder %v2219_v14, 8.507059e+37 }
 0xa5d   :  { %v2200_v52 = vsel %vm2197_vm6, %v2199_v3, %v2195_v50  ;;  %v5556_v57 = vpop.eup %5555 }
 0xa5e   :  { %v2228_v51 = vmul.f32 %v2226_v49, %v2200_v52  ;;  %v2211_v63 = vmul.f32 %v5556_v57, %v2209_v33  ;;  %vm2216_vm8 = vweird.f32 %v5556_v57 }
 0xa5f   :  { %vm2217_vm11 = vmor %vm2215_vm9, %vm2216_vm8  ;;  %vm1834_vm8 = vcmask 257154  }
 0xa60   :  { %v2229_v41 = vadd.f32 %v2228_v51, %v6310_v35  ;;  %v2212_v46 = vsub.f32 1.0, %v2211_v63 }
 0xa62   :  { %v2230_v54 = vmul.f32 -2.0, %v2229_v41  ;;  %v2213_v0 = vmul.f32 %v5556_v57, %v2212_v46 }
 0xa64   :  { %v2231_v32 = vmul.f32 1.442695, %v2230_v54  ;;  %v2214_v42 = vadd.f32 %v5556_v57, %v2213_v0 }
 0xa66   :  { %5557 = vpow2.f32 %v2231_v32  ;;  %v2218_v5 = vsel %vm2217_vm11, %v5556_v57, %v2214_v42 }
 0xa67   :  { %v2223_v26 = vsel %vm2220_vm5, %v2222_v58, %v2218_v5 }
 0xa68   :  { %v2250_v45 = vsub.f32 1.0, %v2223_v26  ;;  %v2254_v27 = vmul.f32 %v2252_v31, %v2223_v26 }
 0xa6c   :  { %v5558_v62 = vpop.eup %5557 }
 0xa6d   :  { %v2233_v29 = vadd.f32 1.0, %v5558_v62 }
 0xa6f   :  { %5559 = vrcp.f32 %v2233_v29  ;;  %v2245_v12 = vand.u32 2147483648, %v2233_v29  ;;  %v2243_v6 = vand.u32 2147483647, %v2233_v29  ;;  %vm2239_vm3 = vweird.f32 %v2233_v29 }
 0xa71   :  { %v2246_v18 = vor.u32 1.1754944e-38, %v2245_v12  ;;  %vm2244_vm6 = vcmp.eq.f32.partialorder %v2243_v6, 8.507059e+37 }
 0xa75   :  { %v5560_v40 = vpop.eup %5559 }
 0xa76   :  { %v2235_v1 = vmul.f32 %v5560_v40, %v2233_v29  ;;  %vm2240_vm10 = vweird.f32 %v5560_v40 }
 0xa77   :  { %vm2241_vm4 = vmor %vm2239_vm3, %vm2240_vm10 }
 0xa78   :  { %v2236_v7 = vsub.f32 1.0, %v2235_v1 }
 0xa7a   :  { %v2237_v59 = vmul.f32 %v5560_v40, %v2236_v7 }
 0xa7c   :  { %v2238_v48 = vadd.f32 %v5560_v40, %v2237_v59 }
 0xa7e   :  { %v2242_v24 = vsel %vm2241_vm4, %v5560_v40, %v2238_v48 }
 0xa7f   :  { %v2247_v28 = vsel %vm2244_vm6, %v2246_v18, %v2242_v24 }
 0xa80   :  { %v2248_v30 = vmul.f32 2.0, %v2247_v28 }
 0xa82   :  { %v5234_v17 = vadd.f32 -1.0, %v2248_v30 }
 0xa84   :  { %v2251_v36 = vmul.f32 %v5234_v17, %v2250_v45 }
 0xa86   :  { %v6465_v16 = vadd.f32 %v2254_v27, %v2251_v36 }
 0xa88   :  { %2257 = vrot.lane.b32.xlu0 %v6465_v16, %s5828_s19  ;;  %v2261_v56 = vrot.slane %v6465_v16, 4 }
 0xa8a   :  { %5235 = vmatmul.msk.f32.vlgmr.msrb.gmra.mxu1 %vm159_vm13, %v2261_v56  ;;  %5236 = vmatmul.msk.f32.vlgmr.msrb.gmra.mxu2 %vm159_vm13, %v2261_v56 }
 0xa8b   :  { %5237 = vmatmul.msk.f32.vlgmr.msrb.gmra.mxu3 %vm159_vm13, %v2261_v56 }
 0xa90   :  { %1831 = vrot.lane.b32.xlu0 %v6392_v53, %s5828_s19 }
 0xafa   :  { %v2258_v37 = vpop.permute.xlu0 %2257 }
 0xafb   :  { %2260 = vst.msk [vmem:[#allocation2] sm:$0x30] %vm7136_vm7, %v2258_v37 }
 0xb02   :  { %v1832_v34 = vpop.permute.xlu0 %1831 }
 0xb03   :  { %1835 = vst.msk [vmem:[#allocation2 + $0x8] sm:$0xc] %vm1834_vm8, %v1832_v34  ;;  %v2397_v34 = vrot.slane %v6465_v16, 2 }
 0xb07   :  { %v2281_v22 = vpop.f32.mrf.mxu1 }
 0xb08   :  { %v2325_v44 = vrot.slane %v2281_v22, 6 }
 0xb0a   :  { %v2327_v61 = vadd.f32 %v2325_v44, %v6292_v4 }
 0xb0c   :  { %v2328_v13 = vsub.f32 0.0, %v2327_v61 }
 0xb0d   :  { %v2301_v47 = vpop.f32.mrf.mxu2 }
 0xb0e   :  { %v2329_v55 = vmul.f32 1.442695, %v2328_v13  ;;  %v2348_v15 = vrot.slane %v2301_v47, 6  ;;  %v2321_v43 = vpop.f32.mrf.mxu3 }
 0xb0f   :  { %v2322_v39 = vadd.f32 %v6460_v8, %v2321_v43 }
 0xb10   :  { %5561 = vpow2.f32 %v2329_v55  ;;  %v2350_v21 = vadd.f32 %v2348_v15, %v6313_v38 }
 0xb11   :  { %v2371_v54 = vrot.slane %v2322_v39, 6 }
 0xb12   :  { %v2351_v2 = vsub.f32 0.0, %v2350_v21 }
 0xb14   :  { %v2352_v19 = vmul.f32 1.442695, %v2351_v2 }
 0xb16   :  { %v5562_v25 = vpop.eup %5561 }
 0xb17   :  { %v2331_v53 = vadd.f32 1.0, %v5562_v25 }
 0xb19   :  { %5563 = vrcp.f32 %v2331_v53  ;;  %v2343_v3 = vand.u32 2147483648, %v2331_v53  ;;  %v2341_v50 = vand.u32 2147483647, %v2331_v53  ;;  %vm2337_vm10 = vweird.f32 %v2331_v53 }
 0xb1a   :  { %5565 = vpow2.f32 %v2352_v19 }
 0xb1b   :  { %v2344_v51 = vor.u32 1.1754944e-38, %v2343_v3  ;;  %vm2342_vm3 = vcmp.eq.f32.partialorder %v2341_v50, 8.507059e+37 }
 0xb1f   :  { %v5564_v11 = vpop.eup %5563 }
 0xb20   :  { %v2333_v60 = vmul.f32 %v5564_v11, %v2331_v53  ;;  %vm2338_vm9 = vweird.f32 %v5564_v11  ;;  %v5566_v33 = vpop.eup %5565 }
 0xb21   :  { %vm2339_vm11 = vmor %vm2337_vm10, %vm2338_vm9  ;;  %v2354_v62 = vadd.f32 1.0, %v5566_v33 }
 0xb22   :  { %v2334_v20 = vsub.f32 1.0, %v2333_v60 }
 0xb23   :  { %5567 = vrcp.f32 %v2354_v62  ;;  %vm2360_vm5 = vweird.f32 %v2354_v62  ;;  %v2366_v5 = vand.u32 2147483648, %v2354_v62  ;;  %v2364_v58 = vand.u32 2147483647, %v2354_v62 }
 0xb24   :  { %v2335_v49 = vmul.f32 %v5564_v11, %v2334_v20 }
 0xb25   :  { %v2367_v30 = vor.u32 1.1754944e-38, %v2366_v5 }
 0xb26   :  { %v2336_v52 = vadd.f32 %v5564_v11, %v2335_v49 }
 0xb28   :  { %v2340_v41 = vsel %vm2339_vm11, %v5564_v11, %v2336_v52 }
 0xb29   :  { %v2345_v32 = vsel %vm2342_vm3, %v2344_v51, %v2340_v41  ;;  %v5568_v0 = vpop.eup %5567  ;;  %vm2365_vm3 = vcmp.eq.f32.partialorder %v2364_v58, 8.507059e+37 }
 0xb2a   :  { %v2373_v57 = vmul.f32 %v2371_v54, %v2345_v32  ;;  %v2356_v1 = vmul.f32 %v5568_v0, %v2354_v62  ;;  %vm2361_vm4 = vweird.f32 %v5568_v0 }
 0xb2b   :  { %vm2362_vm9 = vmor %vm2360_vm5, %vm2361_vm4 }
 0xb2c   :  { %v2374_v63 = vadd.f32 %v2373_v57, %v6310_v35  ;;  %v2357_v7 = vsub.f32 1.0, %v2356_v1 }
 0xb2e   :  { %v2375_v29 = vmul.f32 -2.0, %v2374_v63  ;;  %v2358_v10 = vmul.f32 %v5568_v0, %v2357_v7  ;;  %v6504_v7 = vld [vmem:[%s7131_s3 + $0x60] sm:$0xff] }
 0xb30   :  { %v2376_v46 = vmul.f32 1.442695, %v2375_v29  ;;  %v2359_v59 = vadd.f32 %v5568_v0, %v2358_v10 }
 0xb32   :  { %5569 = vpow2.f32 %v2376_v46  ;;  %v2363_v26 = vsel %vm2362_vm9, %v5568_v0, %v2359_v59 }
 0xb33   :  { %v2368_v31 = vsel %vm2365_vm3, %v2367_v30, %v2363_v26 }
 0xb34   :  { %v2395_v37 = vsub.f32 1.0, %v2368_v31  ;;  %v2399_v44 = vmul.f32 %v2397_v34, %v2368_v31 }
 0xb38   :  { %v5570_v40 = vpop.eup %5569 }
 0xb39   :  { %v2378_v42 = vadd.f32 1.0, %v5570_v40 }
 0xb3b   :  { %5571 = vrcp.f32 %v2378_v42  ;;  %v2390_v48 = vand.u32 2147483648, %v2378_v42  ;;  %v2388_v24 = vand.u32 2147483647, %v2378_v42  ;;  %vm2384_vm10 = vweird.f32 %v2378_v42 }
 0xb3d   :  { %v2391_v17 = vor.u32 1.1754944e-38, %v2390_v48  ;;  %vm2389_vm7 = vcmp.eq.f32.partialorder %v2388_v24, 8.507059e+37 }
 0xb41   :  { %v5572_v12 = vpop.eup %5571 }
 0xb42   :  { %v2380_v14 = vmul.f32 %v5572_v12, %v2378_v42  ;;  %vm2385_vm6 = vweird.f32 %v5572_v12 }
 0xb43   :  { %vm2386_vm11 = vmor %vm2384_vm10, %vm2385_vm6 }
 0xb44   :  { %v2381_v6 = vsub.f32 1.0, %v2380_v14 }
 0xb46   :  { %v2382_v18 = vmul.f32 %v5572_v12, %v2381_v6 }
 0xb48   :  { %v2383_v28 = vadd.f32 %v5572_v12, %v2382_v18 }
 0xb4a   :  { %v2387_v45 = vsel %vm2386_vm11, %v5572_v12, %v2383_v28 }
 0xb4b   :  { %v2392_v36 = vsel %vm2389_vm7, %v2391_v17, %v2387_v45 }
 0xb4c   :  { %v2393_v27 = vmul.f32 2.0, %v2392_v36 }
 0xb4e   :  { %v5238_v56 = vadd.f32 -1.0, %v2393_v27 }
 0xb50   :  { %v2396_v22 = vmul.f32 %v5238_v56, %v2395_v37 }
 0xb52   :  { %v2400_v61 = vadd.f32 %v2399_v44, %v2396_v22  ;;  %v5246_v44 = vld [vmem:[%s7129_s1 + $0xd8] sm:$0xff] }
 0xb53   :  { %2571 = vmatpush.msra.mxu3 %v5246_v44 }
 0xb54   :  { %2402 = vrot.lane.b32.xlu1 %v2400_v61, %s5828_s19  ;;  %v6483_v13 = vrot.slane %v2400_v61, 2  ;;  %v5254_v61 = vld [vmem:[%s7129_s1 + $0xf8] sm:$0xff] }
 0xb55   :  { %2611 = vmatpush.msra.mxu0 %v5254_v61 }
 0xb56   :  { %5239 = vmatmul.msk.f32.vlgmr.msrb.gmra.mxu0 %vm159_vm13, %v6483_v13  ;;  %5240 = vmatmul.msk.f32.vlgmr.msra.gmra.mxu1 %vm159_vm13, %v6483_v13 }
 0xb57   :  { %5241 = vmatmul.msk.f32.vlgmr.msra.gmra.mxu2 %vm159_vm13, %v6483_v13 }
 0xbc6   :  { %v2403_v55 = vpop.permute.xlu1 %2402 }
 0xbc7   :  { %2405 = vst.msk [vmem:[#allocation2] sm:$0xc] %vm1834_vm8, %v2403_v55  ;;  %v5262_v55 = vld [vmem:[%s7129_s1 + $0x118] sm:$0xff] }
 0xbc8   :  { %2651 = vmatpush.msrb.mxu1 %v5262_v55 }
 0xbd3   :  { %v2426_v16 = vpop.f32.mrf.mxu0  ;;  %v2446_v21 = vpop.f32.mrf.mxu1 }
 0xbd4   :  { %v2469_v47 = vadd.f32 %v2426_v16, %v6292_v4  ;;  %v2489_v2 = vadd.f32 %v2446_v21, %v6313_v38  ;;  %v5261_v16 = vld [vmem:[%s7129_s1 + $0x110] sm:$0xff]  ;;  %v5260_v21 = vld [vmem:[%s7129_s1 + $0x108] sm:$0xff] }
 0xbd5   :  { %2652 = vmatpush.msrb.mxu1 %v5261_v16 }
 0xbd6   :  { %v2470_v15 = vsub.f32 0.0, %v2469_v47  ;;  %v2490_v11 = vsub.f32 0.0, %v2489_v2  ;;  %v6534_v47 = vld [vmem:[%s7131_s3 + $0x78] sm:$0xff]  ;;  %v5243_v2 = vld [vmem:[%s7129_s1 + $0xc0] sm:$0xff] }
 0xbd7   :  { %2653 = vmatpush.msrb.mxu1 %v5260_v21 }
 0xbd8   :  { %v2471_v25 = vmul.f32 1.442695, %v2470_v15  ;;  %v2491_v60 = vmul.f32 1.442695, %v2490_v11  ;;  %v5244_v15 = vld [vmem:[%s7129_s1 + $0xc8] sm:$0xff]  ;;  %v5259_v11 = vld [vmem:[%s7129_s1 + $0x100] sm:$0xff] }
 0xbd9   :  { %2654 = vmatpush.msrb.mxu1 %v5259_v11 }
 0xbda   :  { %5573 = vpow2.f32 %v2471_v25  ;;  %v2466_v4 = vpop.f32.mrf.mxu2  ;;  %v5252_v25 = vld [vmem:[%s7129_s1 + $0xe8] sm:$0xff] }
 0xbdb   :  { %v2467_v38 = vadd.f32 %v6460_v8, %v2466_v4  ;;  %v6499_v8 = vld [vmem:[%s7131_s3 + $0x68] sm:$0xff]  ;;  %2840 = vmatpush.msra.mxu1 %v6534_v47  ;;  %v5382_v4 = vld [vmem:[%s7130_s2 + $0x6] ss:$0 sm:$0xff] }
 0xbdc   :  { %2690 = vmatpush.msrb.mxu2 %v6499_v8 }
 0xbde   :  { %2691 = vmatpush.msrb.mxu2 %v6504_v7 }
 0xbdf   :  { %2692 = vmatmul.f32.vlgmr.msrb.gmra.mxu2 %v5827_v9 }
 0xbe0   :  { %v5574_v53 = vpop.eup %5573  ;;  %2710 = vmatpush.msra.mxu2 %v6534_v47 }
 0xbe1   :  { %v2473_v19 = vadd.f32 1.0, %v5574_v53  ;;  %v6549_v53 = vld [vmem:[%s7131_s3 + $0x70] sm:$0xff] }
 0xbe2   :  { %2711 = vmatpush.msra.mxu2 %v6549_v53  ;;  %2841 = vmatpush.msra.mxu1 %v6549_v53 }
 0xbe3   :  { %5575 = vrcp.f32 %v2473_v19  ;;  %v2485_v39 = vand.u32 2147483648, %v2473_v19  ;;  %v2483_v50 = vand.u32 2147483647, %v2473_v19  ;;  %vm2479_vm4 = vweird.f32 %v2473_v19 }
 0xbe4   :  { %5577 = vpow2.f32 %v2491_v60  ;;  %v6569_v60 = vld [vmem:[%s7131_s3 + $0x88] sm:$0xff] }
 0xbe5   :  { %v2486_v51 = vor.u32 1.1754944e-38, %v2485_v39  ;;  %vm2484_vm6 = vcmp.eq.f32.partialorder %v2483_v50, 8.507059e+37  ;;  %2860 = vmatpush.msrb.mxu2 %v6569_v60 }
 0xbe7   :  { %2712 = vmatmul.f32.vlgmr.msra.gmra.mxu2 %v5827_v9 }
 0xbe9   :  { %v5576_v43 = vpop.eup %5575 }
 0xbea   :  { %v2475_v20 = vmul.f32 %v5576_v43, %v2473_v19  ;;  %vm2480_vm7 = vweird.f32 %v5576_v43  ;;  %v5578_v33 = vpop.eup %5577  ;;  %v5251_v19 = vld [vmem:[%s7129_s1 + $0xe0] sm:$0xff] }
 0xbeb   :  { %vm2481_vm5 = vmor %vm2479_vm4, %vm2480_vm7  ;;  %v2493_v57 = vadd.f32 1.0, %v5578_v33  ;;  %v5379_v33 = vld [vmem:[%s7130_s2 + $0x7] ss:$0 sm:$0xff] }
 0xbec   :  { %v2476_v3 = vsub.f32 1.0, %v2475_v20 }
 0xbed   :  { %5579 = vrcp.f32 %v2493_v57  ;;  %vm2499_vm10 = vweird.f32 %v2493_v57  ;;  %v2505_v6 = vand.u32 2147483648, %v2493_v57  ;;  %v2503_v48 = vand.u32 2147483647, %v2493_v57 }
 0xbee   :  { %v2477_v49 = vmul.f32 %v5576_v43, %v2476_v3 }
 0xbef   :  { %v2506_v28 = vor.u32 1.1754944e-38, %v2505_v6 }
 0xbf0   :  { %v2478_v52 = vadd.f32 %v5576_v43, %v2477_v49 }
 0xbf2   :  { %v2482_v41 = vsel %vm2481_vm5, %v5576_v43, %v2478_v52  ;;  %vm2504_vm5 = vcmp.eq.f32.partialorder %v2503_v48, 8.507059e+37  ;;  %v6574_v43 = vld [vmem:[%s7131_s3 + $0x80] sm:$0xff] }
 0xbf3   :  { %v2487_v54 = vsel %vm2484_vm6, %v2486_v51, %v2482_v41  ;;  %v5580_v46 = vpop.eup %5579  ;;  %2861 = vmatpush.msrb.mxu2 %v6574_v43  ;;  %v5383_v52 = vld [vmem:[%s7132_s4 + $0x6] ss:$0 sm:$0xff] }
 0xbf4   :  { %v2509_v32 = vmul.f32 %v2487_v54, %v2467_v38  ;;  %v2495_v40 = vmul.f32 %v5580_v46, %v2493_v57  ;;  %vm2500_vm9 = vweird.f32 %v5580_v46  ;;  %v5380_v54 = vld [vmem:[%s7132_s4 + $0x7] ss:$0 sm:$0xff] }
 0xbf5   :  { %vm2501_vm3 = vmor %vm2499_vm10, %vm2500_vm9  ;;  %3104 = vmatpush.msra.mxu2 %v6499_v8  ;;  %vm7137_vm9 = vcmask 255104  }
 0xbf6   :  { %v2510_v62 = vadd.f32 %v2509_v32, %v6310_v35  ;;  %v2496_v42 = vsub.f32 1.0, %v2495_v40 }
 0xbf7   :  { %3105 = vmatpush.msra.mxu2 %v6504_v7 }
 0xbf8   :  { %v2511_v63 = vmul.f32 -2.0, %v2510_v62  ;;  %v2497_v35 = vmul.f32 %v5580_v46, %v2496_v42 }
 0xbfa   :  { %v2512_v29 = vmul.f32 1.442695, %v2511_v63  ;;  %v2498_v14 = vadd.f32 %v5580_v46, %v2497_v35 }
 0xbfc   :  { %5581 = vpow2.f32 %v2512_v29  ;;  %v2502_v24 = vsel %vm2501_vm3, %v5580_v46, %v2498_v14 }
 0xbfd   :  { %v2507_v45 = vsel %vm2504_vm5, %v2506_v28, %v2502_v24  ;;  %v6634_v24 = vld [vmem:[%s7132_s4 + $0x8] ss:$0 sm:$0xff] }
 0xbfe   :  { %v2531_v56 = vsub.f32 1.0, %v2507_v45  ;;  %v2534_v34 = vmul.f32 %v2507_v45, %v6483_v13  ;;  %v5245_v13 = vld [vmem:[%s7129_s1 + $0xd0] sm:$0xff] }
 0xbff   :  { %2572 = vmatpush.msra.mxu3 %v5245_v13 }
 0xc01   :  { %2573 = vmatpush.msra.mxu3 %v5244_v15 }
 0xc02   :  { %v5582_v0 = vpop.eup %5581 }
 0xc03   :  { %v2514_v1 = vadd.f32 1.0, %v5582_v0  ;;  %2574 = vmatpush.msra.mxu3 %v5243_v2 }
 0xc05   :  { %5583 = vrcp.f32 %v2514_v1  ;;  %v2526_v5 = vand.u32 2147483648, %v2514_v1  ;;  %v2524_v18 = vand.u32 2147483647, %v2514_v1  ;;  %vm2520_vm7 = vweird.f32 %v2514_v1  ;;  %2730 = vmatpush.msrb.mxu3 %v6569_v60 }
 0xc07   :  { %v2527_v30 = vor.u32 1.1754944e-38, %v2526_v5  ;;  %vm2525_vm6 = vcmp.eq.f32.partialorder %v2524_v18, 8.507059e+37  ;;  %2731 = vmatpush.msrb.mxu3 %v6574_v43 }
 0xc0b   :  { %v5584_v10 = vpop.eup %5583 }
 0xc0c   :  { %v2516_v12 = vmul.f32 %v5584_v10, %v2514_v1  ;;  %vm2521_vm11 = vweird.f32 %v5584_v10 }
 0xc0d   :  { %vm2522_vm4 = vmor %vm2520_vm7, %vm2521_vm11 }
 0xc0e   :  { %v2517_v59 = vsub.f32 1.0, %v2516_v12 }
 0xc10   :  { %v2518_v58 = vmul.f32 %v5584_v10, %v2517_v59 }
 0xc12   :  { %v2519_v26 = vadd.f32 %v5584_v10, %v2518_v58 }
 0xc14   :  { %v2523_v17 = vsel %vm2522_vm4, %v5584_v10, %v2519_v26 }
 0xc15   :  { %v2528_v31 = vsel %vm2525_vm6, %v2527_v30, %v2523_v17 }
 0xc16   :  { %v2529_v36 = vmul.f32 2.0, %v2528_v31  ;;  %v6639_v31 = vld [vmem:[%s7130_s2 + $0x8] ss:$0 sm:$0xff] }
 0xc18   :  { %v5242_v27 = vadd.f32 -1.0, %v2529_v36 }
 0xc1a   :  { %v2532_v37 = vmul.f32 %v5242_v27, %v2531_v56 }
 0xc1c   :  { %v2535_v22 = vadd.f32 %v2534_v34, %v2532_v37 }
 0xc1e   :  { %2537 = vrot.lane.b32.xlu1 %v2535_v22, %s5828_s19 }
 0xc26   :  { %1967 = vrot.lane.b32.xlu1 %v6414_v23, %s5828_s19  ;;  %v5253_v23 = vld [vmem:[%s7129_s1 + $0xf0] sm:$0xff] }
 0xc27   :  { %2612 = vmatpush.msra.mxu0 %v5253_v23 }
 0xc29   :  { %2613 = vmatpush.msra.mxu0 %v5252_v25 }
 0xc2b   :  { %2614 = vmatpush.msra.mxu0 %v5251_v19 }
 0xc2d   :  { %2820 = vmatpush.msrb.mxu0 %v6499_v8 }
 0xc2f   :  { %2821 = vmatpush.msrb.mxu0 %v6504_v7 }
 0xc62   :  { %v2693_v62 = vpop.f32.mrf.mxu2 }
 0xc6a   :  { %v2713_v12 = vpop.f32.mrf.mxu2 }
 0xc90   :  { %v2538_v20 = vpop.permute.xlu1 %2537 }
 0xc91   :  { %2540 = vst.msk [vmem:[#allocation2] sm:$0x3] %vm7137_vm9, %v2538_v20 }
 0xc98   :  { %v6583_v3 = vld [vmem:[#allocation2] sm:$0xff]  ;;  %v1968_v39 = vpop.permute.xlu1 %1967 }
 0xc99   :  { %1971 = vst.msk [vmem:[#allocation2 + $0x8] sm:$0x3] %vm7137_vm9, %v1968_v39  ;;  %5248 = vmatmul.msk.f32.vlgmr.msra.gmra.mxu3 %vm37_vm0, %v6583_v3  ;;  %5256 = vmatmul.msk.f32.vlgmr.msra.gmra.mxu0 %vm37_vm0, %v6583_v3 }
 0xc9a   :  { %5264 = vmatmul.msk.f32.vlgmr.msrb.gmra.mxu1 %vm37_vm0, %v6583_v3  ;;  %2962 = vmatpush.msra.mxu3 %v6499_v8 }
 0xc9b   :  { %2982 = vmatpush.msra.mxu0 %v6534_v47  ;;  %3002 = vmatpush.msrb.mxu1 %v6569_v60 }
 0xc9c   :  { %2963 = vmatpush.msra.mxu3 %v6504_v7 }
 0xc9d   :  { %2983 = vmatpush.msra.mxu0 %v6549_v53  ;;  %3003 = vmatpush.msrb.mxu1 %v6574_v43 }
 0xca0   :  { %v6598_v49 = vld [vmem:[#allocation2 + $0x8] sm:$0xff] }
 0xca1   :  { %5249 = vmatmul.msk.f32.gmra.mxu3 %vm37_vm0, %v6598_v49  ;;  %5257 = vmatmul.msk.f32.gmra.mxu0 %vm37_vm0, %v6598_v49 }
 0xca2   :  { %5265 = vmatmul.msk.f32.gmra.mxu1 %vm37_vm0, %v6598_v49 }
 0xca9   :  { %2732 = vmatmul.f32.vlgmr.msrb.gmra.mxu3 %v5827_v9 }
 0xcaa   :  { %3124 = vmatpush.msrb.mxu3 %v6534_v47 }
 0xcac   :  { %3125 = vmatpush.msrb.mxu3 %v6549_v53 }
 0xd16   :  { %v2616_v50 = vpop.f32.mrf.mxu0 }
 0xd17   :  { %v2617_v40 = vadd.f32 %v5379_v33, %v2616_v50  ;;  %v2656_v56 = vpop.f32.mrf.mxu1 }
 0xd18   :  { %v6643_v61 = vadd.f32 %v6639_v31, %v2656_v56 }
 0xd19   :  { %v6628_v10 = vadd.f32 %v5380_v54, %v2617_v40 }
 0xd1b   :  { %v2756_v59 = vadd.f32 %v2713_v12, %v6628_v10 }
 0xd1c   :  { %v2576_v51 = vpop.f32.mrf.mxu3 }
 0xd1d   :  { %v2577_v38 = vadd.f32 %v5382_v4, %v2576_v51  ;;  %v2757_v5 = vsub.f32 0.0, %v2756_v59 }
 0xd1e   :  { %v2619_v41 = vpop.f32.mrf.mxu0 }
 0xd1f   :  { %v6621_v32 = vadd.f32 %v5383_v52, %v2577_v38  ;;  %v2620_v57 = vadd.f32 %v5379_v33, %v2619_v41  ;;  %v2758_v48 = vmul.f32 1.442695, %v2757_v5 }
 0xd21   :  { %v2736_v63 = vadd.f32 %v2693_v62, %v6621_v32  ;;  %v6624_v29 = vadd.f32 %v5380_v54, %v2620_v57 }
 0xd23   :  { %v2737_v46 = vsub.f32 0.0, %v2736_v63 }
 0xd24   :  { %v2579_v0 = vpop.f32.mrf.mxu3 }
 0xd25   :  { %v2738_v1 = vmul.f32 1.442695, %v2737_v46  ;;  %v2580_v42 = vadd.f32 %v5382_v4, %v2579_v0 }
 0xd27   :  { %5585 = vpow2.f32 %v2738_v1  ;;  %v6626_v35 = vadd.f32 %v5383_v52, %v2580_v42 }
 0xd2c   :  { %v2733_v28 = vpop.f32.mrf.mxu3 }
 0xd2d   :  { %v5586_v14 = vpop.eup %5585  ;;  %v2734_v36 = vadd.f32 %v6634_v24, %v2733_v28 }
 0xd2e   :  { %v2740_v6 = vadd.f32 1.0, %v5586_v14 }
 0xd30   :  { %5587 = vrcp.f32 %v2740_v6  ;;  %v2752_v30 = vand.u32 2147483648, %v2740_v6  ;;  %v2750_v45 = vand.u32 2147483647, %v2740_v6  ;;  %vm2746_vm11 = vweird.f32 %v2740_v6 }
 0xd31   :  { %5589 = vpow2.f32 %v2758_v48  ;;  %v6662_v48 = vpop.f32.mrf.mxu1 }
 0xd32   :  { %v2753_v37 = vor.u32 1.1754944e-38, %v2752_v30  ;;  %vm2751_vm7 = vcmp.eq.f32.partialorder %v2750_v45, 8.507059e+37 }
 0xd36   :  { %v5588_v58 = vpop.eup %5587 }
 0xd37   :  { %v2742_v18 = vmul.f32 %v5588_v58, %v2740_v6  ;;  %vm2747_vm10 = vweird.f32 %v5588_v58  ;;  %v5590_v34 = vpop.eup %5589 }
 0xd38   :  { %vm2748_vm3 = vmor %vm2746_vm11, %vm2747_vm10  ;;  %v2760_v13 = vadd.f32 1.0, %v5590_v34 }
 0xd39   :  { %v2743_v26 = vsub.f32 1.0, %v2742_v18 }
 0xd3a   :  { %5591 = vrcp.f32 %v2760_v13  ;;  %vm2766_vm5 = vweird.f32 %v2760_v13  ;;  %v2772_v51 = vand.u32 2147483648, %v2760_v13  ;;  %v2770_v38 = vand.u32 2147483647, %v2760_v13 }
 0xd3b   :  { %v2744_v17 = vmul.f32 %v5588_v58, %v2743_v26 }
 0xd3c   :  { %v2773_v63 = vor.u32 1.1754944e-38, %v2772_v51 }
 0xd3d   :  { %v2745_v27 = vadd.f32 %v5588_v58, %v2744_v17 }
 0xd3f   :  { %v2749_v22 = vsel %vm2748_vm3, %v5588_v58, %v2745_v27 }
 0xd40   :  { %v2754_v44 = vsel %vm2751_vm7, %v2753_v37, %v2749_v22  ;;  %v5592_v25 = vpop.eup %5591  ;;  %vm2771_vm7 = vcmp.eq.f32.partialorder %v2770_v38, 8.507059e+37 }
 0xd41   :  { %v2776_v55 = vmul.f32 %v2754_v44, %v2734_v36  ;;  %v2762_v2 = vmul.f32 %v5592_v25, %v2760_v13  ;;  %vm2767_vm4 = vweird.f32 %v5592_v25 }
 0xd42   :  { %vm2768_vm10 = vmor %vm2766_vm5, %vm2767_vm4 }
 0xd43   :  { %v2777_v23 = vadd.f32 %v2776_v55, %v6643_v61  ;;  %v2763_v11 = vsub.f32 1.0, %v2762_v2 }
 0xd45   :  { %v2778_v16 = vmul.f32 -2.0, %v2777_v23  ;;  %v2764_v20 = vmul.f32 %v5592_v25, %v2763_v11 }
 0xd47   :  { %v2779_v15 = vmul.f32 1.442695, %v2778_v16  ;;  %v2765_v4 = vadd.f32 %v5592_v25, %v2764_v20 }
 0xd49   :  { %5593 = vpow2.f32 %v2779_v15  ;;  %v2769_v57 = vsel %vm2768_vm10, %v5592_v25, %v2765_v4 }
 0xd4a   :  { %v2774_v40 = vsel %vm2771_vm7, %v2773_v63, %v2769_v57 }
 0xd4b   :  { %v2798_v14 = vsub.f32 1.0, %v2774_v40  ;;  %v2800_v6 = vmul.f32 0.0, %v2774_v40 }
 0xd4f   :  { %v5594_v21 = vpop.eup %5593 }
 0xd50   :  { %v2781_v19 = vadd.f32 1.0, %v5594_v21 }
 0xd52   :  { %5595 = vrcp.f32 %v2781_v19  ;;  %v2793_v33 = vand.u32 2147483648, %v2781_v19  ;;  %v2791_v54 = vand.u32 2147483647, %v2781_v19  ;;  %vm2787_vm11 = vweird.f32 %v2781_v19 }
 0xd54   :  { %v2794_v46 = vor.u32 1.1754944e-38, %v2793_v33  ;;  %vm2792_vm9 = vcmp.eq.f32.partialorder %v2791_v54, 8.507059e+37 }
 0xd58   :  { %v5596_v39 = vpop.eup %5595 }
 0xd59   :  { %v2783_v50 = vmul.f32 %v5596_v39, %v2781_v19  ;;  %vm2788_vm6 = vweird.f32 %v5596_v39 }
 0xd5a   :  { %vm2789_vm3 = vmor %vm2787_vm11, %vm2788_vm6 }
 0xd5b   :  { %v2784_v52 = vsub.f32 1.0, %v2783_v50 }
 0xd5d   :  { %v2785_v41 = vmul.f32 %v5596_v39, %v2784_v52 }
 0xd5f   :  { %v2786_v62 = vadd.f32 %v5596_v39, %v2785_v41 }
 0xd61   :  { %v2790_v0 = vsel %vm2789_vm3, %v5596_v39, %v2786_v62 }
 0xd62   :  { %v2795_v1 = vsel %vm2792_vm9, %v2794_v46, %v2790_v0 }
 0xd63   :  { %v2796_v42 = vmul.f32 2.0, %v2795_v1 }
 0xd65   :  { %v5273_v12 = vadd.f32 -1.0, %v2796_v42 }
 0xd67   :  { %v2799_v59 = vmul.f32 %v5273_v12, %v2798_v14 }
 0xd69   :  { %v6646_v5 = vadd.f32 %v2800_v6, %v2799_v59 }
 0xd6b   :  { %5274 = vmatmul.msk.f32.vlgmr.msrb.gmra.mxu0 %vm159_vm13, %v6646_v5  ;;  %2802 = vst.msk [vmem:[#allocation2] sm:$0x3] %vm289_vm14, %v6646_v5  ;;  %5275 = vmatmul.msk.f32.vlgmr.msra.gmra.mxu1 %vm159_vm13, %v6646_v5 }
 0xd6c   :  { %5276 = vmatmul.msk.f32.vlgmr.msrb.gmra.mxu2 %vm159_vm13, %v6646_v5  ;;  %3144 = vmatpush.msrb.mxu0 %v6569_v60 }
 0xd6d   :  { %3246 = vmatpush.msra.mxu1 %v6499_v8  ;;  %3266 = vmatpush.msrb.mxu2 %v6534_v47 }
 0xd6e   :  { %3145 = vmatpush.msrb.mxu0 %v6574_v43 }
 0xd6f   :  { %3247 = vmatpush.msra.mxu1 %v6504_v7  ;;  %3267 = vmatpush.msrb.mxu2 %v6549_v53 }
 0xde8   :  { %v2823_v58 = vpop.f32.mrf.mxu0  ;;  %v2843_v17 = vpop.f32.mrf.mxu1 }
 0xde9   :  { %v2867_v18 = vrot.slane %v2823_v58, 6  ;;  %v2890_v45 = vrot.slane %v2843_v17, 6 }
 0xdeb   :  { %v2869_v26 = vadd.f32 %v2867_v18, %v6621_v32  ;;  %v2892_v27 = vadd.f32 %v2890_v45, %v6628_v10 }
 0xded   :  { %v2870_v28 = vsub.f32 0.0, %v2869_v26  ;;  %v2893_v37 = vsub.f32 0.0, %v2892_v27 }
 0xdef   :  { %v2871_v30 = vmul.f32 1.442695, %v2870_v28  ;;  %v2894_v34 = vmul.f32 1.442695, %v2893_v37  ;;  %v2863_v55 = vpop.f32.mrf.mxu2  ;;  %v2939_v37 = vrot.slane %v6646_v5, 6 }
 0xdf0   :  { %v2864_v16 = vadd.f32 %v6634_v24, %v2863_v55 }
 0xdf1   :  { %5597 = vpow2.f32 %v2871_v30 }
 0xdf2   :  { %v2913_v20 = vrot.slane %v2864_v16, 6 }
 0xdf7   :  { %v5598_v36 = vpop.eup %5597 }
 0xdf8   :  { %v2873_v56 = vadd.f32 1.0, %v5598_v36 }
 0xdfa   :  { %5599 = vrcp.f32 %v2873_v56  ;;  %v2885_v23 = vand.u32 2147483648, %v2873_v56  ;;  %v2883_v25 = vand.u32 2147483647, %v2873_v56  ;;  %vm2879_vm4 = vweird.f32 %v2873_v56 }
 0xdfb   :  { %5601 = vpow2.f32 %v2894_v34 }
 0xdfc   :  { %v2886_v2 = vor.u32 1.1754944e-38, %v2885_v23  ;;  %vm2884_vm6 = vcmp.eq.f32.partialorder %v2883_v25, 8.507059e+37 }
 0xe00   :  { %v5600_v22 = vpop.eup %5599 }
 0xe01   :  { %v2875_v44 = vmul.f32 %v5600_v22, %v2873_v56  ;;  %vm2880_vm9 = vweird.f32 %v5600_v22  ;;  %v5602_v19 = vpop.eup %5601 }
 0xe02   :  { %vm2881_vm5 = vmor %vm2879_vm4, %vm2880_vm9  ;;  %v2896_v4 = vadd.f32 1.0, %v5602_v19 }
 0xe03   :  { %v2876_v13 = vsub.f32 1.0, %v2875_v44 }
 0xe04   :  { %5603 = vrcp.f32 %v2896_v4  ;;  %vm2902_vm11 = vweird.f32 %v2896_v4  ;;  %v2908_v42 = vand.u32 2147483648, %v2896_v4  ;;  %v2906_v14 = vand.u32 2147483647, %v2896_v4 }
 0xe05   :  { %v2877_v15 = vmul.f32 %v5600_v22, %v2876_v13 }
 0xe06   :  { %v2909_v26 = vor.u32 1.1754944e-38, %v2908_v42 }
 0xe07   :  { %v2878_v21 = vadd.f32 %v5600_v22, %v2877_v15 }
 0xe09   :  { %v2882_v11 = vsel %vm2881_vm5, %v5600_v22, %v2878_v21  ;;  %vm2907_vm5 = vcmp.eq.f32.partialorder %v2906_v14, 8.507059e+37 }
 0xe0a   :  { %v2887_v39 = vsel %vm2884_vm6, %v2886_v2, %v2882_v11  ;;  %v5604_v38 = vpop.eup %5603 }
 0xe0b   :  { %v2915_v50 = vmul.f32 %v2913_v20, %v2887_v39  ;;  %v2898_v54 = vmul.f32 %v5604_v38, %v2896_v4  ;;  %vm2903_vm10 = vweird.f32 %v5604_v38 }
 0xe0c   :  { %vm2904_vm7 = vmor %vm2902_vm11, %vm2903_vm10 }
 0xe0d   :  { %v2916_v52 = vadd.f32 %v2915_v50, %v6643_v61  ;;  %v2899_v62 = vsub.f32 1.0, %v2898_v54 }
 0xe0f   :  { %v2917_v51 = vmul.f32 -2.0, %v2916_v52  ;;  %v2900_v63 = vmul.f32 %v5604_v38, %v2899_v62 }
 0xe11   :  { %v2918_v33 = vmul.f32 1.442695, %v2917_v51  ;;  %v2901_v40 = vadd.f32 %v5604_v38, %v2900_v63 }
 0xe13   :  { %5605 = vpow2.f32 %v2918_v33  ;;  %v2905_v58 = vsel %vm2904_vm7, %v5604_v38, %v2901_v40 }
 0xe14   :  { %v2910_v17 = vsel %vm2907_vm5, %v2909_v26, %v2905_v58 }
 0xe15   :  { %v2937_v56 = vsub.f32 1.0, %v2910_v17  ;;  %v2941_v22 = vmul.f32 %v2939_v37, %v2910_v17 }
 0xe19   :  { %v5606_v41 = vpop.eup %5605 }
 0xe1a   :  { %v2920_v57 = vadd.f32 1.0, %v5606_v41 }
 0xe1c   :  { %5607 = vrcp.f32 %v2920_v57  ;;  %v2932_v12 = vand.u32 2147483648, %v2920_v57  ;;  %v2930_v6 = vand.u32 2147483647, %v2920_v57  ;;  %vm2926_vm9 = vweird.f32 %v2920_v57 }
 0xe1e   :  { %v2933_v28 = vor.u32 1.1754944e-38, %v2932_v12  ;;  %vm2931_vm6 = vcmp.eq.f32.partialorder %v2930_v6, 8.507059e+37 }
 0xe22   :  { %v5608_v46 = vpop.eup %5607 }
 0xe23   :  { %v2922_v0 = vmul.f32 %v5608_v46, %v2920_v57  ;;  %vm2927_vm3 = vweird.f32 %v5608_v46 }
 0xe24   :  { %vm2928_vm4 = vmor %vm2926_vm9, %vm2927_vm3 }
 0xe25   :  { %v2923_v1 = vsub.f32 1.0, %v2922_v0 }
 0xe27   :  { %v2924_v59 = vmul.f32 %v5608_v46, %v2923_v1 }
 0xe29   :  { %v2925_v18 = vadd.f32 %v5608_v46, %v2924_v59 }
 0xe2b   :  { %v2929_v30 = vsel %vm2928_vm4, %v5608_v46, %v2925_v18 }
 0xe2c   :  { %v2934_v45 = vsel %vm2931_vm6, %v2933_v28, %v2929_v30 }
 0xe2d   :  { %v2935_v36 = vmul.f32 2.0, %v2934_v45 }
 0xe2f   :  { %v5277_v27 = vadd.f32 -1.0, %v2935_v36 }
 0xe31   :  { %v2938_v34 = vmul.f32 %v5277_v27, %v2937_v56 }
 0xe33   :  { %v6669_v44 = vadd.f32 %v2941_v22, %v2938_v34 }
 0xe35   :  { %v2945_v55 = vrot.slane %v6669_v44, 2  ;;  %2943 = vst.msk [vmem:[#allocation2] sm:$0xc] %vm431_vm12, %v6669_v44 }
 0xe37   :  { %5278 = vmatmul.msk.f32.vlgmr.msra.gmra.mxu3 %vm159_vm13, %v2945_v55  ;;  %5279 = vmatmul.msk.f32.vlgmr.msra.gmra.mxu0 %vm159_vm13, %v2945_v55 }
 0xe38   :  { %5280 = vmatmul.msk.f32.vlgmr.msrb.gmra.mxu1 %vm159_vm13, %v2945_v55  ;;  %3286 = vmatpush.msra.mxu3 %v6569_v60 }
 0xe39   :  { %3377 = vmatpush.msra.mxu0 %v6499_v8  ;;  %3397 = vmatpush.msrb.mxu1 %v6534_v47 }
 0xe3a   :  { %3287 = vmatpush.msra.mxu3 %v6574_v43 }
 0xe3b   :  { %3378 = vmatpush.msra.mxu0 %v6504_v7  ;;  %3398 = vmatpush.msrb.mxu1 %v6549_v53 }
 0xeb4   :  { %v2985_v25 = vpop.f32.mrf.mxu0 }
 0xeb5   :  { %v3032_v21 = vrot.slane %v2985_v25, 4  ;;  %v3005_v52 = vpop.f32.mrf.mxu1 }
 0xeb6   :  { %v3006_v38 = vadd.f32 %v6634_v24, %v3005_v52 }
 0xeb7   :  { %v3034_v19 = vadd.f32 %v3032_v21, %v6628_v10 }
 0xeb8   :  { %v3055_v46 = vrot.slane %v3006_v38, 4 }
 0xeb9   :  { %v3035_v20 = vsub.f32 0.0, %v3034_v19 }
 0xeba   :  { %v2965_v5 = vpop.f32.mrf.mxu3 }
 0xebb   :  { %v3009_v13 = vrot.slane %v2965_v5, 4  ;;  %v3036_v39 = vmul.f32 1.442695, %v3035_v20  ;;  %v3081_v20 = vrot.slane %v6669_v44, 6 }
 0xebd   :  { %v3011_v23 = vadd.f32 %v3009_v13, %v6621_v32 }
 0xebf   :  { %v3012_v16 = vsub.f32 0.0, %v3011_v23 }
 0xec1   :  { %v3013_v15 = vmul.f32 1.442695, %v3012_v16 }
 0xec3   :  { %5609 = vpow2.f32 %v3013_v15 }
 0xec9   :  { %v5610_v2 = vpop.eup %5609 }
 0xeca   :  { %v3015_v11 = vadd.f32 1.0, %v5610_v2 }
 0xecc   :  { %5611 = vrcp.f32 %v3015_v11  ;;  %v3027_v33 = vand.u32 2147483648, %v3015_v11  ;;  %v3025_v54 = vand.u32 2147483647, %v3015_v11  ;;  %vm3021_vm11 = vweird.f32 %v3015_v11 }
 0xecd   :  { %5613 = vpow2.f32 %v3036_v39 }
 0xece   :  { %v3028_v62 = vor.u32 1.1754944e-38, %v3027_v33  ;;  %vm3026_vm7 = vcmp.eq.f32.partialorder %v3025_v54, 8.507059e+37 }
 0xed2   :  { %v5612_v50 = vpop.eup %5611 }
 0xed3   :  { %v3017_v4 = vmul.f32 %v5612_v50, %v3015_v11  ;;  %vm3022_vm10 = vweird.f32 %v5612_v50  ;;  %v5614_v63 = vpop.eup %5613 }
 0xed4   :  { %vm3023_vm3 = vmor %vm3021_vm11, %vm3022_vm10  ;;  %v3038_v42 = vadd.f32 1.0, %v5614_v63 }
 0xed5   :  { %v3018_v51 = vsub.f32 1.0, %v3017_v4 }
 0xed6   :  { %5615 = vrcp.f32 %v3038_v42  ;;  %vm3044_vm4 = vweird.f32 %v3038_v42  ;;  %v3050_v56 = vand.u32 2147483648, %v3038_v42  ;;  %v3048_v34 = vand.u32 2147483647, %v3038_v42 }
 0xed7   :  { %v3019_v41 = vmul.f32 %v5612_v50, %v3018_v51 }
 0xed8   :  { %v3051_v23 = vor.u32 1.1754944e-38, %v3050_v56 }
 0xed9   :  { %v3020_v57 = vadd.f32 %v5612_v50, %v3019_v41 }
 0xedb   :  { %v3024_v0 = vsel %vm3023_vm3, %v5612_v50, %v3020_v57  ;;  %vm3049_vm3 = vcmp.eq.f32.partialorder %v3048_v34, 8.507059e+37 }
 0xedc   :  { %v3029_v40 = vsel %vm3026_vm7, %v3028_v62, %v3024_v0  ;;  %v5616_v6 = vpop.eup %5615 }
 0xedd   :  { %v3057_v1 = vmul.f32 %v3055_v46, %v3029_v40  ;;  %v3040_v18 = vmul.f32 %v5616_v6, %v3038_v42  ;;  %vm3045_vm9 = vweird.f32 %v5616_v6 }
 0xede   :  { %vm3046_vm6 = vmor %vm3044_vm4, %vm3045_vm9 }
 0xedf   :  { %v3058_v12 = vadd.f32 %v3057_v1, %v6643_v61  ;;  %v3041_v28 = vsub.f32 1.0, %v3040_v18 }
 0xee1   :  { %v3059_v14 = vmul.f32 -2.0, %v3058_v12  ;;  %v3042_v30 = vmul.f32 %v5616_v6, %v3041_v28 }
 0xee3   :  { %v3060_v59 = vmul.f32 1.442695, %v3059_v14  ;;  %v3043_v36 = vadd.f32 %v5616_v6, %v3042_v30 }
 0xee5   :  { %5617 = vpow2.f32 %v3060_v59  ;;  %v3047_v5 = vsel %vm3046_vm6, %v5616_v6, %v3043_v36 }
 0xee6   :  { %v3052_v25 = vsel %vm3049_vm3, %v3051_v23, %v3047_v5 }
 0xee7   :  { %v3079_v11 = vsub.f32 1.0, %v3052_v25  ;;  %v3083_v50 = vmul.f32 %v3081_v20, %v3052_v25 }
 0xeeb   :  { %v5618_v58 = vpop.eup %5617 }
 0xeec   :  { %v3062_v26 = vadd.f32 1.0, %v5618_v58 }
 0xeee   :  { %5619 = vrcp.f32 %v3062_v26  ;;  %v3074_v37 = vand.u32 2147483648, %v3062_v26  ;;  %v3072_v55 = vand.u32 2147483647, %v3062_v26  ;;  %vm3068_vm10 = vweird.f32 %v3062_v26 }
 0xef0   :  { %v3075_v16 = vor.u32 1.1754944e-38, %v3074_v37  ;;  %vm3073_vm7 = vcmp.eq.f32.partialorder %v3072_v55, 8.507059e+37 }
 0xef4   :  { %v5620_v17 = vpop.eup %5619 }
 0xef5   :  { %v3064_v45 = vmul.f32 %v5620_v17, %v3062_v26  ;;  %vm3069_vm5 = vweird.f32 %v5620_v17 }
 0xef6   :  { %vm3070_vm11 = vmor %vm3068_vm10, %vm3069_vm5 }
 0xef7   :  { %v3065_v27 = vsub.f32 1.0, %v3064_v45 }
 0xef9   :  { %v3066_v22 = vmul.f32 %v5620_v17, %v3065_v27 }
 0xefb   :  { %v3067_v13 = vadd.f32 %v5620_v17, %v3066_v22 }
 0xefd   :  { %v3071_v15 = vsel %vm3070_vm11, %v5620_v17, %v3067_v13 }
 0xefe   :  { %v3076_v21 = vsel %vm3073_vm7, %v3075_v16, %v3071_v15 }
 0xeff   :  { %v3077_v2 = vmul.f32 2.0, %v3076_v21 }
 0xf01   :  { %v5281_v19 = vadd.f32 -1.0, %v3077_v2 }
 0xf03   :  { %v3080_v39 = vmul.f32 %v5281_v19, %v3079_v11 }
 0xf05   :  { %v6688_v4 = vadd.f32 %v3083_v50, %v3080_v39 }
 0xf07   :  { %v3087_v52 = vrot.slane %v6688_v4, 4  ;;  %3085 = vst.msk [vmem:[#allocation2] sm:$0x30] %vm574_vm15, %v6688_v4 }
 0xf09   :  { %5282 = vmatmul.msk.f32.vlgmr.msra.gmra.mxu2 %vm159_vm13, %v3087_v52  ;;  %5283 = vmatmul.msk.f32.vlgmr.msrb.gmra.mxu3 %vm159_vm13, %v3087_v52 }
 0xf0a   :  { %5284 = vmatmul.msk.f32.vlgmr.msrb.gmra.mxu0 %vm159_vm13, %v3087_v52  ;;  %3417 = vmatpush.msra.mxu2 %v6569_v60 }
 0xf0b   :  { %3519 = vmatpush.msrb.mxu3 %v6499_v8  ;;  %3539 = vmatpush.msrb.mxu0 %v6534_v47 }
 0xf0c   :  { %3418 = vmatpush.msra.mxu2 %v6574_v43 }
 0xf0d   :  { %3520 = vmatpush.msrb.mxu3 %v6504_v7  ;;  %3540 = vmatpush.msrb.mxu0 %v6549_v53 }
 0xf87   :  { %v3147_v12 = vpop.f32.mrf.mxu0 }
 0xf8c   :  { %v3107_v44 = vpop.f32.mrf.mxu2  ;;  %v3127_v54 = vpop.f32.mrf.mxu3 }
 0xf8d   :  { %v3151_v51 = vrot.slane %v3107_v44, 2  ;;  %v3174_v57 = vrot.slane %v3127_v54, 2 }
 0xf8f   :  { %v3153_v33 = vadd.f32 %v3151_v51, %v6621_v32  ;;  %v3176_v63 = vadd.f32 %v3174_v57, %v6628_v10  ;;  %v3148_v32 = vadd.f32 %v6634_v24, %v3147_v12 }
 0xf91   :  { %v3154_v38 = vsub.f32 0.0, %v3153_v33  ;;  %v3177_v0 = vsub.f32 0.0, %v3176_v63  ;;  %v3197_v28 = vrot.slane %v3148_v32, 2 }
 0xf93   :  { %v3155_v41 = vmul.f32 1.442695, %v3154_v38  ;;  %v3178_v40 = vmul.f32 1.442695, %v3177_v0 }
 0xf95   :  { %5621 = vpow2.f32 %v3155_v41 }
 0xf9b   :  { %v5622_v62 = vpop.eup %5621 }
 0xf9c   :  { %v3157_v46 = vadd.f32 1.0, %v5622_v62  ;;  %v3223_v62 = vrot.slane %v6688_v4, 6 }
 0xf9e   :  { %5623 = vrcp.f32 %v3157_v46  ;;  %v3169_v59 = vand.u32 2147483648, %v3157_v46  ;;  %v3167_v58 = vand.u32 2147483647, %v3157_v46  ;;  %vm3163_vm4 = vweird.f32 %v3157_v46 }
 0xf9f   :  { %5625 = vpow2.f32 %v3178_v40 }
 0xfa0   :  { %v3170_v26 = vor.u32 1.1754944e-38, %v3169_v59  ;;  %vm3168_vm6 = vcmp.eq.f32.partialorder %v3167_v58, 8.507059e+37 }
 0xfa4   :  { %v5624_v1 = vpop.eup %5623 }
 0xfa5   :  { %v3159_v42 = vmul.f32 %v5624_v1, %v3157_v46  ;;  %vm3164_vm9 = vweird.f32 %v5624_v1  ;;  %v5626_v10 = vpop.eup %5625 }
 0xfa6   :  { %vm3165_vm5 = vmor %vm3163_vm4, %vm3164_vm9  ;;  %v3180_v36 = vadd.f32 1.0, %v5626_v10 }
 0xfa7   :  { %v3160_v14 = vsub.f32 1.0, %v3159_v42 }
 0xfa8   :  { %5627 = vrcp.f32 %v3180_v36  ;;  %vm3186_vm11 = vweird.f32 %v3180_v36  ;;  %v3192_v2 = vand.u32 2147483648, %v3180_v36 }
 0xfa9   :  { %v3161_v6 = vmul.f32 %v5624_v1, %v3160_v14 }
 0xfaa   :  { %v3193_v52 = vor.u32 1.1754944e-38, %v3192_v2 }
 0xfab   :  { %v3162_v18 = vadd.f32 %v5624_v1, %v3161_v6 }
 0xfad   :  { %v3166_v30 = vsel %vm3165_vm5, %v5624_v1, %v3162_v18 }
 0xfae   :  { %v3171_v17 = vsel %vm3168_vm6, %v3170_v26, %v3166_v30  ;;  %v5628_v34 = vpop.eup %5627 }
 0xfaf   :  { %v3199_v45 = vmul.f32 %v3197_v28, %v3171_v17  ;;  %v3182_v55 = vmul.f32 %v5628_v34, %v3180_v36  ;;  %vm3187_vm10 = vweird.f32 %v5628_v34 }
 0xfb0   :  { %vm3188_vm7 = vmor %vm3186_vm11, %vm3187_vm10 }
 0xfb1   :  { %v3200_v27 = vadd.f32 %v3199_v45, %v6643_v61  ;;  %v3183_v13 = vsub.f32 1.0, %v3182_v55  ;;  %v3190_v61 = vand.u32 2147483647, %v3180_v36 }
 0xfb3   :  { %v3201_v56 = vmul.f32 -2.0, %v3200_v27  ;;  %v3184_v23 = vmul.f32 %v5628_v34, %v3183_v13  ;;  %vm3191_vm5 = vcmp.eq.f32.partialorder %v3190_v61, 8.507059e+37 }
 0xfb5   :  { %v3202_v37 = vmul.f32 1.442695, %v3201_v56  ;;  %v3185_v25 = vadd.f32 %v5628_v34, %v3184_v23 }
 0xfb7   :  { %5629 = vpow2.f32 %v3202_v37  ;;  %v3189_v39 = vsel %vm3188_vm7, %v5628_v34, %v3185_v25  ;;  %v6727_v37 = vadd.f32 %v6639_v31, %v6662_v48 }
 0xfb8   :  { %v3194_v33 = vsel %vm3191_vm5, %v3193_v52, %v3189_v39 }
 0xfb9   :  { %v3221_v57 = vsub.f32 1.0, %v3194_v33  ;;  %v3225_v46 = vmul.f32 %v3223_v62, %v3194_v33 }
 0xfbd   :  { %v5630_v22 = vpop.eup %5629 }
 0xfbe   :  { %v3204_v5 = vadd.f32 1.0, %v5630_v22 }
 0xfc0   :  { %5631 = vrcp.f32 %v3204_v5  ;;  %v3216_v19 = vand.u32 2147483648, %v3204_v5  ;;  %v3214_v20 = vand.u32 2147483647, %v3204_v5  ;;  %vm3210_vm9 = vweird.f32 %v3204_v5 }
 0xfc2   :  { %v3217_v44 = vor.u32 1.1754944e-38, %v3216_v19  ;;  %vm3215_vm6 = vcmp.eq.f32.partialorder %v3214_v20, 8.507059e+37 }
 0xfc6   :  { %v5632_v16 = vpop.eup %5631 }
 0xfc7   :  { %v3206_v15 = vmul.f32 %v5632_v16, %v3204_v5  ;;  %vm3211_vm3 = vweird.f32 %v5632_v16 }
 0xfc8   :  { %vm3212_vm4 = vmor %vm3210_vm9, %vm3211_vm3 }
 0xfc9   :  { %v3207_v21 = vsub.f32 1.0, %v3206_v15 }
 0xfcb   :  { %v3208_v11 = vmul.f32 %v5632_v16, %v3207_v21 }
 0xfcd   :  { %v3209_v50 = vadd.f32 %v5632_v16, %v3208_v11 }
 0xfcf   :  { %v3213_v51 = vsel %vm3212_vm4, %v5632_v16, %v3209_v50 }
 0xfd0   :  { %v3218_v38 = vsel %vm3215_vm6, %v3217_v44, %v3213_v51 }
 0xfd1   :  { %v3219_v41 = vmul.f32 2.0, %v3218_v38 }
 0xfd3   :  { %v5285_v54 = vadd.f32 -1.0, %v3219_v41 }
 0xfd5   :  { %v3222_v63 = vmul.f32 %v5285_v54, %v3221_v57 }
 0xfd7   :  { %v3226_v0 = vadd.f32 %v3225_v46, %v3222_v63 }
 0xfd9   :  { %v6707_v40 = vrot.slane %v3226_v0, 6  ;;  %3227 = vst.msk [vmem:[#allocation2] sm:$0xc0] %vm717_vm2, %v3226_v0 }
 0xfdb   :  { %5286 = vmatmul.msk.f32.vlgmr.msra.gmra.mxu1 %vm159_vm13, %v6707_v40  ;;  %5287 = vmatmul.msk.f32.vlgmr.msrb.gmra.mxu2 %vm159_vm13, %v6707_v40 }
 0xfdc   :  { %5288 = vmatmul.msk.f32.vlgmr.msra.gmra.mxu3 %vm159_vm13, %v6707_v40  ;;  %3559 = vmatpush.msra.mxu1 %v6569_v60 }
 0xfdd   :  { %3661 = vmatpush.msrb.mxu2 %v6499_v8  ;;  %3681 = vmatpush.msra.mxu3 %v6534_v47 }
 0xfde   :  { %3560 = vmatpush.msra.mxu1 %v6574_v43 }
 0xfdf   :  { %3662 = vmatpush.msrb.mxu2 %v6504_v7  ;;  %3682 = vmatpush.msra.mxu3 %v6549_v53 }
0x1058   :  { %v3249_v4 = vpop.f32.mrf.mxu1 }
0x1059   :  { %v3292_v1 = vadd.f32 %v3249_v4, %v6626_v35 }
0x105b   :  { %v3293_v42 = vsub.f32 0.0, %v3292_v1 }
0x105d   :  { %v3294_v12 = vmul.f32 1.442695, %v3293_v42 }
0x105e   :  { %v3269_v14 = vpop.f32.mrf.mxu2 }
0x105f   :  { %5633 = vpow2.f32 %v3294_v12  ;;  %v3312_v32 = vadd.f32 %v3269_v14, %v6624_v29  ;;  %v3289_v28 = vpop.f32.mrf.mxu3 }
0x1060   :  { %v3290_v36 = vadd.f32 %v6634_v24, %v3289_v28 }
0x1061   :  { %v3313_v8 = vsub.f32 0.0, %v3312_v32 }
0x1063   :  { %v3314_v47 = vmul.f32 1.442695, %v3313_v8 }
0x1065   :  { %v5634_v59 = vpop.eup %5633 }
0x1066   :  { %v3296_v6 = vadd.f32 1.0, %v5634_v59 }
0x1068   :  { %5635 = vrcp.f32 %v3296_v6  ;;  %v3308_v26 = vand.u32 2147483648, %v3296_v6  ;;  %v3306_v10 = vand.u32 2147483647, %v3296_v6  ;;  %vm3302_vm11 = vweird.f32 %v3296_v6 }
0x1069   :  { %5637 = vpow2.f32 %v3314_v47 }
0x106a   :  { %v3309_v17 = vor.u32 1.1754944e-38, %v3308_v26  ;;  %vm3307_vm7 = vcmp.eq.f32.partialorder %v3306_v10, 8.507059e+37 }
0x106e   :  { %v5636_v58 = vpop.eup %5635 }
0x106f   :  { %v3298_v18 = vmul.f32 %v5636_v58, %v3296_v6  ;;  %vm3303_vm10 = vweird.f32 %v5636_v58  ;;  %v5638_v45 = vpop.eup %5637 }
0x1070   :  { %vm3304_vm3 = vmor %vm3302_vm11, %vm3303_vm10  ;;  %v3316_v22 = vadd.f32 1.0, %v5638_v45 }
0x1071   :  { %v3299_v7 = vsub.f32 1.0, %v3298_v18 }
0x1072   :  { %5639 = vrcp.f32 %v3316_v22  ;;  %vm3322_vm4 = vweird.f32 %v3316_v22  ;;  %v3328_v48 = vand.u32 2147483648, %v3316_v22  ;;  %v3326_v39 = vand.u32 2147483647, %v3316_v22 }
0x1073   :  { %v3300_v53 = vmul.f32 %v5636_v58, %v3299_v7 }
0x1074   :  { %v3329_v33 = vor.u32 1.1754944e-38, %v3328_v48 }
0x1075   :  { %v3301_v30 = vadd.f32 %v5636_v58, %v3300_v53 }
0x1077   :  { %v3305_v27 = vsel %vm3304_vm3, %v5636_v58, %v3301_v30  ;;  %vm3327_vm3 = vcmp.eq.f32.partialorder %v3326_v39, 8.507059e+37 }
0x1078   :  { %v3310_v56 = vsel %vm3307_vm7, %v3309_v17, %v3305_v27  ;;  %v5640_v23 = vpop.eup %5639 }
0x1079   :  { %v3332_v34 = vmul.f32 %v3310_v56, %v3290_v36  ;;  %v3318_v15 = vmul.f32 %v5640_v23, %v3316_v22  ;;  %vm3323_vm9 = vweird.f32 %v5640_v23 }
0x107a   :  { %vm3324_vm6 = vmor %vm3322_vm4, %vm3323_vm9 }
0x107b   :  { %v3333_v55 = vadd.f32 %v3332_v34, %v6727_v37  ;;  %v3319_v21 = vsub.f32 1.0, %v3318_v15  ;;  %v5305_v15 = vld [vmem:[%s7129_s1 + $0x138] sm:$0xff] }
0x107d   :  { %v3334_v5 = vmul.f32 -2.0, %v3333_v55  ;;  %v3320_v2 = vmul.f32 %v5640_v23, %v3319_v21 }
0x107f   :  { %v3335_v13 = vmul.f32 1.442695, %v3334_v5  ;;  %v3321_v11 = vadd.f32 %v5640_v23, %v3320_v2 }
0x1081   :  { %5641 = vpow2.f32 %v3335_v13  ;;  %v3325_v44 = vsel %vm3324_vm6, %v5640_v23, %v3321_v11  ;;  %v5302_v11 = vld [vmem:[%s7129_s1 + $0x120] sm:$0xff] }
0x1082   :  { %v3330_v54 = vsel %vm3327_vm3, %v3329_v33, %v3325_v44 }
0x1083   :  { %v3354_v46 = vsub.f32 1.0, %v3330_v54  ;;  %v3357_v4 = vmul.f32 %v3330_v54, %v6707_v40 }
0x1087   :  { %v5642_v16 = vpop.eup %5641 }
0x1088   :  { %v3337_v25 = vadd.f32 1.0, %v5642_v16 }
0x108a   :  { %5643 = vrcp.f32 %v3337_v25  ;;  %v3349_v20 = vand.u32 2147483648, %v3337_v25  ;;  %v3347_v52 = vand.u32 2147483647, %v3337_v25  ;;  %vm3343_vm10 = vweird.f32 %v3337_v25 }
0x108c   :  { %v3350_v38 = vor.u32 1.1754944e-38, %v3349_v20  ;;  %vm3348_vm7 = vcmp.eq.f32.partialorder %v3347_v52, 8.507059e+37 }
0x1090   :  { %v5644_v19 = vpop.eup %5643 }
0x1091   :  { %v3339_v61 = vmul.f32 %v5644_v19, %v3337_v25  ;;  %vm3344_vm5 = vweird.f32 %v5644_v19  ;;  %v5304_v25 = vld [vmem:[%s7129_s1 + $0x130] sm:$0xff] }
0x1092   :  { %vm3345_vm11 = vmor %vm3343_vm10, %vm3344_vm5 }
0x1093   :  { %v3340_v31 = vsub.f32 1.0, %v3339_v61  ;;  %v5303_v61 = vld [vmem:[%s7129_s1 + $0x128] sm:$0xff] }
0x1095   :  { %v3341_v50 = vmul.f32 %v5644_v19, %v3340_v31 }
0x1097   :  { %v3342_v51 = vadd.f32 %v5644_v19, %v3341_v50 }
0x1099   :  { %v3346_v41 = vsel %vm3345_vm11, %v5644_v19, %v3342_v51 }
0x109a   :  { %v3351_v57 = vsel %vm3348_vm7, %v3350_v38, %v3346_v41 }
0x109b   :  { %v3352_v62 = vmul.f32 2.0, %v3351_v57 }
0x109d   :  { %v5289_v63 = vadd.f32 -1.0, %v3352_v62 }
0x109f   :  { %v3355_v0 = vmul.f32 %v5289_v63, %v3354_v46 }
0x10a1   :  { %v6731_v1 = vadd.f32 %v3357_v4, %v3355_v0 }
0x10a3   :  { %5290 = vmatmul.msk.f32.vlgmr.msra.gmra.mxu0 %vm159_vm13, %v6731_v1  ;;  %3359 = vst.msk [vmem:[#allocation2 + $0x8] sm:$0x3] %vm289_vm14, %v6731_v1  ;;  %5291 = vmatmul.msk.f32.vlgmr.msrb.gmra.mxu1 %vm159_vm13, %v6731_v1 }
0x10a4   :  { %5292 = vmatmul.msk.f32.vlgmr.msra.gmra.mxu2 %vm159_vm13, %v6731_v1  ;;  %3701 = vmatpush.msra.mxu0 %v6569_v60 }
0x10a5   :  { %3807 = vmatpush.msrb.mxu1 %v5305_v15 }
0x10a6   :  { %3702 = vmatpush.msra.mxu0 %v6574_v43 }
0x10a7   :  { %3808 = vmatpush.msrb.mxu1 %v5304_v25 }
0x10a9   :  { %3809 = vmatpush.msrb.mxu1 %v5303_v61 }
0x10ab   :  { %3810 = vmatpush.msrb.mxu1 %v5302_v11 }
0x1120   :  { %v3380_v42 = vpop.f32.mrf.mxu0  ;;  %v3400_v32 = vpop.f32.mrf.mxu1 }
0x1121   :  { %v3424_v40 = vrot.slane %v3380_v42, 6  ;;  %v3447_v6 = vrot.slane %v3400_v32, 6 }
0x1123   :  { %v3426_v12 = vadd.f32 %v3424_v40, %v6626_v35  ;;  %v3449_v47 = vadd.f32 %v3447_v6, %v6624_v29 }
0x1125   :  { %v3427_v14 = vsub.f32 0.0, %v3426_v12  ;;  %v3450_v18 = vsub.f32 0.0, %v3449_v47 }
0x1127   :  { %v3428_v59 = vmul.f32 1.442695, %v3427_v14  ;;  %v3451_v7 = vmul.f32 1.442695, %v3450_v18  ;;  %v3420_v53 = vpop.f32.mrf.mxu2  ;;  %v3496_v14 = vrot.slane %v6731_v1, 6 }
0x1128   :  { %v3421_v28 = vadd.f32 %v6634_v24, %v3420_v53 }
0x1129   :  { %5645 = vpow2.f32 %v3428_v59 }
0x112a   :  { %v3470_v34 = vrot.slane %v3421_v28, 6 }
0x112f   :  { %v5646_v8 = vpop.eup %5645 }
0x1130   :  { %v3430_v58 = vadd.f32 1.0, %v5646_v8 }
0x1132   :  { %5647 = vrcp.f32 %v3430_v58  ;;  %v3442_v10 = vand.u32 2147483648, %v3430_v58  ;;  %v3440_v17 = vand.u32 2147483647, %v3430_v58  ;;  %vm3436_vm9 = vweird.f32 %v3430_v58 }
0x1133   :  { %5649 = vpow2.f32 %v3451_v7  ;;  %v6780_v7 = vld [vmem:[%s7132_s4 + $0x9] ss:$0 sm:$0xff] }
0x1134   :  { %v3443_v36 = vor.u32 1.1754944e-38, %v3442_v10  ;;  %vm3441_vm5 = vcmp.eq.f32.partialorder %v3440_v17, 8.507059e+37 }
0x1138   :  { %v5648_v26 = vpop.eup %5647 }
0x1139   :  { %v3432_v60 = vmul.f32 %v5648_v26, %v3430_v58  ;;  %vm3437_vm14 = vweird.f32 %v5648_v26  ;;  %v5650_v27 = vpop.eup %5649  ;;  %v6775_v58 = vld [vmem:[%s7130_s2 + $0x9] ss:$0 sm:$0xff] }
0x113a   :  { %vm3438_vm4 = vmor %vm3436_vm9, %vm3437_vm14  ;;  %v3453_v5 = vadd.f32 1.0, %v5650_v27 }
0x113b   :  { %v3433_v43 = vsub.f32 1.0, %v3432_v60 }
0x113c   :  { %5651 = vrcp.f32 %v3453_v5  ;;  %vm3459_vm10 = vweird.f32 %v3453_v5  ;;  %v3465_v44 = vand.u32 2147483648, %v3453_v5  ;;  %v3463_v33 = vand.u32 2147483647, %v3453_v5 }
0x113d   :  { %v3434_v30 = vmul.f32 %v5648_v26, %v3433_v43 }
0x113e   :  { %v3466_v62 = vor.u32 1.1754944e-38, %v3465_v44  ;;  %vm3464_vm9 = vcmp.eq.f32.partialorder %v3463_v33, 8.507059e+37  ;;  %v6798_v44 = vld [vmem:[%s7131_s3 + $0x98] sm:$0xff] }
0x113f   :  { %v3435_v45 = vadd.f32 %v5648_v26, %v3434_v30  ;;  %v5321_v33 = vld [vmem:[%s7129_s1 + $0x178] sm:$0xff] }
0x1141   :  { %v3439_v56 = vsel %vm3438_vm4, %v5648_v26, %v3435_v45 }
0x1142   :  { %v3444_v22 = vsel %vm3441_vm5, %v3443_v36, %v3439_v56  ;;  %v5652_v24 = vpop.eup %5651 }
0x1143   :  { %v3472_v55 = vmul.f32 %v3470_v34, %v3444_v22  ;;  %v3455_v2 = vmul.f32 %v5652_v24, %v3453_v5  ;;  %vm3460_vm6 = vweird.f32 %v5652_v24 }
0x1144   :  { %vm3461_vm3 = vmor %vm3459_vm10, %vm3460_vm6 }
0x1145   :  { %v3473_v13 = vadd.f32 %v3472_v55, %v6727_v37  ;;  %v3456_v31 = vsub.f32 1.0, %v3455_v2 }
0x1147   :  { %v3474_v23 = vmul.f32 -2.0, %v3473_v13  ;;  %v3457_v48 = vmul.f32 %v5652_v24, %v3456_v31 }
0x1149   :  { %v3475_v16 = vmul.f32 1.442695, %v3474_v23  ;;  %v3458_v50 = vadd.f32 %v5652_v24, %v3457_v48  ;;  %v6791_v23 = vld [vmem:[%s7132_s4 + $0x8] ss:$0 sm:$0xff] }
0x114b   :  { %5653 = vpow2.f32 %v3475_v16  ;;  %v3462_v54 = vsel %vm3461_vm3, %v5652_v24, %v3458_v50 }
0x114c   :  { %v3467_v0 = vsel %vm3464_vm9, %v3466_v62, %v3462_v54  ;;  %v5312_v54 = vld [vmem:[%s7129_s1 + $0x150] sm:$0xff] }
0x114d   :  { %v3494_v12 = vsub.f32 1.0, %v3467_v0  ;;  %v3498_v32 = vmul.f32 %v3496_v14, %v3467_v0  ;;  %v6816_v62 = vld [vmem:[%s7131_s3 + $0x90] sm:$0xff]  ;;  %v5319_v0 = vld [vmem:[%s7129_s1 + $0x168] sm:$0xff] }
0x1151   :  { %v5654_v21 = vpop.eup %5653 }
0x1152   :  { %v3477_v19 = vadd.f32 1.0, %v5654_v21 }
0x1154   :  { %5655 = vrcp.f32 %v3477_v19  ;;  %v3489_v51 = vand.u32 2147483648, %v3477_v19  ;;  %v3487_v41 = vand.u32 2147483647, %v3477_v19  ;;  %vm3483_vm7 = vweird.f32 %v3477_v19 }
0x1156   :  { %v3490_v63 = vor.u32 1.1754944e-38, %v3489_v51  ;;  %vm3488_vm4 = vcmp.eq.f32.partialorder %v3487_v41, 8.507059e+37  ;;  %v5313_v51 = vld [vmem:[%s7129_s1 + $0x158] sm:$0xff] }
0x1157   :  { %3847 = vmatpush.msra.mxu2 %v5313_v51 }
0x1159   :  { %3848 = vmatpush.msra.mxu2 %v5312_v54 }
0x115a   :  { %v5656_v20 = vpop.eup %5655 }
0x115b   :  { %v3479_v39 = vmul.f32 %v5656_v20, %v3477_v19  ;;  %vm3484_vm11 = vweird.f32 %v5656_v20 }
0x115c   :  { %vm3485_vm14 = vmor %vm3483_vm7, %vm3484_vm11 }
0x115d   :  { %v3480_v52 = vsub.f32 1.0, %v3479_v39 }
0x115f   :  { %v3481_v38 = vmul.f32 %v5656_v20, %v3480_v52 }
0x1161   :  { %v3482_v57 = vadd.f32 %v5656_v20, %v3481_v38 }
0x1163   :  { %v3486_v46 = vsel %vm3485_vm14, %v5656_v20, %v3482_v57  ;;  %v5320_v57 = vld [vmem:[%s7129_s1 + $0x170] sm:$0xff] }
0x1164   :  { %v3491_v4 = vsel %vm3488_vm4, %v3490_v63, %v3486_v46  ;;  %v5311_v46 = vld [vmem:[%s7129_s1 + $0x148] sm:$0xff] }
0x1165   :  { %v3492_v42 = vmul.f32 2.0, %v3491_v4  ;;  %v5310_v4 = vld [vmem:[%s7129_s1 + $0x140] sm:$0xff]  ;;  %3849 = vmatpush.msra.mxu2 %v5311_v46 }
0x1167   :  { %v5293_v40 = vadd.f32 -1.0, %v3492_v42  ;;  %3850 = vmatpush.msra.mxu2 %v5310_v4 }
0x1169   :  { %v3495_v59 = vmul.f32 %v5293_v40, %v3494_v12  ;;  %v5318_v40 = vld [vmem:[%s7129_s1 + $0x160] sm:$0xff] }
0x116b   :  { %v6760_v6 = vadd.f32 %v3498_v32, %v3495_v59 }
0x116d   :  { %v3502_v8 = vrot.slane %v6760_v6, 2  ;;  %3500 = vst.msk [vmem:[#allocation2 + $0x8] sm:$0xc] %vm431_vm12, %v6760_v6 }
0x116f   :  { %5294 = vmatmul.msk.f32.vlgmr.msrb.gmra.mxu3 %vm159_vm13, %v3502_v8  ;;  %5295 = vmatmul.msk.f32.vlgmr.msrb.gmra.mxu0 %vm159_vm13, %v3502_v8 }
0x1170   :  { %5296 = vmatmul.msk.f32.vlgmr.msra.gmra.mxu1 %vm159_vm13, %v3502_v8  ;;  %3926 = vmatpush.msrb.mxu0 %v6798_v44 }
0x1171   :  { %3887 = vmatpush.msrb.mxu3 %v5321_v33 }
0x1172   :  { %3927 = vmatpush.msrb.mxu0 %v6816_v62 }
0x1173   :  { %3888 = vmatpush.msrb.mxu3 %v5320_v57 }
0x1175   :  { %3889 = vmatpush.msrb.mxu3 %v5319_v0 }
0x1177   :  { %3890 = vmatpush.msrb.mxu3 %v5318_v40 }
0x1178   :  { %5307 = vmatmul.msk.f32.vlgmr.msrb.gmra.mxu1 %vm37_vm0, %v6583_v3 }
0x1180   :  { %5308 = vmatmul.msk.f32.gmra.mxu1 %vm37_vm0, %v6598_v49 }
0x11ec   :  { %v3542_v30 = vpop.f32.mrf.mxu0 }
0x11ed   :  { %v3562_v1 = vpop.f32.mrf.mxu1  ;;  %v3589_v17 = vrot.slane %v3542_v30, 4 }
0x11ee   :  { %v3563_v16 = vadd.f32 %v6791_v23, %v3562_v1 }
0x11ef   :  { %v3591_v36 = vadd.f32 %v3589_v17, %v6624_v29 }
0x11f0   :  { %v3612_v19 = vrot.slane %v3563_v16, 4  ;;  %v6856_v16 = vld [vmem:[%s7131_s3 + $0xa0] sm:$0xff] }
0x11f1   :  { %v3592_v56 = vsub.f32 0.0, %v3591_v36 }
0x11f2   :  { %v3522_v47 = vpop.f32.mrf.mxu3 }
0x11f3   :  { %v3566_v18 = vrot.slane %v3522_v47, 4  ;;  %v3593_v34 = vmul.f32 1.442695, %v3592_v56 }
0x11f5   :  { %v3568_v26 = vadd.f32 %v3566_v18, %v6626_v35  ;;  %v3812_v60 = vpop.f32.mrf.mxu1 }
0x11f6   :  { %v3813_v53 = vadd.f32 %v6775_v58, %v3812_v60 }
0x11f7   :  { %v3569_v43 = vsub.f32 0.0, %v3568_v26 }
0x11f8   :  { %v6785_v10 = vadd.f32 %v6780_v7, %v3813_v53  ;;  %v6834_v53 = vld [vmem:[%s7131_s3 + $0xb8] sm:$0xff] }
0x11f9   :  { %v3570_v28 = vmul.f32 1.442695, %v3569_v43  ;;  %3966 = vmatpush.msra.mxu1 %v6834_v53  ;;  %v6840_v43 = vld [vmem:[%s7131_s3 + $0xb0] sm:$0xff] }
0x11fb   :  { %5657 = vpow2.f32 %v3570_v28  ;;  %3967 = vmatpush.msra.mxu1 %v6840_v43 }
0x11fc   :  { %3968 = vmatmul.f32.vlgmr.msra.gmra.mxu1 %v5827_v9 }
0x11fd   :  { %4214 = vmatpush.msrb.mxu1 %v6798_v44 }
0x11ff   :  { %4215 = vmatpush.msrb.mxu1 %v6816_v62 }
0x1201   :  { %v5658_v45 = vpop.eup %5657 }
0x1202   :  { %v3572_v27 = vadd.f32 1.0, %v5658_v45 }
0x1204   :  { %5659 = vrcp.f32 %v3572_v27  ;;  %v3584_v13 = vand.u32 2147483648, %v3572_v27  ;;  %v3582_v15 = vand.u32 2147483647, %v3572_v27  ;;  %vm3578_vm5 = vweird.f32 %v3572_v27 }
0x1205   :  { %5661 = vpow2.f32 %v3593_v34 }
0x1206   :  { %v3585_v21 = vor.u32 1.1754944e-38, %v3584_v13  ;;  %vm3583_vm10 = vcmp.eq.f32.partialorder %v3582_v15, 8.507059e+37  ;;  %v3638_v13 = vrot.slane %v6760_v6, 6  ;;  %v3815_v6 = vpop.f32.mrf.mxu1 }
0x120a   :  { %v5660_v22 = vpop.eup %5659 }
0x120b   :  { %v3574_v55 = vmul.f32 %v5660_v22, %v3572_v27  ;;  %vm3579_vm12 = vweird.f32 %v5660_v22  ;;  %v5662_v2 = vpop.eup %5661 }
0x120c   :  { %vm3580_vm6 = vmor %vm3578_vm5, %vm3579_vm12  ;;  %v3595_v48 = vadd.f32 1.0, %v5662_v2  ;;  %v3816_v2 = vadd.f32 %v6775_v58, %v3815_v6 }
0x120d   :  { %v3575_v5 = vsub.f32 1.0, %v3574_v55 }
0x120e   :  { %5663 = vrcp.f32 %v3595_v48  ;;  %vm3601_vm3 = vweird.f32 %v3595_v48  ;;  %v3607_v1 = vand.u32 2147483648, %v3595_v48  ;;  %v3605_v18 = vand.u32 2147483647, %v3595_v48 }
0x120f   :  { %v3576_v24 = vmul.f32 %v5660_v22, %v3575_v5 }
0x1210   :  { %v3608_v17 = vor.u32 1.1754944e-38, %v3607_v1  ;;  %vm3606_vm12 = vcmp.eq.f32.partialorder %v3605_v18, 8.507059e+37 }
0x1211   :  { %v3577_v25 = vadd.f32 %v5660_v22, %v3576_v24 }
0x1213   :  { %v3581_v61 = vsel %vm3580_vm6, %v5660_v22, %v3577_v25  ;;  %v6848_v22 = vld [vmem:[%s7131_s3 + $0xa8] sm:$0xff] }
0x1214   :  { %v3586_v11 = vsel %vm3583_vm10, %v3585_v21, %v3581_v61  ;;  %v5664_v52 = vpop.eup %5663  ;;  %4379 = vmatpush.msra.mxu1 %v6848_v22 }
0x1215   :  { %v3614_v31 = vmul.f32 %v3612_v19, %v3586_v11  ;;  %v3597_v41 = vmul.f32 %v5664_v52, %v3595_v48  ;;  %vm3602_vm11 = vweird.f32 %v5664_v52 }
0x1216   :  { %vm3603_vm14 = vmor %vm3601_vm3, %vm3602_vm11  ;;  %4380 = vmatpush.msra.mxu1 %v6856_v16 }
0x1217   :  { %v3615_v20 = vadd.f32 %v3614_v31, %v6727_v37  ;;  %v3598_v42 = vsub.f32 1.0, %v3597_v41 }
0x1219   :  { %v3616_v39 = vmul.f32 -2.0, %v3615_v20  ;;  %v3599_v12 = vmul.f32 %v5664_v52, %v3598_v42  ;;  %v6894_v20 = vadd.f32 %v6780_v7, %v3816_v2 }
0x121b   :  { %v3617_v50 = vmul.f32 1.442695, %v3616_v39  ;;  %v3600_v32 = vadd.f32 %v5664_v52, %v3599_v12 }
0x121d   :  { %5665 = vpow2.f32 %v3617_v50  ;;  %v3604_v28 = vsel %vm3603_vm14, %v5664_v52, %v3600_v32  ;;  %v6902_v50 = vld [vmem:[%s7130_s2 + $0xb] ss:$0 sm:$0xff] }
0x121e   :  { %v3609_v27 = vsel %vm3606_vm12, %v3608_v17, %v3604_v28 }
0x121f   :  { %v3636_v5 = vsub.f32 1.0, %v3609_v27  ;;  %v3640_v15 = vmul.f32 %v3638_v13, %v3609_v27 }
0x1223   :  { %v5666_v38 = vpop.eup %5665 }
0x1224   :  { %v3619_v63 = vadd.f32 1.0, %v5666_v38 }
0x1226   :  { %5667 = vrcp.f32 %v3619_v63  ;;  %v3631_v47 = vand.u32 2147483648, %v3619_v63  ;;  %v3629_v60 = vand.u32 2147483647, %v3619_v63  ;;  %vm3625_vm9 = vweird.f32 %v3619_v63 }
0x1228   :  { %v3632_v45 = vor.u32 1.1754944e-38, %v3631_v47  ;;  %vm3630_vm5 = vcmp.eq.f32.partialorder %v3629_v60, 8.507059e+37 }
0x122c   :  { %v5668_v14 = vpop.eup %5667 }
0x122d   :  { %v3621_v59 = vmul.f32 %v5668_v14, %v3619_v63  ;;  %vm3626_vm7 = vweird.f32 %v5668_v14 }
0x122e   :  { %vm3627_vm4 = vmor %vm3625_vm9, %vm3626_vm7 }
0x122f   :  { %v3622_v8 = vsub.f32 1.0, %v3621_v59 }
0x1231   :  { %v3623_v26 = vmul.f32 %v5668_v14, %v3622_v8 }
0x1233   :  { %v3624_v30 = vadd.f32 %v5668_v14, %v3623_v26 }
0x1235   :  { %v3628_v36 = vsel %vm3627_vm4, %v5668_v14, %v3624_v30  ;;  %v6921_v30 = vld [vmem:[%s7132_s4 + $0xb] ss:$0 sm:$0xff] }
0x1236   :  { %v3633_v56 = vsel %vm3630_vm5, %v3632_v45, %v3628_v36 }
0x1237   :  { %v3634_v34 = vmul.f32 2.0, %v3633_v56 }
0x1239   :  { %v5297_v55 = vadd.f32 -1.0, %v3634_v34 }
0x123b   :  { %v3637_v24 = vmul.f32 %v5297_v55, %v3636_v5 }
0x123d   :  { %v6859_v25 = vadd.f32 %v3640_v15, %v3637_v24 }
0x123f   :  { %v3644_v21 = vrot.slane %v6859_v25, 4  ;;  %3642 = vst.msk [vmem:[#allocation2 + $0x8] sm:$0x30] %vm574_vm15, %v6859_v25 }
0x1241   :  { %5298 = vmatmul.msk.f32.vlgmr.msrb.gmra.mxu2 %vm159_vm13, %v3644_v21  ;;  %5299 = vmatmul.msk.f32.vlgmr.msra.gmra.mxu3 %vm159_vm13, %v3644_v21 }
0x1242   :  { %5300 = vmatmul.msk.f32.vlgmr.msra.gmra.mxu0 %vm159_vm13, %v3644_v21  ;;  %4069 = vmatpush.msrb.mxu2 %v6798_v44 }
0x1243   :  { %3946 = vmatpush.msra.mxu0 %v6848_v22  ;;  %4089 = vmatpush.msra.mxu3 %v6848_v22 }
0x1244   :  { %4070 = vmatpush.msrb.mxu2 %v6816_v62 }
0x1245   :  { %3947 = vmatpush.msra.mxu0 %v6856_v16  ;;  %4090 = vmatpush.msra.mxu3 %v6856_v16 }
0x1249   :  { %5315 = vmatmul.msk.f32.vlgmr.msra.gmra.mxu2 %vm37_vm0, %v6583_v3  ;;  %5323 = vmatmul.msk.f32.vlgmr.msrb.gmra.mxu3 %vm37_vm0, %v6583_v3 }
0x124a   :  { %3928 = vmatmul.f32.vlgmr.msrb.gmra.mxu0 %v5827_v9  ;;  %4234 = vmatpush.msra.mxu2 %v6848_v22 }
0x124b   :  { %4109 = vmatpush.msrb.mxu0 %v6834_v53  ;;  %4254 = vmatpush.msrb.mxu3 %v6834_v53 }
0x124c   :  { %4235 = vmatpush.msra.mxu2 %v6856_v16 }
0x124d   :  { %4110 = vmatpush.msrb.mxu0 %v6840_v43  ;;  %4255 = vmatpush.msrb.mxu3 %v6840_v43 }
0x1251   :  { %5316 = vmatmul.msk.f32.gmra.mxu2 %vm37_vm0, %v6598_v49  ;;  %5324 = vmatmul.msk.f32.gmra.mxu3 %vm37_vm0, %v6598_v49 }
0x1252   :  { %3948 = vmatmul.f32.vlgmr.msra.gmra.mxu0 %v5827_v9  ;;  %v5387_v9 = vld [vmem:[%s7130_s2 + $0xa] ss:$0 sm:$0xff] }
0x1253   :  { %4359 = vmatpush.msra.mxu0 %v6798_v44 }
0x1255   :  { %4360 = vmatpush.msra.mxu0 %v6816_v62 }
0x1279   :  { %v3969_v36 = vpop.f32.mrf.mxu1 }
0x127a   :  { %v3970_v15 = vadd.f32 %v6921_v30, %v3969_v36 }
0x12bf   :  { %v3704_v3 = vpop.f32.mrf.mxu0 }
0x12c0   :  { %v3705_v28 = vadd.f32 %v6791_v23, %v3704_v3 }
0x12c2   :  { %v3754_v24 = vrot.slane %v3705_v28, 2 }
0x12c4   :  { %v3664_v19 = vpop.f32.mrf.mxu2  ;;  %v3684_v61 = vpop.f32.mrf.mxu3 }
0x12c5   :  { %v3708_v11 = vrot.slane %v3664_v19, 2  ;;  %v3731_v51 = vrot.slane %v3684_v61, 2 }
0x12c7   :  { %v3710_v31 = vadd.f32 %v3708_v11, %v6626_v35  ;;  %v3929_v48 = vpop.f32.mrf.mxu0  ;;  %v5388_v35 = vld [vmem:[%s7132_s4 + $0xa] ss:$0 sm:$0xff]  ;;  %v3733_v63 = vadd.f32 %v3731_v51, %v6624_v29 }
0x12c8   :  { %v3973_v49 = vrot.slane %v3929_v48, 2 }
0x12c9   :  { %v3711_v39 = vsub.f32 0.0, %v3710_v31  ;;  %v3734_v4 = vsub.f32 0.0, %v3733_v63 }
0x12ca   :  { %v3975_v58 = vadd.f32 %v3973_v49, %v6894_v20 }
0x12cb   :  { %v3712_v52 = vmul.f32 1.442695, %v3711_v39  ;;  %v3735_v8 = vmul.f32 1.442695, %v3734_v4  ;;  %v4019_v39 = vrot.slane %v3970_v15, 2 }
0x12cc   :  { %v3976_v7 = vsub.f32 0.0, %v3975_v58  ;;  %v3852_v33 = vpop.f32.mrf.mxu2  ;;  %v3892_v38 = vpop.f32.mrf.mxu3 }
0x12cd   :  { %5669 = vpow2.f32 %v3712_v52  ;;  %v3853_v41 = vadd.f32 %v5387_v9, %v3852_v33  ;;  %v6909_v54 = vadd.f32 %v6902_v50, %v3892_v38 }
0x12ce   :  { %v3977_v57 = vmul.f32 1.442695, %v3976_v7 }
0x12cf   :  { %v6912_v46 = vadd.f32 %v5388_v35, %v3853_v41  ;;  %v3949_v42 = vpop.f32.mrf.mxu0 }
0x12d0   :  { %5671 = vpow2.f32 %v3977_v57  ;;  %v3996_v32 = vrot.slane %v3949_v42, 2 }
0x12d3   :  { %v5670_v0 = vpop.eup %5669 }
0x12d4   :  { %v3714_v40 = vadd.f32 1.0, %v5670_v0  ;;  %v3855_v12 = vpop.f32.mrf.mxu2 }
0x12d5   :  { %v3856_v14 = vadd.f32 %v5387_v9, %v3855_v12  ;;  %v3895_v9 = vpop.f32.mrf.mxu3 }
0x12d6   :  { %v5672_v59 = vpop.eup %5671  ;;  %5673 = vrcp.f32 %v3714_v40  ;;  %v3724_v56 = vand.u32 2147483647, %v3714_v40  ;;  %v3726_v34 = vand.u32 2147483648, %v3714_v40  ;;  %vm3720_vm6 = vweird.f32 %v3714_v40 }
0x12d7   :  { %v3979_v1 = vadd.f32 1.0, %v5672_v59  ;;  %v6914_v47 = vadd.f32 %v5388_v35, %v3856_v14  ;;  %v6926_v38 = vadd.f32 %v6902_v50, %v3895_v9 }
0x12d8   :  { %vm3725_vm11 = vcmp.eq.f32.partialorder %v3724_v56, 8.507059e+37  ;;  %v3727_v3 = vor.u32 1.1754944e-38, %v3726_v34 }
0x12d9   :  { %5675 = vrcp.f32 %v3979_v1  ;;  %v3998_v18 = vadd.f32 %v3996_v32, %v6914_v47  ;;  %v3991_v2 = vand.u32 2147483648, %v3979_v1  ;;  %v3989_v11 = vand.u32 2147483647, %v3979_v1 }
0x12da   :  { %5677 = vpow2.f32 %v3735_v8  ;;  %vm3985_vm7 = vweird.f32 %v3979_v1 }
0x12db   :  { %v3999_v26 = vsub.f32 0.0, %v3998_v18  ;;  %v3992_v58 = vor.u32 1.1754944e-38, %v3991_v2  ;;  %vm3990_vm9 = vcmp.eq.f32.partialorder %v3989_v11, 8.507059e+37 }
0x12dc   :  { %v5674_v29 = vpop.eup %5673 }
0x12dd   :  { %v3716_v60 = vmul.f32 %v5674_v29, %v3714_v40  ;;  %v4000_v45 = vmul.f32 1.442695, %v3999_v26  ;;  %vm3721_vm15 = vweird.f32 %v5674_v29 }
0x12de   :  { %vm3722_vm10 = vmor %vm3720_vm6, %vm3721_vm15 }
0x12df   :  { %v3717_v17 = vsub.f32 1.0, %v3716_v60  ;;  %v5676_v27 = vpop.eup %5675  ;;  %5679 = vpow2.f32 %v4000_v45 }
0x12e0   :  { %v5678_v55 = vpop.eup %5677  ;;  %v3981_v13 = vmul.f32 %v5676_v27, %v3979_v1  ;;  %vm3986_vm3 = vweird.f32 %v5676_v27 }
0x12e1   :  { %v3718_v5 = vmul.f32 %v5674_v29, %v3717_v17  ;;  %v3737_v6 = vadd.f32 1.0, %v5678_v55  ;;  %vm3987_vm14 = vmor %vm3985_vm7, %vm3986_vm3 }
0x12e2   :  { %v3982_v23 = vsub.f32 1.0, %v3981_v13 }
0x12e3   :  { %v3719_v21 = vadd.f32 %v5674_v29, %v3718_v5  ;;  %5681 = vrcp.f32 %v3737_v6  ;;  %v3749_v28 = vand.u32 2147483648, %v3737_v6  ;;  %vm3743_vm12 = vweird.f32 %v3737_v6 }
0x12e4   :  { %v3983_v61 = vmul.f32 %v5676_v27, %v3982_v23  ;;  %v3747_v17 = vand.u32 2147483647, %v3737_v6 }
0x12e5   :  { %v3723_v19 = vsel %vm3722_vm10, %v5674_v29, %v3719_v21  ;;  %v5680_v52 = vpop.eup %5679  ;;  %v3750_v5 = vor.u32 1.1754944e-38, %v3749_v28 }
0x12e6   :  { %v3728_v31 = vsel %vm3725_vm11, %v3727_v3, %v3723_v19  ;;  %v3984_v49 = vadd.f32 %v5676_v27, %v3983_v61  ;;  %v6928_v57 = vadd.f32 1.0, %v5680_v52  ;;  %vm3748_vm15 = vcmp.eq.f32.partialorder %v3747_v17, 8.507059e+37 }
0x12e7   :  { %v3756_v48 = vmul.f32 %v3754_v24, %v3728_v31 }
0x12e8   :  { %v3988_v35 = vsel %vm3987_vm14, %v5676_v27, %v3984_v49  ;;  %vm4008_vm10 = vweird.f32 %v6928_v57  ;;  %v4012_v23 = vand.u32 2147483647, %v6928_v57  ;;  %v4014_v61 = vand.u32 2147483648, %v6928_v57 }
0x12e9   :  { %v3757_v51 = vadd.f32 %v3756_v48, %v6727_v37  ;;  %v3993_v7 = vsel %vm3990_vm9, %v3992_v58, %v3988_v35  ;;  %v5682_v4 = vpop.eup %5681 }
0x12ea   :  { %v4021_v41 = vmul.f32 %v4019_v39, %v3993_v7  ;;  %v3739_v40 = vmul.f32 %v5682_v4, %v3737_v6  ;;  %vm3744_vm4 = vweird.f32 %v5682_v4  ;;  %v4015_v7 = vor.u32 1.1754944e-38, %v4014_v61 }
0x12eb   :  { %v3758_v33 = vmul.f32 -2.0, %v3757_v51  ;;  %vm6933_vm5 = vmor %vm3743_vm12, %vm3744_vm4 }
0x12ec   :  { %v4022_v0 = vadd.f32 %v4021_v41, %v6926_v38  ;;  %v3740_v14 = vsub.f32 1.0, %v3739_v40 }
0x12ed   :  { %v3759_v63 = vmul.f32 1.442695, %v3758_v33 }
0x12ee   :  { %v4023_v42 = vmul.f32 -2.0, %v4022_v0  ;;  %v3741_v8 = vmul.f32 %v5682_v4, %v3740_v14 }
0x12ef   :  { %5683 = vpow2.f32 %v3759_v63  ;;  %v3780_v63 = vrot.slane %v6859_v25, 6 }
0x12f0   :  { %5685 = vrcp.f32 %v6928_v57  ;;  %v4024_v37 = vmul.f32 1.442695, %v4023_v42  ;;  %v3742_v29 = vadd.f32 %v5682_v4, %v3741_v8 }
0x12f2   :  { %5687 = vpow2.f32 %v4024_v37  ;;  %v3746_v56 = vsel %vm6933_vm5, %v5682_v4, %v3742_v29 }
0x12f3   :  { %v3751_v3 = vsel %vm3748_vm15, %v3750_v5, %v3746_v56  ;;  %vm4013_vm15 = vcmp.eq.f32.partialorder %v4012_v23, 8.507059e+37 }
0x12f4   :  { %v3778_v41 = vsub.f32 1.0, %v3751_v3  ;;  %v3782_v37 = vmul.f32 %v3780_v63, %v3751_v3 }
0x12f5   :  { %v5684_v12 = vpop.eup %5683 }
0x12f6   :  { %v5686_v59 = vpop.eup %5685  ;;  %v3761_v32 = vadd.f32 1.0, %v5684_v12 }
0x12f7   :  { %v4004_v1 = vmul.f32 %v5686_v59, %v6928_v57  ;;  %vm4009_vm11 = vweird.f32 %v5686_v59 }
0x12f8   :  { %5689 = vrcp.f32 %v3761_v32  ;;  %v5688_v50 = vpop.eup %5687  ;;  %v3771_v13 = vand.u32 2147483647, %v3761_v32  ;;  %v3773_v24 = vand.u32 2147483648, %v3761_v32  ;;  %vm3767_vm3 = vweird.f32 %v3761_v32  ;;  %vm6945_vm4 = vmor %vm4008_vm10, %vm4009_vm11 }
0x12f9   :  { %v4026_v18 = vadd.f32 1.0, %v5688_v50  ;;  %v4005_v26 = vsub.f32 1.0, %v4004_v1 }
0x12fa   :  { %vm3772_vm14 = vcmp.eq.f32.partialorder %v3771_v13, 8.507059e+37  ;;  %v3774_v31 = vor.u32 1.1754944e-38, %v3773_v24 }
0x12fb   :  { %5691 = vrcp.f32 %v4026_v18  ;;  %v4006_v27 = vmul.f32 %v5686_v59, %v4005_v26  ;;  %v4038_v11 = vand.u32 2147483648, %v4026_v18  ;;  %v4036_v49 = vand.u32 2147483647, %v4026_v18 }
0x12fc   :  { %vm4032_vm12 = vweird.f32 %v4026_v18 }
0x12fd   :  { %v4007_v6 = vadd.f32 %v5686_v59, %v4006_v27  ;;  %v4039_v33 = vor.u32 1.1754944e-38, %v4038_v11 }
0x12fe   :  { %v5690_v60 = vpop.eup %5689 }
0x12ff   :  { %v3763_v45 = vmul.f32 %v5690_v60, %v3761_v32  ;;  %vm3768_vm6 = vweird.f32 %v5690_v60  ;;  %v4011_v52 = vsel %vm6945_vm4, %v5686_v59, %v4007_v6 }
0x1300   :  { %vm3769_vm7 = vmor %vm3767_vm3, %vm3768_vm6  ;;  %vm4037_vm6 = vcmp.eq.f32.partialorder %v4036_v49, 8.507059e+37  ;;  %v4016_v4 = vsel %vm4013_vm15, %v4015_v7, %v4011_v52 }
0x1301   :  { %v3764_v34 = vsub.f32 1.0, %v3763_v45  ;;  %v5692_v55 = vpop.eup %5691  ;;  %v4043_v59 = vsub.f32 1.0, %v4016_v4  ;;  %v4045_v8 = vmul.f32 0.0, %v4016_v4 }
0x1302   :  { %v4028_v15 = vmul.f32 %v5692_v55, %v4026_v18  ;;  %vm4033_vm9 = vweird.f32 %v5692_v55 }
0x1303   :  { %v3765_v21 = vmul.f32 %v5690_v60, %v3764_v34  ;;  %vm4034_vm5 = vmor %vm4032_vm12, %vm4033_vm9 }
0x1304   :  { %v4029_v2 = vsub.f32 1.0, %v4028_v15 }
0x1305   :  { %v3766_v19 = vadd.f32 %v5690_v60, %v3765_v21 }
0x1306   :  { %v4030_v48 = vmul.f32 %v5692_v55, %v4029_v2 }
0x1307   :  { %v3770_v39 = vsel %vm3769_vm7, %v5690_v60, %v3766_v19 }
0x1308   :  { %v3775_v58 = vsel %vm3772_vm14, %v3774_v31, %v3770_v39  ;;  %v4031_v51 = vadd.f32 %v5692_v55, %v4030_v48 }
0x1309   :  { %v3776_v35 = vmul.f32 2.0, %v3775_v58 }
0x130a   :  { %v4035_v0 = vsel %vm4034_vm5, %v5692_v55, %v4031_v51 }
0x130b   :  { %v5301_v57 = vadd.f32 -1.0, %v3776_v35  ;;  %v4040_v42 = vsel %vm4037_vm6, %v4039_v33, %v4035_v0 }
0x130c   :  { %v4041_v40 = vmul.f32 2.0, %v4040_v42 }
0x130d   :  { %v3779_v12 = vmul.f32 %v5301_v57, %v3778_v41 }
0x130e   :  { %v5332_v14 = vadd.f32 -1.0, %v4041_v40 }
0x130f   :  { %v3783_v32 = vadd.f32 %v3782_v37, %v3779_v12 }
0x1310   :  { %v4044_v50 = vmul.f32 %v5332_v14, %v4043_v59 }
0x1311   :  { %3784 = vst.msk [vmem:[#allocation2 + $0x8] sm:$0xc0] %vm717_vm2, %v3783_v32 }
0x1312   :  { %v6953_v1 = vadd.f32 %v4045_v8, %v4044_v50 }
0x1314   :  { %4048 = vrot.lane.b32.xlu2 %v6953_v1, %s5828_s19  ;;  %v4052_v25 = vrot.slane %v6953_v1, 6 }
0x1316   :  { %5333 = vmatmul.msk.f32.vlgmr.msrb.gmra.mxu2 %vm159_vm13, %v4052_v25  ;;  %5334 = vmatmul.msk.f32.vlgmr.msra.gmra.mxu3 %vm159_vm13, %v4052_v25 }
0x1317   :  { %5335 = vmatmul.msk.f32.vlgmr.msrb.gmra.mxu0 %vm159_vm13, %v4052_v25  ;;  %4399 = vmatpush.msrb.mxu2 %v6834_v53 }
0x1318   :  { %4493 = vmatpush.msra.mxu3 %v6798_v44  ;;  %4513 = vmatpush.msrb.mxu0 %v6848_v22 }
0x1319   :  { %4400 = vmatpush.msrb.mxu2 %v6840_v43 }
0x131a   :  { %4494 = vmatpush.msra.mxu3 %v6816_v62  ;;  %4514 = vmatpush.msrb.mxu0 %v6856_v16 }
0x136e   :  { %v4049_v18 = vpop.permute.xlu2 %4048 }
0x136f   :  { %4051 = vst.msk [vmem:[#allocation2 + $0x8] sm:$0xc0] %vm1542_vm1, %v4049_v18 }
0x1394   :  { %v4112_v15 = vpop.f32.mrf.mxu0 }
0x1395   :  { %v4113_v3 = vadd.f32 %v6921_v30, %v4112_v15 }
0x1397   :  { %v4162_v31 = vrot.slane %v4113_v3, 4 }
0x1399   :  { %v4072_v29 = vpop.f32.mrf.mxu2  ;;  %v4092_v45 = vpop.f32.mrf.mxu3 }
0x139a   :  { %v4116_v26 = vrot.slane %v4072_v29, 4  ;;  %v4139_v36 = vrot.slane %v4092_v45, 4 }
0x139c   :  { %v4118_v60 = vadd.f32 %v4116_v26, %v6894_v20  ;;  %v4141_v56 = vadd.f32 %v4139_v36, %v6914_v47  ;;  %v4188_v36 = vrot.slane %v6953_v1, 2 }
0x139e   :  { %v4119_v28 = vsub.f32 0.0, %v4118_v60  ;;  %v4142_v55 = vsub.f32 0.0, %v4141_v56 }
0x13a0   :  { %v4120_v17 = vmul.f32 1.442695, %v4119_v28  ;;  %v4143_v5 = vmul.f32 1.442695, %v4142_v55 }
0x13a2   :  { %5693 = vpow2.f32 %v4120_v17 }
0x13a8   :  { %v5694_v27 = vpop.eup %5693 }
0x13a9   :  { %v4122_v34 = vadd.f32 1.0, %v5694_v27 }
0x13ab   :  { %5695 = vrcp.f32 %v4122_v34  ;;  %v4134_v23 = vand.u32 2147483648, %v4122_v34  ;;  %v4132_v2 = vand.u32 2147483647, %v4122_v34  ;;  %vm4128_vm10 = vweird.f32 %v4122_v34 }
0x13ac   :  { %5697 = vpow2.f32 %v4143_v5 }
0x13ad   :  { %v4135_v61 = vor.u32 1.1754944e-38, %v4134_v23  ;;  %vm4133_vm3 = vcmp.eq.f32.partialorder %v4132_v2, 8.507059e+37 }
0x13b1   :  { %v5696_v13 = vpop.eup %5695 }
0x13b2   :  { %v4124_v24 = vmul.f32 %v5696_v13, %v4122_v34  ;;  %vm4129_vm2 = vweird.f32 %v5696_v13  ;;  %v5698_v11 = vpop.eup %5697 }
0x13b3   :  { %vm4130_vm11 = vmor %vm4128_vm10, %vm4129_vm2  ;;  %v4145_v9 = vadd.f32 1.0, %v5698_v11  ;;  %vm7148_vm2 = vcmask 259204  }
0x13b4   :  { %v4125_v21 = vsub.f32 1.0, %v4124_v24 }
0x13b5   :  { %5699 = vrcp.f32 %v4145_v9  ;;  %vm4151_vm14 = vweird.f32 %v4145_v9  ;;  %v4157_v37 = vand.u32 2147483648, %v4145_v9  ;;  %v4155_v14 = vand.u32 2147483647, %v4145_v9 }
0x13b6   :  { %v4126_v6 = vmul.f32 %v5696_v13, %v4125_v21 }
0x13b7   :  { %v4158_v25 = vor.u32 1.1754944e-38, %v4157_v37  ;;  %vm4156_vm15 = vcmp.eq.f32.partialorder %v4155_v14, 8.507059e+37 }
0x13b8   :  { %v4127_v19 = vadd.f32 %v5696_v13, %v4126_v6 }
0x13ba   :  { %v4131_v48 = vsel %vm4130_vm11, %v5696_v13, %v4127_v19 }
0x13bb   :  { %v4136_v49 = vsel %vm4133_vm3, %v4135_v61, %v4131_v48  ;;  %v5700_v35 = vpop.eup %5699 }
0x13bc   :  { %v4164_v39 = vmul.f32 %v4162_v31, %v4136_v49  ;;  %v4147_v33 = vmul.f32 %v5700_v35, %v4145_v9  ;;  %vm4152_vm7 = vweird.f32 %v5700_v35 }
0x13bd   :  { %vm4153_vm4 = vmor %vm4151_vm14, %vm4152_vm7 }
0x13be   :  { %v4165_v58 = vadd.f32 %v4164_v39, %v6926_v38  ;;  %v4148_v63 = vsub.f32 1.0, %v4147_v33 }
0x13c0   :  { %v4166_v52 = vmul.f32 -2.0, %v4165_v58  ;;  %v4149_v0 = vmul.f32 %v5700_v35, %v4148_v63 }
0x13c2   :  { %v4167_v51 = vmul.f32 1.442695, %v4166_v52  ;;  %v4150_v42 = vadd.f32 %v5700_v35, %v4149_v0 }
0x13c4   :  { %5701 = vpow2.f32 %v4167_v51  ;;  %v4154_v50 = vsel %vm4153_vm4, %v5700_v35, %v4150_v42 }
0x13c5   :  { %v4159_v26 = vsel %vm4156_vm15, %v4158_v25, %v4154_v50 }
0x13c6   :  { %v4186_v45 = vsub.f32 1.0, %v4159_v26  ;;  %v4190_v56 = vmul.f32 %v4188_v36, %v4159_v26 }
0x13ca   :  { %v5702_v7 = vpop.eup %5701 }
0x13cb   :  { %v4169_v41 = vadd.f32 1.0, %v5702_v7 }
0x13cd   :  { %5703 = vrcp.f32 %v4169_v41  ;;  %v4181_v12 = vand.u32 2147483648, %v4169_v41  ;;  %v4179_v32 = vand.u32 2147483647, %v4169_v41  ;;  %vm4175_vm12 = vweird.f32 %v4169_v41 }
0x13cf   :  { %v4182_v18 = vor.u32 1.1754944e-38, %v4181_v12  ;;  %vm4180_vm6 = vcmp.eq.f32.partialorder %v4179_v32, 8.507059e+37 }
0x13d3   :  { %v5704_v57 = vpop.eup %5703 }
0x13d4   :  { %v4171_v4 = vmul.f32 %v5704_v57, %v4169_v41  ;;  %vm4176_vm9 = vweird.f32 %v5704_v57 }
0x13d5   :  { %vm4177_vm5 = vmor %vm4175_vm12, %vm4176_vm9 }
0x13d6   :  { %v4172_v40 = vsub.f32 1.0, %v4171_v4 }
0x13d8   :  { %v4173_v59 = vmul.f32 %v5704_v57, %v4172_v40 }
0x13da   :  { %v4174_v8 = vadd.f32 %v5704_v57, %v4173_v59 }
0x13dc   :  { %v4178_v29 = vsel %vm4177_vm5, %v5704_v57, %v4174_v8 }
0x13dd   :  { %v4183_v60 = vsel %vm4180_vm6, %v4182_v18, %v4178_v29 }
0x13de   :  { %v4184_v28 = vmul.f32 2.0, %v4183_v60 }
0x13e0   :  { %v5336_v17 = vadd.f32 -1.0, %v4184_v28 }
0x13e2   :  { %v4187_v27 = vmul.f32 %v5336_v17, %v4186_v45 }
0x13e4   :  { %v6973_v34 = vadd.f32 %v4190_v56, %v4187_v27 }
0x13e6   :  { %4193 = vrot.lane.b32.xlu0 %v6973_v34, %s5828_s19  ;;  %v4197_v55 = vrot.slane %v6973_v34, 4 }
0x13e8   :  { %5337 = vmatmul.msk.f32.vlgmr.msrb.gmra.mxu1 %vm159_vm13, %v4197_v55  ;;  %5338 = vmatmul.msk.f32.vlgmr.msra.gmra.mxu2 %vm159_vm13, %v4197_v55 }
0x13e9   :  { %5339 = vmatmul.msk.f32.vlgmr.msrb.gmra.mxu3 %vm159_vm13, %v4197_v55  ;;  %4533 = vmatpush.msrb.mxu1 %v6834_v53 }
0x13ea   :  { %4638 = vmatpush.msra.mxu2 %v6798_v44  ;;  %4658 = vmatpush.msrb.mxu3 %v6848_v22 }
0x13eb   :  { %4534 = vmatpush.msrb.mxu1 %v6840_v43 }
0x13ec   :  { %4639 = vmatpush.msra.mxu2 %v6816_v62  ;;  %4659 = vmatpush.msrb.mxu3 %v6856_v16 }
0x1458   :  { %v4194_v1 = vpop.permute.xlu0 %4193 }
0x1459   :  { %4196 = vst.msk [vmem:[#allocation2 + $0x8] sm:$0x30] %vm7148_vm2, %v4194_v1 }
0x1465   :  { %v4217_v5 = vpop.f32.mrf.mxu1 }
0x1466   :  { %v4261_v13 = vrot.slane %v4217_v5, 6 }
0x1468   :  { %v4263_v24 = vadd.f32 %v4261_v13, %v6894_v20 }
0x146a   :  { %v4264_v15 = vsub.f32 0.0, %v4263_v24 }
0x146b   :  { %v4237_v23 = vpop.f32.mrf.mxu2 }
0x146c   :  { %v4265_v21 = vmul.f32 1.442695, %v4264_v15  ;;  %v4284_v3 = vrot.slane %v4237_v23, 6  ;;  %v4257_v49 = vpop.f32.mrf.mxu3 }
0x146d   :  { %v4258_v58 = vadd.f32 %v6921_v30, %v4257_v49 }
0x146e   :  { %5705 = vpow2.f32 %v4265_v21  ;;  %v4286_v2 = vadd.f32 %v4284_v3, %v6914_v47  ;;  %v4333_v3 = vrot.slane %v6973_v34, 2 }
0x146f   :  { %v4307_v63 = vrot.slane %v4258_v58, 6 }
0x1470   :  { %v4287_v61 = vsub.f32 0.0, %v4286_v2 }
0x1472   :  { %v4288_v11 = vmul.f32 1.442695, %v4287_v61 }
0x1474   :  { %v5706_v6 = vpop.eup %5705 }
0x1475   :  { %v4267_v19 = vadd.f32 1.0, %v5706_v6 }
0x1477   :  { %5707 = vrcp.f32 %v4267_v19  ;;  %v4279_v9 = vand.u32 2147483648, %v4267_v19  ;;  %v4277_v51 = vand.u32 2147483647, %v4267_v19  ;;  %vm4273_vm11 = vweird.f32 %v4267_v19 }
0x1478   :  { %5709 = vpow2.f32 %v4288_v11 }
0x1479   :  { %v4280_v7 = vor.u32 1.1754944e-38, %v4279_v9  ;;  %vm4278_vm7 = vcmp.eq.f32.partialorder %v4277_v51, 8.507059e+37 }
0x147d   :  { %v5708_v31 = vpop.eup %5707 }
0x147e   :  { %v4269_v48 = vmul.f32 %v5708_v31, %v4267_v19  ;;  %vm4274_vm10 = vweird.f32 %v5708_v31  ;;  %v5710_v33 = vpop.eup %5709 }
0x147f   :  { %vm4275_vm3 = vmor %vm4273_vm11, %vm4274_vm10  ;;  %v4290_v4 = vadd.f32 1.0, %v5710_v33 }
0x1480   :  { %v4270_v39 = vsub.f32 1.0, %v4269_v48 }
0x1481   :  { %5711 = vrcp.f32 %v4290_v4  ;;  %vm4296_vm9 = vweird.f32 %v4290_v4  ;;  %v4302_v60 = vand.u32 2147483648, %v4290_v4  ;;  %v4300_v17 = vand.u32 2147483647, %v4290_v4 }
0x1482   :  { %v4271_v52 = vmul.f32 %v5708_v31, %v4270_v39 }
0x1483   :  { %v4303_v55 = vor.u32 1.1754944e-38, %v4302_v60  ;;  %vm4301_vm6 = vcmp.eq.f32.partialorder %v4300_v17, 8.507059e+37 }
0x1484   :  { %v4272_v35 = vadd.f32 %v5708_v31, %v4271_v52 }
0x1486   :  { %v4276_v41 = vsel %vm4275_vm3, %v5708_v31, %v4272_v35 }
0x1487   :  { %v4281_v0 = vsel %vm4278_vm7, %v4280_v7, %v4276_v41  ;;  %v5712_v12 = vpop.eup %5711 }
0x1488   :  { %v4309_v57 = vmul.f32 %v4307_v63, %v4281_v0  ;;  %v4292_v59 = vmul.f32 %v5712_v12, %v4290_v4  ;;  %vm4297_vm14 = vweird.f32 %v5712_v12 }
0x1489   :  { %vm4298_vm12 = vmor %vm4296_vm9, %vm4297_vm14 }
0x148a   :  { %v4310_v42 = vadd.f32 %v4309_v57, %v6926_v38  ;;  %v4293_v50 = vsub.f32 1.0, %v4292_v59 }
0x148c   :  { %v4311_v40 = vmul.f32 -2.0, %v4310_v42  ;;  %v4294_v8 = vmul.f32 %v5712_v12, %v4293_v50 }
0x148e   :  { %v4312_v37 = vmul.f32 1.442695, %v4311_v40  ;;  %v4295_v29 = vadd.f32 %v5712_v12, %v4294_v8 }
0x1490   :  { %5713 = vpow2.f32 %v4312_v37  ;;  %v4299_v27 = vsel %vm4298_vm12, %v5712_v12, %v4295_v29 }
0x1491   :  { %v4304_v13 = vsel %vm4301_vm6, %v4303_v55, %v4299_v27 }
0x1492   :  { %v4331_v23 = vsub.f32 1.0, %v4304_v13  ;;  %v4335_v2 = vmul.f32 %v4333_v3, %v4304_v13 }
0x1496   :  { %v5714_v14 = vpop.eup %5713 }
0x1497   :  { %v4314_v32 = vadd.f32 1.0, %v5714_v14 }
0x1499   :  { %5715 = vrcp.f32 %v4314_v32  ;;  %v4326_v28 = vand.u32 2147483648, %v4314_v32  ;;  %v4324_v36 = vand.u32 2147483647, %v4314_v32  ;;  %vm4320_vm5 = vweird.f32 %v4314_v32 }
0x149b   :  { %v4327_v1 = vor.u32 1.1754944e-38, %v4326_v28  ;;  %vm4325_vm2 = vcmp.eq.f32.partialorder %v4324_v36, 8.507059e+37 }
0x149f   :  { %v5716_v25 = vpop.eup %5715 }
0x14a0   :  { %v4316_v18 = vmul.f32 %v5716_v25, %v4314_v32  ;;  %vm4321_vm4 = vweird.f32 %v5716_v25 }
0x14a1   :  { %vm4322_vm15 = vmor %vm4320_vm5, %vm4321_vm4 }
0x14a2   :  { %v4317_v26 = vsub.f32 1.0, %v4316_v18 }
0x14a4   :  { %v4318_v45 = vmul.f32 %v5716_v25, %v4317_v26 }
0x14a6   :  { %v4319_v56 = vadd.f32 %v5716_v25, %v4318_v45 }
0x14a8   :  { %v4323_v5 = vsel %vm4322_vm15, %v5716_v25, %v4319_v56 }
0x14a9   :  { %v4328_v24 = vsel %vm4325_vm2, %v4327_v1, %v4323_v5 }
0x14aa   :  { %v4329_v15 = vmul.f32 2.0, %v4328_v24 }
0x14ac   :  { %v5340_v21 = vadd.f32 -1.0, %v4329_v15 }
0x14ae   :  { %v4332_v6 = vmul.f32 %v5340_v21, %v4331_v23 }
0x14b0   :  { %v4336_v19 = vadd.f32 %v4335_v2, %v4332_v6 }
0x14b2   :  { %4338 = vrot.lane.b32.xlu1 %v4336_v19, %s5828_s19  ;;  %v6994_v61 = vrot.slane %v4336_v19, 2 }
0x14b4   :  { %5341 = vmatmul.msk.f32.vlgmr.msra.gmra.mxu0 %vm159_vm13, %v6994_v61  ;;  %5342 = vmatmul.msk.f32.vlgmr.msra.gmra.mxu1 %vm159_vm13, %v6994_v61 }
0x14b5   :  { %5343 = vmatmul.msk.f32.vlgmr.msrb.gmra.mxu2 %vm159_vm13, %v6994_v61  ;;  %4678 = vmatpush.msra.mxu0 %v6834_v53 }
0x14b6   :  { %4783 = vmatpush.msra.mxu1 %v6798_v44  ;;  %4803 = vmatpush.msrb.mxu2 %v6848_v22 }
0x14b7   :  { %4679 = vmatpush.msra.mxu0 %v6840_v43 }
0x14b8   :  { %4784 = vmatpush.msra.mxu1 %v6816_v62  ;;  %4804 = vmatpush.msrb.mxu2 %v6856_v16 }
0x1524   :  { %v4339_v34 = vpop.permute.xlu1 %4338 }
0x1525   :  { %4341 = vst.msk [vmem:[#allocation2 + $0x8] sm:$0xc] %vm1834_vm8, %v4339_v34 }
0x1531   :  { %v4362_v11 = vpop.f32.mrf.mxu0  ;;  %v4382_v39 = vpop.f32.mrf.mxu1 }
0x1532   :  { %v4405_v31 = vadd.f32 %v4362_v11, %v6894_v20  ;;  %v4425_v44 = vadd.f32 %v4382_v39, %v6914_v47 }
0x1534   :  { %v4406_v48 = vsub.f32 0.0, %v4405_v31  ;;  %v4426_v52 = vsub.f32 0.0, %v4425_v44  ;;  %v5795_v31 = vld [vmem:[%s7131_s3 + $0x90] sm:$0xff] }
0x1536   :  { %v4407_v49 = vmul.f32 1.442695, %v4406_v48  ;;  %v4427_v51 = vmul.f32 1.442695, %v4426_v52 }
0x1538   :  { %5717 = vpow2.f32 %v4407_v49  ;;  %v4402_v20 = vpop.f32.mrf.mxu2 }
0x1539   :  { %v4403_v47 = vadd.f32 %v6921_v30, %v4402_v20 }
0x153e   :  { %v5718_v9 = vpop.eup %5717 }
0x153f   :  { %v4409_v58 = vadd.f32 1.0, %v5718_v9 }
0x1541   :  { %5719 = vrcp.f32 %v4409_v58  ;;  %v4421_v33 = vand.u32 2147483648, %v4409_v58  ;;  %v4419_v63 = vand.u32 2147483647, %v4409_v58  ;;  %vm4415_vm11 = vweird.f32 %v4409_v58 }
0x1542   :  { %5721 = vpow2.f32 %v4427_v51 }
0x1543   :  { %v4422_v57 = vor.u32 1.1754944e-38, %v4421_v33  ;;  %vm4420_vm7 = vcmp.eq.f32.partialorder %v4419_v63, 8.507059e+37 }
0x1547   :  { %v5720_v62 = vpop.eup %5719 }
0x1548   :  { %v4411_v35 = vmul.f32 %v5720_v62, %v4409_v58  ;;  %vm4416_vm10 = vweird.f32 %v5720_v62  ;;  %v5722_v4 = vpop.eup %5721 }
0x1549   :  { %vm4417_vm3 = vmor %vm4415_vm11, %vm4416_vm10  ;;  %v4429_v12 = vadd.f32 1.0, %v5722_v4  ;;  %vm7149_vm10 = vcmask 255104  }
0x154a   :  { %v4412_v7 = vsub.f32 1.0, %v4411_v35 }
0x154b   :  { %5723 = vrcp.f32 %v4429_v12  ;;  %vm4435_vm9 = vweird.f32 %v4429_v12  ;;  %v4441_v36 = vand.u32 2147483648, %v4429_v12 }
0x154c   :  { %v4413_v41 = vmul.f32 %v5720_v62, %v4412_v7 }
0x154d   :  { %v4442_v13 = vor.u32 1.1754944e-38, %v4441_v36 }
0x154e   :  { %v4414_v0 = vadd.f32 %v5720_v62, %v4413_v41 }
0x1550   :  { %v4418_v42 = vsel %vm4417_vm3, %v5720_v62, %v4414_v0 }
0x1551   :  { %v4423_v40 = vsel %vm4420_vm7, %v4422_v57, %v4418_v42  ;;  %v5724_v50 = vpop.eup %5723 }
0x1552   :  { %v4445_v37 = vmul.f32 %v4423_v40, %v4403_v47  ;;  %v4431_v25 = vmul.f32 %v5724_v50, %v4429_v12  ;;  %vm4436_vm14 = vweird.f32 %v5724_v50 }
0x1553   :  { %vm4437_vm12 = vmor %vm4435_vm9, %vm4436_vm14 }
0x1554   :  { %v4446_v14 = vadd.f32 %v4445_v37, %v6926_v38  ;;  %v4432_v29 = vsub.f32 1.0, %v4431_v25  ;;  %v4439_v38 = vand.u32 2147483647, %v4429_v12 }
0x1556   :  { %v4447_v59 = vmul.f32 -2.0, %v4446_v14  ;;  %v4433_v26 = vmul.f32 %v5724_v50, %v4432_v29  ;;  %vm4440_vm6 = vcmp.eq.f32.partialorder %v4439_v38, 8.507059e+37 }
0x1558   :  { %v4448_v32 = vmul.f32 1.442695, %v4447_v59  ;;  %v4434_v17 = vadd.f32 %v5724_v50, %v4433_v26 }
0x155a   :  { %5725 = vpow2.f32 %v4448_v32  ;;  %v4438_v1 = vsel %vm4437_vm12, %v5724_v50, %v4434_v17 }
0x155b   :  { %v4443_v21 = vsel %vm4440_vm6, %v4442_v13, %v4438_v1 }
0x155c   :  { %v4467_v2 = vsub.f32 1.0, %v4443_v21  ;;  %v4470_v34 = vmul.f32 %v4443_v21, %v6994_v61  ;;  %v5794_v61 = vld [vmem:[%s7131_s3 + $0x98] sm:$0xff] }
0x1560   :  { %v5726_v8 = vpop.eup %5725 }
0x1561   :  { %v4450_v18 = vadd.f32 1.0, %v5726_v8 }
0x1563   :  { %5727 = vrcp.f32 %v4450_v18  ;;  %v4462_v27 = vand.u32 2147483648, %v4450_v18  ;;  %v4460_v55 = vand.u32 2147483647, %v4450_v18  ;;  %vm4456_vm5 = vweird.f32 %v4450_v18 }
0x1565   :  { %v4463_v24 = vor.u32 1.1754944e-38, %v4462_v27  ;;  %vm4461_vm2 = vcmp.eq.f32.partialorder %v4460_v55, 8.507059e+37 }
0x1569   :  { %v5728_v60 = vpop.eup %5727 }
0x156a   :  { %v4452_v28 = vmul.f32 %v5728_v60, %v4450_v18  ;;  %vm4457_vm4 = vweird.f32 %v5728_v60 }
0x156b   :  { %vm4458_vm15 = vmor %vm4456_vm5, %vm4457_vm4 }
0x156c   :  { %v4453_v45 = vsub.f32 1.0, %v4452_v28 }
0x156e   :  { %v4454_v56 = vmul.f32 %v5728_v60, %v4453_v45 }
0x1570   :  { %v4455_v5 = vadd.f32 %v5728_v60, %v4454_v56 }
0x1572   :  { %v4459_v15 = vsel %vm4458_vm15, %v5728_v60, %v4455_v5 }
0x1573   :  { %v4464_v23 = vsel %vm4461_vm2, %v4463_v24, %v4459_v15 }
0x1574   :  { %v4465_v3 = vmul.f32 2.0, %v4464_v23 }
0x1576   :  { %v5344_v6 = vadd.f32 -1.0, %v4465_v3 }
0x1578   :  { %v4468_v19 = vmul.f32 %v5344_v6, %v4467_v2 }
0x157a   :  { %v7014_v11 = vadd.f32 %v4470_v34, %v4468_v19 }
0x157c   :  { %4473 = vrot.lane.b32.xlu2 %v7014_v11, %s5828_s19  ;;  %5345 = vmatmul.msk.f32.vlgmr.msra.gmra.mxu3 %vm159_vm13, %v7014_v11  ;;  %v4612_v34 = vrot.slane %v7014_v11, 2 }
0x157d   :  { %5346 = vmatmul.msk.f32.vlgmr.msrb.gmra.mxu0 %vm159_vm13, %v7014_v11  ;;  %5347 = vmatmul.msk.f32.vlgmr.msrb.gmra.mxu1 %vm159_vm13, %v7014_v11  ;;  %v5797_v11 = vld [vmem:[%s7131_s3 + $0xb0] sm:$0xff] }
0x157e   :  { %4823 = vmatpush.msra.mxu3 %v6834_v53  ;;  %4928 = vmatpush.msrb.mxu0 %v5794_v61 }
0x157f   :  { %4948 = vmatpush.msrb.mxu1 %v6848_v22 }
0x1580   :  { %4824 = vmatpush.msra.mxu3 %v6840_v43  ;;  %4929 = vmatpush.msrb.mxu0 %v5795_v31 }
0x1581   :  { %4949 = vmatpush.msrb.mxu1 %v6856_v16 }
0x15d6   :  { %v4474_v48 = vpop.permute.xlu2 %4473 }
0x15d7   :  { %4476 = vst.msk [vmem:[#allocation2 + $0x8] sm:$0x3] %vm7149_vm10, %v4474_v48 }
0x15fa   :  { %v4516_v58 = vpop.f32.mrf.mxu0  ;;  %v4536_v33 = vpop.f32.mrf.mxu1 }
0x15fb   :  { %v4563_v22 = vrot.slane %v4516_v58, 2  ;;  %v4537_v20 = vadd.f32 %v6921_v30, %v4536_v33 }
0x15fd   :  { %v4565_v52 = vadd.f32 %v4563_v22, %v6912_v46  ;;  %v4586_v40 = vrot.slane %v4537_v20, 2 }
0x15ff   :  { %v4496_v53 = vpop.f32.mrf.mxu3  ;;  %v4566_v62 = vsub.f32 0.0, %v4565_v52 }
0x1600   :  { %v4540_v49 = vrot.slane %v4496_v53, 2 }
0x1601   :  { %v4567_v35 = vmul.f32 1.442695, %v4566_v62 }
0x1602   :  { %v4542_v39 = vadd.f32 %v4540_v49, %v6785_v10  ;;  %v5796_v49 = vld [vmem:[%s7131_s3 + $0xb8] sm:$0xff] }
0x1604   :  { %v4543_v9 = vsub.f32 0.0, %v4542_v39 }
0x1606   :  { %v4544_v44 = vmul.f32 1.442695, %v4543_v9 }
0x1608   :  { %5729 = vpow2.f32 %v4544_v44 }
0x160e   :  { %v5730_v43 = vpop.eup %5729 }
0x160f   :  { %v4546_v51 = vadd.f32 1.0, %v5730_v43 }
0x1611   :  { %5731 = vrcp.f32 %v4546_v51  ;;  %v4558_v63 = vand.u32 2147483648, %v4546_v51  ;;  %v4556_v57 = vand.u32 2147483647, %v4546_v51  ;;  %vm4552_vm3 = vweird.f32 %v4546_v51 }
0x1612   :  { %5733 = vpow2.f32 %v4567_v35 }
0x1613   :  { %v4559_v47 = vor.u32 1.1754944e-38, %v4558_v63  ;;  %vm4557_vm14 = vcmp.eq.f32.partialorder %v4556_v57, 8.507059e+37 }
0x1617   :  { %v5732_v16 = vpop.eup %5731 }
0x1618   :  { %v4548_v7 = vmul.f32 %v5732_v16, %v4546_v51  ;;  %vm4553_vm11 = vweird.f32 %v5732_v16  ;;  %v5734_v42 = vpop.eup %5733 }
0x1619   :  { %vm4554_vm7 = vmor %vm4552_vm3, %vm4553_vm11  ;;  %v4569_v59 = vadd.f32 1.0, %v5734_v42 }
0x161a   :  { %v4549_v41 = vsub.f32 1.0, %v4548_v7 }
0x161b   :  { %5735 = vrcp.f32 %v4569_v59  ;;  %vm4575_vm4 = vweird.f32 %v4569_v59  ;;  %v4581_v27 = vand.u32 2147483648, %v4569_v59  ;;  %v4579_v56 = vand.u32 2147483647, %v4569_v59 }
0x161c   :  { %v4550_v0 = vmul.f32 %v5732_v16, %v4549_v41 }
0x161d   :  { %v4582_v24 = vor.u32 1.1754944e-38, %v4581_v27  ;;  %vm4580_vm2 = vcmp.eq.f32.partialorder %v4579_v56, 8.507059e+37 }
0x161e   :  { %v4551_v4 = vadd.f32 %v5732_v16, %v4550_v0 }
0x1620   :  { %v4555_v37 = vsel %vm4554_vm7, %v5732_v16, %v4551_v4  ;;  %v7060_v4 = vld [vmem:[%s7132_s4 + $0xb] ss:$0 sm:$0xff] }
0x1621   :  { %v4560_v12 = vsel %vm4557_vm14, %v4559_v47, %v4555_v37  ;;  %v5736_v30 = vpop.eup %5735 }
0x1622   :  { %v4588_v14 = vmul.f32 %v4586_v40, %v4560_v12  ;;  %v4571_v18 = vmul.f32 %v5736_v30, %v4569_v59  ;;  %vm4576_vm9 = vweird.f32 %v5736_v30 }
0x1623   :  { %vm4577_vm5 = vmor %vm4575_vm4, %vm4576_vm9 }
0x1624   :  { %v4589_v32 = vadd.f32 %v4588_v14, %v6909_v54  ;;  %v4572_v26 = vsub.f32 1.0, %v4571_v18 }
0x1626   :  { %v4590_v50 = vmul.f32 -2.0, %v4589_v32  ;;  %v4573_v60 = vmul.f32 %v5736_v30, %v4572_v26 }
0x1628   :  { %v4591_v8 = vmul.f32 1.442695, %v4590_v50  ;;  %v4574_v45 = vadd.f32 %v5736_v30, %v4573_v60 }
0x162a   :  { %5737 = vpow2.f32 %v4591_v8  ;;  %v4578_v5 = vsel %vm4577_vm5, %v5736_v30, %v4574_v45 }
0x162b   :  { %v4583_v23 = vsel %vm4580_vm2, %v4582_v24, %v4578_v5 }
0x162c   :  { %v4610_v19 = vsub.f32 1.0, %v4583_v23  ;;  %v4614_v31 = vmul.f32 %v4612_v34, %v4583_v23 }
0x1630   :  { %v5738_v25 = vpop.eup %5737 }
0x1631   :  { %v4593_v29 = vadd.f32 1.0, %v5738_v25 }
0x1633   :  { %5739 = vrcp.f32 %v4593_v29  ;;  %v4605_v38 = vand.u32 2147483648, %v4593_v29  ;;  %v4603_v1 = vand.u32 2147483647, %v4593_v29  ;;  %vm4599_vm15 = vweird.f32 %v4593_v29 }
0x1635   :  { %v4606_v15 = vor.u32 1.1754944e-38, %v4605_v38  ;;  %vm4604_vm10 = vcmp.eq.f32.partialorder %v4603_v1, 8.507059e+37 }
0x1639   :  { %v5740_v28 = vpop.eup %5739 }
0x163a   :  { %v4595_v17 = vmul.f32 %v5740_v28, %v4593_v29  ;;  %vm4600_vm12 = vweird.f32 %v5740_v28 }
0x163b   :  { %vm4601_vm6 = vmor %vm4599_vm15, %vm4600_vm12 }
0x163c   :  { %v4596_v36 = vsub.f32 1.0, %v4595_v17 }
0x163e   :  { %v4597_v55 = vmul.f32 %v5740_v28, %v4596_v36 }
0x1640   :  { %v4598_v13 = vadd.f32 %v5740_v28, %v4597_v55 }
0x1642   :  { %v4602_v21 = vsel %vm4601_vm6, %v5740_v28, %v4598_v13 }
0x1643   :  { %v4607_v3 = vsel %vm4604_vm10, %v4606_v15, %v4602_v21  ;;  %vm7150_vm10 = vcmask 259204  }
0x1644   :  { %v4608_v6 = vmul.f32 2.0, %v4607_v3 }
0x1646   :  { %v5348_v2 = vadd.f32 -1.0, %v4608_v6 }
0x1648   :  { %v4611_v61 = vmul.f32 %v5348_v2, %v4610_v19 }
0x164a   :  { %v7040_v48 = vadd.f32 %v4614_v31, %v4611_v61 }
0x164c   :  { %4617 = vrot.lane.b32.xlu0 %v7040_v48, %s5828_s19  ;;  %v4621_v53 = vrot.slane %v7040_v48, 6 }
0x164e   :  { %5349 = vmatmul.msk.f32.vlgmr.msra.gmra.mxu2 %vm159_vm13, %v4621_v53  ;;  %5350 = vmatmul.msk.f32.vlgmr.msrb.gmra.mxu3 %vm159_vm13, %v4621_v53 }
0x164f   :  { %5351 = vmatmul.msk.f32.vlgmr.msra.gmra.mxu0 %vm159_vm13, %v4621_v53  ;;  %4968 = vmatpush.msra.mxu2 %v5796_v49  ;;  %v4757_v49 = vrot.slane %v7040_v48, 2 }
0x1651   :  { %4969 = vmatpush.msra.mxu2 %v5797_v11 }
0x16be   :  { %v4618_v39 = vpop.permute.xlu0 %4617 }
0x16bf   :  { %4620 = vst.msk [vmem:[#allocation2] sm:$0xc0] %vm1542_vm1, %v4618_v39 }
0x16cc   :  { %v4681_v20 = vpop.f32.mrf.mxu0 }
0x16cd   :  { %v4682_v47 = vadd.f32 %v7060_v4, %v4681_v20 }
0x16cf   :  { %v4731_v59 = vrot.slane %v4682_v47, 4 }
0x16d1   :  { %v4641_v9 = vpop.f32.mrf.mxu2  ;;  %v4661_v52 = vpop.f32.mrf.mxu3 }
0x16d2   :  { %v4685_v44 = vrot.slane %v4641_v9, 4  ;;  %v4708_v51 = vrot.slane %v4661_v52, 4 }
0x16d4   :  { %v4687_v58 = vadd.f32 %v4685_v44, %v6785_v10  ;;  %v4710_v35 = vadd.f32 %v4708_v51, %v6912_v46 }
0x16d6   :  { %v4688_v22 = vsub.f32 0.0, %v4687_v58  ;;  %v4711_v7 = vsub.f32 0.0, %v4710_v35 }
0x16d8   :  { %v4689_v43 = vmul.f32 1.442695, %v4688_v22  ;;  %v4712_v33 = vmul.f32 1.442695, %v4711_v7 }
0x16da   :  { %5741 = vpow2.f32 %v4689_v43 }
0x16e0   :  { %v5742_v62 = vpop.eup %5741 }
0x16e1   :  { %v4691_v16 = vadd.f32 1.0, %v5742_v62 }
0x16e3   :  { %5743 = vrcp.f32 %v4691_v16  ;;  %v4703_v57 = vand.u32 2147483648, %v4691_v16  ;;  %v4701_v40 = vand.u32 2147483647, %v4691_v16  ;;  %vm4697_vm11 = vweird.f32 %v4691_v16 }
0x16e4   :  { %5745 = vpow2.f32 %v4712_v33 }
0x16e5   :  { %v4704_v12 = vor.u32 1.1754944e-38, %v4703_v57  ;;  %vm4702_vm7 = vcmp.eq.f32.partialorder %v4701_v40, 8.507059e+37 }
0x16e9   :  { %v5744_v41 = vpop.eup %5743 }
0x16ea   :  { %v4693_v63 = vmul.f32 %v5744_v41, %v4691_v16  ;;  %vm4698_vm1 = vweird.f32 %v5744_v41  ;;  %v5746_v14 = vpop.eup %5745 }
0x16eb   :  { %vm4699_vm3 = vmor %vm4697_vm11, %vm4698_vm1  ;;  %v4714_v30 = vadd.f32 1.0, %v5746_v14 }
0x16ec   :  { %v4694_v0 = vsub.f32 1.0, %v4693_v63 }
0x16ed   :  { %5747 = vrcp.f32 %v4714_v30  ;;  %vm4720_vm9 = vweird.f32 %v4714_v30  ;;  %v4726_v1 = vand.u32 2147483648, %v4714_v30  ;;  %v4724_v13 = vand.u32 2147483647, %v4714_v30 }
0x16ee   :  { %v4695_v42 = vmul.f32 %v5744_v41, %v4694_v0 }
0x16ef   :  { %v4727_v3 = vor.u32 1.1754944e-38, %v4726_v1  ;;  %vm4725_vm6 = vcmp.eq.f32.partialorder %v4724_v13, 8.507059e+37 }
0x16f0   :  { %v4696_v37 = vadd.f32 %v5744_v41, %v4695_v42 }
0x16f2   :  { %v4700_v32 = vsel %vm4699_vm3, %v5744_v41, %v4696_v37 }
0x16f3   :  { %v4705_v50 = vsel %vm4702_vm7, %v4704_v12, %v4700_v32  ;;  %v5748_v26 = vpop.eup %5747 }
0x16f4   :  { %v4733_v8 = vmul.f32 %v4731_v59, %v4705_v50  ;;  %v4716_v28 = vmul.f32 %v5748_v26, %v4714_v30  ;;  %vm4721_vm14 = vweird.f32 %v5748_v26 }
0x16f5   :  { %vm4722_vm12 = vmor %vm4720_vm9, %vm4721_vm14 }
0x16f6   :  { %v4734_v25 = vadd.f32 %v4733_v8, %v6909_v54  ;;  %v4717_v45 = vsub.f32 1.0, %v4716_v28 }
0x16f8   :  { %v4735_v18 = vmul.f32 -2.0, %v4734_v25  ;;  %v4718_v36 = vmul.f32 %v5748_v26, %v4717_v45 }
0x16fa   :  { %v4736_v29 = vmul.f32 1.442695, %v4735_v18  ;;  %v4719_v56 = vadd.f32 %v5748_v26, %v4718_v36 }
0x16fc   :  { %5749 = vpow2.f32 %v4736_v29  ;;  %v4723_v21 = vsel %vm4722_vm12, %v5748_v26, %v4719_v56 }
0x16fd   :  { %v4728_v19 = vsel %vm4725_vm6, %v4727_v3, %v4723_v21 }
0x16fe   :  { %v4755_v53 = vsub.f32 1.0, %v4728_v19  ;;  %v4759_v39 = vmul.f32 %v4757_v49, %v4728_v19 }
0x1702   :  { %v5750_v60 = vpop.eup %5749 }
0x1703   :  { %v4738_v17 = vadd.f32 1.0, %v5750_v60 }
0x1705   :  { %5751 = vrcp.f32 %v4738_v17  ;;  %v4750_v5 = vand.u32 2147483648, %v4738_v17  ;;  %v4748_v15 = vand.u32 2147483647, %v4738_v17  ;;  %vm4744_vm5 = vweird.f32 %v4738_v17 }
0x1707   :  { %v4751_v6 = vor.u32 1.1754944e-38, %v4750_v5  ;;  %vm4749_vm2 = vcmp.eq.f32.partialorder %v4748_v15, 8.507059e+37 }
0x170b   :  { %v5752_v27 = vpop.eup %5751 }
0x170c   :  { %v4740_v38 = vmul.f32 %v5752_v27, %v4738_v17  ;;  %vm4745_vm4 = vweird.f32 %v5752_v27 }
0x170d   :  { %vm4746_vm15 = vmor %vm4744_vm5, %vm4745_vm4 }
0x170e   :  { %v4741_v55 = vsub.f32 1.0, %v4740_v38 }
0x1710   :  { %v4742_v24 = vmul.f32 %v5752_v27, %v4741_v55 }
0x1712   :  { %v4743_v23 = vadd.f32 %v5752_v27, %v4742_v24 }
0x1714   :  { %v4747_v2 = vsel %vm4746_vm15, %v5752_v27, %v4743_v23 }
0x1715   :  { %v4752_v34 = vsel %vm4749_vm2, %v4751_v6, %v4747_v2 }
0x1716   :  { %v4753_v61 = vmul.f32 2.0, %v4752_v34 }
0x1718   :  { %v5352_v31 = vadd.f32 -1.0, %v4753_v61 }
0x171a   :  { %v4756_v11 = vmul.f32 %v5352_v31, %v4755_v53 }
0x171c   :  { %v7065_v9 = vadd.f32 %v4759_v39, %v4756_v11 }
0x171e   :  { %4762 = vrot.lane.b32.xlu1 %v7065_v9, %s5828_s19  ;;  %v4766_v44 = vrot.slane %v7065_v9, 4  ;;  %v4902_v39 = vrot.slane %v7065_v9, 2  ;;  %v5799_v9 = vld [vmem:[%s7128_s0 + $0x8] sm:$0xff] }
0x1720   :  { %5353 = vmatmul.msk.f32.vlgmr.msra.gmra.mxu1 %vm159_vm13, %v4766_v44  ;;  %5354 = vmatmul.msk.f32.vlgmr.msrb.gmra.mxu2 %vm159_vm13, %v4766_v44 }
0x1721   :  { %5355 = vmatmul.msk.f32.vlgmr.msra.gmra.mxu3 %vm159_vm13, %v4766_v44 }
0x1790   :  { %v4763_v58 = vpop.permute.xlu1 %4762 }
0x1791   :  { %4765 = vst.msk [vmem:[#allocation2] sm:$0x30] %vm7150_vm10, %v4763_v58 }
0x179d   :  { %v4786_v22 = vpop.f32.mrf.mxu1 }
0x179e   :  { %v4830_v48 = vrot.slane %v4786_v22, 6 }
0x17a0   :  { %v4832_v43 = vadd.f32 %v4830_v48, %v6785_v10 }
0x17a2   :  { %v4833_v52 = vsub.f32 0.0, %v4832_v43  ;;  %v5047_v43 = vld [vmem:[#allocation2 + $0x8] sm:$0xff] }
0x17a3   :  { %v4806_v62 = vpop.f32.mrf.mxu2 }
0x17a4   :  { %v4834_v51 = vmul.f32 1.442695, %v4833_v52  ;;  %v4853_v35 = vrot.slane %v4806_v62, 6  ;;  %v4826_v57 = vpop.f32.mrf.mxu3  ;;  %v5049_v52 = vadd.f32 %v5799_v9, %v5047_v43 }
0x17a5   :  { %v4827_v40 = vadd.f32 %v7060_v4, %v4826_v57 }
0x17a6   :  { %5753 = vpow2.f32 %v4834_v51  ;;  %v4855_v7 = vadd.f32 %v4853_v35, %v6912_v46  ;;  %v5053_v51 = vsel %vm37_vm0, %v5049_v52, 0.0 }
0x17a7   :  { %v4876_v8 = vrot.slane %v4827_v40, 6 }
0x17a8   :  { %v4856_v41 = vsub.f32 0.0, %v4855_v7  ;;  %v5829_v7 = vmov 32.0  }
0x17aa   :  { %v4857_v63 = vmul.f32 1.442695, %v4856_v41 }
0x17ac   :  { %v5754_v16 = vpop.eup %5753 }
0x17ad   :  { %v4836_v33 = vadd.f32 1.0, %v5754_v16 }
0x17af   :  { %5755 = vrcp.f32 %v4836_v33  ;;  %v4848_v42 = vand.u32 2147483648, %v4836_v33  ;;  %v4846_v12 = vand.u32 2147483647, %v4836_v33  ;;  %vm4842_vm11 = vweird.f32 %v4836_v33 }
0x17b0   :  { %5757 = vpow2.f32 %v4857_v63 }
0x17b1   :  { %v4849_v59 = vor.u32 1.1754944e-38, %v4848_v42  ;;  %vm4847_vm7 = vcmp.eq.f32.partialorder %v4846_v12, 8.507059e+37 }
0x17b5   :  { %v5756_v20 = vpop.eup %5755 }
0x17b6   :  { %v4838_v0 = vmul.f32 %v5756_v20, %v4836_v33  ;;  %vm4843_vm1 = vweird.f32 %v5756_v20  ;;  %v5758_v32 = vpop.eup %5757 }
0x17b7   :  { %vm4844_vm3 = vmor %vm4842_vm11, %vm4843_vm1  ;;  %v4859_v18 = vadd.f32 1.0, %v5758_v32 }
0x17b8   :  { %v4839_v47 = vsub.f32 1.0, %v4838_v0 }
0x17b9   :  { %5759 = vrcp.f32 %v4859_v18  ;;  %vm4865_vm9 = vweird.f32 %v4859_v18  ;;  %v4871_v13 = vand.u32 2147483648, %v4859_v18  ;;  %v4869_v15 = vand.u32 2147483647, %v4859_v18 }
0x17ba   :  { %v4840_v37 = vmul.f32 %v5756_v20, %v4839_v47 }
0x17bb   :  { %v4872_v2 = vor.u32 1.1754944e-38, %v4871_v13  ;;  %vm4870_vm6 = vcmp.eq.f32.partialorder %v4869_v15, 8.507059e+37 }
0x17bc   :  { %v4841_v14 = vadd.f32 %v5756_v20, %v4840_v37 }
0x17be   :  { %v4845_v50 = vsel %vm4844_vm3, %v5756_v20, %v4841_v14 }
0x17bf   :  { %v4850_v30 = vsel %vm4847_vm7, %v4849_v59, %v4845_v50  ;;  %v5760_v28 = vpop.eup %5759 }
0x17c0   :  { %v4878_v25 = vmul.f32 %v4876_v8, %v4850_v30  ;;  %v4861_v45 = vmul.f32 %v5760_v28, %v4859_v18  ;;  %vm4866_vm14 = vweird.f32 %v5760_v28 }
0x17c1   :  { %vm4867_vm12 = vmor %vm4865_vm9, %vm4866_vm14 }
0x17c2   :  { %v4879_v29 = vadd.f32 %v4878_v25, %v6909_v54  ;;  %v4862_v27 = vsub.f32 1.0, %v4861_v45 }
0x17c4   :  { %v4880_v26 = vmul.f32 -2.0, %v4879_v29  ;;  %v4863_v38 = vmul.f32 %v5760_v28, %v4862_v27 }
0x17c6   :  { %v4881_v60 = vmul.f32 1.442695, %v4880_v26  ;;  %v4864_v1 = vadd.f32 %v5760_v28, %v4863_v38 }
0x17c8   :  { %5761 = vpow2.f32 %v4881_v60  ;;  %v4868_v3 = vsel %vm4867_vm12, %v5760_v28, %v4864_v1 }
0x17c9   :  { %v4873_v61 = vsel %vm4870_vm6, %v4872_v2, %v4868_v3 }
0x17ca   :  { %v4900_v11 = vsub.f32 1.0, %v4873_v61  ;;  %v4904_v58 = vmul.f32 %v4902_v39, %v4873_v61 }
0x17ce   :  { %v5762_v17 = vpop.eup %5761 }
0x17cf   :  { %v4883_v36 = vadd.f32 1.0, %v5762_v17 }
0x17d1   :  { %5763 = vrcp.f32 %v4883_v36  ;;  %v4895_v24 = vand.u32 2147483648, %v4883_v36  ;;  %v4893_v23 = vand.u32 2147483647, %v4883_v36  ;;  %vm4889_vm5 = vweird.f32 %v4883_v36 }
0x17d2   :  { %5765 = vrcp.f32 %v5829_v7 }
0x17d3   :  { %v4896_v19 = vor.u32 1.1754944e-38, %v4895_v24  ;;  %vm4894_vm2 = vcmp.eq.f32.partialorder %v4893_v23, 8.507059e+37 }
0x17d7   :  { %v5764_v56 = vpop.eup %5763 }
0x17d8   :  { %v4885_v55 = vmul.f32 %v5764_v56, %v4883_v36  ;;  %vm4890_vm4 = vweird.f32 %v5764_v56  ;;  %v5766_v63 = vpop.eup %5765 }
0x17d9   :  { %vm4891_vm15 = vmor %vm4889_vm5, %vm4890_vm4  ;;  %v5057_v0 = vmul.f32 32.0, %v5766_v63 }
0x17da   :  { %v4886_v5 = vsub.f32 1.0, %v4885_v55 }
0x17db   :  { %v5058_v40 = vsub.f32 1.0, %v5057_v0 }
0x17dc   :  { %v4887_v21 = vmul.f32 %v5764_v56, %v4886_v5 }
0x17dd   :  { %v5059_v12 = vmul.f32 %v5766_v63, %v5058_v40 }
0x17de   :  { %v4888_v6 = vadd.f32 %v5764_v56, %v4887_v21 }
0x17e0   :  { %v4892_v34 = vsel %vm4891_vm15, %v5764_v56, %v4888_v6 }
0x17e1   :  { %v4897_v31 = vsel %vm4894_vm2, %v4896_v19, %v4892_v34 }
0x17e2   :  { %v4898_v53 = vmul.f32 2.0, %v4897_v31 }
0x17e4   :  { %v5356_v49 = vadd.f32 -1.0, %v4898_v53 }
0x17e6   :  { %v4901_v44 = vmul.f32 %v5356_v49, %v4900_v11 }
0x17e8   :  { %v4905_v22 = vadd.f32 %v4904_v58, %v4901_v44 }
0x17ea   :  { %4907 = vrot.lane.b32.xlu2 %v4905_v22, %s5828_s19  ;;  %v7080_v48 = vrot.slane %v4905_v22, 2 }
0x17ec   :  { %5357 = vmatmul.msk.f32.vlgmr.msrb.gmra.mxu0 %vm159_vm13, %v7080_v48  ;;  %5358 = vmatmul.msk.f32.vlgmr.msrb.gmra.mxu1 %vm159_vm13, %v7080_v48 }
0x17ed   :  { %5359 = vmatmul.msk.f32.vlgmr.msra.gmra.mxu2 %vm159_vm13, %v7080_v48  ;;  %vm5061_vm13 = vweird.f32 %v5766_v63 }
0x1813   :  { %5054 = vadd.xlane.f32.xlu2 %v5053_v51 }
0x1844   :  { %v4908_v62 = vpop.permute.xlu2 %4907 }
0x1845   :  { %4910 = vst.msk [vmem:[#allocation2] sm:$0xc] %vm1834_vm8, %v4908_v62 }
0x1869   :  { %v4931_v35 = vpop.f32.mrf.mxu0  ;;  %v4951_v20 = vpop.f32.mrf.mxu1 }
0x186a   :  { %v4974_v16 = vadd.f32 %v4931_v35, %v6785_v10  ;;  %v4994_v47 = vadd.f32 %v4951_v20, %v6912_v46  ;;  %v5060_v10 = vadd.f32 %v5766_v63, %v5059_v12 }
0x186c   :  { %v4975_v33 = vsub.f32 0.0, %v4974_v16  ;;  %v4995_v37 = vsub.f32 0.0, %v4994_v47  ;;  %v7095_v18 = vsel %vm5061_vm13, %v5766_v63, %v5060_v10 }
0x186e   :  { %v4976_v41 = vmul.f32 1.442695, %v4975_v33  ;;  %v4996_v14 = vmul.f32 1.442695, %v4995_v37 }
0x1870   :  { %5767 = vpow2.f32 %v4976_v41  ;;  %v4971_v29 = vpop.f32.mrf.mxu2 }
0x1871   :  { %v4972_v45 = vadd.f32 %v7060_v4, %v4971_v29 }
0x1876   :  { %v5768_v57 = vpop.eup %5767 }
0x1877   :  { %v4978_v42 = vadd.f32 1.0, %v5768_v57 }
0x1879   :  { %5769 = vrcp.f32 %v4978_v42  ;;  %v4990_v8 = vand.u32 2147483648, %v4978_v42  ;;  %v4988_v25 = vand.u32 2147483647, %v4978_v42  ;;  %vm4984_vm10 = vweird.f32 %v4978_v42 }
0x187a   :  { %5771 = vpow2.f32 %v4996_v14 }
0x187b   :  { %v4991_v60 = vor.u32 1.1754944e-38, %v4990_v8  ;;  %vm4989_vm11 = vcmp.eq.f32.partialorder %v4988_v25, 8.507059e+37  ;;  %v5800_v25 = vld [vmem:[%s7128_s0] sm:$0xff]  ;;  %s5830_s0 = smov [#allocation3]  }
0x187f   :  { %v5770_v59 = vpop.eup %5769 }
0x1880   :  { %v4980_v32 = vmul.f32 %v5770_v59, %v4978_v42  ;;  %vm4985_vm8 = vweird.f32 %v5770_v59  ;;  %v5772_v17 = vpop.eup %5771 }
0x1881   :  { %vm4986_vm1 = vmor %vm4984_vm10, %vm4985_vm8  ;;  %v4998_v55 = vadd.f32 1.0, %v5772_v17  ;;  %vm7151_vm8 = vcmask 255104  }
0x1882   :  { %v4981_v50 = vsub.f32 1.0, %v4980_v32  ;;  %v5392_v32 = vld [vmem:[%s7134_s6] ss:$0 sm:$0xff] }
0x1883   :  { %5773 = vrcp.f32 %v4998_v55  ;;  %vm5004_vm7 = vweird.f32 %v4998_v55  ;;  %v5008_v49 = vand.u32 2147483647, %v4998_v55 }
0x1884   :  { %v4982_v30 = vmul.f32 %v5770_v59, %v4981_v50 }
0x1885   :  { %vm5009_vm5 = vcmp.eq.f32.partialorder %v5008_v49, 8.507059e+37 }
0x1886   :  { %v4983_v46 = vadd.f32 %v5770_v59, %v4982_v30  ;;  %v5055_v26 = vpop.xlane.xlu2 %5054 }
0x1887   :  { %v5064_v28 = vmul.f32 %v7095_v18, %v5055_v26 }
0x1888   :  { %v4987_v36 = vsel %vm4986_vm1, %v5770_v59, %v4983_v46 }
0x1889   :  { %v4992_v27 = vsel %vm4989_vm11, %v4991_v60, %v4987_v36  ;;  %v7099_v38 = vsub.f32 %v5049_v52, %v5064_v28  ;;  %v5774_v4 = vpop.eup %5773 }
0x188a   :  { %v5014_v56 = vmul.f32 %v4992_v27, %v4972_v45  ;;  %v5000_v23 = vmul.f32 %v5774_v4, %v4998_v55  ;;  %vm5005_vm3 = vweird.f32 %v5774_v4 }
0x188b   :  { %v5068_v1 = vmul.f32 %v7099_v38, %v7099_v38  ;;  %vm5006_vm9 = vmor %vm5004_vm7, %vm5005_vm3 }
0x188c   :  { %v5015_v5 = vadd.f32 %v5014_v56, %v6909_v54  ;;  %v5001_v6 = vsub.f32 1.0, %v5000_v23  ;;  %v5010_v54 = vand.u32 2147483648, %v4998_v55 }
0x188d   :  { %v5072_v13 = vsel %vm37_vm0, %v5068_v1, 0.0 }
0x188e   :  { %v5016_v24 = vmul.f32 -2.0, %v5015_v5  ;;  %5073 = vadd.xlane.f32.xlu2 %v5072_v13  ;;  %v5002_v2 = vmul.f32 %v5774_v4, %v5001_v6  ;;  %v5011_v22 = vor.u32 1.1754944e-38, %v5010_v54 }
0x1890   :  { %v5017_v15 = vmul.f32 1.442695, %v5016_v24  ;;  %v5003_v61 = vadd.f32 %v5774_v4, %v5002_v2 }
0x1892   :  { %5775 = vpow2.f32 %v5017_v15  ;;  %v5007_v44 = vsel %vm5006_vm9, %v5774_v4, %v5003_v61 }
0x1893   :  { %v5012_v52 = vsel %vm5009_vm5, %v5011_v22, %v5007_v44 }
0x1894   :  { %v5036_v16 = vsub.f32 1.0, %v5012_v52  ;;  %v5039_v33 = vmul.f32 %v5012_v52, %v7080_v48  ;;  %v5391_v48 = vld [vmem:[%s7133_s5] ss:$0 sm:$0xff]  ;;  %s5119_s5 = sshll.u32 %s5830_s0, 4  ;;  %s5120_s5 = int_to_ptr.vmem [resolvable:$true] %s5119_s5 }
0x1898   :  { %v5776_v21 = vpop.eup %5775 }
0x1899   :  { %v5019_v3 = vadd.f32 1.0, %v5776_v21 }
0x189b   :  { %5777 = vrcp.f32 %v5019_v3  ;;  %v5031_v53 = vand.u32 2147483648, %v5019_v3  ;;  %v5029_v39 = vand.u32 2147483647, %v5019_v3  ;;  %vm5025_vm4 = vweird.f32 %v5019_v3 }
0x189d   :  { %v5032_v43 = vor.u32 1.1754944e-38, %v5031_v53  ;;  %vm5030_vm15 = vcmp.eq.f32.partialorder %v5029_v39, 8.507059e+37 }
0x18a1   :  { %v5778_v19 = vpop.eup %5777 }
0x18a2   :  { %v5021_v34 = vmul.f32 %v5778_v19, %v5019_v3  ;;  %vm5026_vm14 = vweird.f32 %v5778_v19 }
0x18a3   :  { %vm5027_vm12 = vmor %vm5025_vm4, %vm5026_vm14 }
0x18a4   :  { %v5022_v31 = vsub.f32 1.0, %v5021_v34 }
0x18a6   :  { %v5023_v11 = vmul.f32 %v5778_v19, %v5022_v31 }
0x18a8   :  { %v5024_v58 = vadd.f32 %v5778_v19, %v5023_v11 }
0x18aa   :  { %v5028_v9 = vsel %vm5027_vm12, %v5778_v19, %v5024_v58 }
0x18ab   :  { %v5033_v51 = vsel %vm5030_vm15, %v5032_v43, %v5028_v9 }
0x18ac   :  { %v5034_v62 = vmul.f32 2.0, %v5033_v51 }
0x18ae   :  { %v5360_v35 = vadd.f32 -1.0, %v5034_v62 }
0x18b0   :  { %v5037_v7 = vmul.f32 %v5360_v35, %v5036_v16 }
0x18b2   :  { %v5040_v41 = vadd.f32 %v5039_v33, %v5037_v7 }
0x18b4   :  { %5042 = vrot.lane.b32.xlu0 %v5040_v41, %s5828_s19 }
0x1901   :  { %v5074_v63 = vpop.xlane.xlu2 %5073 }
0x1902   :  { %v5076_v20 = vmul.f32 %v5074_v63, %v7095_v18 }
0x1904   :  { %v5078_v0 = vadd.f32 1e-05, %v5076_v20 }
0x1906   :  { %5779 = vrsqrt.f32 %v5078_v0  ;;  %vm5095_vm2 = vweird.f32 %v5078_v0 }
0x190c   :  { %v5780_v57 = vpop.eup %5779 }
0x190d   :  { %v5090_v47 = vmul.f32 %v5780_v57, %v5078_v0  ;;  %vm5096_vm6 = vweird.f32 %v5780_v57 }
0x190e   :  { %vm5097_vm13 = vmor %vm5095_vm2, %vm5096_vm6 }
0x190f   :  { %v5091_v42 = vmul.f32 %v5780_v57, %v5090_v47 }
0x1911   :  { %v5092_v40 = vmul.f32 0.5, %v5091_v42 }
0x1913   :  { %v5093_v37 = vsub.f32 1.5, %v5092_v40 }
0x1915   :  { %v5094_v12 = vmul.f32 %v5780_v57, %v5093_v37 }
0x1917   :  { %v5098_v14 = vsel %vm5097_vm13, %v5780_v57, %v5094_v12 }
0x1918   :  { %v5100_v59 = vmul.f32 %v5098_v14, %v7099_v38 }
0x191a   :  { %v5106_v10 = vmul.f32 %v5391_v48, %v5100_v59 }
0x191c   :  { %v5112_v50 = vadd.f32 %v5392_v32, %v5106_v10 }
0x191e   :  { %5114 = vst.msk [vmem:[#allocation3 + $0x8] sm:$0xff] %vm37_vm0, %v5112_v50 }
0x1926   :  { %v5043_v8 = vpop.permute.xlu0 %5042 }
0x1927   :  { %5045 = vst.msk [vmem:[#allocation2] sm:$0x3] %vm7151_vm8, %v5043_v8 }
0x192e   :  { %v5046_v30 = vld [vmem:[#allocation2] sm:$0xff] }
0x192f   :  { %v5048_v29 = vadd.f32 %v5800_v25, %v5046_v30 }
0x1931   :  { %v5050_v46 = vsel %vm37_vm0, %v5048_v29, 0.0 }
0x1932   :  { %5051 = vadd.xlane.f32.xlu1 %v5050_v46 }
0x19a5   :  { %v5052_v26 = vpop.xlane.xlu1 %5051 }
0x19a6   :  { %v5063_v60 = vmul.f32 %v7095_v18, %v5052_v26 }
0x19a8   :  { %v5065_v28 = vsub.f32 %v5048_v29, %v5063_v60 }
0x19aa   :  { %v5067_v17 = vmul.f32 %v5065_v28, %v5065_v28 }
0x19ac   :  { %v5069_v45 = vsel %vm37_vm0, %v5067_v17, 0.0 }
0x19ad   :  { %5070 = vadd.xlane.f32.xlu0 %v5069_v45 }
0x1a20   :  { %v5071_v36 = vpop.xlane.xlu0 %5070 }
0x1a21   :  { %v5075_v27 = vmul.f32 %v5071_v36, %v7095_v18 }
0x1a23   :  { %v5077_v38 = vadd.f32 1e-05, %v5075_v27 }
0x1a25   :  { %5781 = vrsqrt.f32 %v5077_v38  ;;  %vm5085_vm1 = vweird.f32 %v5077_v38 }
0x1a2b   :  { %v5782_v56 = vpop.eup %5781 }
0x1a2c   :  { %v5080_v55 = vmul.f32 %v5782_v56, %v5077_v38  ;;  %vm5086_vm10 = vweird.f32 %v5782_v56 }
0x1a2d   :  { %vm5087_vm11 = vmor %vm5085_vm1, %vm5086_vm10 }
0x1a2e   :  { %v5081_v1 = vmul.f32 %v5782_v56, %v5080_v55 }
0x1a30   :  { %v5082_v5 = vmul.f32 0.5, %v5081_v1 }
0x1a32   :  { %v5083_v13 = vsub.f32 1.5, %v5082_v5 }
0x1a34   :  { %v5084_v24 = vmul.f32 %v5782_v56, %v5083_v13 }
0x1a36   :  { %v5088_v15 = vsel %vm5087_vm11, %v5782_v56, %v5084_v24 }
0x1a37   :  { %v5099_v4 = vmul.f32 %v5088_v15, %v5065_v28 }
0x1a39   :  { %v5105_v18 = vmul.f32 %v5391_v48, %v5099_v4 }
0x1a3b   :  { %v5111_v21 = vadd.f32 %v5392_v32, %v5105_v18 }
0x1a3d   :  { %5113 = vst.msk [vmem:[#allocation3] sm:$0xff] %vm37_vm0, %v5111_v21 }
0x1a3e   :  { %5127 = dma.vmem_to_hbm [thread:$0]  %s5120_s5, 256, %s5122_s8, [#allocation4], %s5831_s9, %s5831_s9, %s5832_s10  }
0x1a3f   :  { %5825 = dma.done.wait [#allocation4], 256  }
0x1a40   :  { %5826 = vsyncadd [#allocation4], 4294967040 }
0x1a41   :  { %5132 = vsyncpa [#allocation4], 1 }

</bundles_post_ra>
